<compile_context>
chip_gen: v6e
topology: v6e:2x2x1
jax: 0.10.0
libtpu: 0.0.40
codegen_flags: <defaults>
</compile_context>

<pallas_src>
import functools
import math

import jax
import jax.numpy as jnp
from jax.experimental import pallas as pl
from jax.experimental.pallas import tpu as pltpu


def _round_up(x, m):
    return ((x + m - 1) // m) * m


def _pack_factor(channels):
    """How many voxel rows pack into one 128-lane row."""
    return 128 // channels if (channels < 128 and 128 % channels == 0) else 1


def _gelu_tanh(h):
    # matches torch.nn.GELU(approximate='tanh'); restructured to minimize muls
    # (h2 reused, inner arg factored) since the TPU VPU has no f32 FMA.
    c = 0.7978845608028654  # sqrt(2/pi)
    h2 = h * h
    inner = (c * h) * (1.0 + 0.044715 * h2)
    return (0.5 * h) * (1.0 + jnp.tanh(inner))


def ffn_kernel(x_ref, w1_ref, b1_ref, w2_ref, b2_ref, o_ref, *, compute_dtype):
    # x tile: [bt, R*C] lane-dense; weights are block-diagonal packed and resident.
    x = x_ref[...].astype(compute_dtype)
    h = jnp.dot(x, w1_ref[...], preferred_element_type=jnp.float32)
    h = h + b1_ref[...]                                     # bias + GELU in f32
    h = _gelu_tanh(h)
    y = jnp.dot(h.astype(compute_dtype), w2_ref[...],
                preferred_element_type=jnp.float32)
    y = y + b2_ref[...]
    o_ref[...] = y.astype(o_ref.dtype)


def pack_ffn_params(w1, b1, w2, b2, *, compute_dtype=jnp.bfloat16):
    """Build lane-dense kron-packed weights ONCE at init (hoisted from per-call path).

    w1: [C, H], b1: [1, H] (or [H]), w2: [H, C], b2: [1, C] (or [C]).
    kron(I_R, W) is block-diagonal, so a packed row [x_r0 | ... | x_r(R-1)]
    maps to [h_r0 | ... | h_r(R-1)] -- math identical, but every load/store is
    an unmasked 128-lane-wide access and MXU cycle count is unchanged.
    """
    C, H = w1.shape
    R = _pack_factor(C)
    eye = jnp.eye(R, dtype=jnp.float32)
    w1p = jnp.kron(eye, w1.astype(jnp.float32)).astype(compute_dtype)   # [R*C, R*H]
    w2p = jnp.kron(eye, w2.astype(jnp.float32)).astype(compute_dtype)   # [R*H, R*C]
    b1p = jnp.tile(jnp.reshape(b1, (1, H)), (1, R)).astype(jnp.float32)  # [1, R*H]
    b2p = jnp.tile(jnp.reshape(b2, (1, C)), (1, R)).astype(jnp.float32)  # [1, R*C]
    return (R, C, H, w1p, b1p, w2p, b2p)


def sparse_ffn(x, packed_params, *, tile_n=4096, compute_dtype=jnp.bfloat16,
               vmem_limit_bytes=32 * 1024 * 1024):
    """Feed-forward over sparse-voxel features.

    x : [N, C] flat per-voxel features (channels-last).  Output [N, C], x.dtype.
    For best perf pass x in bf16 (halves HBM I/O; the kernel already computes
    bf16-operand / f32-accumulate internally).
    """
    R, C, H, w1p, b1p, w2p, b2p = packed_params
    N, Cx = x.shape
    assert Cx == C, "channel mismatch between x and packed params"
    assert tile_n % (8 * R) == 0, "tile_n must be a multiple of 8*R for (8,128) tiling"
    if R == 1 and C % 128 != 0:
        # Fallback path: lane width C < 128 -> masked vst.msk partial stores.
        # Correct but ~4x slower store path; prefer C with 128 % C == 0.
        pass

    # Tiny pad (< R rows) only when N isn't a multiple of the pack factor; the
    # common aligned case has no pad and no output slice (zero wrapper copies).
    Np = _round_up(N, R)
    if Np != N:
        # TODO(synk): replace this whole-array-copying pad with an in-kernel
        # masked tail store for the < R remainder rows.
        x = jnp.pad(x, ((0, Np - N), (0, 0)))

    xp = x.reshape(Np // R, R * C)           # free reshape: [N, C] -> [N/R, R*C]
    rows = Np // R
    bt = min(tile_n // R, _round_up(rows, 8))   # packed rows per tile, (8,·)-aligned
    num_tiles = pl.cdiv(rows, bt)               # ragged last tile masked by Pallas

    itemsize = jnp.dtype(x.dtype).itemsize
    cost = pl.CostEstimate(
        flops=4 * Np * C * H,                   # two matmuls
        transcendentals=Np * H,                 # tanh per hidden element
        bytes_accessed=int(2 * Np * C * itemsize
                           + w1p.size * 2 + w2p.size * 2
                           + b1p.size * 4 + b2p.size * 4),
    )

    # VMEM @ tile_n=4096, C=32, H=128: x/out f32 tiles 0.5 MiB each (x2 buffers),
    # f32 hidden intermediate ~2 MiB, bf16 weights ~0.25 MiB  -> well under limit.
    out_packed = pl.pallas_call(
        functools.partial(ffn_kernel, compute_dtype=compute_dtype),
        out_shape=jax.ShapeDtypeStruct((rows, R * C), x.dtype),
        grid_spec=pltpu.PrefetchScalarGridSpec(
            num_scalar_prefetch=0,
            grid=(num_tiles,),
            in_specs=[
                pl.BlockSpec((bt, R * C), lambda i: (i, 0)),       # x tile (lane-dense)
                pl.BlockSpec((R * C, R * H), lambda i: (0, 0)),    # W1 (resident)
                pl.BlockSpec((1, R * H), lambda i: (0, 0)),        # b1
                pl.BlockSpec((R * H, R * C), lambda i: (0, 0)),    # W2 (resident)
                pl.BlockSpec((1, R * C), lambda i: (0, 0)),        # b2
            ],
            out_specs=pl.BlockSpec((bt, R * C), lambda i: (i, 0)),  # lane-dense store
        ),
        compiler_params=pltpu.CompilerParams(
            dimension_semantics=("parallel",),      # token tiles independent
            vmem_limit_bytes=vmem_limit_bytes,      # v5e default is only 16 MiB
        ),
        cost_estimate=cost,
    )(xp, w1p, b1p, w2p, b2p)

    y = out_packed.reshape(Np, C)
    return y[:N] if Np != N else y


def init_params(key, channels, mlp_ratio=4.0, dtype=jnp.float32):
    """Deterministic init mirroring nn.Linear default (uniform +/- 1/sqrt(fan_in))."""
    hidden = int(channels * mlp_ratio)
    k1, k2, k3, k4 = jax.random.split(key, 4)
    bound1 = 1.0 / math.sqrt(channels)
    bound2 = 1.0 / math.sqrt(hidden)
    # stored as [in, out] for the kernel (transpose of PyTorch's [out, in])
    w1 = jax.random.uniform(k1, (channels, hidden), dtype, -bound1, bound1)
    b1 = jax.random.uniform(k2, (1, hidden), dtype, -bound1, bound1)
    w2 = jax.random.uniform(k3, (hidden, channels), dtype, -bound2, bound2)
    b2 = jax.random.uniform(k4, (1, channels), dtype, -bound2, bound2)
    return w1, b1, w2, b2


def reference_ffn(x, w1, b1, w2, b2, compute_dtype=jnp.bfloat16):
    """Pure-JAX reference with the same bf16-operand / f32-accumulate recipe."""
    f32 = jnp.float32
    xc = x.astype(compute_dtype).astype(f32)
    w1c = w1.astype(compute_dtype).astype(f32)
    w2c = w2.astype(compute_dtype).astype(f32)
    h = xc @ w1c + b1.astype(f32)
    h = _gelu_tanh(h)
    y = h.astype(compute_dtype).astype(f32) @ w2c + b2.astype(f32)
    return y.astype(x.dtype)


if __name__ == "__main__":
    key = jax.random.PRNGKey(0)
    kx, kp = jax.random.split(key)

    channels = 32        # C
    mlp_ratio = 4.0      # hidden = 128
    n_voxels = 2500      # N (flat count of active sparse voxels; NOT a tile multiple)

    x = jax.random.normal(kx, (n_voxels, channels), jnp.float32)
    w1, b1, w2, b2 = init_params(kp, channels, mlp_ratio)

    # Weights are packed once at init (hoisted out of the per-call path).
    packed = pack_ffn_params(w1, b1, w2, b2)

    out = sparse_ffn(x, packed, tile_n=4096)
    out = jax.block_until_ready(out)

    ref = reference_ffn(x, w1, b1, w2, b2)
    assert out.shape == x.shape and out.dtype == x.dtype
    assert jnp.allclose(out, ref, atol=1e-2, rtol=1e-2), "mismatch vs reference"

    print("KERNEL_OK")
</pallas_src>

<mosaic_0001>
module attributes {stable_mosaic.version = 11 : i64} {
  func.func @ffn_kernel(%arg0: i32, %arg1: memref<632x128xf32, #tpu.memory_space<vmem>>, %arg2: memref<128x512xbf16, #tpu.memory_space<vmem>>, %arg3: memref<1x512xf32, #tpu.memory_space<vmem>>, %arg4: memref<512x128xbf16, #tpu.memory_space<vmem>>, %arg5: memref<1x128xf32, #tpu.memory_space<vmem>>, %arg6: memref<632x128xf32, #tpu.memory_space<vmem>>) attributes {dimension_semantics = [#tpu.dimension_semantics<parallel>], iteration_bounds = array<i64: 1>, scalar_prefetch = 0 : i64, scratch_operands = 0 : i64, tpu.core_type = #tpu.core_type<tc>, window_params = [{transform_indices = @transform_0, window_bounds = array<i64: 632, 128>}, {pipeline_mode = #tpu.pipeline_mode<synchronous>, transform_indices = @transform_1, window_bounds = array<i64: 128, 512>}, {pipeline_mode = #tpu.pipeline_mode<synchronous>, transform_indices = @transform_2, window_bounds = array<i64: 1, 512>}, {pipeline_mode = #tpu.pipeline_mode<synchronous>, transform_indices = @transform_3, window_bounds = array<i64: 512, 128>}, {pipeline_mode = #tpu.pipeline_mode<synchronous>, transform_indices = @transform_4, window_bounds = array<i64: 1, 128>}, {transform_indices = @transform_5, window_bounds = array<i64: 632, 128>}]} {
    %c0 = arith.constant 0 : index
    %c0_0 = arith.constant 0 : index
    %0 = vector.load %arg1[%c0, %c0_0] : memref<632x128xf32, #tpu.memory_space<vmem>>, vector<632x128xf32>
    %1 = arith.truncf %0 : vector<632x128xf32> to vector<632x128xbf16>
    %c0_1 = arith.constant 0 : index
    %c0_2 = arith.constant 0 : index
    %2 = vector.load %arg2[%c0_1, %c0_2] : memref<128x512xbf16, #tpu.memory_space<vmem>>, vector<128x512xbf16>
    %cst = arith.constant dense<0.000000e+00> : vector<632x512xf32>
    %3 = tpu.matmul %1, %2, %cst {dimension_numbers = #tpu.dot_dimension_numbers<[1], [0], [0], [1], [0, 0, 1, 1], [], []>} : vector<632x128xbf16>, vector<128x512xbf16>, vector<632x512xf32> -> vector<632x512xf32>
    %c0_3 = arith.constant 0 : index
    %c0_4 = arith.constant 0 : index
    %4 = vector.load %arg3[%c0_3, %c0_4] : memref<1x512xf32, #tpu.memory_space<vmem>>, vector<1x512xf32>
    %5 = vector.broadcast %4 : vector<1x512xf32> to vector<632x512xf32>
    %6 = arith.addf %3, %5 : vector<632x512xf32>
    %7 = arith.mulf %6, %6 : vector<632x512xf32>
    %cst_5 = arith.constant 0.797884583 : f32
    %8 = vector.broadcast %cst_5 : f32 to vector<632x512xf32>
    %9 = arith.mulf %8, %6 : vector<632x512xf32>
    %cst_6 = arith.constant 4.471500e-02 : f32
    %10 = vector.broadcast %cst_6 : f32 to vector<632x512xf32>
    %11 = arith.mulf %10, %7 : vector<632x512xf32>
    %cst_7 = arith.constant 1.000000e+00 : f32
    %12 = vector.broadcast %cst_7 : f32 to vector<632x512xf32>
    %13 = arith.addf %12, %11 : vector<632x512xf32>
    %14 = arith.mulf %9, %13 : vector<632x512xf32>
    %cst_8 = arith.constant 5.000000e-01 : f32
    %15 = vector.broadcast %cst_8 : f32 to vector<632x512xf32>
    %16 = arith.mulf %15, %6 : vector<632x512xf32>
    %17 = math.tanh %14 : vector<632x512xf32>
    %cst_9 = arith.constant 1.000000e+00 : f32
    %18 = vector.broadcast %cst_9 : f32 to vector<632x512xf32>
    %19 = arith.addf %18, %17 : vector<632x512xf32>
    %20 = arith.mulf %16, %19 : vector<632x512xf32>
    %21 = arith.truncf %20 : vector<632x512xf32> to vector<632x512xbf16>
    %c0_10 = arith.constant 0 : index
    %c0_11 = arith.constant 0 : index
    %22 = vector.load %arg4[%c0_10, %c0_11] : memref<512x128xbf16, #tpu.memory_space<vmem>>, vector<512x128xbf16>
    %cst_12 = arith.constant dense<0.000000e+00> : vector<632x128xf32>
    %23 = tpu.matmul %21, %22, %cst_12 {dimension_numbers = #tpu.dot_dimension_numbers<[1], [0], [0], [1], [0, 0, 1, 1], [], []>} : vector<632x512xbf16>, vector<512x128xbf16>, vector<632x128xf32> -> vector<632x128xf32>
    %c0_13 = arith.constant 0 : index
    %c0_14 = arith.constant 0 : index
    %24 = vector.load %arg5[%c0_13, %c0_14] : memref<1x128xf32, #tpu.memory_space<vmem>>, vector<1x128xf32>
    %25 = vector.broadcast %24 : vector<1x128xf32> to vector<632x128xf32>
    %26 = arith.addf %23, %25 : vector<632x128xf32>
    %c0_15 = arith.constant 0 : index
    %c0_16 = arith.constant 0 : index
    %27 = vector.load %arg6[%c0_15, %c0_16] : memref<632x128xf32, #tpu.memory_space<vmem>>, vector<632x128xf32>
    tpu.vector_store %arg6[%c0_15, %c0_16], %26 {strides = array<i32>} : memref<632x128xf32, #tpu.memory_space<vmem>>, vector<632x128xf32>,
    return
  }
  func.func @transform_0(%arg0: i32) -> (i32, i32) {
    %c0_i32 = arith.constant 0 : i32
    %c0_i32_0 = arith.constant 0 : i32
    return %arg0, %c0_i32 : i32, i32
  }
  func.func @transform_1(%arg0: i32) -> (i32, i32) {
    %c0_i32 = arith.constant 0 : i32
    %c0_i32_0 = arith.constant 0 : i32
    %c0_i32_1 = arith.constant 0 : i32
    return %c0_i32, %c0_i32_0 : i32, i32
  }
  func.func @transform_2(%arg0: i32) -> (i32, i32) {
    %c0_i32 = arith.constant 0 : i32
    %c0_i32_0 = arith.constant 0 : i32
    %c0_i32_1 = arith.constant 0 : i32
    return %c0_i32, %c0_i32_0 : i32, i32
  }
  func.func @transform_3(%arg0: i32) -> (i32, i32) {
    %c0_i32 = arith.constant 0 : i32
    %c0_i32_0 = arith.constant 0 : i32
    %c0_i32_1 = arith.constant 0 : i32
    return %c0_i32, %c0_i32_0 : i32, i32
  }
  func.func @transform_4(%arg0: i32) -> (i32, i32) {
    %c0_i32 = arith.constant 0 : i32
    %c0_i32_0 = arith.constant 0 : i32
    %c0_i32_1 = arith.constant 0 : i32
    return %c0_i32, %c0_i32_0 : i32, i32
  }
  func.func @transform_5(%arg0: i32) -> (i32, i32) {
    %c0_i32 = arith.constant 0 : i32
    %c0_i32_0 = arith.constant 0 : i32
    return %arg0, %c0_i32 : i32, i32
  }
}

</mosaic_0001>

<bundles_post_ra>
// kernel: tpu_custom_call.1
= control target key start
LH: loop header
LB: loop body
LE: loop exit
PB: predicated region body
PF: predicated region fallthrough
CT: control target
= control target key end

     0   :  { %10 = vsyncpa [#allocation3], 0  ;;  %s11127_s0 = inlined_call_operand.hbm [shape: f32[625,128], index: 0, kind: input, shape index: {}]   ;;  %s11128_s1 = inlined_call_operand.hbm [shape: bf16[128,512], index: 1, kind: input, shape index: {}]   ;;  %s11129_s2 = inlined_call_operand.hbm [shape: f32[1,512], index: 2, kind: input, shape index: {}]   ;;  %s11130_s3 = inlined_call_operand.hbm [shape: bf16[512,128], index: 3, kind: input, shape index: {}]   ;;  %s11131_s4 = inlined_call_operand.vmem [shape: f32[1,128], index: 4, kind: input, shape index: {}]   ;;  %s11132_s5 = inlined_call_operand.hbm [shape: f32[625,128], index: 5, kind: output, shape index: {}]  }
   0x1   :  { %11 = vsyncpa [#allocation6], 0 }
   0x2   :  { %12 = vsyncpa [#allocation9], 0 }
   0x3   :  { %13 = vsyncpa [#allocation4], 0  ;;  %s6237_s18 = smov [#allocation5]  }
   0x4   :  { %s31_s19 = sshll.u32 %s6237_s18, 4  ;;  %s32_s19 = int_to_ptr.vmem [resolvable:$true] %s31_s19 }
   0x5   :  { %s6137_s20 = scalar_lea.vmem %s32_s19, 4096  ;;  %p6142_p1 = scmp.lt.s32.totalorder %s32_s19, %s32_s19 }
   0x6   :  { %p6138_p0 = scmp.ne.s32.totalorder %s32_s19, %s6137_s20  ;;  %p6143_p2 = scmp.lt.s32.totalorder %s6137_s20, %s6137_s20 }
   0x8   :  { %p6144_p3 = por %p6143_p2, %p6142_p1 }
   0xa   :  { %p6145_p4 = pnand %p6144_p3, %p6138_p0 }
   0xc   :  { %6148 = shalt.err (!%p6145_p4)
}
   0xd   :  { %s6238_s21 = smov 256   ;;  %s6239_s22 = smov 16  }
   0xe   :  { %37 = dma.hbm_to_vmem [thread:$0]  %s11128_s1, 4096, %s32_s19, [#allocation6], %s6238_s21, %s6238_s21, %s6239_s22  }
   0xf   :  { %s6240_s25 = smov [#allocation2]  }
  0x10   :  { %s19_s26 = sshll.u32 %s6240_s25, 4  ;;  %s20_s26 = int_to_ptr.vmem [resolvable:$true] %s19_s26 }
  0x11   :  { %s6157_s27 = scalar_lea.vmem %s20_s26, 10112  ;;  %p6162_p6 = scmp.lt.s32.totalorder %s20_s26, %s20_s26 }
  0x12   :  { %p6158_p5 = scmp.ne.s32.totalorder %s20_s26, %s6157_s27  ;;  %p6163_p7 = scmp.lt.s32.totalorder %s6157_s27, %s6157_s27 }
  0x14   :  { %p6164_p8 = por %p6163_p7, %p6162_p6 }
  0x16   :  { %p6165_p9 = pnand %p6164_p8, %p6158_p5 }
  0x18   :  { %6168 = shalt.err (!%p6165_p9)
}
  0x19   :  { %s6241_s28 = smov 128   ;;  %s6242_s29 = smov 8  }
  0x1a   :  { %25 = dma.hbm_to_vmem [thread:$0]  %s11127_s0, 10112, %s20_s26, [#allocation3], %s6241_s28, %s6241_s28, %s6242_s29  }
  0x1b   :  { %s6243_s1 = smov [#allocation7]   ;;  %s6244_s8 = smov [#allocation8]  }
  0x1c   :  { %s44_s7 = sshll.u32 %s6243_s1, 4  ;;  %s53_s9 = sshll.u32 %s6244_s8, 4  ;;  %s45_s7 = int_to_ptr.vmem [resolvable:$true] %s44_s7  ;;  %s54_s9 = int_to_ptr.vmem [resolvable:$true] %s53_s9 }
  0x1d   :  { %s6177_s10 = scalar_lea.vmem %s45_s7, 64  ;;  %p6182_p11 = scmp.lt.s32.totalorder %s45_s7, %s45_s7 }
  0x1e   :  { %p6178_p10 = scmp.ne.s32.totalorder %s45_s7, %s6177_s10  ;;  %p6183_p12 = scmp.lt.s32.totalorder %s6177_s10, %s6177_s10 }
  0x20   :  { %p6184_p13 = por %p6183_p12, %p6182_p11 }
  0x22   :  { %p6185_p0 = pnand %p6184_p13, %p6178_p10 }
  0x24   :  { %6188 = shalt.err (!%p6185_p0)
}
  0x25   :  { %47 = dma.hbm_to_vmem [thread:$0]  %s11129_s2, 64, %s45_s7, [#allocation6]  }
  0x26   :  { %s6197_s13 = scalar_lea.vmem %s54_s9, 4096  ;;  %p6202_p2 = scmp.lt.s32.totalorder %s54_s9, %s54_s9 }
  0x27   :  { %p6198_p1 = scmp.ne.s32.totalorder %s54_s9, %s6197_s13  ;;  %p6203_p3 = scmp.lt.s32.totalorder %s6197_s13, %s6197_s13 }
  0x29   :  { %p6204_p4 = por %p6203_p3, %p6202_p2 }
  0x2b   :  { %p6205_p5 = pnand %p6204_p4, %p6198_p1 }
  0x2d   :  { %6208 = shalt.err (!%p6205_p5)
}
  0x2e   :  { %s6245_s0 = smov 64   ;;  %s6246_s14 = smov 4  }
  0x2f   :  { %59 = dma.hbm_to_vmem [thread:$0]  %s11130_s3, 4096, %s54_s9, [#allocation9], %s6245_s0, %s6245_s0, %s6246_s14  }
  0x30   :  { %6229 = dma.done.wait [#allocation3], 10112  }
  0x31   :  { %6230 = vsyncadd [#allocation3], 4294957184 }
  0x32   :  { %6231 = dma.done.wait [#allocation6], 4160  }
  0x33   :  { %6232 = vsyncadd [#allocation6], 4294963136 }
  0x34   :  { %6233 = dma.done.wait [#allocation9], 4096  }
  0x35   :  { %6234 = vsyncadd [#allocation9], 4294963200  ;;  %v11133_v0 = vmov 0   ;;  %v5416_v1 = vld [vmem:[#allocation5 + $0xe4] ss:$16 sps:$4 sm:$0xff]   ;;  %v75_v33 = vld [vmem:[#allocation2] sm:$0xff] }
  0x36   :  { %440 = vmatprep.mubr.bf16.mxu0 %v11133_v0  ;;  %871 = vmatprep.mubr.bf16.mxu1 %v11133_v0  ;;  %v5418_v2 = vld [vmem:[#allocation5 + $0xec] ss:$16 sps:$4 sm:$0xff]   ;;  %v5420_v3 = vld [vmem:[#allocation5 + $0xe0] ss:$16 sps:$4 sm:$0xff]   ;;  %v5421_v4 = vld [vmem:[#allocation5 + $0xe8] ss:$16 sps:$4 sm:$0xff]  }
  0x37   :  { %408 = vmatprep.subr.bf16.mxu0 %v5416_v1  ;;  %839 = vmatprep.subr.bf16.mxu1 %v5418_v2  ;;  %v5422_v5 = vld [vmem:[#allocation5 + $0xc4] ss:$16 sps:$4 sm:$0xff]   ;;  %v5424_v6 = vld [vmem:[#allocation5 + $0xcc] ss:$16 sps:$4 sm:$0xff]   ;;  %v5426_v7 = vld [vmem:[#allocation5 + $0xc0] ss:$16 sps:$4 sm:$0xff]  }
  0x38   :  { %409 = vmatpush1.bf16.msra.mxu0 %v5420_v3  ;;  %840 = vmatpush1.bf16.msra.mxu1 %v5421_v4  ;;  %v5427_v8 = vld [vmem:[#allocation5 + $0xc8] ss:$16 sps:$4 sm:$0xff]   ;;  %v5428_v9 = vld [vmem:[#allocation5 + $0xa4] ss:$16 sps:$4 sm:$0xff]   ;;  %v5430_v10 = vld [vmem:[#allocation5 + $0xac] ss:$16 sps:$4 sm:$0xff]  }
  0x39   :  { %410 = vmatprep.subr.bf16.mxu0 %v5422_v5  ;;  %841 = vmatprep.subr.bf16.mxu1 %v5424_v6  ;;  %v5432_v11 = vld [vmem:[#allocation5 + $0xa0] ss:$16 sps:$4 sm:$0xff]   ;;  %v5433_v12 = vld [vmem:[#allocation5 + $0xa8] ss:$16 sps:$4 sm:$0xff]   ;;  %v5434_v13 = vld [vmem:[#allocation5 + $0x84] ss:$16 sps:$4 sm:$0xff]  }
  0x3a   :  { %v5436_v14 = vld [vmem:[#allocation5 + $0x8c] ss:$16 sps:$4 sm:$0xff]   ;;  %v5438_v15 = vld [vmem:[#allocation5 + $0x80] ss:$16 sps:$4 sm:$0xff]   ;;  %v5439_v16 = vld [vmem:[#allocation5 + $0x88] ss:$16 sps:$4 sm:$0xff]  }
  0x3b   :  { %v5440_v17 = vld [vmem:[#allocation5 + $0x64] ss:$16 sps:$4 sm:$0xff]   ;;  %v5442_v18 = vld [vmem:[#allocation5 + $0x6c] ss:$16 sps:$4 sm:$0xff]   ;;  %v5444_v19 = vld [vmem:[#allocation5 + $0x60] ss:$16 sps:$4 sm:$0xff]  }
  0x3c   :  { %411 = vmatpush1.bf16.msra.mxu0 %v5426_v7  ;;  %842 = vmatpush1.bf16.msra.mxu1 %v5427_v8  ;;  %v5445_v20 = vld [vmem:[#allocation5 + $0x68] ss:$16 sps:$4 sm:$0xff]   ;;  %v5446_v21 = vld [vmem:[#allocation5 + $0x44] ss:$16 sps:$4 sm:$0xff]   ;;  %v5448_v22 = vld [vmem:[#allocation5 + $0x4c] ss:$16 sps:$4 sm:$0xff]  }
  0x3d   :  { %412 = vmatprep.subr.bf16.mxu0 %v5428_v9  ;;  %843 = vmatprep.subr.bf16.mxu1 %v5430_v10  ;;  %v5450_v23 = vld [vmem:[#allocation5 + $0x40] ss:$16 sps:$4 sm:$0xff]   ;;  %v5451_v24 = vld [vmem:[#allocation5 + $0x48] ss:$16 sps:$4 sm:$0xff]   ;;  %v5452_v25 = vld [vmem:[#allocation5 + $0x24] ss:$16 sps:$4 sm:$0xff]  }
  0x3e   :  { %v5454_v26 = vld [vmem:[#allocation5 + $0x2c] ss:$16 sps:$4 sm:$0xff]   ;;  %v5456_v27 = vld [vmem:[#allocation5 + $0x20] ss:$16 sps:$4 sm:$0xff]   ;;  %v5457_v28 = vld [vmem:[#allocation5 + $0x28] ss:$16 sps:$4 sm:$0xff]  }
  0x3f   :  { %v5458_v29 = vld [vmem:[#allocation5 + $0x4] ss:$16 sps:$4 sm:$0xff]   ;;  %v5460_v30 = vld [vmem:[#allocation5 + $0xc] ss:$16 sps:$4 sm:$0xff]   ;;  %v5462_v31 = vld [vmem:[#allocation5] ss:$16 sps:$4 sm:$0xff]  }
  0x40   :  { %413 = vmatpush1.bf16.msra.mxu0 %v5432_v11  ;;  %844 = vmatpush1.bf16.msra.mxu1 %v5433_v12  ;;  %v5463_v32 = vld [vmem:[#allocation5 + $0x8] ss:$16 sps:$4 sm:$0xff]   ;;  %v76_v34 = vld [vmem:[#allocation2 + $0x8] sm:$0xff]  ;;  %v5464_v36 = vld [vmem:[#allocation8 + $0x38] sm:$0xff]  }
  0x41   :  { %414 = vmatprep.subr.bf16.mxu0 %v5434_v13  ;;  %845 = vmatprep.subr.bf16.mxu1 %v5436_v14  ;;  %v154_v35 = vpack.c.bf16 %v76_v34, %v75_v33  ;;  %v5465_v37 = vld [vmem:[#allocation8 + $0xb8] sm:$0xff]   ;;  %v5466_v40 = vld [vmem:[#allocation8 + $0x30] sm:$0xff]   ;;  %v5468_v43 = vld [vmem:[#allocation8 + $0x28] sm:$0xff]  }
  0x42   :  { %v77_v38 = vld [vmem:[#allocation2 + $0x10] sm:$0xff]  ;;  %v78_v39 = vld [vmem:[#allocation2 + $0x18] sm:$0xff]  ;;  %v5469_v44 = vld [vmem:[#allocation8 + $0xa8] sm:$0xff]  }
  0x43   :  { %v5467_v41 = vld [vmem:[#allocation8 + $0xb0] sm:$0xff]   ;;  %v155_v42 = vpack.c.bf16 %v78_v39, %v77_v38  ;;  %v79_v45 = vld [vmem:[#allocation2 + $0x20] sm:$0xff]  ;;  %v5472_v50 = vld [vmem:[#allocation8 + $0x18] sm:$0xff]  }
  0x44   :  { %415 = vmatpush1.bf16.msra.mxu0 %v5438_v15  ;;  %846 = vmatpush1.bf16.msra.mxu1 %v5439_v16  ;;  %v80_v46 = vld [vmem:[#allocation2 + $0x28] sm:$0xff]  ;;  %v5470_v47 = vld [vmem:[#allocation8 + $0x20] sm:$0xff]   ;;  %v5473_v51 = vld [vmem:[#allocation8 + $0x98] sm:$0xff]  }
  0x45   :  { %416 = vmatprep.subr.bf16.mxu0 %v5440_v17  ;;  %847 = vmatprep.subr.bf16.mxu1 %v5442_v18  ;;  %v5471_v48 = vld [vmem:[#allocation8 + $0xa0] sm:$0xff]   ;;  %v156_v49 = vpack.c.bf16 %v80_v46, %v79_v45  ;;  %v81_v52 = vld [vmem:[#allocation2 + $0x30] sm:$0xff]  ;;  %v5476_v57 = vld [vmem:[#allocation8 + $0x8] sm:$0xff]  }
  0x46   :  { %v82_v53 = vld [vmem:[#allocation2 + $0x38] sm:$0xff]  ;;  %v5474_v54 = vld [vmem:[#allocation8 + $0x10] sm:$0xff]   ;;  %v5477_v58 = vld [vmem:[#allocation8 + $0x88] sm:$0xff]  }
  0x47   :  { %v5475_v55 = vld [vmem:[#allocation8 + $0x90] sm:$0xff]   ;;  %v157_v56 = vpack.c.bf16 %v82_v53, %v81_v52  ;;  %v83_v59 = vld [vmem:[#allocation2 + $0x40] sm:$0xff]  ;;  %v5480_v1 = vld [vmem:[#allocation8 + $0x78] sm:$0xff]  }
  0x48   :  { %417 = vmatpush1.bf16.msra.mxu0 %v5444_v19  ;;  %848 = vmatpush1.bf16.msra.mxu1 %v5445_v20  ;;  %v84_v60 = vld [vmem:[#allocation2 + $0x48] sm:$0xff]  ;;  %v5478_v61 = vld [vmem:[#allocation8] sm:$0xff]   ;;  %v5481_v2 = vld [vmem:[#allocation8 + $0xf8] sm:$0xff]  }
  0x49   :  { %418 = vmatprep.subr.bf16.mxu0 %v5446_v21  ;;  %849 = vmatprep.subr.bf16.mxu1 %v5448_v22  ;;  %v5479_v62 = vld [vmem:[#allocation8 + $0x80] sm:$0xff]   ;;  %v158_v63 = vpack.c.bf16 %v84_v60, %v83_v59  ;;  %v85_v3 = vld [vmem:[#allocation2 + $0x50] sm:$0xff]  ;;  %v88_v7 = vld [vmem:[#allocation2 + $0x68] sm:$0xff] }
  0x4a   :  { %v86_v4 = vld [vmem:[#allocation2 + $0x58] sm:$0xff]  ;;  %v87_v6 = vld [vmem:[#allocation2 + $0x60] sm:$0xff]  ;;  %v5482_v9 = vld [vmem:[#allocation8 + $0x70] sm:$0xff]  }
  0x4b   :  { %v159_v5 = vpack.c.bf16 %v86_v4, %v85_v3  ;;  %v160_v8 = vpack.c.bf16 %v88_v7, %v87_v6  ;;  %v5483_v10 = vld [vmem:[#allocation8 + $0xf0] sm:$0xff]   ;;  %v90_v12 = vld [vmem:[#allocation2 + $0x78] sm:$0xff]  ;;  %v91_v14 = vld [vmem:[#allocation2 + $0x80] sm:$0xff] }
  0x4c   :  { %419 = vmatpush1.bf16.msra.mxu0 %v5450_v23  ;;  %850 = vmatpush1.bf16.msra.mxu1 %v5451_v24  ;;  %v89_v11 = vld [vmem:[#allocation2 + $0x70] sm:$0xff]  ;;  %v92_v15 = vld [vmem:[#allocation2 + $0x88] sm:$0xff]  ;;  %v94_v18 = vld [vmem:[#allocation2 + $0x98] sm:$0xff] }
  0x4d   :  { %420 = vmatprep.subr.bf16.mxu0 %v5452_v25  ;;  %851 = vmatprep.subr.bf16.mxu1 %v5454_v26  ;;  %v161_v13 = vpack.c.bf16 %v90_v12, %v89_v11  ;;  %v162_v16 = vpack.c.bf16 %v92_v15, %v91_v14  ;;  %v93_v17 = vld [vmem:[#allocation2 + $0x90] sm:$0xff]  ;;  %v95_v20 = vld [vmem:[#allocation2 + $0xa0] sm:$0xff]  ;;  %v96_v21 = vld [vmem:[#allocation2 + $0xa8] sm:$0xff] }
  0x4e   :  { %v163_v19 = vpack.c.bf16 %v94_v18, %v93_v17  ;;  %v164_v22 = vpack.c.bf16 %v96_v21, %v95_v20  ;;  %v97_v23 = vld [vmem:[#allocation2 + $0xb0] sm:$0xff]  ;;  %v98_v24 = vld [vmem:[#allocation2 + $0xb8] sm:$0xff]  ;;  %v99_v26 = vld [vmem:[#allocation2 + $0xc0] sm:$0xff] }
  0x4f   :  { %v165_v25 = vpack.c.bf16 %v98_v24, %v97_v23  ;;  %v104_v33 = vld [vmem:[#allocation2 + $0xe8] sm:$0xff]  ;;  %v106_v38 = vld [vmem:[#allocation2 + $0xf8] sm:$0xff]  ;;  %v111_v46 = vld [vmem:[#allocation2 + $0x120] sm:$0xff] }
  0x50   :  { %421 = vmatpush1.bf16.msra.mxu0 %v5456_v27  ;;  %852 = vmatpush1.bf16.msra.mxu1 %v5457_v28  ;;  %v100_v27 = vld [vmem:[#allocation2 + $0xc8] sm:$0xff]  ;;  %v115_v52 = vld [vmem:[#allocation2 + $0x140] sm:$0xff]  ;;  %v125_v17 = vld [vmem:[#allocation2 + $0x190] sm:$0xff] }
  0x51   :  { %422 = vmatprep.subr.bf16.mxu0 %v5458_v29  ;;  %853 = vmatprep.subr.bf16.mxu1 %v5460_v30  ;;  %v166_v28 = vpack.c.bf16 %v100_v27, %v99_v26  ;;  %v101_v29 = vld [vmem:[#allocation2 + $0xd0] sm:$0xff]  ;;  %v102_v30 = vld [vmem:[#allocation2 + $0xd8] sm:$0xff]  ;;  %v5484_v34 = vld [vmem:[#allocation8 + $0x68] sm:$0xff]  }
  0x52   :  { %v116_v53 = vld [vmem:[#allocation2 + $0x148] sm:$0xff]  ;;  %v119_v60 = vld [vmem:[#allocation2 + $0x160] sm:$0xff]  ;;  %v126_v18 = vld [vmem:[#allocation2 + $0x198] sm:$0xff] }
  0x53   :  { %v123_v6 = vld [vmem:[#allocation2 + $0x180] sm:$0xff]  ;;  %v124_v7 = vld [vmem:[#allocation2 + $0x188] sm:$0xff]  ;;  %v5488_v26 = vld [vmem:[#allocation8 + $0x58] sm:$0xff]  }
  0x54   :  { %423 = vmatpush1.bf16.msra.mxu0 %v5462_v31  ;;  %854 = vmatpush1.bf16.msra.mxu1 %v5463_v32  ;;  %v167_v31 = vpack.c.bf16 %v102_v30, %v101_v29  ;;  %v103_v32 = vld [vmem:[#allocation2 + $0xe0] sm:$0xff]  ;;  %v5489_v27 = vld [vmem:[#allocation8 + $0xd8] sm:$0xff]  }
  0x55   :  { %4537 = vmatprep.subr.bf16.mxu0 %v11133_v0  ;;  %4889 = vmatprep.subr.bf16.mxu1 %v11133_v0 }
  0x57   :  { %441 = vmatmul.mubr.bf16.vlgmr.msra.gmra.mxu0 %v154_v35  ;;  %872 = vmatmul.mubr.bf16.vlgmr.msra.gmra.mxu1 %v154_v35  ;;  %v5485_v35 = vld [vmem:[#allocation8 + $0xe8] sm:$0xff]  }
  0x58   :  { %4538 = vmatpush1.bf16.msra.mxu0 %v5464_v36  ;;  %4890 = vmatpush1.bf16.msra.mxu1 %v5465_v37  ;;  %v168_v36 = vpack.c.bf16 %v104_v33, %v103_v32  ;;  %v105_v37 = vld [vmem:[#allocation2 + $0xf0] sm:$0xff] }
  0x59   :  { %450 = vmatprep.mubr.bf16.mxu0 %v11133_v0  ;;  %881 = vmatprep.mubr.bf16.mxu1 %v11133_v0  ;;  %v169_v39 = vpack.c.bf16 %v106_v38, %v105_v37 }
  0x5a   :  { %4539 = vmatprep.subr.bf16.mxu0 %v11133_v0  ;;  %4891 = vmatprep.subr.bf16.mxu1 %v11133_v0 }
  0x5c   :  { %4540 = vmatpush1.bf16.msra.mxu0 %v5466_v40  ;;  %4892 = vmatpush1.bf16.msra.mxu1 %v5467_v41  ;;  %v107_v40 = vld [vmem:[#allocation2 + $0x100] sm:$0xff]  ;;  %v108_v41 = vld [vmem:[#allocation2 + $0x108] sm:$0xff] }
  0x5d   :  { %4541 = vmatprep.subr.bf16.mxu0 %v11133_v0  ;;  %4893 = vmatprep.subr.bf16.mxu1 %v11133_v0 }
  0x5f   :  { %451 = vmatmul.mubr.bf16.gmra.mxu0 %v155_v42  ;;  %882 = vmatmul.mubr.bf16.gmra.mxu1 %v155_v42  ;;  %v170_v42 = vpack.c.bf16 %v108_v41, %v107_v40 }
  0x60   :  { %460 = vmatprep.mubr.bf16.mxu0 %v11133_v0  ;;  %891 = vmatprep.mubr.bf16.mxu1 %v11133_v0 }
  0x61   :  { %4542 = vmatpush1.bf16.msra.mxu0 %v5468_v43  ;;  %4894 = vmatpush1.bf16.msra.mxu1 %v5469_v44  ;;  %v109_v43 = vld [vmem:[#allocation2 + $0x110] sm:$0xff]  ;;  %v110_v44 = vld [vmem:[#allocation2 + $0x118] sm:$0xff] }
  0x62   :  { %4543 = vmatprep.subr.bf16.mxu0 %v11133_v0  ;;  %4895 = vmatprep.subr.bf16.mxu1 %v11133_v0  ;;  %v171_v45 = vpack.c.bf16 %v110_v44, %v109_v43  ;;  %v128_v43 = vld [vmem:[#allocation2 + $0x1a8] sm:$0xff] }
  0x65   :  { %4544 = vmatpush1.bf16.msra.mxu0 %v5470_v47  ;;  %4896 = vmatpush1.bf16.msra.mxu1 %v5471_v48  ;;  %v112_v47 = vld [vmem:[#allocation2 + $0x128] sm:$0xff] }
  0x66   :  { %4545 = vmatprep.subr.bf16.mxu0 %v11133_v0  ;;  %4897 = vmatprep.subr.bf16.mxu1 %v11133_v0  ;;  %v172_v48 = vpack.c.bf16 %v112_v47, %v111_v46 }
  0x67   :  { %461 = vmatmul.mubr.bf16.gmra.mxu0 %v156_v49  ;;  %892 = vmatmul.mubr.bf16.gmra.mxu1 %v156_v49  ;;  %v113_v49 = vld [vmem:[#allocation2 + $0x130] sm:$0xff] }
  0x68   :  { %470 = vmatprep.mubr.bf16.mxu0 %v11133_v0  ;;  %901 = vmatprep.mubr.bf16.mxu1 %v11133_v0 }
  0x69   :  { %4546 = vmatpush1.bf16.msra.mxu0 %v5472_v50  ;;  %4898 = vmatpush1.bf16.msra.mxu1 %v5473_v51  ;;  %v114_v50 = vld [vmem:[#allocation2 + $0x138] sm:$0xff] }
  0x6a   :  { %4547 = vmatprep.subr.bf16.mxu0 %v11133_v0  ;;  %4899 = vmatprep.subr.bf16.mxu1 %v11133_v0  ;;  %v173_v51 = vpack.c.bf16 %v114_v50, %v113_v49 }
  0x6d   :  { %4548 = vmatpush1.bf16.msra.mxu0 %v5474_v54  ;;  %4900 = vmatpush1.bf16.msra.mxu1 %v5475_v55  ;;  %v5486_v54 = vld [vmem:[#allocation8 + $0x60] sm:$0xff]  }
  0x6e   :  { %4549 = vmatprep.subr.bf16.mxu0 %v11133_v0  ;;  %4901 = vmatprep.subr.bf16.mxu1 %v11133_v0  ;;  %v5487_v55 = vld [vmem:[#allocation8 + $0xe0] sm:$0xff]  }
  0x6f   :  { %471 = vmatmul.mubr.bf16.gmra.mxu0 %v157_v56  ;;  %902 = vmatmul.mubr.bf16.gmra.mxu1 %v157_v56  ;;  %v174_v56 = vpack.c.bf16 %v116_v53, %v115_v52 }
  0x70   :  { %480 = vmatprep.mubr.bf16.mxu0 %v11133_v0  ;;  %911 = vmatprep.mubr.bf16.mxu1 %v11133_v0 }
  0x71   :  { %4550 = vmatpush1.bf16.msra.mxu0 %v5476_v57  ;;  %4902 = vmatpush1.bf16.msra.mxu1 %v5477_v58  ;;  %v117_v57 = vld [vmem:[#allocation2 + $0x150] sm:$0xff]  ;;  %v118_v58 = vld [vmem:[#allocation2 + $0x158] sm:$0xff] }
  0x72   :  { %4551 = vmatprep.subr.bf16.mxu0 %v11133_v0  ;;  %4903 = vmatprep.subr.bf16.mxu1 %v11133_v0  ;;  %v175_v59 = vpack.c.bf16 %v118_v58, %v117_v57  ;;  %v129_v57 = vld [vmem:[#allocation2 + $0x1b0] sm:$0xff]  ;;  %v130_v58 = vld [vmem:[#allocation2 + $0x1b8] sm:$0xff] }
  0x75   :  { %4552 = vmatpush1.bf16.msra.mxu0 %v5478_v61  ;;  %4904 = vmatpush1.bf16.msra.mxu1 %v5479_v62  ;;  %v120_v61 = vld [vmem:[#allocation2 + $0x168] sm:$0xff] }
  0x76   :  { %4553 = vmatprep.subr.bf16.mxu0 %v11133_v0  ;;  %4905 = vmatprep.subr.bf16.mxu1 %v11133_v0  ;;  %v176_v62 = vpack.c.bf16 %v120_v61, %v119_v60  ;;  %v181_v61 = vpack.c.bf16 %v130_v58, %v129_v57  ;;  %v137_v57 = vld [vmem:[#allocation2 + $0x1f0] sm:$0xff] }
  0x77   :  { %481 = vmatmul.mubr.bf16.gmra.mxu0 %v158_v63  ;;  %912 = vmatmul.mubr.bf16.gmra.mxu1 %v158_v63  ;;  %v121_v63 = vld [vmem:[#allocation2 + $0x170] sm:$0xff] }
  0x78   :  { %490 = vmatprep.mubr.bf16.mxu0 %v11133_v0  ;;  %921 = vmatprep.mubr.bf16.mxu1 %v11133_v0 }
  0x79   :  { %4554 = vmatpush2.bf16.msra.mxu0 %v5480_v1  ;;  %4906 = vmatpush2.bf16.msra.mxu1 %v5481_v2  ;;  %v122_v1 = vld [vmem:[#allocation2 + $0x178] sm:$0xff]  ;;  %v228_v2 = vlaneseq }
  0x7a   :  { %4555 = vmatprep.subr.bf16.mxu0 %v11133_v0  ;;  %4907 = vmatprep.subr.bf16.mxu1 %v11133_v0  ;;  %v177_v3 = vpack.c.bf16 %v122_v1, %v121_v63 }
  0x7b   :  { %v6368_v4 = vshrl.u32 %v228_v2, 7  ;;  %v131_v2 = vld [vmem:[#allocation2 + $0x1c0] sm:$0xff] }
  0x7d   :  { %4556 = vmatpush2.bf16.msra.mxu0 %v5482_v9  ;;  %4908 = vmatpush2.bf16.msra.mxu1 %v5483_v10  ;;  %v6374_v9 = vld [vmem:[#allocation7] sm:$0xf]  ;;  %v178_v10 = vpack.c.bf16 %v124_v7, %v123_v6 }
  0x7e   :  { %4557 = vmatprep.subr.bf16.mxu0 %v11133_v0  ;;  %4909 = vmatprep.subr.bf16.mxu1 %v11133_v0 }
  0x7f   :  { %491 = vmatmul.mubr.bf16.gmra.mxu0 %v159_v5  ;;  %922 = vmatmul.mubr.bf16.gmra.mxu1 %v159_v5  ;;  %v230_v5 = vsub.s32 0, %v6368_v4 }
  0x80   :  { %500 = vmatprep.mubr.bf16.mxu0 %v11133_v0  ;;  %931 = vmatprep.mubr.bf16.mxu1 %v11133_v0 }
  0x81   :  { %4558 = vmatpush2.bf16.msra.mxu0 %v5484_v34  ;;  %4910 = vmatpush2.bf16.msra.mxu1 %v5485_v35  ;;  %v6377_v11 = vrot.slane %v6374_v9, %v230_v5 }
  0x82   :  { %4559 = vmatprep.subr.bf16.mxu0 %v11133_v0  ;;  %4911 = vmatprep.subr.bf16.mxu1 %v11133_v0 }
  0x85   :  { %4560 = vmatpush2.bf16.msra.mxu0 %v5486_v54  ;;  %4912 = vmatpush2.bf16.msra.mxu1 %v5487_v55 }
  0x86   :  { %4561 = vmatprep.subr.bf16.mxu0 %v11133_v0  ;;  %4913 = vmatprep.subr.bf16.mxu1 %v11133_v0 }
  0x87   :  { %501 = vmatmul.mubr.bf16.gmra.mxu0 %v160_v8  ;;  %932 = vmatmul.mubr.bf16.gmra.mxu1 %v160_v8  ;;  %v238_v8 = vsub.s32 2, %v6368_v4 }
  0x88   :  { %510 = vmatprep.mubr.bf16.mxu0 %v11133_v0  ;;  %941 = vmatprep.mubr.bf16.mxu1 %v11133_v0 }
  0x89   :  { %v6380_v12 = vrot.slane %v6374_v9, %v238_v8  ;;  %4562 = vmatpush2.bf16.msra.mxu0 %v5488_v26  ;;  %4914 = vmatpush2.bf16.msra.mxu1 %v5489_v27 }
  0x8a   :  { %4563 = vmatprep.subr.bf16.mxu0 %v11133_v0  ;;  %4915 = vmatprep.subr.bf16.mxu1 %v11133_v0 }
  0x8f   :  { %511 = vmatmul.mubr.bf16.gmra.mxu0 %v161_v13  ;;  %942 = vmatmul.mubr.bf16.gmra.mxu1 %v161_v13 }
  0x90   :  { %520 = vmatprep.mubr.bf16.mxu0 %v11133_v0  ;;  %951 = vmatprep.mubr.bf16.mxu1 %v11133_v0 }
  0x97   :  { %521 = vmatmul.mubr.bf16.gmra.mxu0 %v162_v16  ;;  %952 = vmatmul.mubr.bf16.gmra.mxu1 %v162_v16 }
  0x98   :  { %530 = vmatprep.mubr.bf16.mxu0 %v11133_v0  ;;  %961 = vmatprep.mubr.bf16.mxu1 %v11133_v0 }
  0x9f   :  { %531 = vmatmul.mubr.bf16.gmra.mxu0 %v163_v19  ;;  %962 = vmatmul.mubr.bf16.gmra.mxu1 %v163_v19 }
  0xa0   :  { %540 = vmatprep.mubr.bf16.mxu0 %v11133_v0  ;;  %971 = vmatprep.mubr.bf16.mxu1 %v11133_v0 }
  0xa7   :  { %541 = vmatmul.mubr.bf16.gmra.mxu0 %v164_v22  ;;  %972 = vmatmul.mubr.bf16.gmra.mxu1 %v164_v22 }
  0xa8   :  { %550 = vmatprep.mubr.bf16.mxu0 %v11133_v0  ;;  %981 = vmatprep.mubr.bf16.mxu1 %v11133_v0 }
  0xaf   :  { %551 = vmatmul.mubr.bf16.gmra.mxu0 %v165_v25  ;;  %982 = vmatmul.mubr.bf16.gmra.mxu1 %v165_v25  ;;  %v179_v25 = vpack.c.bf16 %v126_v18, %v125_v17 }
  0xb0   :  { %560 = vmatprep.mubr.bf16.mxu0 %v11133_v0  ;;  %991 = vmatprep.mubr.bf16.mxu1 %v11133_v0 }
  0xb7   :  { %561 = vmatmul.mubr.bf16.gmra.mxu0 %v166_v28  ;;  %992 = vmatmul.mubr.bf16.gmra.mxu1 %v166_v28 }
  0xb8   :  { %570 = vmatprep.mubr.bf16.mxu0 %v11133_v0  ;;  %1001 = vmatprep.mubr.bf16.mxu1 %v11133_v0 }
  0xbf   :  { %571 = vmatmul.mubr.bf16.gmra.mxu0 %v167_v31  ;;  %1002 = vmatmul.mubr.bf16.gmra.mxu1 %v167_v31 }
  0xc0   :  { %580 = vmatprep.mubr.bf16.mxu0 %v11133_v0  ;;  %1011 = vmatprep.mubr.bf16.mxu1 %v11133_v0 }
  0xc7   :  { %581 = vmatmul.mubr.bf16.gmra.mxu0 %v168_v36  ;;  %1012 = vmatmul.mubr.bf16.gmra.mxu1 %v168_v36 }
  0xc8   :  { %590 = vmatprep.mubr.bf16.mxu0 %v11133_v0  ;;  %1021 = vmatprep.mubr.bf16.mxu1 %v11133_v0 }
  0xcf   :  { %591 = vmatmul.mubr.bf16.gmra.mxu0 %v169_v39  ;;  %1022 = vmatmul.mubr.bf16.gmra.mxu1 %v169_v39 }
  0xd0   :  { %600 = vmatprep.mubr.bf16.mxu0 %v11133_v0  ;;  %1031 = vmatprep.mubr.bf16.mxu1 %v11133_v0 }
  0xd7   :  { %601 = vmatmul.mubr.bf16.gmra.mxu0 %v170_v42  ;;  %1032 = vmatmul.mubr.bf16.gmra.mxu1 %v170_v42  ;;  %v127_v42 = vld [vmem:[#allocation2 + $0x1a0] sm:$0xff] }
  0xd8   :  { %610 = vmatprep.mubr.bf16.mxu0 %v11133_v0  ;;  %1041 = vmatprep.mubr.bf16.mxu1 %v11133_v0  ;;  %v180_v50 = vpack.c.bf16 %v128_v43, %v127_v42  ;;  %v135_v42 = vld [vmem:[#allocation2 + $0x1e0] sm:$0xff]  ;;  %v136_v43 = vld [vmem:[#allocation2 + $0x1e8] sm:$0xff] }
  0xdf   :  { %611 = vmatmul.mubr.bf16.gmra.mxu0 %v171_v45  ;;  %1042 = vmatmul.mubr.bf16.gmra.mxu1 %v171_v45 }
  0xe0   :  { %620 = vmatprep.mubr.bf16.mxu0 %v11133_v0  ;;  %1051 = vmatprep.mubr.bf16.mxu1 %v11133_v0 }
  0xe7   :  { %621 = vmatmul.mubr.bf16.gmra.mxu0 %v172_v48  ;;  %1052 = vmatmul.mubr.bf16.gmra.mxu1 %v172_v48 }
  0xe8   :  { %630 = vmatprep.mubr.bf16.mxu0 %v11133_v0  ;;  %1061 = vmatprep.mubr.bf16.mxu1 %v11133_v0 }
  0xef   :  { %631 = vmatmul.mubr.bf16.gmra.mxu0 %v173_v51  ;;  %1062 = vmatmul.mubr.bf16.gmra.mxu1 %v173_v51 }
  0xf0   :  { %640 = vmatprep.mubr.bf16.mxu0 %v11133_v0  ;;  %1071 = vmatprep.mubr.bf16.mxu1 %v11133_v0 }
  0xf7   :  { %641 = vmatmul.mubr.bf16.gmra.mxu0 %v174_v56  ;;  %1072 = vmatmul.mubr.bf16.gmra.mxu1 %v174_v56 }
  0xf8   :  { %650 = vmatprep.mubr.bf16.mxu0 %v11133_v0  ;;  %1081 = vmatprep.mubr.bf16.mxu1 %v11133_v0 }
  0xff   :  { %651 = vmatmul.mubr.bf16.gmra.mxu0 %v175_v59  ;;  %1082 = vmatmul.mubr.bf16.gmra.mxu1 %v175_v59 }
 0x100   :  { %660 = vmatprep.mubr.bf16.mxu0 %v11133_v0  ;;  %1091 = vmatprep.mubr.bf16.mxu1 %v11133_v0 }
 0x107   :  { %661 = vmatmul.mubr.bf16.gmra.mxu0 %v176_v62  ;;  %1092 = vmatmul.mubr.bf16.gmra.mxu1 %v176_v62 }
 0x108   :  { %670 = vmatprep.mubr.bf16.mxu0 %v11133_v0  ;;  %1101 = vmatprep.mubr.bf16.mxu1 %v11133_v0 }
 0x10f   :  { %671 = vmatmul.mubr.bf16.gmra.mxu0 %v177_v3  ;;  %1102 = vmatmul.mubr.bf16.gmra.mxu1 %v177_v3  ;;  %v132_v3 = vld [vmem:[#allocation2 + $0x1c8] sm:$0xff] }
 0x110   :  { %680 = vmatprep.mubr.bf16.mxu0 %v11133_v0  ;;  %1111 = vmatprep.mubr.bf16.mxu1 %v11133_v0 }
 0x117   :  { %v442_v13 = vpop.f32.mrf.mxu0  ;;  %681 = vmatmul.mubr.bf16.gmra.mxu0 %v178_v10  ;;  %v873_v14 = vpop.f32.mrf.mxu1  ;;  %1112 = vmatmul.mubr.bf16.gmra.mxu1 %v178_v10  ;;  %v182_v10 = vpack.c.bf16 %v132_v3, %v131_v2  ;;  %v5490_v3 = vld [vmem:[#allocation8 + $0x50] sm:$0xff]  }
 0x118   :  { %v6383_v15 = vadd.f32 %v442_v13, %v6377_v11  ;;  %v6386_v16 = vadd.f32 %v873_v14, %v6380_v12  ;;  %690 = vmatprep.mubr.bf16.mxu0 %v11133_v0  ;;  %1121 = vmatprep.mubr.bf16.mxu1 %v11133_v0 }
 0x119   :  { %v6390_v19 = vpop.f32.mrf.mxu0  ;;  %v6392_v20 = vpop.f32.mrf.mxu1  ;;  %4564 = vmatpush2.bf16.msra.mxu0 %v5490_v3 }
 0x11a   :  { %v1270_v21 = vmul.f32 %v6383_v15, %v6383_v15  ;;  %v1272_v22 = vmul.f32 %v6386_v16, %v6386_v16  ;;  %v1586_v32 = vmul.f32 0.7978846, %v6383_v15  ;;  %v1588_v34 = vmul.f32 0.7978846, %v6386_v16  ;;  %4565 = vmatprep.subr.bf16.mxu0 %v11133_v0 }
 0x11b   :  { %v446_v23 = vpop.f32.mrf.mxu0  ;;  %v877_v24 = vpop.f32.mrf.mxu1  ;;  %v2850_v18 = vmul.f32 0.5, %v6383_v15 }
 0x11c   :  { %v1902_v28 = vmul.f32 0.044715, %v1270_v21  ;;  %v1904_v29 = vmul.f32 0.044715, %v1272_v22  ;;  %v6399_v30 = vadd.f32 %v446_v23, %v6377_v11  ;;  %v6402_v31 = vadd.f32 %v877_v24, %v6380_v12 }
 0x11d   :  { %v6410_v37 = vpop.f32.mrf.mxu0  ;;  %v6412_v38 = vpop.f32.mrf.mxu1  ;;  %v2852_v23 = vmul.f32 0.5, %v6386_v16  ;;  %v133_v16 = vld [vmem:[#allocation2 + $0x1d0] sm:$0xff] }
 0x11e   :  { %v2218_v33 = vadd.f32 1.0, %v1902_v28  ;;  %v2220_v35 = vadd.f32 1.0, %v1904_v29  ;;  %v1274_v36 = vmul.f32 %v6399_v30, %v6399_v30  ;;  %v1276_v41 = vmul.f32 %v6402_v31, %v6402_v31 }
 0x11f   :  { %691 = vmatmul.mubr.bf16.gmra.mxu0 %v179_v25  ;;  %1122 = vmatmul.mubr.bf16.gmra.mxu1 %v179_v25  ;;  %v1590_v46 = vmul.f32 0.7978846, %v6399_v30  ;;  %v6419_v48 = vpop.f32.mrf.mxu0  ;;  %v6421_v49 = vpop.f32.mrf.mxu1  ;;  %v1592_v51 = vmul.f32 0.7978846, %v6402_v31  ;;  %v2854_v21 = vmul.f32 0.5, %v6399_v30  ;;  %v2856_v24 = vmul.f32 0.5, %v6402_v31 }
 0x120   :  { %v2534_v39 = vmul.f32 %v2218_v33, %v1586_v32  ;;  %v2536_v40 = vmul.f32 %v2220_v35, %v1588_v34  ;;  %700 = vmatprep.mubr.bf16.mxu0 %v11133_v0  ;;  %1131 = vmatprep.mubr.bf16.mxu1 %v11133_v0  ;;  %v1906_v44 = vmul.f32 0.044715, %v1274_v36  ;;  %v1908_v45 = vmul.f32 0.044715, %v1276_v41  ;;  %v134_v30 = vld [vmem:[#allocation2 + $0x1d8] sm:$0xff] }
 0x121   :  { %v6424_v55 = vpop.f32.mrf.mxu0  ;;  %v6426_v56 = vpop.f32.mrf.mxu1  ;;  %v183_v36 = vpack.c.bf16 %v134_v30, %v133_v16  ;;  %v6502_v58 = vadd.f32 %v6421_v49, %v6380_v12 }
 0x122   :  { %5496 = vtanh.f32 %v2534_v39  ;;  %v2222_v47 = vadd.f32 1.0, %v1906_v44  ;;  %v2224_v52 = vadd.f32 1.0, %v1908_v45  ;;  %v234_v39 = vsub.s32 1, %v6368_v4 }
 0x123   :  { %5498 = vtanh.f32 %v2536_v40  ;;  %v6430_v59 = vpop.f32.mrf.mxu0  ;;  %v6432_v60 = vpop.f32.mrf.mxu1  ;;  %v242_v44 = vsub.s32 3, %v6368_v4  ;;  %v6496_v4 = vadd.f32 %v6419_v48, %v6377_v11  ;;  %v1280_v49 = vmul.f32 %v6502_v58, %v6502_v58 }
 0x124   :  { %v2538_v53 = vmul.f32 %v2222_v47, %v1590_v46  ;;  %v2540_v54 = vmul.f32 %v2224_v52, %v1592_v51  ;;  %v6479_v45 = vrot.slane %v6374_v9, %v234_v39  ;;  %v1596_v3 = vmul.f32 0.7978846, %v6502_v58 }
 0x125   :  { %v6434_v62 = vpop.f32.mrf.mxu0  ;;  %v6436_v63 = vpop.f32.mrf.mxu1  ;;  %v6486_v51 = vrot.slane %v6374_v9, %v242_v44  ;;  %v138_v9 = vld [vmem:[#allocation2 + $0x1f8] sm:$0xff]  ;;  %v6540_v44 = vadd.f32 %v6432_v60, %v6380_v12 }
 0x126   :  { %5500 = vtanh.f32 %v2538_v53  ;;  %v445_v52 = vadd.f32 %v6390_v19, %v6479_v45  ;;  %v185_v48 = vpack.c.bf16 %v138_v9, %v137_v57  ;;  %v1594_v9 = vmul.f32 0.7978846, %v6496_v4 }
 0x127   :  { %701 = vmatmul.mubr.bf16.gmra.mxu0 %v180_v50  ;;  %1132 = vmatmul.mubr.bf16.gmra.mxu1 %v180_v50  ;;  %5502 = vtanh.f32 %v2540_v54  ;;  %v6440_v7 = vpop.f32.mrf.mxu0  ;;  %v6442_v8 = vpop.f32.mrf.mxu1  ;;  %v184_v50 = vpack.c.bf16 %v136_v43, %v135_v42  ;;  %v876_v19 = vadd.f32 %v6392_v20, %v6486_v51  ;;  %v6550_v60 = vadd.f32 %v6434_v62, %v6479_v45 }
 0x128   :  { %710 = vmatprep.mubr.bf16.mxu0 %v11133_v0  ;;  %1141 = vmatprep.mubr.bf16.mxu1 %v11133_v0  ;;  %v1587_v39 = vmul.f32 0.7978846, %v445_v52 }
 0x129   :  { %v6452_v28 = vpop.f32.mrf.mxu0  ;;  %v6454_v29 = vpop.f32.mrf.mxu1  ;;  %v1273_v20 = vmul.f32 %v876_v19, %v876_v19 }
 0x12b   :  { %v6466_v34 = vpop.f32.mrf.mxu0  ;;  %v6468_v35 = vpop.f32.mrf.mxu1 }
 0x12d   :  { %v6471_v40 = vpop.f32.mrf.mxu0  ;;  %v6473_v41 = vpop.f32.mrf.mxu1 }
 0x12f   :  { %711 = vmatmul.mubr.bf16.gmra.mxu0 %v181_v61  ;;  %1142 = vmatmul.mubr.bf16.gmra.mxu1 %v181_v61  ;;  %v5497_v1 = vpop.eup %5496  ;;  %v6481_v46 = vpop.f32.mrf.mxu0  ;;  %v1271_v61 = vmul.f32 %v445_v52, %v445_v52 }
 0x130   :  { %720 = vmatprep.mubr.bf16.mxu0 %v11133_v0  ;;  %1151 = vmatprep.mubr.bf16.mxu1 %v11133_v0  ;;  %v5499_v5 = vpop.eup %5498  ;;  %v3482_v6 = vadd.f32 1.0, %v5497_v1  ;;  %v6483_v47 = vpop.f32.mrf.mxu1 }
 0x131   :  { %v3484_v14 = vadd.f32 1.0, %v5499_v5  ;;  %v6490_v53 = vpop.f32.mrf.mxu0  ;;  %v5491_v5 = vld [vmem:[#allocation8 + $0xd0] sm:$0xff]  }
 0x132   :  { %v6448_v26 = vmul.f32 %v3482_v6, %v2850_v18  ;;  %v6492_v54 = vpop.f32.mrf.mxu1  ;;  %v1278_v6 = vmul.f32 %v6496_v4, %v6496_v4  ;;  %4916 = vmatpush2.bf16.msra.mxu1 %v5491_v5 }
 0x133   :  { %v5501_v13 = vpop.eup %5500  ;;  %v6456_v32 = vmul.f32 %v3484_v14, %v2852_v23  ;;  %v6506_v1 = vpop.f32.mrf.mxu0  ;;  %4917 = vmatprep.subr.bf16.mxu1 %v11133_v0  ;;  %v1903_v14 = vmul.f32 0.044715, %v1271_v61  ;;  %v1905_v23 = vmul.f32 0.044715, %v1273_v20 }
 0x134   :  { %v5503_v17 = vpop.eup %5502  ;;  %v3486_v22 = vadd.f32 1.0, %v5501_v13  ;;  %v6508_v2 = vpop.f32.mrf.mxu1  ;;  %v6518_v13 = vadd.f32 %v6430_v59, %v6377_v11 }
 0x135   :  { %v3488_v25 = vadd.f32 1.0, %v5503_v17  ;;  %v880_v17 = vadd.f32 %v6412_v38, %v6486_v51  ;;  %v6524_v18 = vpop.f32.mrf.mxu0  ;;  %v455_v38 = vadd.f32 %v6424_v55, %v6479_v45  ;;  %v2221_v57 = vadd.f32 1.0, %v1905_v23 }
 0x136   :  { %v6450_v27 = vmul.f32 %v3486_v22, %v2854_v21  ;;  %v1910_v21 = vmul.f32 0.044715, %v1278_v6  ;;  %v1912_v22 = vmul.f32 0.044715, %v1280_v49 }
 0x137   :  { %721 = vmatmul.mubr.bf16.gmra.mxu0 %v182_v10  ;;  %1152 = vmatmul.mubr.bf16.gmra.mxu1 %v182_v10  ;;  %v6458_v15 = vmul.f32 %v3488_v25, %v2856_v24  ;;  %v449_v10 = vadd.f32 %v6410_v37, %v6479_v45  ;;  %v6526_v37 = vpop.f32.mrf.mxu1  ;;  %v1282_v24 = vmul.f32 %v6518_v13, %v6518_v13  ;;  %v2219_v25 = vadd.f32 1.0, %v1903_v14 }
 0x138   :  { %730 = vmatprep.mubr.bf16.mxu0 %v11133_v0  ;;  %1161 = vmatprep.mubr.bf16.mxu1 %v11133_v0  ;;  %v1277_v16 = vmul.f32 %v880_v17, %v880_v17  ;;  %v2226_v30 = vadd.f32 1.0, %v1910_v21  ;;  %v2228_v43 = vadd.f32 1.0, %v1912_v22  ;;  %v1279_v5 = vmul.f32 %v455_v38, %v455_v38 }
 0x139   :  { %v1275_v59 = vmul.f32 %v449_v10, %v449_v10  ;;  %v1914_v61 = vmul.f32 0.044715, %v1282_v24  ;;  %v1284_v21 = vmul.f32 %v6540_v44, %v6540_v44  ;;  %v1591_v22 = vmul.f32 0.7978846, %v449_v10 }
 0x13a   :  { %v1909_v55 = vmul.f32 0.044715, %v1277_v16  ;;  %v2542_v6 = vmul.f32 %v2226_v30, %v1594_v9  ;;  %v2544_v14 = vmul.f32 %v2228_v43, %v1596_v3  ;;  %v6558_v24 = vadd.f32 %v6440_v7, %v6377_v11 }
 0x13b   :  { %v1907_v42 = vmul.f32 0.044715, %v1275_v59  ;;  %v2230_v23 = vadd.f32 1.0, %v1914_v61  ;;  %v1911_v62 = vmul.f32 0.044715, %v1279_v5  ;;  %v6571_v61 = vmul.f32 0.5, %v880_v17 }
 0x13c   :  { %v2225_v16 = vadd.f32 1.0, %v1909_v55  ;;  %v1598_v30 = vmul.f32 0.7978846, %v6518_v13  ;;  %v1916_v43 = vmul.f32 0.044715, %v1284_v21  ;;  %v1286_v9 = vmul.f32 %v6558_v24, %v6558_v24 }
 0x13d   :  { %v2223_v20 = vadd.f32 1.0, %v1907_v42  ;;  %v1593_v7 = vmul.f32 0.7978846, %v880_v17  ;;  %v2227_v55 = vadd.f32 1.0, %v1911_v62  ;;  %v890_v3 = vadd.f32 %v6436_v63, %v6486_v51 }
 0x13e   :  { %v465_v21 = vadd.f32 %v6452_v28, %v6479_v45  ;;  %v6597_v28 = vadd.f32 %v6466_v34, %v6377_v11 }
 0x13f   :  { %731 = vmatmul.mubr.bf16.gmra.mxu0 %v183_v36  ;;  %1162 = vmatmul.mubr.bf16.gmra.mxu1 %v183_v36  ;;  %v6536_v36 = vadd.f32 %v6426_v56, %v6486_v51  ;;  %v1589_v56 = vmul.f32 0.7978846, %v876_v19  ;;  %v2539_v42 = vmul.f32 %v2223_v20, %v1591_v22  ;;  %v2541_v5 = vmul.f32 %v2225_v16, %v1593_v7 }
 0x140   :  { %740 = vmatprep.mubr.bf16.mxu0 %v11133_v0  ;;  %1171 = vmatprep.mubr.bf16.mxu1 %v11133_v0  ;;  %v2232_v20 = vadd.f32 1.0, %v1916_v43  ;;  %v1285_v22 = vmul.f32 %v890_v3, %v890_v3  ;;  %v1287_v43 = vmul.f32 %v465_v21, %v465_v21  ;;  %v896_v7 = vadd.f32 %v6454_v29, %v6486_v51 }
 0x141   :  { %v1281_v49 = vmul.f32 %v6536_v36, %v6536_v36  ;;  %v2537_v59 = vmul.f32 %v2221_v57, %v1589_v56  ;;  %v6567_v57 = vadd.f32 %v6442_v8, %v6380_v12  ;;  %v6579_v56 = vmul.f32 0.5, %v6502_v58 }
 0x142   :  { %v1600_v58 = vmul.f32 0.7978846, %v6540_v44  ;;  %v6590_v16 = vmul.f32 0.5, %v6536_v36  ;;  %v1601_v29 = vmul.f32 0.7978846, %v890_v3 }
 0x143   :  { %v1288_v17 = vmul.f32 %v6567_v57, %v6567_v57  ;;  %v1605_v31 = vmul.f32 0.7978846, %v896_v7 }
 0x144   :  { %11144 = vst [vmem:[#allocation16_spill] sm:$0xff] %v6590_v16 }
 0x147   :  { %741 = vmatmul.mubr.bf16.gmra.mxu0 %v184_v50  ;;  %1172 = vmatmul.mubr.bf16.gmra.mxu1 %v184_v50  ;;  %v6542_v50 = vmul.f32 0.5, %v445_v52  ;;  %v6552_v52 = vmul.f32 0.5, %v876_v19  ;;  %v1913_v19 = vmul.f32 0.044715, %v1281_v49  ;;  %v1595_v49 = vmul.f32 0.7978846, %v455_v38 }
 0x148   :  { %750 = vmatprep.mubr.bf16.mxu0 %v11133_v0  ;;  %1181 = vmatprep.mubr.bf16.mxu1 %v11133_v0 }
 0x149   :  { %v2229_v8 = vadd.f32 1.0, %v1913_v19  ;;  %v2543_v63 = vmul.f32 %v2227_v55, %v1595_v49  ;;  %v6593_v19 = vmul.f32 0.5, %v6518_v13  ;;  %v6607_v13 = vadd.f32 %v6468_v35, %v6380_v12 }
 0x14a   :  { %v6612_v55 = vmul.f32 0.5, %v6550_v60  ;;  %v1919_v35 = vmul.f32 0.044715, %v1287_v43 }
 0x14c   :  { %11145 = vst [vmem:[#allocation17_spill] sm:$0xff] %v6612_v55 }
 0x14f   :  { %751 = vmatmul.mubr.bf16.gmra.mxu0 %v185_v48  ;;  %1182 = vmatmul.mubr.bf16.gmra.mxu1 %v185_v48  ;;  %v2535_v48 = vmul.f32 %v2219_v25, %v1587_v39  ;;  %v6560_v25 = vmul.f32 0.5, %v449_v10  ;;  %v1283_v39 = vmul.f32 %v6550_v60, %v6550_v60  ;;  %v2546_v10 = vmul.f32 %v2230_v23, %v1598_v30 }
 0x150   :  { %760 = vmatprep.mubr.bf16.mxu0 %v11133_v0  ;;  %1191 = vmatprep.mubr.bf16.mxu1 %v11133_v0  ;;  %v2548_v30 = vmul.f32 %v2232_v20, %v1600_v58  ;;  %v1292_v58 = vmul.f32 %v6607_v13, %v6607_v13  ;;  %v6667_v0 = vmul.f32 0.5, %v896_v7 }
 0x151   :  { %5504 = vtanh.f32 %v2535_v48  ;;  %v6574_v48 = vmul.f32 0.5, %v6496_v4  ;;  %v1918_v4 = vmul.f32 0.044715, %v1286_v9 }
 0x152   :  { %5506 = vtanh.f32 %v2542_v6  ;;  %v1915_v6 = vmul.f32 0.044715, %v1283_v39  ;;  %v1920_v39 = vmul.f32 0.044715, %v1288_v17  ;;  %v1289_v17 = vmul.f32 %v896_v7, %v896_v7  ;;  %11150 = vst [vmem:[#allocation22_spill] sm:$0xff] %v6667_v0 }
 0x153   :  { %5508 = vtanh.f32 %v2544_v14  ;;  %v1597_v14 = vmul.f32 0.7978846, %v6536_v36  ;;  %v6603_v36 = vmul.f32 0.5, %v6540_v44  ;;  %v1290_v44 = vmul.f32 %v6597_v28, %v6597_v28 }
 0x154   :  { %5510 = vtanh.f32 %v2537_v59  ;;  %v6586_v59 = vmul.f32 0.5, %v455_v38  ;;  %v2231_v62 = vadd.f32 1.0, %v1915_v6  ;;  %v1599_v38 = vmul.f32 0.7978846, %v6550_v60 }
 0x155   :  { %5512 = vtanh.f32 %v2539_v42  ;;  %v2545_v23 = vmul.f32 %v2229_v8, %v1597_v14  ;;  %v2234_v42 = vadd.f32 1.0, %v1918_v4  ;;  %v2236_v6 = vadd.f32 1.0, %v1920_v39 }
 0x156   :  { %5514 = vtanh.f32 %v2546_v10  ;;  %11143 = vst [vmem:[#allocation15_spill] sm:$0xff] %v6586_v59  ;;  %v1917_v10 = vmul.f32 0.044715, %v1285_v22  ;;  %v2547_v34 = vmul.f32 %v2231_v62, %v1599_v38  ;;  %v6619_v14 = vadd.f32 %v6471_v40, %v6479_v45 }
 0x157   :  { %5516 = vtanh.f32 %v2541_v5  ;;  %v1602_v5 = vmul.f32 0.7978846, %v6558_v24  ;;  %v6628_v22 = vadd.f32 %v6481_v46, %v6377_v11  ;;  %v6630_v62 = vmul.f32 0.5, %v890_v3 }
 0x158   :  { %5518 = vtanh.f32 %v2543_v63  ;;  %v2233_v60 = vadd.f32 1.0, %v1917_v10  ;;  %v1604_v63 = vmul.f32 0.7978846, %v6567_v57  ;;  %v1922_v38 = vmul.f32 0.044715, %v1290_v44 }
 0x159   :  { %5520 = vtanh.f32 %v2545_v23  ;;  %v2550_v20 = vmul.f32 %v2234_v42, %v1602_v5  ;;  %11146 = vst [vmem:[#allocation18_spill] sm:$0xff] %v6630_v62  ;;  %v6637_v42 = vadd.f32 %v6473_v41, %v6486_v51  ;;  %v2235_v10 = vadd.f32 1.0, %v1919_v35 }
 0x15a   :  { %5522 = vtanh.f32 %v2548_v30  ;;  %v6633_v30 = vmul.f32 0.5, %v6558_v24  ;;  %v2552_v39 = vmul.f32 %v2236_v6, %v1604_v63  ;;  %v1921_v46 = vmul.f32 0.044715, %v1289_v17 }
 0x15b   :  { %5524 = vtanh.f32 %v2547_v34  ;;  %v1291_v34 = vmul.f32 %v6619_v14, %v6619_v14  ;;  %v2549_v5 = vmul.f32 %v2233_v60, %v1601_v29  ;;  %v6644_v24 = vmul.f32 0.5, %v6567_v57 }
 0x15c   :  { %5526 = vtanh.f32 %v2550_v20  ;;  %v1294_v6 = vmul.f32 %v6628_v22, %v6628_v22  ;;  %v1603_v44 = vmul.f32 0.7978846, %v465_v21  ;;  %v6655_v20 = vadd.f32 %v6483_v47, %v6380_v12 }
 0x15d   :  { %5528 = vtanh.f32 %v2552_v39  ;;  %v2238_v57 = vadd.f32 1.0, %v1922_v38  ;;  %v1293_v17 = vmul.f32 %v6637_v42, %v6637_v42  ;;  %v2237_v63 = vadd.f32 1.0, %v1921_v46 }
 0x15e   :  { %v6609_v9 = vpop.eup %5504  ;;  %5530 = vtanh.f32 %v2549_v5  ;;  %v1926_v47 = vmul.f32 0.044715, %v1294_v6 }
 0x15f   :  { %v5507_v8 = vpop.eup %5506  ;;  %v1925_v46 = vmul.f32 0.044715, %v1293_v17  ;;  %v6691_v17 = vmul.f32 0.5, %v6607_v13 }
 0x160   :  { %v5509_v49 = vpop.eup %5508  ;;  %v3490_v23 = vadd.f32 1.0, %v5507_v8  ;;  %v1924_v8 = vmul.f32 0.044715, %v1292_v58  ;;  %v1923_v58 = vmul.f32 0.044715, %v1291_v34  ;;  %v6679_v34 = vadd.f32 %v6506_v1, %v6377_v11 }
 0x161   :  { %v6621_v4 = vpop.eup %5510  ;;  %v3492_v40 = vadd.f32 1.0, %v5509_v49  ;;  %v6651_v49 = vmul.f32 0.5, %v465_v21  ;;  %v1606_v21 = vmul.f32 0.7978846, %v6597_v28  ;;  %v2242_v6 = vadd.f32 1.0, %v1926_v47 }
 0x162   :  { %v6639_v43 = vpop.eup %5512  ;;  %v6649_v41 = vmul.f32 %v3490_v23, %v6574_v48  ;;  %v2551_v48 = vmul.f32 %v2235_v10, %v1603_v44  ;;  %v2240_v23 = vadd.f32 1.0, %v1924_v8  ;;  %v1608_v10 = vmul.f32 0.7978846, %v6607_v13 }
 0x163   :  { %v5515_v3 = vpop.eup %5514  ;;  %11148 = vst [vmem:[#allocation20_spill] sm:$0xff] %v6651_v49  ;;  %v6660_v29 = vmul.f32 %v3492_v40, %v6579_v56  ;;  %v6670_v56 = vmul.f32 0.5, %v6597_v28  ;;  %v1296_v40 = vmul.f32 %v6655_v20, %v6655_v20  ;;  %v2554_v38 = vmul.f32 %v2238_v57, %v1606_v21 }
 0x164   :  { %11147 = vst [vmem:[#allocation19_spill] sm:$0xff] %v6649_v41  ;;  %v6657_v35 = vpop.eup %5516  ;;  %v3494_v60 = vadd.f32 1.0, %v5515_v3  ;;  %5532 = vtanh.f32 %v2551_v48  ;;  %v2553_v28 = vmul.f32 %v2237_v63, %v1605_v31  ;;  %v2239_v5 = vadd.f32 1.0, %v1923_v58  ;;  %v5492_v48 = vld [vmem:[#allocation8 + $0x48] sm:$0xff]  }
 0x165   :  { %11149 = vst [vmem:[#allocation21_spill] sm:$0xff] %v6660_v29  ;;  %v6665_v33 = vpop.eup %5518  ;;  %v2556_v8 = vmul.f32 %v2240_v23, %v1608_v10  ;;  %v475_v44 = vadd.f32 %v6490_v53, %v6479_v45  ;;  %v6688_v57 = vadd.f32 %v6492_v54, %v6486_v51  ;;  %v1607_v1 = vmul.f32 0.7978846, %v6619_v14  ;;  %v5493_v63 = vld [vmem:[#allocation8 + $0xc8] sm:$0xff]   ;;  %4566 = vmatpush2.bf16.msra.mxu0 %v5492_v48 }
 0x166   :  { %v6674_v39 = vpop.eup %5520  ;;  %v6682_v7 = vmul.f32 %v3494_v60, %v6593_v19  ;;  %v1928_v21 = vmul.f32 0.044715, %v1296_v40  ;;  %v6696_v19 = vadd.f32 %v6508_v2, %v6380_v12  ;;  %5534 = vtanh.f32 %v2554_v38  ;;  %4918 = vmatpush2.bf16.msra.mxu1 %v5493_v63 }
 0x167   :  { %v5523_v3 = vpop.eup %5522  ;;  %v2241_v60 = vadd.f32 1.0, %v1925_v46  ;;  %v1610_v53 = vmul.f32 0.7978846, %v6628_v22  ;;  %v1298_v54 = vmul.f32 %v6679_v34, %v6679_v34  ;;  %5536 = vtanh.f32 %v2553_v28 }
 0x168   :  { %11151 = vst [vmem:[#allocation23_spill] sm:$0xff] %v6682_v7  ;;  %v6698_v31 = vpop.eup %5524  ;;  %v3496_v13 = vadd.f32 1.0, %v5523_v3  ;;  %v2555_v58 = vmul.f32 %v2239_v5, %v1607_v1  ;;  %v1609_v23 = vmul.f32 0.7978846, %v6637_v42  ;;  %5538 = vtanh.f32 %v2556_v8 }
 0x169   :  { %v5527_v47 = vpop.eup %5526  ;;  %v2558_v2 = vmul.f32 %v2242_v6, %v1610_v53  ;;  %v1295_v40 = vmul.f32 %v475_v44, %v475_v44  ;;  %v1297_v38 = vmul.f32 %v6688_v57, %v6688_v57  ;;  %v6707_v10 = vmul.f32 0.5, %v6619_v14  ;;  %v482_v14 = vpop.f32.mrf.mxu0 }
 0x16a   :  { %v2244_v46 = vadd.f32 1.0, %v1928_v21  ;;  %v1300_v3 = vmul.f32 %v6696_v19, %v6696_v19  ;;  %v6713_v28 = vadd.f32 %v6524_v18, %v6479_v45  ;;  %v11153_v5 = vmov 0   ;;  %v5529_v21 = vpop.eup %5528 }
 0x16b   :  { %11152 = vst [vmem:[#allocation24_spill] sm:$0xff] %v6707_v10  ;;  %4567 = vmatprep.subr.bf16.mxu0 %v11153_v5  ;;  %v2557_v8 = vmul.f32 %v2241_v60, %v1609_v23  ;;  %v6717_v6 = vmul.f32 0.5, %v6637_v42  ;;  %v1930_v1 = vmul.f32 0.044715, %v1298_v54  ;;  %v6721_v53 = vadd.f32 %v6526_v37, %v6486_v51  ;;  %4919 = vmatprep.subr.bf16.mxu1 %v11153_v5  ;;  %v913_v23 = vpop.f32.mrf.mxu1  ;;  %v6731_v37 = vpop.eup %5530 }
 0x16c   :  { %v6725_v48 = vmul.f32 %v3496_v13, %v6603_v36  ;;  %v3498_v18 = vadd.f32 1.0, %v5527_v47  ;;  %5540 = vtanh.f32 %v2555_v58  ;;  %v1612_v63 = vmul.f32 0.7978846, %v6655_v20  ;;  %v484_v47 = vpop.f32.mrf.mxu0 }
 0x16d   :  { %11154 = vst [vmem:[#allocation25_spill] sm:$0xff] %v6717_v6  ;;  %v6729_v60 = vmul.f32 0.5, %v6628_v22  ;;  %5542 = vtanh.f32 %v2558_v2  ;;  %v1927_v42 = vmul.f32 0.044715, %v1295_v40  ;;  %v1929_v54 = vmul.f32 0.044715, %v1297_v38 }
 0x16e   :  { %11155 = vst [vmem:[#allocation26_spill] sm:$0xff] %v6725_v48  ;;  %v2560_v6 = vmul.f32 %v2244_v46, %v1612_v63  ;;  %v1932_v0 = vmul.f32 0.044715, %v1300_v3  ;;  %v1299_v10 = vmul.f32 %v6713_v28, %v6713_v28  ;;  %v6736_v36 = vadd.f32 %v482_v14, %v6377_v11  ;;  %v915_v63 = vpop.f32.mrf.mxu1 }
 0x16f   :  { %v3500_v13 = vadd.f32 1.0, %v5529_v21  ;;  %5544 = vtanh.f32 %v2557_v8  ;;  %v2246_v58 = vadd.f32 1.0, %v1930_v1  ;;  %v1301_v22 = vmul.f32 %v6721_v53, %v6721_v53 }
 0x170   :  { %v6741_v2 = vmul.f32 %v3498_v18, %v6633_v30  ;;  %v6744_v40 = vmul.f32 0.5, %v6655_v20  ;;  %v1611_v38 = vmul.f32 0.7978846, %v475_v44  ;;  %v6747_v46 = vadd.f32 %v913_v23, %v6380_v12 }
 0x171   :  { %v6749_v3 = vpop.eup %5532  ;;  %v2243_v14 = vadd.f32 1.0, %v1927_v42  ;;  %v6751_v21 = vmul.f32 0.5, %v475_v44  ;;  %v2245_v8 = vadd.f32 1.0, %v1929_v54  ;;  %v1614_v1 = vmul.f32 0.7978846, %v6679_v34  ;;  %v486_v42 = vpop.f32.mrf.mxu0 }
 0x172   :  { %11156 = vst [vmem:[#allocation27_spill] sm:$0xff] %v6741_v2  ;;  %11157 = vst [vmem:[#allocation28_spill] sm:$0xff] %v6749_v3  ;;  %5546 = vtanh.f32 %v2560_v6  ;;  %v2248_v49 = vadd.f32 1.0, %v1932_v0  ;;  %v1931_v30 = vmul.f32 0.044715, %v1299_v10  ;;  %v1302_v20 = vmul.f32 %v6736_v36, %v6736_v36 }
 0x173   :  { %11158 = vst [vmem:[#allocation29_spill] sm:$0xff] %v6751_v21  ;;  %v6757_v18 = vmul.f32 %v3500_v13, %v6644_v24  ;;  %v1613_v23 = vmul.f32 0.7978846, %v6688_v57  ;;  %v2562_v2 = vmul.f32 %v2246_v58, %v1614_v1  ;;  %v1933_v3 = vmul.f32 0.044715, %v1301_v22  ;;  %v5535_v44 = vpop.eup %5534  ;;  %v917_v22 = vpop.f32.mrf.mxu1 }
 0x174   :  { %v6761_v54 = vmul.f32 0.5, %v6688_v57  ;;  %v1616_v21 = vmul.f32 0.7978846, %v6696_v19  ;;  %v1304_v0 = vmul.f32 %v6747_v46, %v6747_v46  ;;  %v6767_v10 = vadd.f32 %v484_v47, %v6479_v45  ;;  %v6769_v6 = vpop.eup %5536 }
 0x175   :  { %11159 = vst [vmem:[#allocation30_spill] sm:$0xff] %v6757_v18  ;;  %11161 = vst [vmem:[#allocation32_spill] sm:$0xff] %v6769_v6  ;;  %v2559_v24 = vmul.f32 %v2243_v14, %v1611_v38  ;;  %v6772_v13 = vmul.f32 0.5, %v6679_v34  ;;  %v6775_v58 = vmul.f32 0.5, %v6696_v19  ;;  %v6778_v57 = vadd.f32 %v915_v63, %v6486_v51  ;;  %v5539_v1 = vpop.eup %5538  ;;  %v488_v34 = vpop.f32.mrf.mxu0 }
 0x176   :  { %11160 = vst [vmem:[#allocation31_spill] sm:$0xff] %v6761_v54  ;;  %v2561_v54 = vmul.f32 %v2245_v8, %v1613_v23  ;;  %v2564_v18 = vmul.f32 %v2248_v49, %v1616_v21  ;;  %v2247_v48 = vadd.f32 1.0, %v1931_v30  ;;  %v1934_v29 = vmul.f32 0.044715, %v1302_v20  ;;  %v919_v21 = vpop.f32.mrf.mxu1 }
 0x177   :  { %v3502_v47 = vadd.f32 1.0, %v5535_v44  ;;  %5548 = vtanh.f32 %v2562_v2  ;;  %v2249_v7 = vadd.f32 1.0, %v1933_v3  ;;  %v6781_v38 = vadd.f32 %v486_v42, %v6377_v11 }
 0x178   :  { %v1615_v14 = vmul.f32 0.7978846, %v6713_v28  ;;  %v1936_v19 = vmul.f32 0.044715, %v1304_v0  ;;  %v1303_v63 = vmul.f32 %v6767_v10, %v6767_v10  ;;  %v6787_v6 = vadd.f32 %v917_v22, %v6380_v12  ;;  %v492_v22 = vpop.f32.mrf.mxu0 }
 0x179   :  { %v6789_v8 = vpop.eup %5540  ;;  %v3504_v49 = vadd.f32 1.0, %v5539_v1  ;;  %5550 = vtanh.f32 %v2559_v24  ;;  %v1617_v2 = vmul.f32 0.7978846, %v6721_v53  ;;  %v1305_v3 = vmul.f32 %v6778_v57, %v6778_v57 }
 0x17a   :  { %11162 = vst [vmem:[#allocation33_spill] sm:$0xff] %v6789_v8  ;;  %v5543_v30 = vpop.eup %5542  ;;  %5552 = vtanh.f32 %v2564_v18  ;;  %v2563_v20 = vmul.f32 %v2247_v48, %v1615_v14  ;;  %v6795_v23 = vmul.f32 0.5, %v6713_v28  ;;  %v2250_v42 = vadd.f32 1.0, %v1934_v29 }
 0x17b   :  { %v6798_v44 = vmul.f32 %v3502_v47, %v6670_v56  ;;  %5554 = vtanh.f32 %v2561_v54  ;;  %v2565_v0 = vmul.f32 %v2249_v7, %v1617_v2  ;;  %v1306_v24 = vmul.f32 %v6781_v38, %v6781_v38  ;;  %v923_v54 = vpop.f32.mrf.mxu1 }
 0x17c   :  { %11163 = vst [vmem:[#allocation34_spill] sm:$0xff] %v6795_v23  ;;  %v6802_v1 = vpop.eup %5544  ;;  %v1618_v8 = vmul.f32 0.7978846, %v6736_v36  ;;  %v2252_v41 = vadd.f32 1.0, %v1936_v19  ;;  %v1935_v18 = vmul.f32 0.044715, %v1303_v63  ;;  %v1308_v28 = vmul.f32 %v6787_v6, %v6787_v6 }
 0x17d   :  { %11164 = vst [vmem:[#allocation35_spill] sm:$0xff] %v6798_v44  ;;  %11165 = vst [vmem:[#allocation36_spill] sm:$0xff] %v6802_v1  ;;  %v6808_v29 = vmul.f32 %v3504_v49, %v6691_v17  ;;  %v3506_v56 = vadd.f32 1.0, %v5543_v30  ;;  %v6811_v48 = vmul.f32 0.5, %v6721_v53  ;;  %v1937_v7 = vmul.f32 0.044715, %v1305_v3  ;;  %v494_v53 = vpop.f32.mrf.mxu0 }
 0x17e   :  { %5556 = vtanh.f32 %v2563_v20  ;;  %v2566_v47 = vmul.f32 %v2250_v42, %v1618_v8  ;;  %v6814_v14 = vmul.f32 0.5, %v6736_v36  ;;  %v1620_v19 = vmul.f32 0.7978846, %v6747_v46  ;;  %v5495_v44 = vld [vmem:[#allocation8 + $0xc0] sm:$0xff]  }
 0x17f   :  { %11166 = vst [vmem:[#allocation37_spill] sm:$0xff] %v6808_v29  ;;  %11167 = vst [vmem:[#allocation38_spill] sm:$0xff] %v6811_v48  ;;  %v5547_v63 = vpop.eup %5546  ;;  %5558 = vtanh.f32 %v2565_v0  ;;  %v6818_v2 = vmul.f32 0.5, %v6747_v46  ;;  %v1938_v17 = vmul.f32 0.044715, %v1306_v24  ;;  %v6821_v49 = vadd.f32 %v492_v22, %v6377_v11  ;;  %v925_v0 = vpop.f32.mrf.mxu1  ;;  %4920 = vmatpush2.bf16.msra.mxu1 %v5495_v44 }
 0x180   :  { %v2568_v30 = vmul.f32 %v2252_v41, %v1620_v19  ;;  %v2251_v3 = vadd.f32 1.0, %v1935_v18  ;;  %v1940_v48 = vmul.f32 0.044715, %v1308_v28  ;;  %v6824_v8 = vadd.f32 %v923_v54, %v6380_v12 }
 0x181   :  { %v6827_v36 = vmul.f32 %v3506_v56, %v6729_v60  ;;  %v2253_v20 = vadd.f32 1.0, %v1937_v7  ;;  %v489_v42 = vadd.f32 %v488_v34, %v6479_v45  ;;  %v6831_v46 = vadd.f32 %v919_v21, %v6486_v51  ;;  %v496_v56 = vpop.f32.mrf.mxu0 }
 0x182   :  { %v3508_v24 = vadd.f32 1.0, %v5547_v63  ;;  %5560 = vtanh.f32 %v2566_v47  ;;  %v1619_v22 = vmul.f32 0.7978846, %v6767_v10  ;;  %v6835_v41 = vmul.f32 0.5, %v6767_v10 }
 0x183   :  { %11168 = vst [vmem:[#allocation39_spill] sm:$0xff] %v6827_v36  ;;  %v1621_v18 = vmul.f32 0.7978846, %v6778_v57  ;;  %v6839_v28 = vmul.f32 0.5, %v6778_v57  ;;  %v2254_v60 = vadd.f32 1.0, %v1938_v17  ;;  %v1310_v34 = vmul.f32 %v6821_v49, %v6821_v49  ;;  %v498_v29 = vpop.f32.mrf.mxu0 }
 0x184   :  { %11169 = vst [vmem:[#allocation40_spill] sm:$0xff] %v6835_v41  ;;  %v5549_v21 = vpop.eup %5548  ;;  %5562 = vtanh.f32 %v2568_v30  ;;  %v2567_v7 = vmul.f32 %v2251_v3, %v1619_v22  ;;  %v2256_v54 = vadd.f32 1.0, %v1940_v48  ;;  %v1312_v47 = vmul.f32 %v6824_v8, %v6824_v8 }
 0x185   :  { %11170 = vst [vmem:[#allocation41_spill] sm:$0xff] %v6839_v28  ;;  %v2569_v19 = vmul.f32 %v2253_v20, %v1621_v18  ;;  %v1622_v10 = vmul.f32 0.7978846, %v6781_v38  ;;  %v1307_v63 = vmul.f32 %v489_v42, %v489_v42  ;;  %v1309_v57 = vmul.f32 %v6831_v46, %v6831_v46  ;;  %v927_v28 = vpop.f32.mrf.mxu1 }
 0x186   :  { %v6848_v17 = vpop.eup %5550  ;;  %v6851_v41 = vmul.f32 %v3508_v24, %v6744_v40  ;;  %v6854_v30 = vmul.f32 0.5, %v6781_v38  ;;  %v1624_v48 = vmul.f32 0.7978846, %v6787_v6  ;;  %v6858_v3 = vadd.f32 %v494_v53, %v6479_v45 }
 0x187   :  { %11171 = vst [vmem:[#allocation42_spill] sm:$0xff] %v6848_v17  ;;  %v5553_v20 = vpop.eup %5552  ;;  %v3510_v22 = vadd.f32 1.0, %v5549_v21  ;;  %v2570_v18 = vmul.f32 %v2254_v60, %v1622_v10  ;;  %v1942_v36 = vmul.f32 0.044715, %v1310_v34  ;;  %v6861_v23 = vadd.f32 %v925_v0, %v6486_v51  ;;  %v929_v21 = vpop.f32.mrf.mxu1 }
 0x188   :  { %11172 = vst [vmem:[#allocation43_spill] sm:$0xff] %v6851_v41  ;;  %v6863_v17 = vpop.eup %5554  ;;  %5564 = vtanh.f32 %v2567_v7  ;;  %v2572_v40 = vmul.f32 %v2256_v54, %v1624_v48  ;;  %v1944_v24 = vmul.f32 0.044715, %v1312_v47  ;;  %v6866_v38 = vadd.f32 %v496_v56, %v6377_v11  ;;  %v5494_v41 = vld [vmem:[#allocation8 + $0x40] sm:$0xff]  }
 0x189   :  { %11173 = vst [vmem:[#allocation44_spill] sm:$0xff] %v6863_v17  ;;  %5566 = vtanh.f32 %v2569_v19  ;;  %v6869_v53 = vmul.f32 0.5, %v6787_v6  ;;  %v1939_v60 = vmul.f32 0.044715, %v1307_v63  ;;  %v1941_v34 = vmul.f32 0.044715, %v1309_v57  ;;  %4568 = vmatpush2.bf16.msra.mxu0 %v5494_v41  ;;  %v502_v19 = vpop.f32.mrf.mxu0 }
 0x18a   :  { %v3512_v0 = vadd.f32 1.0, %v5553_v20  ;;  %v1623_v10 = vmul.f32 0.7978846, %v489_v42  ;;  %v6871_v1 = vmul.f32 0.5, %v489_v42  ;;  %v1311_v7 = vmul.f32 %v6858_v3, %v6858_v3 }
 0x18b   :  { %v6875_v56 = vpop.eup %5556  ;;  %5568 = vtanh.f32 %v2570_v18  ;;  %v2258_v54 = vadd.f32 1.0, %v1942_v36  ;;  %v1313_v6 = vmul.f32 %v6861_v23, %v6861_v23  ;;  %v6880_v47 = vadd.f32 %v927_v28, %v6380_v12  ;;  %v933_v18 = vpop.f32.mrf.mxu1 }
 0x18c   :  { %11174 = vst [vmem:[#allocation45_spill] sm:$0xff] %v6871_v1  ;;  %11175 = vst [vmem:[#allocation46_spill] sm:$0xff] %v6875_v56  ;;  %v6882_v63 = vpop.eup %5558  ;;  %v6885_v42 = vmul.f32 %v3510_v22, %v6772_v13  ;;  %5570 = vtanh.f32 %v2572_v40  ;;  %v2260_v57 = vadd.f32 1.0, %v1944_v24  ;;  %v1314_v44 = vmul.f32 %v6866_v38, %v6866_v38 }
 0x18d   :  { %11176 = vst [vmem:[#allocation47_spill] sm:$0xff] %v6882_v63  ;;  %v2255_v41 = vadd.f32 1.0, %v1939_v60  ;;  %v1625_v36 = vmul.f32 0.7978846, %v6831_v46  ;;  %v2257_v48 = vadd.f32 1.0, %v1941_v34  ;;  %v6892_v28 = vmul.f32 %v3512_v0, %v6775_v58 }
 0x18e   :  { %11177 = vst [vmem:[#allocation48_spill] sm:$0xff] %v6885_v42  ;;  %v1626_v20 = vmul.f32 0.7978846, %v6821_v49  ;;  %v1628_v1 = vmul.f32 0.7978846, %v6824_v8  ;;  %v6896_v13 = vadd.f32 %v502_v19, %v6377_v11  ;;  %v6899_v40 = vmul.f32 0.5, %v6831_v46 }
 0x18f   :  { %11178 = vst [vmem:[#allocation49_spill] sm:$0xff] %v6892_v28  ;;  %v1943_v63 = vmul.f32 0.044715, %v1311_v7  ;;  %v5561_v22 = vpop.eup %5560  ;;  %v1945_v60 = vmul.f32 0.044715, %v1313_v6  ;;  %v1316_v34 = vmul.f32 %v6880_v47, %v6880_v47  ;;  %v6904_v42 = vmul.f32 0.5, %v6821_v49  ;;  %v504_v49 = vpop.f32.mrf.mxu0 }
 0x190   :  { %11179 = vst [vmem:[#allocation50_spill] sm:$0xff] %v6899_v40  ;;  %v2574_v24 = vmul.f32 %v2258_v54, %v1626_v20  ;;  %v2576_v58 = vmul.f32 %v2260_v57, %v1628_v1  ;;  %v1946_v0 = vmul.f32 0.044715, %v1314_v44  ;;  %v6907_v28 = vadd.f32 %v933_v18, %v6380_v12  ;;  %v139_v57 = vld [vmem:[#allocation2 + $0x200] sm:$0xff]  ;;  %v140_v44 = vld [vmem:[#allocation2 + $0x208] sm:$0xff] }
 0x191   :  { %v5563_v7 = vpop.eup %5562  ;;  %v2571_v19 = vmul.f32 %v2255_v41, %v1623_v10  ;;  %v2573_v17 = vmul.f32 %v2257_v48, %v1625_v36  ;;  %v6910_v56 = vmul.f32 0.5, %v6824_v8  ;;  %v6913_v46 = vadd.f32 %v498_v29, %v6479_v45  ;;  %v506_v40 = vpop.f32.mrf.mxu0 }
 0x192   :  { %v3514_v54 = vadd.f32 1.0, %v5561_v22  ;;  %v1627_v6 = vmul.f32 0.7978846, %v6858_v3  ;;  %v2259_v20 = vadd.f32 1.0, %v1943_v63  ;;  %v1318_v1 = vmul.f32 %v6896_v13, %v6896_v13 }
 0x193   :  { %5572 = vtanh.f32 %v2574_v24  ;;  %v2261_v18 = vadd.f32 1.0, %v1945_v60  ;;  %v1948_v10 = vmul.f32 0.044715, %v1316_v34  ;;  %v6919_v41 = vadd.f32 %v929_v21, %v6486_v51 }
 0x194   :  { %v3516_v8 = vadd.f32 1.0, %v5563_v7  ;;  %5574 = vtanh.f32 %v2576_v58  ;;  %v2262_v29 = vadd.f32 1.0, %v1946_v0  ;;  %v1320_v36 = vmul.f32 %v6907_v28, %v6907_v28  ;;  %v935_v7 = vpop.f32.mrf.mxu1 }
 0x195   :  { %v6923_v48 = vpop.eup %5564  ;;  %5576 = vtanh.f32 %v2571_v19  ;;  %v1629_v63 = vmul.f32 0.7978846, %v6861_v23  ;;  %v1315_v22 = vmul.f32 %v6913_v46, %v6913_v46  ;;  %v186_v24 = vpack.c.bf16 %v140_v44, %v139_v57 }
 0x196   :  { %11180 = vst [vmem:[#allocation51_spill] sm:$0xff] %v6923_v48  ;;  %v6928_v60 = vpop.eup %5566  ;;  %v2575_v34 = vmul.f32 %v2259_v20, %v1627_v6  ;;  %v6931_v21 = vmul.f32 0.5, %v6858_v3  ;;  %v1630_v58 = vmul.f32 0.7978846, %v6866_v38  ;;  %v1950_v0 = vmul.f32 0.044715, %v1318_v1 }
 0x197   :  { %11181 = vst [vmem:[#allocation52_spill] sm:$0xff] %v6928_v60  ;;  %5578 = vtanh.f32 %v2573_v17  ;;  %v2577_v48 = vmul.f32 %v2261_v18, %v1629_v63  ;;  %v2264_v19 = vadd.f32 1.0, %v1948_v10  ;;  %v1317_v62 = vmul.f32 %v6919_v41, %v6919_v41  ;;  %761 = vmatmul.mubr.bf16.gmra.mxu0 %v186_v24  ;;  %1192 = vmatmul.mubr.bf16.gmra.mxu1 %v186_v24 }
 0x198   :  { %11182 = vst [vmem:[#allocation53_spill] sm:$0xff] %v6931_v21  ;;  %v5569_v57 = vpop.eup %5568  ;;  %v6937_v44 = vmul.f32 %v3514_v54, %v6814_v14  ;;  %v6940_v3 = vmul.f32 %v3516_v8, %v6818_v2  ;;  %v2578_v6 = vmul.f32 %v2262_v29, %v1630_v58  ;;  %v1952_v20 = vmul.f32 0.044715, %v1320_v36  ;;  %770 = vmatprep.mubr.bf16.mxu0 %v11153_v5  ;;  %v937_v8 = vpop.f32.mrf.mxu1 }
 0x199   :  { %1201 = vmatprep.mubr.bf16.mxu1 %v11153_v5  ;;  %v5571_v17 = vpop.eup %5570  ;;  %v6945_v1 = vmul.f32 0.5, %v6861_v23  ;;  %v1632_v18 = vmul.f32 0.7978846, %v6880_v47  ;;  %v1947_v10 = vmul.f32 0.044715, %v1315_v22  ;;  %v6949_v63 = vadd.f32 %v504_v49, %v6479_v45  ;;  %v508_v29 = vpop.f32.mrf.mxu0 }
 0x19a   :  { %11183 = vst [vmem:[#allocation54_spill] sm:$0xff] %v6937_v44  ;;  %11184 = vst [vmem:[#allocation55_spill] sm:$0xff] %v6940_v3  ;;  %5580 = vtanh.f32 %v2575_v34  ;;  %v6952_v14 = vmul.f32 0.5, %v6866_v38  ;;  %v2266_v2 = vadd.f32 1.0, %v1950_v0  ;;  %v6955_v54 = vadd.f32 %v506_v40, %v6377_v11 }
 0x19b   :  { %11185 = vst [vmem:[#allocation56_spill] sm:$0xff] %v6945_v1  ;;  %v3518_v36 = vadd.f32 1.0, %v5569_v57  ;;  %5582 = vtanh.f32 %v2577_v48  ;;  %v2580_v23 = vmul.f32 %v2264_v19, %v1632_v18  ;;  %v1949_v24 = vmul.f32 0.044715, %v1317_v62  ;;  %v512_v57 = vpop.f32.mrf.mxu0 }
 0x19c   :  { %v3520_v58 = vadd.f32 1.0, %v5571_v17  ;;  %5584 = vtanh.f32 %v2578_v6  ;;  %v1634_v22 = vmul.f32 0.7978846, %v6896_v13  ;;  %v2268_v49 = vadd.f32 1.0, %v1952_v20 }
 0x19d   :  { %v6959_v34 = vmul.f32 0.5, %v6880_v47  ;;  %v2263_v38 = vadd.f32 1.0, %v1947_v10  ;;  %v1319_v0 = vmul.f32 %v6949_v63, %v6949_v63  ;;  %v6964_v40 = vadd.f32 %v937_v8, %v6380_v12  ;;  %v939_v8 = vpop.f32.mrf.mxu1 }
 0x19e   :  { %v2582_v1 = vmul.f32 %v2266_v2, %v1634_v22  ;;  %v1636_v48 = vmul.f32 0.7978846, %v6907_v28  ;;  %v6968_v62 = vadd.f32 %v935_v7, %v6486_v51  ;;  %v1322_v19 = vmul.f32 %v6955_v54, %v6955_v54 }
 0x19f   :  { %v6973_v47 = vmul.f32 %v3518_v36, %v6854_v30  ;;  %5586 = vtanh.f32 %v2580_v23  ;;  %v1631_v6 = vmul.f32 0.7978846, %v6913_v46  ;;  %v2265_v20 = vadd.f32 1.0, %v1949_v24 }
 0x1a0   :  { %v5573_v17 = vpop.eup %5572  ;;  %v6977_v18 = vmul.f32 %v3520_v58, %v6869_v53  ;;  %v6980_v10 = vmul.f32 0.5, %v6913_v46  ;;  %v1633_v7 = vmul.f32 0.7978846, %v6919_v41  ;;  %v2584_v2 = vmul.f32 %v2268_v49, %v1636_v48  ;;  %v141_v58 = vld [vmem:[#allocation2 + $0x210] sm:$0xff]  ;;  %v142_v49 = vld [vmem:[#allocation2 + $0x218] sm:$0xff] }
 0x1a1   :  { %11186 = vst [vmem:[#allocation57_spill] sm:$0xff] %v6973_v47  ;;  %v5575_v22 = vpop.eup %5574  ;;  %v2579_v21 = vmul.f32 %v2263_v38, %v1631_v6  ;;  %v1951_v3 = vmul.f32 0.044715, %v1319_v0  ;;  %v1324_v30 = vmul.f32 %v6964_v40, %v6964_v40  ;;  %v6986_v36 = vadd.f32 %v512_v57, %v6377_v11 }
 0x1a2   :  { %11187 = vst [vmem:[#allocation58_spill] sm:$0xff] %v6977_v18  ;;  %11188 = vst [vmem:[#allocation59_spill] sm:$0xff] %v6980_v10  ;;  %v6988_v23 = vpop.eup %5576  ;;  %5588 = vtanh.f32 %v2582_v1  ;;  %v1321_v53 = vmul.f32 %v6968_v62, %v6968_v62  ;;  %v1954_v46 = vmul.f32 0.044715, %v1322_v19  ;;  %v6993_v24 = vadd.f32 %v508_v29, %v6479_v45  ;;  %v943_v19 = vpop.f32.mrf.mxu1 }
 0x1a3   :  { %11189 = vst [vmem:[#allocation60_spill] sm:$0xff] %v6988_v23  ;;  %v3522_v38 = vadd.f32 1.0, %v5573_v17  ;;  %v2581_v0 = vmul.f32 %v2265_v20, %v1633_v7  ;;  %v6996_v48 = vmul.f32 0.5, %v6919_v41  ;;  %v6999_v57 = vmul.f32 0.5, %v6896_v13  ;;  %v514_v20 = vpop.f32.mrf.mxu0 }
 0x1a4   :  { %v7001_v6 = vpop.eup %5578  ;;  %v3524_v1 = vadd.f32 1.0, %v5575_v22  ;;  %v7004_v10 = vmul.f32 0.5, %v6907_v28  ;;  %5590 = vtanh.f32 %v2584_v2  ;;  %v7007_v29 = vadd.f32 %v939_v8, %v6486_v51 }
 0x1a5   :  { %11190 = vst [vmem:[#allocation61_spill] sm:$0xff] %v6996_v48  ;;  %11191 = vst [vmem:[#allocation62_spill] sm:$0xff] %v7001_v6  ;;  %v2267_v18 = vadd.f32 1.0, %v1951_v3  ;;  %v1956_v17 = vmul.f32 0.044715, %v1324_v30  ;;  %v1326_v41 = vmul.f32 %v6986_v36, %v6986_v36  ;;  %v187_v7 = vpack.c.bf16 %v142_v49, %v141_v58  ;;  %v945_v58 = vpop.f32.mrf.mxu1 }
 0x1a6   :  { %5592 = vtanh.f32 %v2579_v21  ;;  %v1953_v13 = vmul.f32 0.044715, %v1321_v53  ;;  %v2270_v48 = vadd.f32 1.0, %v1954_v46  ;;  %v1323_v22 = vmul.f32 %v6993_v24, %v6993_v24 }
 0x1a7   :  { %v7013_v28 = vpop.eup %5580  ;;  %v7016_v2 = vmul.f32 %v3522_v38, %v6904_v42  ;;  %5594 = vtanh.f32 %v2581_v0  ;;  %v1635_v3 = vmul.f32 0.7978846, %v6949_v63  ;;  %v7020_v8 = vmul.f32 0.5, %v6949_v63  ;;  %771 = vmatmul.mubr.bf16.gmra.mxu0 %v187_v7  ;;  %1202 = vmatmul.mubr.bf16.gmra.mxu1 %v187_v7 }
 0x1a8   :  { %11192 = vst [vmem:[#allocation63_spill] sm:$0xff] %v7013_v28  ;;  %v7022_v30 = vpop.eup %5582  ;;  %v7025_v21 = vmul.f32 %v3524_v1, %v6910_v56  ;;  %v1638_v53 = vmul.f32 0.7978846, %v6955_v54  ;;  %v1325_v46 = vmul.f32 %v7007_v29, %v7007_v29  ;;  %v7031_v42 = vadd.f32 %v943_v19, %v6380_v12  ;;  %780 = vmatprep.mubr.bf16.mxu0 %v11153_v5  ;;  %v516_v1 = vpop.f32.mrf.mxu0 }
 0x1a9   :  { %11193 = vst [vmem:[#allocation64_spill] sm:$0xff] %v7016_v2  ;;  %11194 = vst [vmem:[#allocation65_spill] sm:$0xff] %v7020_v8  ;;  %1211 = vmatprep.mubr.bf16.mxu1 %v11153_v5  ;;  %v5585_v63 = vpop.eup %5584  ;;  %v2583_v49 = vmul.f32 %v2267_v18, %v1635_v3  ;;  %v1637_v38 = vmul.f32 0.7978846, %v6968_v62  ;;  %v2272_v0 = vadd.f32 1.0, %v1956_v17  ;;  %v2269_v7 = vadd.f32 1.0, %v1953_v13 }
 0x1aa   :  { %11195 = vst [vmem:[#allocation66_spill] sm:$0xff] %v7022_v30  ;;  %11196 = vst [vmem:[#allocation67_spill] sm:$0xff] %v7025_v21  ;;  %v1958_v56 = vmul.f32 0.044715, %v1326_v41  ;;  %v7037_v8 = vmul.f32 0.5, %v6968_v62  ;;  %v2586_v21 = vmul.f32 %v2270_v48, %v1638_v53  ;;  %v7040_v19 = vmul.f32 0.5, %v6955_v54  ;;  %v947_v48 = vpop.f32.mrf.mxu1 }
 0x1ab   :  { %v1955_v2 = vmul.f32 0.044715, %v1323_v22  ;;  %v1640_v30 = vmul.f32 0.7978846, %v6964_v40  ;;  %v7044_v28 = vmul.f32 0.5, %v6964_v40  ;;  %v3526_v17 = vadd.f32 1.0, %v5585_v63 }
 0x1ac   :  { %11197 = vst [vmem:[#allocation68_spill] sm:$0xff] %v7037_v8  ;;  %v1639_v18 = vmul.f32 0.7978846, %v6993_v24  ;;  %v5587_v3 = vpop.eup %5586  ;;  %v1957_v41 = vmul.f32 0.044715, %v1325_v46  ;;  %v1328_v13 = vmul.f32 %v7031_v42, %v7031_v42  ;;  %v7050_v62 = vadd.f32 %v516_v1, %v6377_v11  ;;  %v518_v8 = vpop.f32.mrf.mxu0 }
 0x1ad   :  { %5596 = vtanh.f32 %v2583_v49  ;;  %v2588_v54 = vmul.f32 %v2272_v0, %v1640_v30  ;;  %v2274_v22 = vadd.f32 1.0, %v1958_v56  ;;  %v515_v53 = vadd.f32 %v514_v20, %v6479_v45 }
 0x1ae   :  { %v2585_v40 = vmul.f32 %v2269_v7, %v1637_v38  ;;  %5598 = vtanh.f32 %v2586_v21  ;;  %v2271_v47 = vadd.f32 1.0, %v1955_v2  ;;  %v7054_v44 = vmul.f32 0.5, %v6993_v24  ;;  %v949_v24 = vpop.f32.mrf.mxu1 }
 0x1af   :  { %v5589_v46 = vpop.eup %5588  ;;  %v3528_v63 = vadd.f32 1.0, %v5587_v3  ;;  %v1642_v6 = vmul.f32 0.7978846, %v6986_v36  ;;  %v7058_v1 = vadd.f32 %v945_v58, %v6486_v51  ;;  %v7061_v49 = vadd.f32 %v947_v48, %v6380_v12  ;;  %v522_v58 = vpop.f32.mrf.mxu0 }
 0x1b0   :  { %11198 = vst [vmem:[#allocation69_spill] sm:$0xff] %v7054_v44  ;;  %v7064_v30 = vmul.f32 %v3526_v17, %v6952_v14  ;;  %v2273_v20 = vadd.f32 1.0, %v1957_v41  ;;  %v1960_v38 = vmul.f32 0.044715, %v1328_v13  ;;  %v1330_v2 = vmul.f32 %v7050_v62, %v7050_v62 }
 0x1b1   :  { %v5591_v21 = vpop.eup %5590  ;;  %5600 = vtanh.f32 %v2588_v54  ;;  %v1641_v0 = vmul.f32 0.7978846, %v7007_v29  ;;  %v2590_v56 = vmul.f32 %v2274_v22, %v1642_v6  ;;  %v1327_v7 = vmul.f32 %v515_v53, %v515_v53 }
 0x1b2   :  { %11199 = vst [vmem:[#allocation70_spill] sm:$0xff] %v7064_v30  ;;  %v3530_v3 = vadd.f32 1.0, %v5589_v46  ;;  %5602 = vtanh.f32 %v2585_v40  ;;  %v2587_v48 = vmul.f32 %v2271_v47, %v1639_v18  ;;  %v7070_v44 = vmul.f32 0.5, %v7007_v29  ;;  %v953_v40 = vpop.f32.mrf.mxu1 }
 0x1b3   :  { %v7072_v14 = vpop.eup %5592  ;;  %v7075_v17 = vmul.f32 %v3528_v63, %v6959_v34  ;;  %v1329_v41 = vmul.f32 %v7058_v1, %v7058_v1  ;;  %v1332_v13 = vmul.f32 %v7061_v49, %v7061_v49  ;;  %v7082_v6 = vadd.f32 %v518_v8, %v6479_v45 }
 0x1b4   :  { %11200 = vst [vmem:[#allocation71_spill] sm:$0xff] %v7070_v44  ;;  %11201 = vst [vmem:[#allocation72_spill] sm:$0xff] %v7072_v14  ;;  %v7084_v54 = vpop.eup %5594  ;;  %v2589_v47 = vmul.f32 %v2273_v20, %v1641_v0  ;;  %v2276_v18 = vadd.f32 1.0, %v1960_v38  ;;  %v1962_v29 = vmul.f32 0.044715, %v1330_v2  ;;  %v7087_v22 = vadd.f32 %v522_v58, %v6377_v11  ;;  %v524_v44 = vpop.f32.mrf.mxu0  ;;  %v143_v0 = vld [vmem:[#allocation2 + $0x220] sm:$0xff] }
 0x1b5   :  { %11202 = vst [vmem:[#allocation73_spill] sm:$0xff] %v7075_v17  ;;  %11203 = vst [vmem:[#allocation74_spill] sm:$0xff] %v7084_v54  ;;  %v3532_v34 = vadd.f32 1.0, %v5591_v21  ;;  %v7090_v46 = vmul.f32 0.5, %v6986_v36  ;;  %5604 = vtanh.f32 %v2590_v56  ;;  %v1959_v63 = vmul.f32 0.044715, %v1327_v7 }
 0x1b6   :  { %v7093_v17 = vmul.f32 %v3530_v3, %v6999_v57  ;;  %5606 = vtanh.f32 %v2587_v48  ;;  %v1644_v8 = vmul.f32 0.7978846, %v7031_v42  ;;  %v7097_v20 = vmul.f32 0.5, %v7031_v42  ;;  %v144_v56 = vld [vmem:[#allocation2 + $0x228] sm:$0xff]  ;;  %v955_v3 = vpop.f32.mrf.mxu1 }
 0x1b7   :  { %v1961_v38 = vmul.f32 0.044715, %v1329_v41  ;;  %v1964_v2 = vmul.f32 0.044715, %v1332_v13  ;;  %v1331_v21 = vmul.f32 %v7082_v6, %v7082_v6  ;;  %v7102_v36 = vadd.f32 %v949_v24, %v6486_v51 }
 0x1b8   :  { %11204 = vst [vmem:[#allocation75_spill] sm:$0xff] %v7093_v17  ;;  %5608 = vtanh.f32 %v2589_v47  ;;  %v2592_v7 = vmul.f32 %v2276_v18, %v1644_v8  ;;  %v2278_v57 = vadd.f32 1.0, %v1962_v29  ;;  %v1334_v58 = vmul.f32 %v7087_v22, %v7087_v22  ;;  %v526_v17 = vpop.f32.mrf.mxu0 }
 0x1b9   :  { %v7107_v42 = vmul.f32 %v3532_v34, %v7004_v10  ;;  %v1643_v48 = vmul.f32 0.7978846, %v515_v53  ;;  %v2275_v41 = vadd.f32 1.0, %v1959_v63  ;;  %v7109_v13 = vmul.f32 0.5, %v515_v53 }
 0x1ba   :  { %v7111_v30 = vpop.eup %5596  ;;  %v1645_v24 = vmul.f32 0.7978846, %v7058_v1  ;;  %v1646_v47 = vmul.f32 0.7978846, %v7050_v62  ;;  %v7116_v18 = vadd.f32 %v953_v40, %v6380_v12  ;;  %v188_v29 = vpack.c.bf16 %v144_v56, %v143_v0 }
 0x1bb   :  { %11205 = vst [vmem:[#allocation76_spill] sm:$0xff] %v7107_v42  ;;  %11206 = vst [vmem:[#allocation77_spill] sm:$0xff] %v7109_v13  ;;  %v5599_v8 = vpop.eup %5598  ;;  %v2277_v54 = vadd.f32 1.0, %v1961_v38  ;;  %v2280_v14 = vadd.f32 1.0, %v1964_v2  ;;  %v1963_v10 = vmul.f32 0.044715, %v1331_v21  ;;  %v1333_v34 = vmul.f32 %v7102_v36, %v7102_v36  ;;  %v957_v42 = vpop.f32.mrf.mxu1 }
 0x1bc   :  { %11207 = vst [vmem:[#allocation78_spill] sm:$0xff] %v7111_v30  ;;  %5610 = vtanh.f32 %v2592_v7  ;;  %v2594_v53 = vmul.f32 %v2278_v57, %v1646_v47  ;;  %v1966_v63 = vmul.f32 0.044715, %v1334_v58  ;;  %v7121_v13 = vadd.f32 %v526_v17, %v6377_v11  ;;  %781 = vmatmul.mubr.bf16.gmra.mxu0 %v188_v29  ;;  %1212 = vmatmul.mubr.bf16.gmra.mxu1 %v188_v29  ;;  %v528_v7 = vpop.f32.mrf.mxu0 }
 0x1bd   :  { %v2591_v30 = vmul.f32 %v2275_v41, %v1643_v48  ;;  %v7124_v40 = vmul.f32 0.5, %v7058_v1  ;;  %v7127_v38 = vmul.f32 0.5, %v7050_v62  ;;  %v1648_v2 = vmul.f32 0.7978846, %v7061_v49  ;;  %790 = vmatprep.mubr.bf16.mxu0 %v11153_v5  ;;  %1221 = vmatprep.mubr.bf16.mxu1 %v11153_v5 }
 0x1be   :  { %v5601_v21 = vpop.eup %5600  ;;  %v3534_v0 = vadd.f32 1.0, %v5599_v8  ;;  %v7133_v17 = vmul.f32 0.5, %v7061_v49  ;;  %v1336_v56 = vmul.f32 %v7116_v18, %v7116_v18  ;;  %v7138_v1 = vadd.f32 %v524_v44, %v6479_v45  ;;  %v959_v8 = vpop.f32.mrf.mxu1 }
 0x1bf   :  { %11208 = vst [vmem:[#allocation79_spill] sm:$0xff] %v7124_v40  ;;  %v7140_v62 = vpop.eup %5602  ;;  %v2593_v57 = vmul.f32 %v2277_v54, %v1645_v24  ;;  %v2596_v58 = vmul.f32 %v2280_v14, %v1648_v2  ;;  %v2279_v48 = vadd.f32 1.0, %v1963_v10  ;;  %v1965_v41 = vmul.f32 0.044715, %v1333_v34 }
 0x1c0   :  { %11209 = vst [vmem:[#allocation80_spill] sm:$0xff] %v7140_v62  ;;  %5612 = vtanh.f32 %v2594_v53  ;;  %v2282_v47 = vadd.f32 1.0, %v1966_v63  ;;  %v1338_v29 = vmul.f32 %v7121_v13, %v7121_v13  ;;  %v7145_v49 = vadd.f32 %v957_v42, %v6380_v12  ;;  %v532_v42 = vpop.f32.mrf.mxu0 }
 0x1c1   :  { %v3536_v40 = vadd.f32 1.0, %v5601_v21  ;;  %5614 = vtanh.f32 %v2591_v30  ;;  %v1647_v44 = vmul.f32 0.7978846, %v7082_v6  ;;  %v7149_v60 = vadd.f32 %v955_v3, %v6486_v51 }
 0x1c2   :  { %v5605_v54 = vpop.eup %5604  ;;  %v7152_v14 = vmul.f32 0.5, %v7082_v6  ;;  %v1650_v24 = vmul.f32 0.7978846, %v7087_v22  ;;  %v1968_v10 = vmul.f32 0.044715, %v1336_v56  ;;  %v1335_v34 = vmul.f32 %v7138_v1, %v7138_v1 }
 0x1c3   :  { %v7157_v53 = vpop.eup %5606  ;;  %v7160_v30 = vmul.f32 %v3534_v0, %v7040_v19  ;;  %5616 = vtanh.f32 %v2593_v57  ;;  %v2595_v63 = vmul.f32 %v2279_v48, %v1647_v44  ;;  %v2281_v3 = vadd.f32 1.0, %v1965_v41  ;;  %v534_v41 = vpop.f32.mrf.mxu0 }
 0x1c4   :  { %11210 = vst [vmem:[#allocation81_spill] sm:$0xff] %v7152_v14  ;;  %11211 = vst [vmem:[#allocation82_spill] sm:$0xff] %v7157_v53  ;;  %5618 = vtanh.f32 %v2596_v58  ;;  %v2598_v2 = vmul.f32 %v2282_v47, %v1650_v24  ;;  %v1970_v21 = vmul.f32 0.044715, %v1338_v29  ;;  %v1340_v6 = vmul.f32 %v7145_v49, %v7145_v49  ;;  %v963_v14 = vpop.f32.mrf.mxu1 }
 0x1c5   :  { %11212 = vst [vmem:[#allocation83_spill] sm:$0xff] %v7160_v30  ;;  %v7164_v56 = vpop.eup %5608  ;;  %v7167_v62 = vmul.f32 %v3536_v40, %v7044_v28  ;;  %v3538_v23 = vadd.f32 1.0, %v5605_v54  ;;  %v1649_v53 = vmul.f32 0.7978846, %v7102_v36  ;;  %v1337_v19 = vmul.f32 %v7149_v60, %v7149_v60 }
 0x1c6   :  { %11213 = vst [vmem:[#allocation84_spill] sm:$0xff] %v7164_v56  ;;  %v7173_v0 = vmul.f32 0.5, %v7102_v36  ;;  %v2284_v57 = vadd.f32 1.0, %v1968_v10  ;;  %v1967_v58 = vmul.f32 0.044715, %v1335_v34  ;;  %v7176_v48 = vadd.f32 %v528_v7, %v6479_v45  ;;  %v965_v54 = vpop.f32.mrf.mxu1 }
 0x1c7   :  { %11214 = vst [vmem:[#allocation85_spill] sm:$0xff] %v7167_v62  ;;  %5620 = vtanh.f32 %v2595_v63  ;;  %v2597_v47 = vmul.f32 %v2281_v3, %v1649_v53  ;;  %v7179_v28 = vmul.f32 0.5, %v7087_v22  ;;  %v7182_v40 = vadd.f32 %v532_v42, %v6377_v11  ;;  %v145_v53 = vld [vmem:[#allocation2 + $0x230] sm:$0xff]  ;;  %v146_v42 = vld [vmem:[#allocation2 + $0x238] sm:$0xff] }
 0x1c8   :  { %11215 = vst [vmem:[#allocation86_spill] sm:$0xff] %v7173_v0  ;;  %5622 = vtanh.f32 %v2598_v2  ;;  %v1652_v29 = vmul.f32 0.7978846, %v7116_v18  ;;  %v2286_v44 = vadd.f32 1.0, %v1970_v21  ;;  %v1972_v36 = vmul.f32 0.044715, %v1340_v6  ;;  %v536_v6 = vpop.f32.mrf.mxu0 }
 0x1c9   :  { %v5611_v24 = vpop.eup %5610  ;;  %v7186_v10 = vmul.f32 %v3538_v23, %v7090_v46  ;;  %v7189_v7 = vmul.f32 0.5, %v7116_v18  ;;  %v1969_v34 = vmul.f32 0.044715, %v1337_v19  ;;  %v7192_v22 = vadd.f32 %v963_v14, %v6380_v12 }
 0x1ca   :  { %v2600_v63 = vmul.f32 %v2284_v57, %v1652_v29  ;;  %v2283_v3 = vadd.f32 1.0, %v1967_v58  ;;  %v1654_v2 = vmul.f32 0.7978846, %v7121_v13  ;;  %v1339_v21 = vmul.f32 %v7176_v48, %v7176_v48  ;;  %v967_v57 = vpop.f32.mrf.mxu1 }
 0x1cb   :  { %11216 = vst [vmem:[#allocation87_spill] sm:$0xff] %v7186_v10  ;;  %5624 = vtanh.f32 %v2597_v47  ;;  %v1651_v23 = vmul.f32 0.7978846, %v7138_v1  ;;  %v7199_v46 = vadd.f32 %v959_v8, %v6486_v51  ;;  %v1342_v18 = vmul.f32 %v7182_v40, %v7182_v40 }
 0x1cc   :  { %v3540_v14 = vadd.f32 1.0, %v5611_v24  ;;  %v2602_v19 = vmul.f32 %v2286_v44, %v1654_v2  ;;  %v2288_v10 = vadd.f32 1.0, %v1972_v36  ;;  %v189_v58 = vpack.c.bf16 %v146_v42, %v145_v53  ;;  %v538_v36 = vpop.f32.mrf.mxu0 }
 0x1cd   :  { %v5613_v29 = vpop.eup %5612  ;;  %v7204_v0 = vmul.f32 0.5, %v7138_v1  ;;  %v1653_v62 = vmul.f32 0.7978846, %v7149_v60  ;;  %v2285_v47 = vadd.f32 1.0, %v1969_v34  ;;  %v1344_v30 = vmul.f32 %v7192_v22, %v7192_v22 }
 0x1ce   :  { %v7209_v8 = vpop.eup %5614  ;;  %5626 = vtanh.f32 %v2600_v63  ;;  %v2599_v56 = vmul.f32 %v2283_v3, %v1651_v23  ;;  %v1656_v24 = vmul.f32 0.7978846, %v7145_v49  ;;  %v1971_v44 = vmul.f32 0.044715, %v1339_v21  ;;  %791 = vmatmul.mubr.bf16.gmra.mxu0 %v189_v58  ;;  %1222 = vmatmul.mubr.bf16.gmra.mxu1 %v189_v58  ;;  %v969_v21 = vpop.f32.mrf.mxu1 }
 0x1cf   :  { %11217 = vst [vmem:[#allocation88_spill] sm:$0xff] %v7204_v0  ;;  %11218 = vst [vmem:[#allocation89_spill] sm:$0xff] %v7209_v8  ;;  %v7213_v53 = vmul.f32 0.5, %v7149_v60  ;;  %v1341_v1 = vmul.f32 %v7199_v46, %v7199_v46  ;;  %v1974_v34 = vmul.f32 0.044715, %v1342_v18  ;;  %v7218_v42 = vadd.f32 %v534_v41, %v6479_v45  ;;  %800 = vmatprep.mubr.bf16.mxu0 %v11153_v5 }
 0x1d0   :  { %1231 = vmatprep.mubr.bf16.mxu1 %v11153_v5  ;;  %v7222_v63 = vpop.eup %5616  ;;  %v7225_v3 = vmul.f32 %v3540_v14, %v7097_v20  ;;  %v3542_v2 = vadd.f32 1.0, %v5613_v29  ;;  %5628 = vtanh.f32 %v2602_v19  ;;  %v2604_v60 = vmul.f32 %v2288_v10, %v1656_v24  ;;  %v542_v14 = vpop.f32.mrf.mxu0 }
 0x1d1   :  { %11219 = vst [vmem:[#allocation90_spill] sm:$0xff] %v7213_v53  ;;  %11220 = vst [vmem:[#allocation91_spill] sm:$0xff] %v7222_v63  ;;  %v5619_v23 = vpop.eup %5618  ;;  %v2601_v58 = vmul.f32 %v2285_v47, %v1653_v62  ;;  %v7228_v18 = vmul.f32 0.5, %v7121_v13  ;;  %v1976_v41 = vmul.f32 0.044715, %v1344_v30  ;;  %v7231_v53 = vadd.f32 %v965_v54, %v6486_v51 }
 0x1d2   :  { %11221 = vst [vmem:[#allocation92_spill] sm:$0xff] %v7225_v3  ;;  %5630 = vtanh.f32 %v2599_v56  ;;  %v7234_v0 = vmul.f32 0.5, %v7145_v49  ;;  %v2287_v63 = vadd.f32 1.0, %v1971_v44  ;;  %v7237_v20 = vadd.f32 %v536_v6, %v6377_v11  ;;  %v973_v6 = vpop.f32.mrf.mxu1 }
 0x1d3   :  { %v1973_v10 = vmul.f32 0.044715, %v1341_v1  ;;  %v2290_v19 = vadd.f32 1.0, %v1974_v34  ;;  %v1343_v62 = vmul.f32 %v7218_v42, %v7218_v42  ;;  %v7242_v13 = vadd.f32 %v967_v57, %v6380_v12 }
 0x1d4   :  { %v7244_v30 = vpop.eup %5620  ;;  %v7247_v56 = vmul.f32 %v3542_v2, %v7127_v38  ;;  %v3544_v49 = vadd.f32 1.0, %v5619_v23  ;;  %5632 = vtanh.f32 %v2604_v60  ;;  %v1655_v54 = vmul.f32 0.7978846, %v7176_v48  ;;  %v544_v2 = vpop.f32.mrf.mxu0 }
 0x1d5   :  { %11222 = vst [vmem:[#allocation93_spill] sm:$0xff] %v7244_v30  ;;  %v5623_v29 = vpop.eup %5622  ;;  %5634 = vtanh.f32 %v2601_v58  ;;  %v1658_v47 = vmul.f32 0.7978846, %v7182_v40  ;;  %v2292_v24 = vadd.f32 1.0, %v1976_v41  ;;  %v1345_v44 = vmul.f32 %v7231_v53, %v7231_v53 }
 0x1d6   :  { %11223 = vst [vmem:[#allocation94_spill] sm:$0xff] %v7247_v56  ;;  %v2603_v57 = vmul.f32 %v2287_v63, %v1655_v54  ;;  %v7254_v1 = vmul.f32 0.5, %v7176_v48  ;;  %v1660_v38 = vmul.f32 0.7978846, %v7192_v22  ;;  %v1346_v34 = vmul.f32 %v7237_v20, %v7237_v20 }
 0x1d7   :  { %v2289_v60 = vadd.f32 1.0, %v1973_v10  ;;  %v2606_v23 = vmul.f32 %v2290_v19, %v1658_v47  ;;  %v1975_v3 = vmul.f32 0.044715, %v1343_v62  ;;  %v1348_v58 = vmul.f32 %v7242_v13, %v7242_v13 }
 0x1d8   :  { %11224 = vst [vmem:[#allocation95_spill] sm:$0xff] %v7254_v1  ;;  %v7261_v41 = vpop.eup %5624  ;;  %v7264_v56 = vmul.f32 %v3544_v49, %v7133_v17  ;;  %v3546_v63 = vadd.f32 1.0, %v5623_v29  ;;  %v1657_v48 = vmul.f32 0.7978846, %v7199_v46  ;;  %v7268_v54 = vmul.f32 0.5, %v7199_v46  ;;  %v7270_v1 = vpop.f32.mrf.mxu1 }
 0x1d9   :  { %11225 = vst [vmem:[#allocation96_spill] sm:$0xff] %v7261_v41  ;;  %v7273_v10 = vmul.f32 0.5, %v7182_v40  ;;  %v2608_v19 = vmul.f32 %v2292_v24, %v1660_v38  ;;  %v1977_v62 = vmul.f32 0.044715, %v1345_v44  ;;  %v7276_v47 = vadd.f32 %v542_v14, %v6377_v11  ;;  %v546_v46 = vpop.f32.mrf.mxu0 }
 0x1da   :  { %11226 = vst [vmem:[#allocation97_spill] sm:$0xff] %v7264_v56  ;;  %11227 = vst [vmem:[#allocation98_spill] sm:$0xff] %v7268_v54  ;;  %5636 = vtanh.f32 %v2603_v57  ;;  %v7279_v17 = vmul.f32 0.5, %v7192_v22  ;;  %v1978_v49 = vmul.f32 0.044715, %v1346_v34  ;;  %v7282_v29 = vadd.f32 %v538_v36, %v6479_v45  ;;  %v147_v54 = vld [vmem:[#allocation2 + $0x240] sm:$0xff]  ;;  %v977_v36 = vpop.f32.mrf.mxu1 }
 0x1db   :  { %v148_v56 = vld [vmem:[#allocation2 + $0x248] sm:$0xff]  ;;  %v5627_v41 = vpop.eup %5626  ;;  %v2605_v30 = vmul.f32 %v2289_v60, %v1657_v48  ;;  %5638 = vtanh.f32 %v2606_v23  ;;  %v2291_v40 = vadd.f32 1.0, %v1975_v3  ;;  %v1980_v24 = vmul.f32 0.044715, %v1348_v58 }
 0x1dc   :  { %v7285_v44 = vmul.f32 %v3546_v63, %v7179_v28  ;;  %v1659_v14 = vmul.f32 0.7978846, %v7218_v42  ;;  %v7289_v22 = vmul.f32 0.5, %v7218_v42  ;;  %v7292_v57 = vadd.f32 %v969_v21, %v6486_v51  ;;  %v7301_v42 = vpop.f32.mrf.mxu0 }
 0x1dd   :  { %v5629_v38 = vpop.eup %5628  ;;  %5640 = vtanh.f32 %v2608_v19  ;;  %v2293_v34 = vadd.f32 1.0, %v1977_v62  ;;  %v1350_v60 = vmul.f32 %v7276_v47, %v7276_v47  ;;  %v190_v3 = vpack.c.bf16 %v148_v56, %v147_v54 }
 0x1de   :  { %11228 = vst [vmem:[#allocation99_spill] sm:$0xff] %v7285_v44  ;;  %11229 = vst [vmem:[#allocation100_spill] sm:$0xff] %v7289_v22  ;;  %v3548_v23 = vadd.f32 1.0, %v5627_v41  ;;  %v2294_v58 = vadd.f32 1.0, %v1978_v49  ;;  %v1347_v28 = vmul.f32 %v7282_v29, %v7282_v29  ;;  %v7299_v63 = vadd.f32 %v973_v6, %v6380_v12  ;;  %v7312_v49 = vpop.f32.mrf.mxu1 }
 0x1df   :  { %v7303_v21 = vpop.eup %5630  ;;  %5642 = vtanh.f32 %v2605_v30  ;;  %v2607_v48 = vmul.f32 %v2291_v40, %v1659_v14  ;;  %v1661_v19 = vmul.f32 0.7978846, %v7231_v53  ;;  %v2296_v62 = vadd.f32 1.0, %v1980_v24  ;;  %801 = vmatmul.mubr.bf16.gmra.mxu0 %v190_v3  ;;  %1232 = vmatmul.mubr.bf16.gmra.mxu1 %v190_v3 }
 0x1e0   :  { %11230 = vst [vmem:[#allocation101_spill] sm:$0xff] %v7303_v21  ;;  %v3550_v56 = vadd.f32 1.0, %v5629_v38  ;;  %v7307_v41 = vmul.f32 0.5, %v7231_v53  ;;  %v1662_v54 = vmul.f32 0.7978846, %v7237_v20  ;;  %v1349_v6 = vmul.f32 %v7292_v57, %v7292_v57  ;;  %810 = vmatprep.mubr.bf16.mxu0 %v11153_v5  ;;  %1241 = vmatprep.mubr.bf16.mxu1 %v11153_v5  ;;  %v552_v21 = vpop.f32.mrf.mxu0 }
 0x1e1   :  { %v5633_v30 = vpop.eup %5632  ;;  %v2609_v40 = vmul.f32 %v2293_v34, %v1661_v19  ;;  %v1664_v24 = vmul.f32 0.7978846, %v7242_v13  ;;  %v1982_v14 = vmul.f32 0.044715, %v1350_v60  ;;  %v7318_v38 = vadd.f32 %v544_v2, %v6479_v45 }
 0x1e2   :  { %11231 = vst [vmem:[#allocation102_spill] sm:$0xff] %v7307_v41  ;;  %v7320_v53 = vpop.eup %5634  ;;  %v7323_v3 = vmul.f32 %v3548_v23, %v7189_v7  ;;  %v2610_v41 = vmul.f32 %v2294_v58, %v1662_v54  ;;  %v1979_v22 = vmul.f32 0.044715, %v1347_v28  ;;  %v1352_v44 = vmul.f32 %v7299_v63, %v7299_v63  ;;  %v983_v58 = vpop.f32.mrf.mxu1 }
 0x1e3   :  { %11232 = vst [vmem:[#allocation103_spill] sm:$0xff] %v7320_v53  ;;  %5644 = vtanh.f32 %v2607_v48  ;;  %v7328_v34 = vmul.f32 0.5, %v7237_v20  ;;  %v2612_v19 = vmul.f32 %v2296_v62, %v1664_v24  ;;  %v7331_v60 = vmul.f32 0.5, %v7242_v13 }
 0x1e4   :  { %11233 = vst [vmem:[#allocation104_spill] sm:$0xff] %v7323_v3  ;;  %v7334_v2 = vmul.f32 %v3550_v56, %v7228_v18  ;;  %v3552_v53 = vadd.f32 1.0, %v5633_v30  ;;  %v1981_v7 = vmul.f32 0.044715, %v1349_v6  ;;  %v7337_v23 = vadd.f32 %v546_v46, %v6377_v11  ;;  %v7348_v56 = vpop.f32.mrf.mxu0 }
 0x1e5   :  { %5646 = vtanh.f32 %v2609_v40  ;;  %v2298_v28 = vadd.f32 1.0, %v1982_v14  ;;  %v1351_v48 = vmul.f32 %v7318_v38, %v7318_v38  ;;  %v7342_v20 = vadd.f32 %v977_v36, %v6380_v12  ;;  %v7363_v40 = vpop.f32.mrf.mxu1 }
 0x1e6   :  { %11234 = vst [vmem:[#allocation105_spill] sm:$0xff] %v7334_v2  ;;  %5648 = vtanh.f32 %v2610_v41  ;;  %v2295_v13 = vadd.f32 1.0, %v1979_v22  ;;  %v1984_v62 = vmul.f32 0.044715, %v1352_v44  ;;  %v7346_v18 = vadd.f32 %v7270_v1, %v6486_v51 }
 0x1e7   :  { %v7350_v46 = vpop.eup %5636  ;;  %5650 = vtanh.f32 %v2612_v19  ;;  %v1663_v54 = vmul.f32 0.7978846, %v7282_v29  ;;  %v7354_v6 = vmul.f32 0.5, %v7282_v29  ;;  %v1666_v36 = vmul.f32 0.7978846, %v7276_v47 }
 0x1e8   :  { %11235 = vst [vmem:[#allocation106_spill] sm:$0xff] %v7350_v46  ;;  %v5639_v30 = vpop.eup %5638  ;;  %v7358_v22 = vmul.f32 %v3552_v53, %v7234_v0  ;;  %v1665_v44 = vmul.f32 0.7978846, %v7292_v57  ;;  %v2297_v1 = vadd.f32 1.0, %v1981_v7  ;;  %v1354_v41 = vmul.f32 %v7337_v23, %v7337_v23 }
 0x1e9   :  { %11236 = vst [vmem:[#allocation107_spill] sm:$0xff] %v7354_v6  ;;  %v7366_v24 = vmul.f32 0.5, %v7292_v57  ;;  %v2614_v14 = vmul.f32 %v2298_v28, %v1666_v36  ;;  %v1983_v29 = vmul.f32 0.044715, %v1351_v48  ;;  %v1356_v19 = vmul.f32 %v7342_v20, %v7342_v20  ;;  %v7391_v36 = vpop.f32.mrf.mxu1 }
 0x1ea   :  { %11237 = vst [vmem:[#allocation108_spill] sm:$0xff] %v7358_v22  ;;  %v5641_v6 = vpop.eup %5640  ;;  %v2611_v3 = vmul.f32 %v2295_v13, %v1663_v54  ;;  %v2300_v0 = vadd.f32 1.0, %v1984_v62  ;;  %v1353_v53 = vmul.f32 %v7346_v18, %v7346_v18  ;;  %v7373_v7 = vadd.f32 %v552_v21, %v6377_v11  ;;  %v556_v22 = vpop.f32.mrf.mxu0 }
 0x1eb   :  { %11238 = vst [vmem:[#allocation109_spill] sm:$0xff] %v7366_v24  ;;  %v3554_v2 = vadd.f32 1.0, %v5639_v30  ;;  %v7376_v46 = vmul.f32 0.5, %v7276_v47  ;;  %v1668_v57 = vmul.f32 0.7978846, %v7299_v63  ;;  %v7381_v28 = vadd.f32 %v7301_v42, %v6479_v45 }
 0x1ec   :  { %v7383_v48 = vpop.eup %5642  ;;  %v2613_v13 = vmul.f32 %v2297_v1, %v1665_v44  ;;  %v7386_v62 = vmul.f32 0.5, %v7299_v63  ;;  %v1986_v54 = vmul.f32 0.044715, %v1354_v41  ;;  %v7389_v21 = vadd.f32 %v983_v58, %v6380_v12  ;;  %v7395_v44 = vpop.f32.mrf.mxu0  ;;  %v149_v63 = vld [vmem:[#allocation2 + $0x250] sm:$0xff]  ;;  %v150_v1 = vld [vmem:[#allocation2 + $0x258] sm:$0xff] }
 0x1ed   :  { %11239 = vst [vmem:[#allocation110_spill] sm:$0xff] %v7383_v48  ;;  %v3556_v47 = vadd.f32 1.0, %v5641_v6  ;;  %5652 = vtanh.f32 %v2614_v14  ;;  %v2299_v30 = vadd.f32 1.0, %v1983_v29  ;;  %v1988_v24 = vmul.f32 0.044715, %v1356_v19 }
 0x1ee   :  { %5654 = vtanh.f32 %v2611_v3  ;;  %v2616_v8 = vmul.f32 %v2300_v0, %v1668_v57  ;;  %v1985_v42 = vmul.f32 0.044715, %v1353_v53  ;;  %v1358_v48 = vmul.f32 %v7373_v7, %v7373_v7 }
 0x1ef   :  { %v7398_v41 = vmul.f32 %v3554_v2, %v7273_v10  ;;  %v1667_v58 = vmul.f32 0.7978846, %v7318_v38  ;;  %v1355_v6 = vmul.f32 %v7381_v28, %v7381_v28  ;;  %v7405_v3 = vadd.f32 %v7312_v49, %v6486_v51  ;;  %v7414_v2 = vpop.f32.mrf.mxu1 }
 0x1f0   :  { %v7407_v14 = vpop.eup %5644  ;;  %5656 = vtanh.f32 %v2613_v13  ;;  %v7410_v29 = vmul.f32 0.5, %v7318_v38  ;;  %v2302_v19 = vadd.f32 1.0, %v1986_v54  ;;  %v1360_v10 = vmul.f32 %v7389_v21, %v7389_v21 }
 0x1f1   :  { %11240 = vst [vmem:[#allocation111_spill] sm:$0xff] %v7398_v41  ;;  %11241 = vst [vmem:[#allocation112_spill] sm:$0xff] %v7407_v14  ;;  %v7417_v0 = vmul.f32 %v3556_v47, %v7279_v17  ;;  %v2615_v53 = vmul.f32 %v2299_v30, %v1667_v58  ;;  %v2304_v57 = vadd.f32 1.0, %v1988_v24  ;;  %v191_v41 = vpack.c.bf16 %v150_v1, %v149_v63 }
 0x1f2   :  { %11242 = vst [vmem:[#allocation113_spill] sm:$0xff] %v7410_v29  ;;  %v7419_v49 = vpop.eup %5646  ;;  %5658 = vtanh.f32 %v2616_v8  ;;  %v2301_v14 = vadd.f32 1.0, %v1985_v42  ;;  %v1670_v13 = vmul.f32 0.7978846, %v7337_v23  ;;  %v1990_v38 = vmul.f32 0.044715, %v1358_v48  ;;  %v7422_v29 = vpop.f32.mrf.mxu0 }
 0x1f3   :  { %11243 = vst [vmem:[#allocation114_spill] sm:$0xff] %v7417_v0  ;;  %11244 = vst [vmem:[#allocation115_spill] sm:$0xff] %v7419_v49  ;;  %v5649_v54 = vpop.eup %5648  ;;  %v1669_v16 = vmul.f32 0.7978846, %v7346_v18  ;;  %v1672_v55 = vmul.f32 0.7978846, %v7342_v20  ;;  %v1357_v17 = vmul.f32 %v7405_v3, %v7405_v3  ;;  %811 = vmatmul.mubr.bf16.gmra.mxu0 %v191_v41  ;;  %1242 = vmatmul.mubr.bf16.gmra.mxu1 %v191_v41  ;;  %v993_v42 = vpop.f32.mrf.mxu1  ;;  %5660 = vtanh.f32 %v2615_v53 }
 0x1f4   :  { %v1987_v59 = vmul.f32 0.044715, %v1355_v6  ;;  %v5651_v24 = vpop.eup %5650  ;;  %v7429_v8 = vmul.f32 0.5, %v7346_v18  ;;  %v2618_v47 = vmul.f32 %v2302_v19, %v1670_v13  ;;  %v1992_v30 = vmul.f32 0.044715, %v1360_v10  ;;  %820 = vmatprep.mubr.bf16.mxu0 %v11153_v5  ;;  %1251 = vmatprep.mubr.bf16.mxu1 %v11153_v5  ;;  %v7446_v19 = vpop.f32.mrf.mxu0 }
 0x1f5   :  { %v7432_v48 = vadd.f32 %v556_v22, %v6377_v11  ;;  %v7437_v63 = vmul.f32 0.5, %v7337_v23  ;;  %v2620_v1 = vmul.f32 %v2304_v57, %v1672_v55  ;;  %v7441_v41 = vadd.f32 %v7348_v56, %v6479_v45 }
 0x1f6   :  { %11245 = vst [vmem:[#allocation116_spill] sm:$0xff] %v7429_v8  ;;  %v3558_v18 = vadd.f32 1.0, %v5649_v54  ;;  %v2617_v58 = vmul.f32 %v2301_v14, %v1669_v16  ;;  %v7444_v6 = vmul.f32 0.5, %v7342_v20  ;;  %v2306_v22 = vadd.f32 1.0, %v1990_v38  ;;  %v7455_v14 = vpop.f32.mrf.mxu1 }
 0x1f7   :  { %v3560_v10 = vadd.f32 1.0, %v5651_v24  ;;  %v2303_v13 = vadd.f32 1.0, %v1987_v59  ;;  %v1989_v8 = vmul.f32 0.044715, %v1357_v17  ;;  %v7450_v23 = vadd.f32 %v7363_v40, %v6486_v51  ;;  %v7471_v24 = vpop.f32.mrf.mxu0 }
 0x1f8   :  { %5662 = vtanh.f32 %v2618_v47  ;;  %v1674_v55 = vmul.f32 0.7978846, %v7373_v7  ;;  %v2308_v56 = vadd.f32 1.0, %v1992_v30  ;;  %v1362_v16 = vmul.f32 %v7432_v48, %v7432_v48 }
 0x1f9   :  { %5664 = vtanh.f32 %v2620_v1  ;;  %v1671_v20 = vmul.f32 0.7978846, %v7381_v28  ;;  %v1359_v59 = vmul.f32 %v7441_v41, %v7441_v41  ;;  %v7462_v53 = vadd.f32 %v7391_v36, %v6380_v12 }
 0x1fa   :  { %v5653_v40 = vpop.eup %5652  ;;  %v7465_v57 = vmul.f32 %v3558_v18, %v7328_v34  ;;  %v7468_v38 = vmul.f32 0.5, %v7381_v28  ;;  %v2622_v54 = vmul.f32 %v2306_v22, %v1674_v55  ;;  %v1676_v17 = vmul.f32 0.7978846, %v7389_v21  ;;  %v7484_v22 = vpop.f32.mrf.mxu1 }
 0x1fb   :  { %v7473_v47 = vpop.eup %5654  ;;  %5666 = vtanh.f32 %v2617_v58  ;;  %v2619_v30 = vmul.f32 %v2303_v13, %v1671_v20  ;;  %v2305_v1 = vadd.f32 1.0, %v1989_v8  ;;  %v1361_v36 = vmul.f32 %v7450_v23, %v7450_v23 }
 0x1fc   :  { %11246 = vst [vmem:[#allocation117_spill] sm:$0xff] %v7465_v57  ;;  %11247 = vst [vmem:[#allocation118_spill] sm:$0xff] %v7468_v38  ;;  %v7478_v0 = vmul.f32 %v3560_v10, %v7331_v60  ;;  %v2624_v34 = vmul.f32 %v2308_v56, %v1676_v17  ;;  %v1994_v18 = vmul.f32 0.044715, %v1362_v16  ;;  %v7482_v28 = vadd.f32 %v7395_v44, %v6479_v45  ;;  %v7501_v56 = vpop.f32.mrf.mxu0  ;;  %v151_v17 = vld [vmem:[#allocation2 + $0x260] sm:$0xff] }
 0x1fd   :  { %11248 = vst [vmem:[#allocation119_spill] sm:$0xff] %v7473_v47  ;;  %v7486_v55 = vpop.eup %5656  ;;  %v3562_v38 = vadd.f32 1.0, %v5653_v40  ;;  %v1673_v58 = vmul.f32 0.7978846, %v7405_v3  ;;  %v1991_v8 = vmul.f32 0.044715, %v1359_v59  ;;  %v1364_v13 = vmul.f32 %v7462_v53, %v7462_v53 }
 0x1fe   :  { %11249 = vst [vmem:[#allocation120_spill] sm:$0xff] %v7478_v0  ;;  %11250 = vst [vmem:[#allocation121_spill] sm:$0xff] %v7486_v55  ;;  %v7492_v60 = vmul.f32 0.5, %v7405_v3  ;;  %v7495_v10 = vmul.f32 0.5, %v7373_v7  ;;  %5668 = vtanh.f32 %v2622_v54  ;;  %v7499_v44 = vadd.f32 %v7414_v2, %v6486_v51  ;;  %v7512_v2 = vpop.f32.mrf.mxu1  ;;  %v7526_v57 = vpop.f32.mrf.mxu0 }
 0x1ff   :  { %v5659_v16 = vpop.eup %5658  ;;  %5670 = vtanh.f32 %v2619_v30  ;;  %v2621_v20 = vmul.f32 %v2305_v1, %v1673_v58  ;;  %v1993_v59 = vmul.f32 0.044715, %v1361_v36  ;;  %v7505_v40 = vadd.f32 %v7422_v29, %v6377_v11 }
 0x200   :  { %11251 = vst [vmem:[#allocation122_spill] sm:$0xff] %v7492_v60  ;;  %5672 = vtanh.f32 %v2624_v34  ;;  %v2310_v3 = vadd.f32 1.0, %v1994_v18  ;;  %v1363_v7 = vmul.f32 %v7482_v28, %v7482_v28  ;;  %v7510_v54 = vadd.f32 %v993_v42, %v6380_v12  ;;  %v152_v60 = vld [vmem:[#allocation2 + $0x268] sm:$0xff]  ;;  %v7520_v34 = vpop.eup %5660 }
 0x201   :  { %v7515_v30 = vmul.f32 %v3562_v38, %v7376_v46  ;;  %v7518_v1 = vmul.f32 0.5, %v7389_v21  ;;  %v2307_v29 = vadd.f32 1.0, %v1991_v8  ;;  %v1996_v36 = vmul.f32 0.044715, %v1364_v13  ;;  %11253 = vst [vmem:[#allocation124_spill] sm:$0xff] %v7520_v34  ;;  %v7535_v34 = vpop.f32.mrf.mxu1 }
 0x202   :  { %v3564_v18 = vadd.f32 1.0, %v5659_v16  ;;  %v1675_v58 = vmul.f32 0.7978846, %v7441_v41  ;;  %v1678_v42 = vmul.f32 0.7978846, %v7432_v48  ;;  %v1365_v0 = vmul.f32 %v7499_v44, %v7499_v44 }
 0x203   :  { %11252 = vst [vmem:[#allocation123_spill] sm:$0xff] %v7515_v30  ;;  %v7529_v46 = vmul.f32 0.5, %v7441_v41  ;;  %v2309_v38 = vadd.f32 1.0, %v1993_v59  ;;  %v1366_v21 = vmul.f32 %v7505_v40, %v7505_v40  ;;  %v192_v8 = vpack.c.bf16 %v152_v60, %v151_v17  ;;  %v7549_v17 = vpop.f32.mrf.mxu0 }
 0x204   :  { %5674 = vtanh.f32 %v2621_v20  ;;  %v2626_v13 = vmul.f32 %v2310_v3, %v1678_v42  ;;  %v1995_v16 = vmul.f32 0.044715, %v1363_v7  ;;  %v1368_v30 = vmul.f32 %v7510_v54, %v7510_v54 }
 0x205   :  { %11254 = vst [vmem:[#allocation125_spill] sm:$0xff] %v7529_v46  ;;  %v5663_v55 = vpop.eup %5662  ;;  %v2623_v49 = vmul.f32 %v2307_v29, %v1675_v58  ;;  %v1677_v47 = vmul.f32 0.7978846, %v7450_v23  ;;  %v7539_v41 = vmul.f32 0.5, %v7450_v23  ;;  %v2312_v59 = vadd.f32 1.0, %v1996_v36  ;;  %821 = vmatmul.mubr.bf16.gmra.mxu0 %v192_v8  ;;  %1252 = vmatmul.mubr.bf16.gmra.mxu1 %v192_v8  ;;  %v7560_v58 = vpop.f32.mrf.mxu1 }
 0x206   :  { %v5665_v46 = vpop.eup %5664  ;;  %v7542_v60 = vmul.f32 %v3564_v18, %v7386_v62  ;;  %v7545_v20 = vmul.f32 0.5, %v7432_v48  ;;  %v1997_v3 = vmul.f32 0.044715, %v1365_v0  ;;  %v565_v7 = vadd.f32 %v7446_v19, %v6479_v45  ;;  %830 = vmatprep.mubr.bf16.mxu0 %v11153_v5  ;;  %1261 = vmatprep.mubr.bf16.mxu1 %v11153_v5 }
 0x207   :  { %11255 = vst [vmem:[#allocation126_spill] sm:$0xff] %v7539_v41  ;;  %v2625_v23 = vmul.f32 %v2309_v38, %v1677_v47  ;;  %v1680_v29 = vmul.f32 0.7978846, %v7462_v53  ;;  %v1998_v36 = vmul.f32 0.044715, %v1366_v21  ;;  %v7556_v62 = vadd.f32 %v7455_v14, %v6486_v51 }
 0x208   :  { %11256 = vst [vmem:[#allocation127_spill] sm:$0xff] %v7542_v60  ;;  %v7558_v48 = vpop.eup %5666  ;;  %v3566_v0 = vadd.f32 1.0, %v5663_v55  ;;  %5676 = vtanh.f32 %v2626_v13  ;;  %v2311_v18 = vadd.f32 1.0, %v1995_v16  ;;  %v2000_v19 = vmul.f32 0.044715, %v1368_v30  ;;  %v7570_v55 = vpop.f32.mrf.mxu0 }
 0x209   :  { %11257 = vst [vmem:[#allocation128_spill] sm:$0xff] %v7558_v48  ;;  %v3568_v42 = vadd.f32 1.0, %v5665_v46  ;;  %5678 = vtanh.f32 %v2623_v49  ;;  %v2628_v8 = vmul.f32 %v2312_v59, %v1680_v29  ;;  %v7564_v5 = vadd.f32 %v7471_v24, %v6377_v11  ;;  %v7583_v29 = vpop.f32.mrf.mxu1  ;;  %v11356_v48 = vld [vmem:[#allocation45_spill] sm:$0xff] }
 0x20a   :  { %v7567_v47 = vmul.f32 0.5, %v7462_v53  ;;  %v1679_v14 = vmul.f32 0.7978846, %v7482_v28  ;;  %v2313_v38 = vadd.f32 1.0, %v1997_v3  ;;  %v1367_v21 = vmul.f32 %v565_v7, %v565_v7 }
 0x20b   :  { %v5669_v13 = vpop.eup %5668  ;;  %5680 = vtanh.f32 %v2625_v23  ;;  %v7573_v30 = vmul.f32 0.5, %v7482_v28  ;;  %v2314_v49 = vadd.f32 1.0, %v1998_v36  ;;  %v1369_v46 = vmul.f32 %v7556_v62, %v7556_v62 }
 0x20c   :  { %v7577_v24 = vpop.eup %5670  ;;  %v7580_v53 = vmul.f32 %v3566_v0, %v7437_v63  ;;  %v2627_v16 = vmul.f32 %v2311_v18, %v1679_v14  ;;  %v1681_v59 = vmul.f32 0.7978846, %v7499_v44  ;;  %v2316_v3 = vadd.f32 1.0, %v2000_v19  ;;  %v7592_v18 = vpop.f32.mrf.mxu0 }
 0x20d   :  { %11258 = vst [vmem:[#allocation129_spill] sm:$0xff] %v7573_v30  ;;  %11259 = vst [vmem:[#allocation130_spill] sm:$0xff] %v7577_v24  ;;  %v5673_v41 = vpop.eup %5672  ;;  %v7586_v23 = vmul.f32 %v3568_v42, %v7444_v6  ;;  %5682 = vtanh.f32 %v2628_v8  ;;  %v1682_v28 = vmul.f32 0.7978846, %v7505_v40  ;;  %v1370_v36 = vmul.f32 %v7564_v5, %v7564_v5 }
 0x20e   :  { %11260 = vst [vmem:[#allocation131_spill] sm:$0xff] %v7580_v53  ;;  %v3570_v30 = vadd.f32 1.0, %v5669_v13  ;;  %v2629_v60 = vmul.f32 %v2313_v38, %v1681_v59  ;;  %v1684_v63 = vmul.f32 0.7978846, %v7510_v54  ;;  %v1999_v0 = vmul.f32 0.044715, %v1367_v21  ;;  %v7604_v13 = vpop.f32.mrf.mxu1 }
 0x20f   :  { %11261 = vst [vmem:[#allocation132_spill] sm:$0xff] %v7586_v23  ;;  %v7595_v19 = vmul.f32 0.5, %v7499_v44  ;;  %v2630_v14 = vmul.f32 %v2314_v49, %v1682_v28  ;;  %v2001_v53 = vmul.f32 0.044715, %v1369_v46  ;;  %v7599_v6 = vadd.f32 %v7484_v22, %v6380_v12 }
 0x210   :  { %v3572_v42 = vadd.f32 1.0, %v5673_v41  ;;  %5684 = vtanh.f32 %v2627_v16  ;;  %v7602_v8 = vmul.f32 0.5, %v7505_v40  ;;  %v2632_v38 = vmul.f32 %v2316_v3, %v1684_v63  ;;  %v7620_v16 = vpop.f32.mrf.mxu0  ;;  %v153_v3 = vld [vmem:[#allocation2 + $0x270] sm:$0xff] }
 0x211   :  { %11262 = vst [vmem:[#allocation133_spill] sm:$0xff] %v7595_v19  ;;  %v7606_v21 = vpop.eup %5674  ;;  %v7609_v59 = vmul.f32 0.5, %v7510_v54  ;;  %v1683_v44 = vmul.f32 0.7978846, %v565_v7  ;;  %v2002_v49 = vmul.f32 0.044715, %v1370_v36  ;;  %v7613_v46 = vadd.f32 %v7501_v56, %v6479_v45 }
 0x212   :  { %11263 = vst [vmem:[#allocation134_spill] sm:$0xff] %v7606_v21  ;;  %v7616_v22 = vmul.f32 %v3570_v30, %v7495_v10  ;;  %5686 = vtanh.f32 %v2629_v60  ;;  %v2315_v40 = vadd.f32 1.0, %v1999_v0  ;;  %v7618_v41 = vmul.f32 0.5, %v565_v7  ;;  %v7635_v7 = vpop.f32.mrf.mxu1 }
 0x213   :  { %5688 = vtanh.f32 %v2630_v14  ;;  %v2317_v28 = vadd.f32 1.0, %v2001_v53  ;;  %v1372_v54 = vmul.f32 %v7599_v6, %v7599_v6  ;;  %v7626_v36 = vadd.f32 %v7512_v2, %v6486_v51 }
 0x214   :  { %11264 = vst [vmem:[#allocation135_spill] sm:$0xff] %v7616_v22  ;;  %11265 = vst [vmem:[#allocation136_spill] sm:$0xff] %v7618_v41  ;;  %v7629_v56 = vmul.f32 %v3572_v42, %v7518_v1  ;;  %5690 = vtanh.f32 %v2632_v38  ;;  %v1685_v10 = vmul.f32 0.7978846, %v7556_v62  ;;  %v7633_v60 = vmul.f32 0.5, %v7556_v62  ;;  %v7650_v38 = vpop.f32.mrf.mxu0 }
 0x215   :  { %v5677_v30 = vpop.eup %5676  ;;  %v2318_v53 = vadd.f32 1.0, %v2002_v49  ;;  %v1371_v63 = vmul.f32 %v7613_v46, %v7613_v46  ;;  %v7641_v2 = vadd.f32 %v7526_v57, %v6377_v11  ;;  %v193_v0 = vpack.c.bf16 %v153_v3, %v153_v3 }
 0x216   :  { %11266 = vst [vmem:[#allocation137_spill] sm:$0xff] %v7629_v56  ;;  %11267 = vst [vmem:[#allocation138_spill] sm:$0xff] %v7633_v60  ;;  %v7643_v1 = vpop.eup %5678  ;;  %v2631_v14 = vmul.f32 %v2315_v40, %v1683_v44  ;;  %v1686_v42 = vmul.f32 0.7978846, %v7564_v5  ;;  %v7648_v62 = vadd.f32 %v7535_v34, %v6380_v12  ;;  %v3483_v49 = vadd.f32 1.0, %v6609_v9  ;;  %v7665_v9 = vpop.f32.mrf.mxu1 }
 0x217   :  { %11268 = vst [vmem:[#allocation139_spill] sm:$0xff] %v7643_v1  ;;  %v2633_v60 = vmul.f32 %v2317_v28, %v1685_v10  ;;  %v7654_v41 = vmul.f32 0.5, %v7564_v5  ;;  %v2004_v57 = vmul.f32 0.044715, %v1372_v54  ;;  %v1373_v3 = vmul.f32 %v7626_v36, %v7626_v36  ;;  %831 = vmatmul.mubr.bf16.gmra.mxu0 %v193_v0  ;;  %1262 = vmatmul.mubr.bf16.gmra.mxu1 %v193_v0  ;;  %v7673_v19 = vpop.f32.mrf.mxu0 }
 0x218   :  { %v7658_v44 = vpop.eup %5680  ;;  %v3574_v40 = vadd.f32 1.0, %v5677_v30  ;;  %v1688_v34 = vmul.f32 0.7978846, %v7599_v6  ;;  %v7663_v56 = vadd.f32 %v7549_v17, %v6479_v45  ;;  %v3487_v5 = vadd.f32 1.0, %v6639_v43 }
 0x219   :  { %11269 = vst [vmem:[#allocation140_spill] sm:$0xff] %v7658_v44  ;;  %v2634_v28 = vmul.f32 %v2318_v53, %v1686_v42  ;;  %v2003_v54 = vmul.f32 0.044715, %v1371_v63  ;;  %v1374_v10 = vmul.f32 %v7641_v2, %v7641_v2  ;;  %v3485_v0 = vadd.f32 1.0, %v6621_v4  ;;  %v7684_v42 = vpop.f32.mrf.mxu1 }
 0x21a   :  { %v5683_v22 = vpop.eup %5682  ;;  %v1376_v30 = vmul.f32 %v7648_v62, %v7648_v62  ;;  %v3799_v17 = vmul.f32 %v3483_v49, %v6542_v50  ;;  %v3803_v44 = vmul.f32 %v3487_v5, %v6560_v25  ;;  %v3489_v1 = vadd.f32 1.0, %v6657_v35 }
 0x21b   :  { %5692 = vtanh.f32 %v2631_v14  ;;  %v2320_v43 = vadd.f32 1.0, %v2004_v57  ;;  %v2005_v53 = vmul.f32 0.044715, %v1373_v3  ;;  %v7680_v63 = vadd.f32 %v7560_v58, %v6486_v51  ;;  %v7693_v3 = vpop.f32.mrf.mxu0 }
 0x21c   :  { %v1375_v4 = vmul.f32 %v7663_v56, %v7663_v56  ;;  %v4115_v23 = vpack.c.bf16 %v3803_v44, %v3799_v17  ;;  %v3801_v21 = vmul.f32 %v3485_v0, %v6552_v52  ;;  %v3805_v50 = vmul.f32 %v3489_v1, %v6571_v61 }
 0x21d   :  { %v7688_v25 = vpop.eup %5684  ;;  %v3576_v35 = vadd.f32 1.0, %v5683_v22  ;;  %5694 = vtanh.f32 %v2634_v28  ;;  %v2319_v14 = vadd.f32 1.0, %v2003_v54  ;;  %v2006_v49 = vmul.f32 0.044715, %v1374_v10  ;;  %v7710_v54 = vpop.f32.mrf.mxu1 }
 0x21e   :  { %11270 = vst [vmem:[#allocation141_spill] sm:$0xff] %v7688_v25  ;;  %5696 = vtanh.f32 %v2633_v60  ;;  %v7691_v58 = vmul.f32 0.5, %v7599_v6  ;;  %v2008_v57 = vmul.f32 0.044715, %v1376_v30  ;;  %4569 = vmatprep.mubr.bf16.mxu0 %v4115_v23  ;;  %v4117_v5 = vpack.c.bf16 %v3805_v50, %v3801_v21 }
 0x21f   :  { %v7695_v44 = vpop.eup %5686  ;;  %v2636_v52 = vmul.f32 %v2320_v43, %v1688_v34  ;;  %v1687_v61 = vmul.f32 0.7978846, %v7613_v46  ;;  %v2321_v1 = vadd.f32 1.0, %v2005_v53  ;;  %v1377_v22 = vmul.f32 %v7680_v63, %v7680_v63 }
 0x220   :  { %11271 = vst [vmem:[#allocation142_spill] sm:$0xff] %v7695_v44  ;;  %v11272_v60 = vpack.c.bf16 %v6450_v27, %v6448_v26  ;;  %v5689_v6 = vpop.eup %5688  ;;  %v7704_v28 = vmul.f32 %v3574_v40, %v7545_v20  ;;  %v7707_v23 = vmul.f32 0.5, %v7613_v46  ;;  %v1689_v21 = vmul.f32 0.7978846, %v7626_v36  ;;  %4921 = vmatprep.mubr.bf16.mxu1 %v4117_v5  ;;  %v11355_v44 = vld [vmem:[#allocation40_spill] sm:$0xff] }
 0x221   :  { %v2007_v34 = vmul.f32 0.044715, %v1375_v4  ;;  %v5691_v10 = vpop.eup %5690  ;;  %v7713_v0 = vmul.f32 %v3576_v35, %v7567_v47  ;;  %v2635_v30 = vmul.f32 %v2319_v14, %v1687_v61  ;;  %v7716_v26 = vmul.f32 0.5, %v7626_v36  ;;  %v7727_v47 = vpop.f32.mrf.mxu0 }
 0x222   :  { %4570 = vmatmul.mubr.bf16.vlgmr.msra.gmra.mxu0 %v11272_v60  ;;  %11273 = vst [vmem:[#allocation143_spill] sm:$0xff] %v7704_v28  ;;  %11274 = vst [vmem:[#allocation144_spill] sm:$0xff] %v7707_v23  ;;  %v2322_v27 = vadd.f32 1.0, %v2006_v49  ;;  %v11277_v20 = vpack.c.bf16 %v6458_v15, %v6456_v32  ;;  %v1690_v46 = vmul.f32 0.7978846, %v7641_v2  ;;  %v7723_v40 = vmul.f32 0.5, %v7641_v2  ;;  %v7738_v35 = vpop.f32.mrf.mxu1 }
 0x223   :  { %11275 = vst [vmem:[#allocation145_spill] sm:$0xff] %v7713_v0  ;;  %11276 = vst [vmem:[#allocation146_spill] sm:$0xff] %v7716_v26  ;;  %v2324_v17 = vadd.f32 1.0, %v2008_v57  ;;  %v577_v43 = vadd.f32 %v7570_v55, %v6377_v11  ;;  %5698 = vtanh.f32 %v2636_v52  ;;  %v2637_v53 = vmul.f32 %v2321_v1, %v1689_v21  ;;  %v7747_v61 = vpop.f32.mrf.mxu0  ;;  %v11287_v26 = vld [vmem:[#allocation18_spill] sm:$0xff] }
 0x224   :  { %4922 = vmatmul.mubr.bf16.vlgmr.msra.gmra.mxu1 %v11277_v20  ;;  %v2009_v36 = vmul.f32 0.044715, %v1377_v22  ;;  %v7731_v4 = vadd.f32 %v7583_v29, %v6380_v12  ;;  %v3578_v32 = vadd.f32 1.0, %v5689_v6  ;;  %v1692_v15 = vmul.f32 0.7978846, %v7648_v62 }
 0x225   :  { %v2323_v50 = vadd.f32 1.0, %v2007_v34  ;;  %v7736_v2 = vadd.f32 %v7592_v18, %v6479_v45  ;;  %v3580_v55 = vadd.f32 1.0, %v5691_v10  ;;  %5700 = vtanh.f32 %v2635_v30  ;;  %v7763_v34 = vpop.f32.mrf.mxu1 }
 0x226   :  { %v2638_v14 = vmul.f32 %v2322_v27, %v1690_v46  ;;  %v7741_v49 = vmul.f32 0.5, %v7648_v62  ;;  %v2640_v57 = vmul.f32 %v2324_v17, %v1692_v15  ;;  %v1691_v29 = vmul.f32 0.7978846, %v7663_v56  ;;  %v7777_v17 = vpop.f32.mrf.mxu0 }
 0x227   :  { %v7745_v5 = vmul.f32 0.5, %v7663_v56  ;;  %v1378_v52 = vmul.f32 %v577_v43, %v577_v43  ;;  %5702 = vtanh.f32 %v2637_v53  ;;  %v2325_v18 = vadd.f32 1.0, %v2009_v36 }
 0x228   :  { %v1380_v1 = vmul.f32 %v7731_v4, %v7731_v4  ;;  %v7753_v22 = vadd.f32 %v7620_v16, %v6377_v11  ;;  %v7755_v62 = vpop.eup %5692  ;;  %v7758_v60 = vmul.f32 %v3578_v32, %v7602_v8  ;;  %v2639_v6 = vmul.f32 %v2323_v50, %v1691_v29  ;;  %v7788_v50 = vpop.f32.mrf.mxu1 }
 0x229   :  { %11278 = vst [vmem:[#allocation147_spill] sm:$0xff] %v7745_v5  ;;  %11279 = vst [vmem:[#allocation148_spill] sm:$0xff] %v7755_v62  ;;  %v1693_v56 = vmul.f32 0.7978846, %v7680_v63  ;;  %v1379_v21 = vmul.f32 %v7736_v2, %v7736_v2  ;;  %v7766_v10 = vmul.f32 %v3580_v55, %v7609_v59  ;;  %5704 = vtanh.f32 %v2638_v14 }
 0x22a   :  { %11280 = vst [vmem:[#allocation149_spill] sm:$0xff] %v7758_v60  ;;  %v7769_v16 = vmul.f32 0.5, %v7680_v63  ;;  %v7773_v30 = vadd.f32 %v7604_v13, %v6486_v51  ;;  %v5695_v8 = vpop.eup %5694  ;;  %5706 = vtanh.f32 %v2640_v57  ;;  %v1694_v27 = vmul.f32 0.7978846, %v577_v43 }
 0x22b   :  { %11281 = vst [vmem:[#allocation150_spill] sm:$0xff] %v7766_v10  ;;  %v2010_v20 = vmul.f32 0.044715, %v1378_v52  ;;  %v7775_v46 = vmul.f32 0.5, %v577_v43  ;;  %v7779_v53 = vpop.eup %5696  ;;  %v2641_v59 = vmul.f32 %v2325_v18, %v1693_v56  ;;  %v1696_v36 = vmul.f32 0.7978846, %v7731_v4 }
 0x22c   :  { %11282 = vst [vmem:[#allocation151_spill] sm:$0xff] %v7769_v16  ;;  %11283 = vst [vmem:[#allocation152_spill] sm:$0xff] %v7779_v53  ;;  %v2012_v32 = vmul.f32 0.044715, %v1380_v1  ;;  %v1382_v63 = vmul.f32 %v7753_v22, %v7753_v22  ;;  %5708 = vtanh.f32 %v2639_v6  ;;  %v2011_v13 = vmul.f32 0.044715, %v1379_v21 }
 0x22d   :  { %v7786_v15 = vadd.f32 %v7635_v7, %v6380_v12  ;;  %v3491_v43 = vadd.f32 1.0, %v6665_v33  ;;  %v3582_v55 = vadd.f32 1.0, %v5695_v8  ;;  %v1381_v14 = vmul.f32 %v7773_v30, %v7773_v30  ;;  %v7802_v7 = vpop.f32.mrf.mxu0  ;;  %v11284_v21 = vld [vmem:[#allocation15_spill] sm:$0xff]  ;;  %v11285_v16 = vld [vmem:[#allocation17_spill] sm:$0xff] }
 0x22e   :  { %v7795_v57 = vadd.f32 %v7650_v38, %v6479_v45  ;;  %v3495_v29 = vadd.f32 1.0, %v6698_v31  ;;  %v2326_v52 = vadd.f32 1.0, %v2010_v20  ;;  %v7800_v18 = vadd.f32 %v7673_v19, %v6377_v11  ;;  %v7810_v20 = vpop.f32.mrf.mxu1  ;;  %v11286_v19 = vld [vmem:[#allocation16_spill] sm:$0xff] }
 0x22f   :  { %v3493_v1 = vadd.f32 1.0, %v6674_v39  ;;  %v3497_v33 = vadd.f32 1.0, %v6731_v37  ;;  %v2328_v6 = vadd.f32 1.0, %v2012_v32  ;;  %v2014_v56 = vmul.f32 0.044715, %v1382_v63 }
 0x230   :  { %v3807_v8 = vmul.f32 %v3491_v43, %v11284_v21  ;;  %v3811_v38 = vmul.f32 %v3495_v29, %v11285_v16  ;;  %v5699_v5 = vpop.eup %5698  ;;  %v2327_v10 = vadd.f32 1.0, %v2011_v13  ;;  %v1384_v31 = vmul.f32 %v7786_v15, %v7786_v15 }
 0x231   :  { %v3809_v60 = vmul.f32 %v3493_v1, %v11286_v19  ;;  %v3813_v23 = vmul.f32 %v3497_v33, %v11287_v26  ;;  %v2013_v39 = vmul.f32 0.044715, %v1381_v14  ;;  %v1383_v37 = vmul.f32 %v7795_v57, %v7795_v57  ;;  %v7825_v1 = vpop.f32.mrf.mxu0 }
 0x232   :  { %v7818_v32 = vadd.f32 %v7665_v9, %v6486_v51  ;;  %v4119_v16 = vpack.c.bf16 %v3811_v38, %v3807_v8  ;;  %v7820_v63 = vpop.eup %5700  ;;  %v2642_v13 = vmul.f32 %v2326_v52, %v1694_v27  ;;  %v1695_v43 = vmul.f32 0.7978846, %v7736_v2  ;;  %v7835_v38 = vpop.f32.mrf.mxu1 }
 0x233   :  { %11288 = vst [vmem:[#allocation15_spill] sm:$0xff] %v7820_v63  ;;  %v1386_v29 = vmul.f32 %v7800_v18, %v7800_v18  ;;  %v4121_v26 = vpack.c.bf16 %v3813_v23, %v3809_v60  ;;  %v3584_v14 = vadd.f32 1.0, %v5699_v5  ;;  %v2644_v33 = vmul.f32 %v2328_v6, %v1696_v36 }
 0x234   :  { %v7828_v21 = vmul.f32 0.5, %v7731_v4  ;;  %v2330_v19 = vadd.f32 1.0, %v2014_v56  ;;  %4577 = vmatprep.mubr.bf16.mxu0 %v4119_v16  ;;  %v7830_v9 = vpop.eup %5702  ;;  %5710 = vtanh.f32 %v2641_v59  ;;  %v2643_v8 = vmul.f32 %v2327_v10, %v1695_v43  ;;  %v7844_v59 = vpop.f32.mrf.mxu0 }
 0x235   :  { %11289 = vst [vmem:[#allocation17_spill] sm:$0xff] %v7830_v9  ;;  %v7833_v27 = vmul.f32 0.5, %v7736_v2  ;;  %v2016_v52 = vmul.f32 0.044715, %v1384_v31  ;;  %4929 = vmatprep.mubr.bf16.mxu1 %v4121_v26  ;;  %v2329_v53 = vadd.f32 1.0, %v2013_v39  ;;  %v1385_v4 = vmul.f32 %v7818_v32, %v7818_v32  ;;  %v7857_v16 = vpop.f32.mrf.mxu1  ;;  %v11312_v9 = vld [vmem:[#allocation25_spill] sm:$0xff] }
 0x236   :  { %v1698_v23 = vmul.f32 0.7978846, %v7753_v22  ;;  %v2015_v5 = vmul.f32 0.044715, %v1383_v37  ;;  %v5705_v60 = vpop.eup %5704  ;;  %v7841_v36 = vmul.f32 %v3582_v55, %v7654_v41  ;;  %5712 = vtanh.f32 %v2642_v13 }
 0x237   :  { %11290 = vst [vmem:[#allocation16_spill] sm:$0xff] %v7833_v27  ;;  %v1697_v10 = vmul.f32 0.7978846, %v7773_v30  ;;  %v2018_v2 = vmul.f32 0.044715, %v1386_v29  ;;  %v5707_v6 = vpop.eup %5706  ;;  %v7847_v56 = vmul.f32 %v3584_v14, %v7691_v58  ;;  %5714 = vtanh.f32 %v2644_v33 }
 0x238   :  { %11291 = vst [vmem:[#allocation18_spill] sm:$0xff] %v7841_v36  ;;  %v7850_v31 = vmul.f32 0.5, %v7773_v30  ;;  %v2646_v39 = vmul.f32 %v2330_v19, %v1698_v23  ;;  %5716 = vtanh.f32 %v2643_v8  ;;  %v7853_v37 = vmul.f32 0.5, %v7753_v22  ;;  %v7869_v19 = vpop.f32.mrf.mxu0 }
 0x239   :  { %11292 = vst [vmem:[#allocation153_spill] sm:$0xff] %v7847_v56  ;;  %v2332_v41 = vadd.f32 1.0, %v2016_v52  ;;  %v1018_v55 = vadd.f32 %v7684_v42, %v6380_v12  ;;  %v7859_v13 = vpop.eup %5708  ;;  %v3586_v43 = vadd.f32 1.0, %v5705_v60  ;;  %v2645_v58 = vmul.f32 %v2329_v53, %v1697_v10  ;;  %v11306_v56 = vld [vmem:[#allocation32_spill] sm:$0xff] }
 0x23a   :  { %11293 = vst [vmem:[#allocation154_spill] sm:$0xff] %v7850_v31  ;;  %11294 = vst [vmem:[#allocation155_spill] sm:$0xff] %v7859_v13  ;;  %v2331_v29 = vadd.f32 1.0, %v2015_v5  ;;  %v2017_v26 = vmul.f32 0.044715, %v1385_v4  ;;  %v7863_v14 = vmul.f32 0.5, %v7786_v15  ;;  %v7867_v22 = vadd.f32 %v7693_v3, %v6479_v45  ;;  %v7881_v3 = vpop.f32.mrf.mxu1 }
 0x23b   :  { %v1700_v30 = vmul.f32 0.7978846, %v7786_v15  ;;  %v2334_v33 = vadd.f32 1.0, %v2018_v2  ;;  %v3588_v42 = vadd.f32 1.0, %v5707_v6  ;;  %5718 = vtanh.f32 %v2646_v39  ;;  %v7895_v39 = vpop.f32.mrf.mxu0 }
 0x23c   :  { %v1699_v8 = vmul.f32 0.7978846, %v7795_v57  ;;  %v7874_v53 = vadd.f32 %v7727_v47, %v6377_v11  ;;  %v1702_v23 = vmul.f32 0.7978846, %v7800_v18  ;;  %v1388_v15 = vmul.f32 %v1018_v55, %v1018_v55 }
 0x23d   :  { %v2648_v52 = vmul.f32 %v2332_v41, %v1700_v30  ;;  %v7879_v5 = vadd.f32 %v7738_v35, %v6380_v12  ;;  %v7884_v4 = vmul.f32 %v3586_v43, %v7723_v40  ;;  %v2333_v10 = vadd.f32 1.0, %v2017_v26  ;;  %v7911_v26 = vpop.f32.mrf.mxu1 }
 0x23e   :  { %v2647_v60 = vmul.f32 %v2331_v29, %v1699_v8  ;;  %v7888_v2 = vadd.f32 %v7710_v54, %v6486_v51  ;;  %5720 = vtanh.f32 %v2645_v58  ;;  %v7891_v47 = vmul.f32 0.5, %v7795_v57  ;;  %v7917_v8 = vpop.f32.mrf.mxu0 }
 0x23f   :  { %11295 = vst [vmem:[#allocation156_spill] sm:$0xff] %v7884_v4  ;;  %v2650_v6 = vmul.f32 %v2334_v33, %v1702_v23  ;;  %v1387_v35 = vmul.f32 %v7867_v22, %v7867_v22  ;;  %v7898_v41 = vmul.f32 %v3588_v42, %v7741_v49  ;;  %v1701_v40 = vmul.f32 0.7978846, %v7818_v32 }
 0x240   :  { %11296 = vst [vmem:[#allocation157_spill] sm:$0xff] %v7891_v47  ;;  %v7902_v43 = vmul.f32 0.5, %v7818_v32  ;;  %v1390_v54 = vmul.f32 %v7874_v53, %v7874_v53  ;;  %5722 = vtanh.f32 %v2648_v52  ;;  %v7907_v57 = vmul.f32 0.5, %v7800_v18  ;;  %v11300_v18 = vld [vmem:[#allocation19_spill] sm:$0xff]  ;;  %v7945_v63 = vpop.f32.mrf.mxu0 }
 0x241   :  { %11297 = vst [vmem:[#allocation158_spill] sm:$0xff] %v7898_v41  ;;  %v2020_v58 = vmul.f32 0.044715, %v1388_v15  ;;  %v1392_v29 = vmul.f32 %v7879_v5, %v7879_v5  ;;  %v7913_v49 = vpop.eup %5710  ;;  %5724 = vtanh.f32 %v2647_v60  ;;  %v2649_v30 = vmul.f32 %v2333_v10, %v1701_v40  ;;  %v11301_v52 = vld [vmem:[#allocation23_spill] sm:$0xff]  ;;  %v11302_v15 = vld [vmem:[#allocation21_spill] sm:$0xff]  ;;  %v11304_v60 = vld [vmem:[#allocation28_spill] sm:$0xff] }
 0x242   :  { %11298 = vst [vmem:[#allocation159_spill] sm:$0xff] %v7902_v43  ;;  %11299 = vst [vmem:[#allocation160_spill] sm:$0xff] %v7913_v49  ;;  %v1704_v33 = vmul.f32 0.7978846, %v1018_v55  ;;  %v1389_v32 = vmul.f32 %v7888_v2, %v7888_v2  ;;  %5726 = vtanh.f32 %v2650_v6  ;;  %v2019_v42 = vmul.f32 0.044715, %v1387_v35  ;;  %v7927_v35 = vpop.f32.mrf.mxu1 }
 0x243   :  { %v4118_v23 = vpack.c.bf16 %v11301_v52, %v11300_v18  ;;  %v11303_v43 = vld [vmem:[#allocation26_spill] sm:$0xff]  ;;  %v5713_v41 = vpop.eup %5712  ;;  %v7923_v4 = vmul.f32 0.5, %v1018_v55  ;;  %v2022_v31 = vmul.f32 0.044715, %v1390_v54  ;;  %v3499_v10 = vadd.f32 1.0, %v11304_v60  ;;  %v11305_v40 = vld [vmem:[#allocation33_spill] sm:$0xff] }
 0x244   :  { %v4120_v47 = vpack.c.bf16 %v11303_v43, %v11302_v15  ;;  %v3503_v27 = vadd.f32 1.0, %v11305_v40  ;;  %v5715_v49 = vpop.eup %5714  ;;  %v2336_v13 = vadd.f32 1.0, %v2020_v58  ;;  %v2024_v6 = vmul.f32 0.044715, %v1392_v29  ;;  %v11307_v52 = vld [vmem:[#allocation36_spill] sm:$0xff] }
 0x245   :  { %4578 = vmatmul.mubr.bf16.gmra.mxu0 %v4118_v23  ;;  %v3501_v18 = vadd.f32 1.0, %v11306_v56  ;;  %v3505_v36 = vadd.f32 1.0, %v11307_v52  ;;  %v7931_v43 = vpop.eup %5716  ;;  %v2021_v55 = vmul.f32 0.044715, %v1389_v32  ;;  %v7935_v54 = vadd.f32 %v7777_v17, %v6377_v11  ;;  %v11309_v15 = vld [vmem:[#allocation20_spill] sm:$0xff] }
 0x246   :  { %4930 = vmatmul.mubr.bf16.gmra.mxu1 %v4120_v47  ;;  %11308 = vst [vmem:[#allocation19_spill] sm:$0xff] %v7931_v43  ;;  %v3815_v60 = vmul.f32 %v3499_v10, %v11309_v15  ;;  %v11310_v40 = vld [vmem:[#allocation24_spill] sm:$0xff]  ;;  %v2335_v29 = vadd.f32 1.0, %v2019_v42  ;;  %v7941_v23 = vadd.f32 %v7788_v50, %v6380_v12  ;;  %v11311_v47 = vld [vmem:[#allocation22_spill] sm:$0xff]  ;;  %v3590_v32 = vadd.f32 1.0, %v5713_v41  ;;  %v7950_v50 = vpop.f32.mrf.mxu1 }
 0x247   :  { %v3819_v58 = vmul.f32 %v3503_v27, %v11310_v40  ;;  %v3817_v56 = vmul.f32 %v3501_v18, %v11311_v47  ;;  %v3821_v52 = vmul.f32 %v3505_v36, %v11312_v9  ;;  %v2338_v43 = vadd.f32 1.0, %v2022_v31 }
 0x248   :  { %v595_v17 = vadd.f32 %v7747_v61, %v6479_v45  ;;  %v5719_v10 = vpop.eup %5718  ;;  %v2652_v15 = vmul.f32 %v2336_v13, %v1704_v33  ;;  %v1703_v27 = vmul.f32 0.7978846, %v7867_v22  ;;  %v2340_v42 = vadd.f32 1.0, %v2024_v6  ;;  %v7960_v33 = vpop.f32.mrf.mxu0 }
 0x249   :  { %v4123_v62 = vpack.c.bf16 %v3819_v58, %v3815_v60  ;;  %v4125_v40 = vpack.c.bf16 %v3821_v52, %v3817_v56  ;;  %v3592_v0 = vadd.f32 1.0, %v5715_v49  ;;  %v2337_v18 = vadd.f32 1.0, %v2021_v55 }
 0x24a   :  { %v1706_v9 = vmul.f32 0.7978846, %v7874_v53  ;;  %v1394_v36 = vmul.f32 %v7935_v54, %v7935_v54  ;;  %v2651_v31 = vmul.f32 %v2335_v29, %v1703_v27  ;;  %v1708_v61 = vmul.f32 0.7978846, %v7879_v5 }
 0x24b   :  { %4585 = vmatprep.mubr.bf16.mxu0 %v4123_v62  ;;  %v1026_v13 = vadd.f32 %v7763_v34, %v6486_v51  ;;  %v1396_v41 = vmul.f32 %v7941_v23, %v7941_v23  ;;  %4937 = vmatprep.mubr.bf16.mxu1 %v4125_v40  ;;  %v7962_v49 = vpop.eup %5720  ;;  %5728 = vtanh.f32 %v2649_v30  ;;  %v1705_v6 = vmul.f32 0.7978846, %v7888_v2  ;;  %v7968_v34 = vpop.f32.mrf.mxu1 }
 0x24c   :  { %11313 = vst [vmem:[#allocation23_spill] sm:$0xff] %v7962_v49  ;;  %v2654_v55 = vmul.f32 %v2338_v43, %v1706_v9  ;;  %v1391_v60 = vmul.f32 %v595_v17, %v595_v17  ;;  %v3594_v62 = vadd.f32 1.0, %v5719_v10  ;;  %5730 = vtanh.f32 %v2652_v15  ;;  %v7981_v15 = vpop.f32.mrf.mxu0 }
 0x24d   :  { %v7966_v58 = vmul.f32 0.5, %v7867_v22  ;;  %v2656_v29 = vmul.f32 %v2340_v42, %v1708_v61  ;;  %v5723_v47 = vpop.eup %5722  ;;  %v7971_v56 = vmul.f32 %v3590_v32, %v7775_v46  ;;  %v7974_v52 = vmul.f32 %v3592_v0, %v7828_v21 }
 0x24e   :  { %v2653_v30 = vmul.f32 %v2337_v18, %v1705_v6  ;;  %v2026_v27 = vmul.f32 0.044715, %v1394_v36  ;;  %v7976_v40 = vpop.eup %5724  ;;  %5732 = vtanh.f32 %v2651_v31  ;;  %v7979_v43 = vmul.f32 0.5, %v7888_v2  ;;  %v7996_v18 = vpop.f32.mrf.mxu1 }
 0x24f   :  { %11314 = vst [vmem:[#allocation21_spill] sm:$0xff] %v7966_v58  ;;  %11315 = vst [vmem:[#allocation26_spill] sm:$0xff] %v7971_v56  ;;  %v1393_v22 = vmul.f32 %v1026_v13, %v1026_v13  ;;  %v2028_v10 = vmul.f32 0.044715, %v1396_v41  ;;  %v5727_v42 = vpop.eup %5726  ;;  %v7984_v9 = vmul.f32 0.5, %v7874_v53  ;;  %5734 = vtanh.f32 %v2654_v55  ;;  %v8006_v6 = vpop.f32.mrf.mxu0 }
 0x250   :  { %11316 = vst [vmem:[#allocation28_spill] sm:$0xff] %v7974_v52  ;;  %11317 = vst [vmem:[#allocation33_spill] sm:$0xff] %v7976_v40  ;;  %v7987_v0 = vmul.f32 0.5, %v7879_v5  ;;  %v2023_v46 = vmul.f32 0.044715, %v1391_v60  ;;  %v7990_v21 = vmul.f32 %v3594_v62, %v7853_v37  ;;  %v3596_v32 = vadd.f32 1.0, %v5723_v47 }
 0x251   :  { %11318 = vst [vmem:[#allocation32_spill] sm:$0xff] %v7979_v43  ;;  %5736 = vtanh.f32 %v2656_v29  ;;  %v7994_v2 = vadd.f32 %v7802_v7, %v6479_v45  ;;  %v1707_v36 = vmul.f32 0.7978846, %v595_v17  ;;  %v2342_v53 = vadd.f32 1.0, %v2026_v27 }
 0x252   :  { %11319 = vst [vmem:[#allocation36_spill] sm:$0xff] %v7990_v21  ;;  %5738 = vtanh.f32 %v2653_v30  ;;  %v8000_v31 = vadd.f32 %v7810_v20, %v6486_v51  ;;  %v3598_v5 = vadd.f32 1.0, %v5727_v42  ;;  %v2025_v61 = vmul.f32 0.044715, %v1393_v22  ;;  %v8021_v30 = vpop.f32.mrf.mxu1 }
 0x253   :  { %v2344_v41 = vadd.f32 1.0, %v2028_v10  ;;  %v8004_v37 = vadd.f32 %v7825_v1, %v6377_v11  ;;  %v2339_v7 = vadd.f32 1.0, %v2023_v46  ;;  %v8008_v55 = vmul.f32 0.5, %v595_v17 }
 0x254   :  { %v1710_v60 = vmul.f32 0.7978846, %v7935_v54  ;;  %v8013_v62 = vadd.f32 %v7835_v38, %v6380_v12  ;;  %v8016_v20 = vmul.f32 %v3596_v32, %v7863_v14  ;;  %v1709_v29 = vmul.f32 0.7978846, %v1026_v13  ;;  %v8035_v32 = vpop.f32.mrf.mxu0  ;;  %v8048_v40 = vpop.f32.mrf.mxu1 }
 0x255   :  { %11320 = vst [vmem:[#allocation20_spill] sm:$0xff] %v8008_v55  ;;  %v1712_v47 = vmul.f32 0.7978846, %v7941_v23  ;;  %v1395_v1 = vmul.f32 %v7994_v2, %v7994_v2  ;;  %v8023_v27 = vmul.f32 0.5, %v1026_v13  ;;  %v8026_v22 = vmul.f32 0.5, %v7935_v54  ;;  %v11325_v54 = vld [vmem:[#allocation35_spill] sm:$0xff] }
 0x256   :  { %11321 = vst [vmem:[#allocation24_spill] sm:$0xff] %v8016_v20  ;;  %v2658_v17 = vmul.f32 %v2342_v53, %v1710_v60  ;;  %v1397_v38 = vmul.f32 %v8000_v31, %v8000_v31  ;;  %v8031_v14 = vmul.f32 %v3598_v5, %v7907_v57  ;;  %v2341_v10 = vadd.f32 1.0, %v2025_v61  ;;  %v11324_v53 = vld [vmem:[#allocation27_spill] sm:$0xff]  ;;  %v11327_v20 = vld [vmem:[#allocation37_spill] sm:$0xff]  ;;  %v11329_v5 = vld [vmem:[#allocation42_spill] sm:$0xff]  ;;  %v8056_v52 = vpop.f32.mrf.mxu0 }
 0x257   :  { %11322 = vst [vmem:[#allocation22_spill] sm:$0xff] %v8023_v27  ;;  %v2660_v42 = vmul.f32 %v2344_v41, %v1712_v47  ;;  %v1398_v46 = vmul.f32 %v8004_v37, %v8004_v37  ;;  %v2655_v55 = vmul.f32 %v2339_v7, %v1707_v36  ;;  %v1400_v13 = vmul.f32 %v8013_v62, %v8013_v62  ;;  %v11326_v27 = vld [vmem:[#allocation30_spill] sm:$0xff] }
 0x258   :  { %11323 = vst [vmem:[#allocation25_spill] sm:$0xff] %v8031_v14  ;;  %v4122_v60 = vpack.c.bf16 %v11325_v54, %v11324_v53  ;;  %v4124_v21 = vpack.c.bf16 %v11327_v20, %v11326_v27  ;;  %v8043_v43 = vpop.eup %5728  ;;  %v2027_v57 = vmul.f32 0.044715, %v1395_v1  ;;  %v3507_v61 = vadd.f32 1.0, %v11329_v5  ;;  %v11330_v41 = vld [vmem:[#allocation46_spill] sm:$0xff]  ;;  %v11331_v14 = vld [vmem:[#allocation44_spill] sm:$0xff] }
 0x259   :  { %11328 = vst [vmem:[#allocation27_spill] sm:$0xff] %v8043_v43  ;;  %v3511_v47 = vadd.f32 1.0, %v11330_v41  ;;  %v3509_v58 = vadd.f32 1.0, %v11331_v14  ;;  %v5731_v36 = vpop.eup %5730  ;;  %5740 = vtanh.f32 %v2658_v17  ;;  %v8051_v7 = vmul.f32 0.5, %v7941_v23  ;;  %v11332_v20 = vld [vmem:[#allocation47_spill] sm:$0xff]  ;;  %v11333_v54 = vld [vmem:[#allocation29_spill] sm:$0xff] }
 0x25a   :  { %v2029_v53 = vmul.f32 0.044715, %v1397_v38  ;;  %4586 = vmatmul.mubr.bf16.gmra.mxu0 %v4122_v60  ;;  %4938 = vmatmul.mubr.bf16.gmra.mxu1 %v4124_v21  ;;  %v3513_v27 = vadd.f32 1.0, %v11332_v20  ;;  %5742 = vtanh.f32 %v2660_v42  ;;  %v2030_v1 = vmul.f32 0.044715, %v1398_v46  ;;  %v11334_v43 = vld [vmem:[#allocation34_spill] sm:$0xff] }
 0x25b   :  { %v3823_v5 = vmul.f32 %v3507_v61, %v11333_v54  ;;  %v3827_v41 = vmul.f32 %v3511_v47, %v11334_v43  ;;  %v8058_v14 = vpop.eup %5732  ;;  %v2032_v56 = vmul.f32 0.044715, %v1400_v13  ;;  %v8062_v23 = vadd.f32 %v7869_v19, %v6377_v11  ;;  %v11336_v17 = vld [vmem:[#allocation31_spill] sm:$0xff]  ;;  %v11337_v21 = vld [vmem:[#allocation38_spill] sm:$0xff]  ;;  %v8066_v54 = vpop.f32.mrf.mxu1 }
 0x25c   :  { %11335 = vst [vmem:[#allocation35_spill] sm:$0xff] %v8058_v14  ;;  %v3825_v38 = vmul.f32 %v3509_v58, %v11336_v17  ;;  %v3829_v60 = vmul.f32 %v3513_v27, %v11337_v21  ;;  %v5735_v20 = vpop.eup %5734  ;;  %v3600_v42 = vadd.f32 1.0, %v5731_v36  ;;  %v2657_v46 = vmul.f32 %v2341_v10, %v1709_v29 }
 0x25d   :  { %v2343_v49 = vadd.f32 1.0, %v2027_v57  ;;  %v4127_v61 = vpack.c.bf16 %v3827_v41, %v3823_v5  ;;  %v1711_v47 = vmul.f32 0.7978846, %v7994_v2  ;;  %v2345_v14 = vadd.f32 1.0, %v2029_v53  ;;  %v8079_v57 = vpop.f32.mrf.mxu0  ;;  %v8088_v41 = vpop.f32.mrf.mxu1 }
 0x25e   :  { %v5737_v43 = vpop.eup %5736  ;;  %v8071_v13 = vadd.f32 %v7881_v3, %v6380_v12  ;;  %v4129_v19 = vpack.c.bf16 %v3829_v60, %v3825_v38  ;;  %5744 = vtanh.f32 %v2655_v55  ;;  %v2346_v58 = vadd.f32 1.0, %v2030_v1 }
 0x25f   :  { %v8073_v28 = vpop.eup %5738  ;;  %v605_v29 = vadd.f32 %v7844_v59, %v6479_v45  ;;  %v1036_v10 = vadd.f32 %v7857_v16, %v6486_v51  ;;  %4593 = vmatprep.mubr.bf16.mxu0 %v4127_v61  ;;  %v8082_v36 = vmul.f32 0.5, %v7994_v2  ;;  %v1713_v3 = vmul.f32 0.7978846, %v8000_v31 }
 0x260   :  { %11338 = vst [vmem:[#allocation30_spill] sm:$0xff] %v8073_v28  ;;  %v2348_v53 = vadd.f32 1.0, %v2032_v56  ;;  %v1402_v27 = vmul.f32 %v8062_v23, %v8062_v23  ;;  %4945 = vmatprep.mubr.bf16.mxu1 %v4129_v19  ;;  %v3602_v55 = vadd.f32 1.0, %v5735_v20  ;;  %v3604_v1 = vadd.f32 1.0, %v5737_v43  ;;  %v8096_v20 = vpop.f32.mrf.mxu0 }
 0x261   :  { %11339 = vst [vmem:[#allocation37_spill] sm:$0xff] %v8082_v36  ;;  %v2659_v5 = vmul.f32 %v2343_v49, %v1711_v47  ;;  %v1714_v59 = vmul.f32 0.7978846, %v8004_v37  ;;  %v8091_v16 = vmul.f32 %v3600_v42, %v7923_v4  ;;  %v2661_v17 = vmul.f32 %v2345_v14, %v1713_v3  ;;  %v8113_v47 = vpop.f32.mrf.mxu1  ;;  %v11344_v3 = vld [vmem:[#allocation39_spill] sm:$0xff] }
 0x262   :  { %v1716_v2 = vmul.f32 0.7978846, %v8013_v62  ;;  %v1404_v56 = vmul.f32 %v8071_v13, %v8071_v13  ;;  %5746 = vtanh.f32 %v2657_v46  ;;  %v1399_v21 = vmul.f32 %v605_v29, %v605_v29 }
 0x263   :  { %11340 = vst [vmem:[#allocation42_spill] sm:$0xff] %v8091_v16  ;;  %v2662_v38 = vmul.f32 %v2346_v58, %v1714_v59  ;;  %v1401_v60 = vmul.f32 %v1036_v10, %v1036_v10  ;;  %v8099_v49 = vmul.f32 0.5, %v8000_v31  ;;  %v8102_v61 = vmul.f32 0.5, %v8004_v37 }
 0x264   :  { %v2664_v4 = vmul.f32 %v2348_v53, %v1716_v2  ;;  %v2034_v42 = vmul.f32 0.044715, %v1402_v27  ;;  %v8105_v14 = vmul.f32 %v3602_v55, %v7984_v9  ;;  %v8108_v43 = vmul.f32 %v3604_v1, %v7987_v0  ;;  %v11345_v53 = vld [vmem:[#allocation48_spill] sm:$0xff]  ;;  %v8125_v27 = vpop.f32.mrf.mxu0 }
 0x265   :  { %11341 = vst [vmem:[#allocation46_spill] sm:$0xff] %v8099_v49  ;;  %5748 = vtanh.f32 %v2659_v5  ;;  %v8111_v46 = vmul.f32 0.5, %v8013_v62  ;;  %v2036_v31 = vmul.f32 0.044715, %v1404_v56  ;;  %v8117_v37 = vadd.f32 %v7917_v8, %v6377_v11  ;;  %v8139_v56 = vpop.f32.mrf.mxu1 }
 0x266   :  { %11342 = vst [vmem:[#allocation44_spill] sm:$0xff] %v8105_v14  ;;  %11343 = vst [vmem:[#allocation47_spill] sm:$0xff] %v8108_v43  ;;  %5750 = vtanh.f32 %v2661_v17  ;;  %v8121_v19 = vadd.f32 %v7927_v35, %v6380_v12  ;;  %v5741_v9 = vpop.eup %5740  ;;  %v2031_v0 = vmul.f32 0.044715, %v1399_v21  ;;  %v2033_v58 = vmul.f32 0.044715, %v1401_v60 }
 0x267   :  { %5752 = vtanh.f32 %v2662_v38  ;;  %v4126_v62 = vpack.c.bf16 %v11345_v53, %v11344_v3  ;;  %v5743_v55 = vpop.eup %5742  ;;  %v1715_v1 = vmul.f32 0.7978846, %v605_v29  ;;  %v2350_v5 = vadd.f32 1.0, %v2034_v42  ;;  %11348 = vst [vmem:[#allocation31_spill] sm:$0xff] %v8139_v56  ;;  %v11352_v43 = vld [vmem:[#allocation51_spill] sm:$0xff]  ;;  %v11353_v14 = vld [vmem:[#allocation60_spill] sm:$0xff]  ;;  %v8162_v36 = vpop.f32.mrf.mxu1 }
 0x268   :  { %5754 = vtanh.f32 %v2664_v4  ;;  %v8129_v8 = vadd.f32 %v7895_v39, %v6479_v45  ;;  %v8131_v59 = vmul.f32 0.5, %v605_v29  ;;  %v1717_v35 = vmul.f32 0.7978846, %v1036_v10  ;;  %v11360_v56 = vld [vmem:[#allocation50_spill] sm:$0xff] }
 0x269   :  { %v8133_v17 = vmul.f32 0.5, %v1036_v10  ;;  %v8137_v2 = vadd.f32 %v7911_v26, %v6486_v51  ;;  %4594 = vmatmul.mubr.bf16.gmra.mxu0 %v4126_v62  ;;  %v1718_v38 = vmul.f32 0.7978846, %v8062_v23  ;;  %v2352_v21 = vadd.f32 1.0, %v2036_v31  ;;  %v8149_v26 = vpop.f32.mrf.mxu0 }
 0x26a   :  { %11346 = vst [vmem:[#allocation29_spill] sm:$0xff] %v8131_v59  ;;  %v1406_v60 = vmul.f32 %v8117_v37, %v8117_v37  ;;  %v1408_v39 = vmul.f32 %v8121_v19, %v8121_v19  ;;  %v3606_v29 = vadd.f32 1.0, %v5741_v9  ;;  %v2347_v4 = vadd.f32 1.0, %v2031_v0  ;;  %v11350_v9 = vld [vmem:[#allocation43_spill] sm:$0xff]  ;;  %v11351_v0 = vld [vmem:[#allocation49_spill] sm:$0xff] }
 0x26b   :  { %11347 = vst [vmem:[#allocation34_spill] sm:$0xff] %v8133_v17  ;;  %v2349_v10 = vadd.f32 1.0, %v2033_v58  ;;  %v8147_v42 = vmul.f32 0.5, %v8062_v23  ;;  %v8151_v3 = vpop.eup %5744  ;;  %v3608_v53 = vadd.f32 1.0, %v5743_v55  ;;  %v2666_v62 = vmul.f32 %v2350_v5, %v1718_v38  ;;  %v11354_v38 = vld [vmem:[#allocation52_spill] sm:$0xff]  ;;  %v8172_v24 = vpop.f32.mrf.mxu0 }
 0x26c   :  { %11349 = vst [vmem:[#allocation38_spill] sm:$0xff] %v8151_v3  ;;  %v1720_v31 = vmul.f32 0.7978846, %v8071_v13  ;;  %v1403_v17 = vmul.f32 %v8129_v8, %v8129_v8  ;;  %v1405_v59 = vmul.f32 %v8137_v2, %v8137_v2  ;;  %v4128_v58 = vpack.c.bf16 %v11351_v0, %v11350_v9  ;;  %v11357_v0 = vld [vmem:[#allocation62_spill] sm:$0xff] }
 0x26d   :  { %v3515_v23 = vadd.f32 1.0, %v11352_v43  ;;  %v3519_v49 = vadd.f32 1.0, %v11353_v14  ;;  %v2038_v55 = vmul.f32 0.044715, %v1406_v60  ;;  %v2040_v5 = vmul.f32 0.044715, %v1408_v39 }
 0x26e   :  { %v2668_v3 = vmul.f32 %v2352_v21, %v1720_v31  ;;  %v3517_v16 = vadd.f32 1.0, %v11354_v38  ;;  %v8167_v28 = vadd.f32 %v7960_v33, %v6377_v11  ;;  %4946 = vmatmul.mubr.bf16.gmra.mxu1 %v4128_v58  ;;  %v3521_v43 = vadd.f32 1.0, %v11357_v0  ;;  %v11359_v38 = vld [vmem:[#allocation41_spill] sm:$0xff] }
 0x26f   :  { %v3831_v25 = vmul.f32 %v3515_v23, %v11355_v44  ;;  %v3835_v9 = vmul.f32 %v3519_v49, %v11356_v48  ;;  %v8174_v14 = vpop.eup %5746  ;;  %v2663_v21 = vmul.f32 %v2347_v4, %v1715_v1  ;;  %5756 = vtanh.f32 %v2666_v62  ;;  %v8181_v23 = vpop.f32.mrf.mxu1 }
 0x270   :  { %11358 = vst [vmem:[#allocation39_spill] sm:$0xff] %v8174_v14  ;;  %v8177_v60 = vmul.f32 0.5, %v8071_v13  ;;  %v2035_v39 = vmul.f32 0.044715, %v1403_v17  ;;  %v2037_v31 = vmul.f32 0.044715, %v1405_v59  ;;  %v3833_v58 = vmul.f32 %v3517_v16, %v11359_v38  ;;  %v8195_v4 = vpop.f32.mrf.mxu0 }
 0x271   :  { %v4131_v33 = vpack.c.bf16 %v3835_v9, %v3831_v25  ;;  %v3837_v44 = vmul.f32 %v3521_v43, %v11360_v56  ;;  %5758 = vtanh.f32 %v2668_v3  ;;  %v2354_v49 = vadd.f32 1.0, %v2038_v55  ;;  %v8208_v0 = vpop.f32.mrf.mxu1 }
 0x272   :  { %v8183_v48 = vpop.eup %5748  ;;  %v615_v1 = vadd.f32 %v7945_v63, %v6479_v45  ;;  %v8189_v13 = vadd.f32 %v7968_v34, %v6380_v12  ;;  %v2665_v25 = vmul.f32 %v2349_v10, %v1717_v35  ;;  %v2356_v59 = vadd.f32 1.0, %v2040_v5 }
 0x273   :  { %11361 = vst [vmem:[#allocation48_spill] sm:$0xff] %v8183_v48  ;;  %v8191_v17 = vpop.eup %5750  ;;  %v1410_v16 = vmul.f32 %v8167_v28, %v8167_v28  ;;  %4601 = vmatprep.mubr.bf16.mxu0 %v4131_v33  ;;  %v4133_v56 = vpack.c.bf16 %v3837_v44, %v3833_v58  ;;  %v8198_v62 = vmul.f32 %v3606_v29, %v8026_v22  ;;  %v2351_v34 = vadd.f32 1.0, %v2035_v39  ;;  %v8215_v33 = vpop.f32.mrf.mxu0 }
 0x274   :  { %11362 = vst [vmem:[#allocation43_spill] sm:$0xff] %v8191_v17  ;;  %v5753_v3 = vpop.eup %5752  ;;  %v8201_v63 = vmul.f32 %v3608_v53, %v8051_v7  ;;  %v1722_v55 = vmul.f32 0.7978846, %v8117_v37  ;;  %5760 = vtanh.f32 %v2663_v21  ;;  %v1719_v35 = vmul.f32 0.7978846, %v8129_v8 }
 0x275   :  { %11363 = vst [vmem:[#allocation49_spill] sm:$0xff] %v8198_v62  ;;  %v5755_v9 = vpop.eup %5754  ;;  %v1724_v10 = vmul.f32 0.7978846, %v8121_v19  ;;  %v1046_v5 = vadd.f32 %v7950_v50, %v6486_v51  ;;  %4953 = vmatprep.mubr.bf16.mxu1 %v4133_v56  ;;  %v2353_v22 = vadd.f32 1.0, %v2037_v31  ;;  %v1407_v43 = vmul.f32 %v615_v1, %v615_v1  ;;  %v11376_v62 = vld [vmem:[#allocation58_spill] sm:$0xff] }
 0x276   :  { %11364 = vst [vmem:[#allocation51_spill] sm:$0xff] %v8201_v63  ;;  %v2670_v29 = vmul.f32 %v2354_v49, %v1722_v55  ;;  %v1412_v7 = vmul.f32 %v8189_v13, %v8189_v13  ;;  %5762 = vtanh.f32 %v2665_v25  ;;  %v8213_v53 = vmul.f32 0.5, %v8129_v8  ;;  %v8228_v25 = vpop.f32.mrf.mxu1  ;;  %v8237_v55 = vpop.f32.mrf.mxu0  ;;  %v11375_v63 = vld [vmem:[#allocation55_spill] sm:$0xff] }
 0x277   :  { %v2672_v21 = vmul.f32 %v2356_v59, %v1724_v10  ;;  %v2042_v39 = vmul.f32 0.044715, %v1410_v16  ;;  %v3610_v38 = vadd.f32 1.0, %v5753_v3  ;;  %v3612_v58 = vadd.f32 1.0, %v5755_v9 }
 0x278   :  { %11365 = vst [vmem:[#allocation60_spill] sm:$0xff] %v8213_v53  ;;  %v2667_v50 = vmul.f32 %v2351_v34, %v1719_v35  ;;  %v1721_v44 = vmul.f32 0.7978846, %v8137_v2  ;;  %v8219_v31 = vmul.f32 0.5, %v8137_v2  ;;  %v8222_v49 = vmul.f32 0.5, %v8117_v37 }
 0x279   :  { %v1409_v56 = vmul.f32 %v1046_v5, %v1046_v5  ;;  %v8226_v8 = vadd.f32 %v7981_v15, %v6479_v45  ;;  %5764 = vtanh.f32 %v2670_v29  ;;  %v2039_v16 = vmul.f32 0.044715, %v1407_v43 }
 0x27a   :  { %11366 = vst [vmem:[#allocation52_spill] sm:$0xff] %v8219_v31  ;;  %v2669_v59 = vmul.f32 %v2353_v22, %v1721_v44  ;;  %v2044_v3 = vmul.f32 0.044715, %v1412_v7  ;;  %v8231_v34 = vmul.f32 0.5, %v8121_v19  ;;  %5766 = vtanh.f32 %v2672_v21 }
 0x27b   :  { %v2358_v2 = vadd.f32 1.0, %v2042_v39  ;;  %v8235_v37 = vadd.f32 %v8006_v6, %v6377_v11  ;;  %v8240_v15 = vmul.f32 %v3610_v38, %v8102_v61  ;;  %v8243_v9 = vmul.f32 %v3612_v58, %v8111_v46  ;;  %v8256_v61 = vpop.f32.mrf.mxu1 }
 0x27c   :  { %5768 = vtanh.f32 %v2667_v50  ;;  %v8247_v35 = vadd.f32 %v7996_v18, %v6486_v51  ;;  %v5757_v19 = vpop.eup %5756  ;;  %v2041_v10 = vmul.f32 0.044715, %v1409_v56  ;;  %v1726_v22 = vmul.f32 0.7978846, %v8167_v28  ;;  %v8262_v50 = vpop.f32.mrf.mxu0 }
 0x27d   :  { %11367 = vst [vmem:[#allocation40_spill] sm:$0xff] %v8240_v15  ;;  %11368 = vst [vmem:[#allocation45_spill] sm:$0xff] %v8243_v9  ;;  %v1411_v6 = vmul.f32 %v8226_v8, %v8226_v8  ;;  %v8254_v29 = vadd.f32 %v8021_v30, %v6380_v12  ;;  %5770 = vtanh.f32 %v2669_v59  ;;  %v1723_v46 = vmul.f32 0.7978846, %v615_v1  ;;  %v11374_v15 = vld [vmem:[#allocation57_spill] sm:$0xff] }
 0x27e   :  { %v2355_v43 = vadd.f32 1.0, %v2039_v16  ;;  %v2360_v7 = vadd.f32 1.0, %v2044_v3  ;;  %v5759_v21 = vpop.eup %5758  ;;  %v8258_v18 = vmul.f32 0.5, %v615_v1  ;;  %v1725_v39 = vmul.f32 0.7978846, %v1046_v5  ;;  %v8283_v17 = vpop.f32.mrf.mxu0 }
 0x27f   :  { %v2674_v38 = vmul.f32 %v2358_v2, %v1726_v22  ;;  %v1414_v58 = vmul.f32 %v8235_v37, %v8235_v37  ;;  %v8264_v44 = vmul.f32 0.5, %v1046_v5  ;;  %v8267_v30 = vmul.f32 0.5, %v8167_v28  ;;  %v8274_v22 = vpop.f32.mrf.mxu1  ;;  %v11373_v28 = vld [vmem:[#allocation54_spill] sm:$0xff] }
 0x280   :  { %11369 = vst [vmem:[#allocation62_spill] sm:$0xff] %v8258_v18  ;;  %v1728_v56 = vmul.f32 0.7978846, %v8189_v13  ;;  %v1413_v59 = vmul.f32 %v8247_v35, %v8247_v35  ;;  %v3614_v16 = vadd.f32 1.0, %v5757_v19  ;;  %v2357_v1 = vadd.f32 1.0, %v2041_v10  ;;  %11371 = vst [vmem:[#allocation50_spill] sm:$0xff] %v8274_v22 }
 0x281   :  { %11370 = vst [vmem:[#allocation41_spill] sm:$0xff] %v8264_v44  ;;  %v2043_v3 = vmul.f32 0.044715, %v1411_v6  ;;  %v1416_v2 = vmul.f32 %v8254_v29, %v8254_v29  ;;  %v8276_v18 = vpop.eup %5760  ;;  %v3616_v5 = vadd.f32 1.0, %v5759_v21  ;;  %v2671_v44 = vmul.f32 %v2355_v43, %v1723_v46  ;;  %v11377_v10 = vld [vmem:[#allocation63_spill] sm:$0xff]  ;;  %11378 = vst [vmem:[#allocation54_spill] sm:$0xff] %v8283_v17 }
 0x282   :  { %11372 = vst [vmem:[#allocation161_spill] sm:$0xff] %v8276_v18  ;;  %v2676_v9 = vmul.f32 %v2360_v7, %v1728_v56  ;;  %v4130_v31 = vpack.c.bf16 %v11374_v15, %v11373_v28  ;;  %5772 = vtanh.f32 %v2674_v38  ;;  %v2046_v53 = vmul.f32 0.044715, %v1414_v58  ;;  %v11380_v18 = vld [vmem:[#allocation72_spill] sm:$0xff]  ;;  %v11381_v46 = vld [vmem:[#allocation66_spill] sm:$0xff]  ;;  %v11384_v28 = vld [vmem:[#allocation53_spill] sm:$0xff] }
 0x283   :  { %v4132_v19 = vpack.c.bf16 %v11376_v62, %v11375_v63  ;;  %v3523_v6 = vadd.f32 1.0, %v11377_v10  ;;  %v8285_v14 = vpop.eup %5762  ;;  %v2045_v48 = vmul.f32 0.044715, %v1413_v59  ;;  %v3527_v21 = vadd.f32 1.0, %v11380_v18  ;;  %v11382_v7 = vld [vmem:[#allocation74_spill] sm:$0xff]  ;;  %v8295_v63 = vpop.f32.mrf.mxu1  ;;  %v11386_v18 = vld [vmem:[#allocation56_spill] sm:$0xff] }
 0x284   :  { %11379 = vst [vmem:[#allocation57_spill] sm:$0xff] %v8285_v14  ;;  %4602 = vmatmul.mubr.bf16.gmra.mxu0 %v4130_v31  ;;  %v3525_v43 = vadd.f32 1.0, %v11381_v46  ;;  %v3529_v56 = vadd.f32 1.0, %v11382_v7  ;;  %v8291_v15 = vmul.f32 0.5, %v8189_v13  ;;  %v2359_v38 = vadd.f32 1.0, %v2043_v3  ;;  %11383 = vst [vmem:[#allocation55_spill] sm:$0xff] %v8295_v63 }
 0x285   :  { %v2048_v58 = vmul.f32 0.044715, %v1416_v2  ;;  %v625_v62 = vadd.f32 %v8035_v32, %v6479_v45  ;;  %4954 = vmatmul.mubr.bf16.gmra.mxu1 %v4132_v19  ;;  %v3839_v59 = vmul.f32 %v3523_v6, %v11384_v28  ;;  %v11385_v31 = vld [vmem:[#allocation59_spill] sm:$0xff]  ;;  %v11387_v46 = vld [vmem:[#allocation61_spill] sm:$0xff]  ;;  %v2673_v22 = vmul.f32 %v2357_v1, %v1725_v39  ;;  %v8303_v2 = vpop.f32.mrf.mxu0  ;;  %v8312_v39 = vpop.f32.mrf.mxu1 }
 0x286   :  { %v3843_v10 = vmul.f32 %v3527_v21, %v11385_v31  ;;  %v3841_v14 = vmul.f32 %v3525_v43, %v11386_v18  ;;  %v3845_v17 = vmul.f32 %v3529_v56, %v11387_v46  ;;  %v5765_v7 = vpop.eup %5764  ;;  %5774 = vtanh.f32 %v2676_v9 }
 0x287   :  { %v2362_v13 = vadd.f32 1.0, %v2046_v53  ;;  %v627_v3 = vadd.f32 %v8056_v52, %v6377_v11  ;;  %v5767_v32 = vpop.eup %5766  ;;  %v1727_v19 = vmul.f32 0.7978846, %v8226_v8  ;;  %v2361_v63 = vadd.f32 1.0, %v2045_v48 }
 0x288   :  { %v4135_v6 = vpack.c.bf16 %v3843_v10, %v3839_v59  ;;  %v4137_v28 = vpack.c.bf16 %v3845_v17, %v3841_v14  ;;  %v8309_v43 = vmul.f32 %v3614_v16, %v8147_v42  ;;  %5776 = vtanh.f32 %v2671_v44  ;;  %v8319_v16 = vpop.f32.mrf.mxu0 }
 0x289   :  { %v8306_v21 = vpop.eup %5768  ;;  %v1730_v9 = vmul.f32 0.7978846, %v8235_v37  ;;  %v1415_v53 = vmul.f32 %v625_v62, %v625_v62  ;;  %v3618_v52 = vadd.f32 1.0, %v5765_v7  ;;  %v2675_v1 = vmul.f32 %v2359_v38, %v1727_v19  ;;  %v8333_v7 = vpop.f32.mrf.mxu1 }
 0x28a   :  { %11388 = vst [vmem:[#allocation58_spill] sm:$0xff] %v8306_v21  ;;  %11389 = vst [vmem:[#allocation63_spill] sm:$0xff] %v8309_v43  ;;  %v1729_v56 = vmul.f32 0.7978846, %v8247_v35  ;;  %v2364_v31 = vadd.f32 1.0, %v2048_v58  ;;  %4609 = vmatprep.mubr.bf16.mxu0 %v4135_v6  ;;  %4961 = vmatprep.mubr.bf16.mxu1 %v4137_v28  ;;  %v8315_v48 = vpop.eup %5770  ;;  %v3620_v14 = vadd.f32 1.0, %v5767_v32  ;;  %v1056_v42 = vadd.f32 %v8048_v40, %v6486_v51 }
 0x28b   :  { %11390 = vst [vmem:[#allocation72_spill] sm:$0xff] %v8315_v48  ;;  %v2678_v17 = vmul.f32 %v2362_v13, %v1730_v9  ;;  %v1418_v44 = vmul.f32 %v627_v3, %v627_v3  ;;  %v8322_v59 = vmul.f32 %v3616_v5, %v8177_v60  ;;  %5778 = vtanh.f32 %v2673_v22  ;;  %v8359_v9 = vpop.f32.mrf.mxu1  ;;  %v11406_v43 = vld [vmem:[#allocation80_spill] sm:$0xff] }
 0x28c   :  { %v2677_v38 = vmul.f32 %v2361_v63, %v1729_v56  ;;  %v1732_v10 = vmul.f32 0.7978846, %v8254_v29  ;;  %v8326_v58 = vmul.f32 0.5, %v8226_v8  ;;  %v8329_v18 = vmul.f32 0.5, %v8247_v35  ;;  %v8344_v63 = vpop.f32.mrf.mxu0 }
 0x28d   :  { %11391 = vst [vmem:[#allocation66_spill] sm:$0xff] %v8322_v59  ;;  %v2047_v46 = vmul.f32 0.044715, %v1415_v53  ;;  %v1058_v40 = vadd.f32 %v8066_v54, %v6380_v12  ;;  %v8336_v13 = vmul.f32 %v3618_v52, %v8222_v49  ;;  %5780 = vtanh.f32 %v2675_v1 }
 0x28e   :  { %11392 = vst [vmem:[#allocation74_spill] sm:$0xff] %v8326_v58  ;;  %11393 = vst [vmem:[#allocation53_spill] sm:$0xff] %v8329_v18  ;;  %v8339_v60 = vmul.f32 0.5, %v8235_v37  ;;  %v2680_v22 = vmul.f32 %v2364_v31, %v1732_v10  ;;  %v8342_v8 = vmul.f32 %v3620_v14, %v8231_v34  ;;  %5782 = vtanh.f32 %v2678_v17  ;;  %v8367_v31 = vpop.f32.mrf.mxu0 }
 0x28f   :  { %11394 = vst [vmem:[#allocation59_spill] sm:$0xff] %v8336_v13  ;;  %v1417_v35 = vmul.f32 %v1056_v42, %v1056_v42  ;;  %v2050_v5 = vmul.f32 0.044715, %v1418_v44  ;;  %v5773_v32 = vpop.eup %5772  ;;  %5784 = vtanh.f32 %v2677_v38  ;;  %v8347_v54 = vmul.f32 0.5, %v8254_v29 }
 0x290   :  { %11395 = vst [vmem:[#allocation56_spill] sm:$0xff] %v8342_v8  ;;  %v1731_v49 = vmul.f32 0.7978846, %v625_v62  ;;  %v8351_v19 = vadd.f32 %v8079_v57, %v6479_v45  ;;  %v2363_v37 = vadd.f32 1.0, %v2047_v46  ;;  %v8353_v6 = vmul.f32 0.5, %v625_v62  ;;  %v11398_v46 = vld [vmem:[#allocation64_spill] sm:$0xff] }
 0x291   :  { %v1420_v34 = vmul.f32 %v1058_v40, %v1058_v40  ;;  %v8357_v28 = vadd.f32 %v8096_v20, %v6377_v11  ;;  %5786 = vtanh.f32 %v2680_v22  ;;  %v1733_v53 = vmul.f32 0.7978846, %v1056_v42  ;;  %v11399_v22 = vld [vmem:[#allocation70_spill] sm:$0xff] }
 0x292   :  { %11396 = vst [vmem:[#allocation61_spill] sm:$0xff] %v8353_v6  ;;  %v8361_v52 = vmul.f32 0.5, %v1056_v42  ;;  %v8365_v29 = vadd.f32 %v8113_v47, %v6380_v12  ;;  %v3622_v57 = vadd.f32 1.0, %v5773_v32  ;;  %v2049_v1 = vmul.f32 0.044715, %v1417_v35  ;;  %v11401_v6 = vld [vmem:[#allocation67_spill] sm:$0xff] }
 0x293   :  { %v1734_v56 = vmul.f32 0.7978846, %v627_v3  ;;  %v2366_v62 = vadd.f32 1.0, %v2050_v5  ;;  %v5775_v14 = vpop.eup %5774  ;;  %v8369_v17 = vmul.f32 0.5, %v627_v3  ;;  %v1736_v20 = vmul.f32 0.7978846, %v1058_v40  ;;  %v8381_v5 = vpop.f32.mrf.mxu1 }
 0x294   :  { %11397 = vst [vmem:[#allocation162_spill] sm:$0xff] %v8361_v52  ;;  %v1419_v44 = vmul.f32 %v8351_v19, %v8351_v19  ;;  %v8375_v42 = vadd.f32 %v8088_v41, %v6486_v51  ;;  %v2679_v38 = vmul.f32 %v2363_v37, %v1731_v49  ;;  %v2052_v47 = vmul.f32 0.044715, %v1420_v34  ;;  %v11402_v41 = vld [vmem:[#allocation73_spill] sm:$0xff]  ;;  %v11403_v49 = vld [vmem:[#allocation78_spill] sm:$0xff] }
 0x295   :  { %v1422_v10 = vmul.f32 %v8357_v28, %v8357_v28  ;;  %v4134_v35 = vpack.c.bf16 %v11399_v22, %v11398_v46  ;;  %v8383_v3 = vpop.eup %5776  ;;  %v8385_v32 = vmul.f32 0.5, %v1058_v40  ;;  %v1424_v52 = vmul.f32 %v8365_v29, %v8365_v29  ;;  %v8395_v22 = vpop.f32.mrf.mxu0 }
 0x296   :  { %11400 = vst [vmem:[#allocation64_spill] sm:$0xff] %v8383_v3  ;;  %v4136_v8 = vpack.c.bf16 %v11402_v41, %v11401_v6  ;;  %v3531_v37 = vadd.f32 1.0, %v11403_v49  ;;  %v8393_v34 = vmul.f32 %v3622_v57, %v8267_v30  ;;  %v3624_v13 = vadd.f32 1.0, %v5775_v14  ;;  %v11405_v3 = vld [vmem:[#allocation82_spill] sm:$0xff] }
 0x297   :  { %v2365_v18 = vadd.f32 1.0, %v2049_v1  ;;  %v2682_v46 = vmul.f32 %v2366_v62, %v1734_v56  ;;  %4610 = vmatmul.mubr.bf16.gmra.mxu0 %v4134_v35  ;;  %v2051_v58 = vmul.f32 0.044715, %v1419_v44  ;;  %v1421_v40 = vmul.f32 %v8375_v42, %v8375_v42  ;;  %v11408_v1 = vld [vmem:[#allocation84_spill] sm:$0xff]  ;;  %v8408_v62 = vpop.f32.mrf.mxu1  ;;  %v11409_v44 = vld [vmem:[#allocation65_spill] sm:$0xff] }
 0x298   :  { %11404 = vst [vmem:[#allocation70_spill] sm:$0xff] %v8393_v34  ;;  %4962 = vmatmul.mubr.bf16.gmra.mxu1 %v4136_v8  ;;  %v3535_v59 = vadd.f32 1.0, %v11405_v3  ;;  %v3533_v6 = vadd.f32 1.0, %v11406_v43  ;;  %v8401_v41 = vpop.eup %5778  ;;  %v2368_v49 = vadd.f32 1.0, %v2052_v47  ;;  %v2054_v30 = vmul.f32 0.044715, %v1422_v10 }
 0x299   :  { %11407 = vst [vmem:[#allocation67_spill] sm:$0xff] %v8401_v41  ;;  %v8405_v57 = vadd.f32 %v8149_v26, %v6377_v11  ;;  %v3537_v56 = vadd.f32 1.0, %v11408_v1  ;;  %5788 = vtanh.f32 %v2679_v38  ;;  %v2056_v14 = vmul.f32 0.044715, %v1424_v52  ;;  %v11410_v35 = vld [vmem:[#allocation69_spill] sm:$0xff]  ;;  %v11412_v10 = vld [vmem:[#allocation68_spill] sm:$0xff]  ;;  %v8420_v1 = vpop.f32.mrf.mxu0 }
 0x29a   :  { %v3847_v8 = vmul.f32 %v3531_v37, %v11409_v44  ;;  %v3851_v3 = vmul.f32 %v3535_v59, %v11410_v35  ;;  %v8412_v34 = vpop.eup %5780  ;;  %v2681_v43 = vmul.f32 %v2365_v18, %v1733_v53  ;;  %v8416_v47 = vadd.f32 %v8162_v36, %v6380_v12  ;;  %v11413_v41 = vld [vmem:[#allocation71_spill] sm:$0xff]  ;;  %v8426_v53 = vpop.f32.mrf.mxu1 }
 0x29b   :  { %11411 = vst [vmem:[#allocation73_spill] sm:$0xff] %v8412_v34  ;;  %v3849_v26 = vmul.f32 %v3533_v6, %v11412_v10  ;;  %v3853_v48 = vmul.f32 %v3537_v56, %v11413_v41  ;;  %v5783_v21 = vpop.eup %5782  ;;  %5790 = vtanh.f32 %v2682_v46  ;;  %v2367_v52 = vadd.f32 1.0, %v2051_v58 }
 0x29c   :  { %v2053_v38 = vmul.f32 0.044715, %v1421_v40  ;;  %v4139_v37 = vpack.c.bf16 %v3851_v3, %v3847_v8  ;;  %v8422_v44 = vpop.eup %5784  ;;  %v2684_v59 = vmul.f32 %v2368_v49, %v1736_v20  ;;  %v2370_v35 = vadd.f32 1.0, %v2054_v30  ;;  %v8438_v49 = vpop.f32.mrf.mxu0 }
 0x29d   :  { %11414 = vst [vmem:[#allocation78_spill] sm:$0xff] %v8422_v44  ;;  %v1426_v18 = vmul.f32 %v8405_v57, %v8405_v57  ;;  %v4141_v36 = vpack.c.bf16 %v3853_v48, %v3849_v26  ;;  %v8429_v6 = vmul.f32 %v3624_v13, %v8291_v15  ;;  %v1735_v41 = vmul.f32 0.7978846, %v8351_v19 }
 0x29e   :  { %v8433_v46 = vmul.f32 0.5, %v8351_v19  ;;  %v2372_v58 = vadd.f32 1.0, %v2056_v14  ;;  %4617 = vmatprep.mubr.bf16.mxu0 %v4139_v37  ;;  %v5787_v40 = vpop.eup %5786  ;;  %v3626_v56 = vadd.f32 1.0, %v5783_v21  ;;  %5792 = vtanh.f32 %v2681_v43  ;;  %v11417_v21 = vld [vmem:[#allocation31_spill] sm:$0xff]  ;;  %v8445_v43 = vpop.f32.mrf.mxu1 }
 0x29f   :  { %11415 = vst [vmem:[#allocation82_spill] sm:$0xff] %v8429_v6  ;;  %v1738_v20 = vmul.f32 0.7978846, %v8357_v28  ;;  %v1428_v48 = vmul.f32 %v8416_v47, %v8416_v47  ;;  %4969 = vmatprep.mubr.bf16.mxu1 %v4141_v36  ;;  %v2683_v15 = vmul.f32 %v2367_v52, %v1735_v41  ;;  %v2369_v13 = vadd.f32 1.0, %v2053_v38 }
 0x2a0   :  { %11416 = vst [vmem:[#allocation80_spill] sm:$0xff] %v8433_v46  ;;  %v1740_v30 = vmul.f32 0.7978846, %v8365_v29  ;;  %v635_v19 = vadd.f32 %v8125_v27, %v6479_v45  ;;  %5794 = vtanh.f32 %v2684_v59  ;;  %v1066_v8 = vadd.f32 %v11417_v21, %v6486_v51 }
 0x2a1   :  { %v2686_v14 = vmul.f32 %v2370_v35, %v1738_v20  ;;  %v2058_v3 = vmul.f32 0.044715, %v1426_v18  ;;  %v3628_v10 = vadd.f32 1.0, %v5787_v40  ;;  %v1737_v26 = vmul.f32 0.7978846, %v8375_v42  ;;  %v8462_v35 = vpop.f32.mrf.mxu0 }
 0x2a2   :  { %v8449_v37 = vmul.f32 0.5, %v8375_v42  ;;  %v2688_v52 = vmul.f32 %v2372_v58, %v1740_v30  ;;  %v8452_v38 = vmul.f32 0.5, %v8357_v28  ;;  %v2060_v36 = vmul.f32 0.044715, %v1428_v48 }
 0x2a3   :  { %v8456_v27 = vadd.f32 %v8172_v24, %v6479_v45  ;;  %v8460_v59 = vadd.f32 %v8181_v23, %v6486_v51  ;;  %v8465_v18 = vmul.f32 %v3626_v56, %v8339_v60  ;;  %5796 = vtanh.f32 %v2683_v15  ;;  %v8471_v24 = vpop.f32.mrf.mxu1 }
 0x2a4   :  { %11418 = vst [vmem:[#allocation84_spill] sm:$0xff] %v8449_v37  ;;  %v2685_v42 = vmul.f32 %v2369_v13, %v1737_v26  ;;  %v1423_v41 = vmul.f32 %v635_v19, %v635_v19  ;;  %5798 = vtanh.f32 %v2686_v14  ;;  %v1425_v28 = vmul.f32 %v1066_v8, %v1066_v8  ;;  %11420 = vst [vmem:[#allocation69_spill] sm:$0xff] %v8471_v24  ;;  %v8490_v13 = vpop.f32.mrf.mxu0  ;;  %v11433_v24 = vld [vmem:[#allocation93_spill] sm:$0xff] }
 0x2a5   :  { %11419 = vst [vmem:[#allocation65_spill] sm:$0xff] %v8465_v18  ;;  %v2374_v58 = vadd.f32 1.0, %v2058_v3  ;;  %v8469_v40 = vadd.f32 %v8195_v4, %v6377_v11  ;;  %v8474_v23 = vmul.f32 %v3628_v10, %v8347_v54  ;;  %v8477_v20 = vmul.f32 0.5, %v8365_v29  ;;  %11423 = vst [vmem:[#allocation31_spill] sm:$0xff] %v8490_v13  ;;  %v11426_v18 = vld [vmem:[#allocation75_spill] sm:$0xff] }
 0x2a6   :  { %5800 = vtanh.f32 %v2688_v52  ;;  %v8481_v60 = vadd.f32 %v8208_v0, %v6380_v12  ;;  %v8483_v56 = vpop.eup %5788  ;;  %v1742_v48 = vmul.f32 0.7978846, %v8405_v57  ;;  %v2376_v15 = vadd.f32 1.0, %v2060_v36  ;;  %v8497_v52 = vpop.f32.mrf.mxu1 }
 0x2a7   :  { %11421 = vst [vmem:[#allocation68_spill] sm:$0xff] %v8474_v23  ;;  %11422 = vst [vmem:[#allocation71_spill] sm:$0xff] %v8483_v56  ;;  %v1427_v4 = vmul.f32 %v8456_v27, %v8456_v27  ;;  %v1429_v54 = vmul.f32 %v8460_v59, %v8460_v59  ;;  %5802 = vtanh.f32 %v2685_v42  ;;  %v1739_v29 = vmul.f32 0.7978846, %v635_v19  ;;  %v11427_v42 = vld [vmem:[#allocation83_spill] sm:$0xff]  ;;  %v8507_v56 = vpop.f32.mrf.mxu0 }
 0x2a8   :  { %v2055_v30 = vmul.f32 0.044715, %v1423_v41  ;;  %v8492_v14 = vmul.f32 0.5, %v635_v19  ;;  %v5791_v0 = vpop.eup %5790  ;;  %v2057_v21 = vmul.f32 0.044715, %v1425_v28  ;;  %v2690_v3 = vmul.f32 %v2374_v58, %v1742_v48  ;;  %11425 = vst [vmem:[#allocation164_spill] sm:$0xff] %v8497_v52 }
 0x2a9   :  { %v1744_v10 = vmul.f32 0.7978846, %v8416_v47  ;;  %v1430_v26 = vmul.f32 %v8469_v40, %v8469_v40  ;;  %v1741_v36 = vmul.f32 0.7978846, %v1066_v8  ;;  %v1432_v23 = vmul.f32 %v8481_v60, %v8481_v60  ;;  %v11428_v41 = vld [vmem:[#allocation76_spill] sm:$0xff]  ;;  %v11429_v19 = vld [vmem:[#allocation85_spill] sm:$0xff] }
 0x2aa   :  { %11424 = vst [vmem:[#allocation163_spill] sm:$0xff] %v8492_v14  ;;  %v4138_v37 = vpack.c.bf16 %v11427_v42, %v11426_v18  ;;  %v4140_v14 = vpack.c.bf16 %v11429_v19, %v11428_v41  ;;  %v8505_v46 = vmul.f32 0.5, %v1066_v8  ;;  %v2059_v58 = vmul.f32 0.044715, %v1427_v4  ;;  %v11432_v52 = vld [vmem:[#allocation89_spill] sm:$0xff]  ;;  %v11434_v8 = vld [vmem:[#allocation91_spill] sm:$0xff] }
 0x2ab   :  { %v2692_v28 = vmul.f32 %v2376_v15, %v1744_v10  ;;  %v2061_v48 = vmul.f32 0.044715, %v1429_v54  ;;  %v8509_v6 = vpop.eup %5792  ;;  %v3630_v44 = vadd.f32 1.0, %v5791_v0  ;;  %v2371_v34 = vadd.f32 1.0, %v2055_v30  ;;  %v8514_v15 = vpop.f32.mrf.mxu1  ;;  %v11436_v10 = vld [vmem:[#allocation77_spill] sm:$0xff]  ;;  %v11438_v30 = vld [vmem:[#allocation96_spill] sm:$0xff] }
 0x2ac   :  { %11430 = vst [vmem:[#allocation75_spill] sm:$0xff] %v8505_v46  ;;  %11431 = vst [vmem:[#allocation83_spill] sm:$0xff] %v8509_v6  ;;  %4618 = vmatmul.mubr.bf16.gmra.mxu0 %v4138_v37  ;;  %4970 = vmatmul.mubr.bf16.gmra.mxu1 %v4140_v14  ;;  %v3539_v13 = vadd.f32 1.0, %v11432_v52  ;;  %v3543_v18 = vadd.f32 1.0, %v11433_v24  ;;  %v2373_v42 = vadd.f32 1.0, %v2057_v21  ;;  %5804 = vtanh.f32 %v2690_v3  ;;  %v11437_v6 = vld [vmem:[#allocation81_spill] sm:$0xff]  ;;  %v8523_v21 = vpop.f32.mrf.mxu0 }
 0x2ad   :  { %v2062_v41 = vmul.f32 0.044715, %v1430_v26  ;;  %v3541_v19 = vadd.f32 1.0, %v11434_v8  ;;  %11435 = vst [vmem:[#allocation76_spill] sm:$0xff] %v8514_v15  ;;  %v5795_v4 = vpop.eup %5794  ;;  %v2064_v54 = vmul.f32 0.044715, %v1432_v23  ;;  %5806 = vtanh.f32 %v2692_v28 }
 0x2ae   :  { %v3855_v46 = vmul.f32 %v3539_v13, %v11436_v10  ;;  %v3859_v0 = vmul.f32 %v3543_v18, %v11437_v6  ;;  %v3545_v37 = vadd.f32 1.0, %v11438_v30  ;;  %v2375_v14 = vadd.f32 1.0, %v2059_v58  ;;  %11439 = vst [vmem:[#allocation85_spill] sm:$0xff] %v8523_v21  ;;  %v11440_v26 = vld [vmem:[#allocation79_spill] sm:$0xff]  ;;  %v11441_v8 = vld [vmem:[#allocation86_spill] sm:$0xff] }
 0x2af   :  { %v2377_v52 = vadd.f32 1.0, %v2061_v48  ;;  %v8521_v24 = vadd.f32 %v8215_v33, %v6479_v45  ;;  %v8527_v3 = vadd.f32 %v8228_v25, %v6486_v51  ;;  %v3857_v13 = vmul.f32 %v3541_v19, %v11440_v26  ;;  %v8534_v33 = vpop.f32.mrf.mxu1 }
 0x2b0   :  { %v4143_v23 = vpack.c.bf16 %v3859_v0, %v3855_v46  ;;  %v3861_v6 = vmul.f32 %v3545_v37, %v11441_v8  ;;  %v8531_v18 = vpop.eup %5796  ;;  %v3632_v28 = vadd.f32 1.0, %v5795_v4  ;;  %v2687_v58 = vmul.f32 %v2371_v34, %v1739_v29 }
 0x2b1   :  { %11442 = vst [vmem:[#allocation89_spill] sm:$0xff] %v8531_v18  ;;  %v1743_v48 = vmul.f32 0.7978846, %v8456_v27  ;;  %v2378_v10 = vadd.f32 1.0, %v2062_v41  ;;  %v5799_v30 = vpop.eup %5798  ;;  %v2689_v21 = vmul.f32 %v2373_v42, %v1741_v36  ;;  %v1745_v15 = vmul.f32 0.7978846, %v8460_v59  ;;  %v8544_v41 = vpop.f32.mrf.mxu0 }
 0x2b2   :  { %v2380_v25 = vadd.f32 1.0, %v2064_v54  ;;  %4625 = vmatprep.mubr.bf16.mxu0 %v4143_v23  ;;  %v4145_v46 = vpack.c.bf16 %v3861_v6, %v3857_v13  ;;  %v8538_v19 = vmul.f32 %v3630_v44, %v8369_v17  ;;  %v8541_v37 = vmul.f32 0.5, %v8405_v57  ;;  %v8555_v23 = vpop.f32.mrf.mxu1 }
 0x2b3   :  { %v5801_v0 = vpop.eup %5800  ;;  %v2691_v34 = vmul.f32 %v2375_v14, %v1743_v48  ;;  %v1746_v29 = vmul.f32 0.7978846, %v8469_v40  ;;  %v2693_v4 = vmul.f32 %v2377_v52, %v1745_v15  ;;  %v1748_v36 = vmul.f32 0.7978846, %v8481_v60 }
 0x2b4   :  { %11443 = vst [vmem:[#allocation93_spill] sm:$0xff] %v8538_v19  ;;  %v1431_v42 = vmul.f32 %v8521_v24, %v8521_v24  ;;  %v1433_v54 = vmul.f32 %v8527_v3, %v8527_v3  ;;  %4977 = vmatprep.mubr.bf16.mxu1 %v4145_v46  ;;  %v8551_v17 = vpop.eup %5802  ;;  %v3634_v44 = vadd.f32 1.0, %v5799_v30  ;;  %5808 = vtanh.f32 %v2687_v58  ;;  %v8581_v48 = vpop.f32.mrf.mxu1 }
 0x2b5   :  { %11444 = vst [vmem:[#allocation91_spill] sm:$0xff] %v8551_v17  ;;  %v2694_v57 = vmul.f32 %v2378_v10, %v1746_v29  ;;  %v647_v14 = vadd.f32 %v8237_v55, %v6377_v11  ;;  %v8558_v15 = vmul.f32 %v3632_v28, %v8385_v32  ;;  %v3636_v52 = vadd.f32 1.0, %v5801_v0  ;;  %v8570_v55 = vpop.f32.mrf.mxu0  ;;  %11450 = vst [vmem:[#allocation165_spill] sm:$0xff] %v8581_v48  ;;  %v11463_v17 = vld [vmem:[#allocation101_spill] sm:$0xff] }
 0x2b6   :  { %5810 = vtanh.f32 %v2689_v21  ;;  %v2696_v26 = vmul.f32 %v2380_v25, %v1748_v36  ;;  %v8561_v13 = vmul.f32 0.5, %v8416_v47  ;;  %v8564_v8 = vmul.f32 0.5, %v8456_v27  ;;  %11447 = vst [vmem:[#allocation96_spill] sm:$0xff] %v8570_v55  ;;  %v11452_v25 = vld [vmem:[#allocation50_spill] sm:$0xff] }
 0x2b7   :  { %11445 = vst [vmem:[#allocation77_spill] sm:$0xff] %v8558_v15  ;;  %5812 = vtanh.f32 %v2691_v34  ;;  %v8568_v6 = vadd.f32 %v8256_v61, %v6380_v12  ;;  %v8573_v58 = vmul.f32 0.5, %v8460_v59  ;;  %v2063_v32 = vmul.f32 0.044715, %v1431_v42 }
 0x2b8   :  { %11446 = vst [vmem:[#allocation81_spill] sm:$0xff] %v8564_v8  ;;  %5814 = vtanh.f32 %v2693_v4  ;;  %v2065_v21 = vmul.f32 0.044715, %v1433_v54  ;;  %v8576_v28 = vmul.f32 %v3634_v44, %v8452_v38  ;;  %v8579_v47 = vmul.f32 0.5, %v8469_v40  ;;  %v11461_v8 = vld [vmem:[#allocation97_spill] sm:$0xff] }
 0x2b9   :  { %11448 = vst [vmem:[#allocation79_spill] sm:$0xff] %v8573_v58  ;;  %5816 = vtanh.f32 %v2694_v57  ;;  %v1434_v27 = vmul.f32 %v647_v14, %v647_v14  ;;  %v5805_v61 = vpop.eup %5804  ;;  %v8584_v10 = vmul.f32 %v3636_v52, %v8477_v20  ;;  %v8587_v59 = vmul.f32 0.5, %v8481_v60  ;;  %v11453_v20 = vld [vmem:[#allocation54_spill] sm:$0xff]  ;;  %v8604_v60 = vpop.f32.mrf.mxu0  ;;  %v11456_v57 = vld [vmem:[#allocation55_spill] sm:$0xff]  ;;  %v11460_v58 = vld [vmem:[#allocation92_spill] sm:$0xff] }
 0x2ba   :  { %11449 = vst [vmem:[#allocation86_spill] sm:$0xff] %v8576_v28  ;;  %5818 = vtanh.f32 %v2696_v26  ;;  %v8591_v30 = vadd.f32 %v8262_v50, %v6479_v45  ;;  %v1747_v38 = vmul.f32 0.7978846, %v8521_v24  ;;  %v1436_v40 = vmul.f32 %v8568_v6, %v8568_v6  ;;  %v5807_v34 = vpop.eup %5806  ;;  %v8617_v26 = vpop.f32.mrf.mxu1 }
 0x2bb   :  { %11451 = vst [vmem:[#allocation166_spill] sm:$0xff] %v8584_v10  ;;  %v8598_v46 = vadd.f32 %v11452_v25, %v6486_v51  ;;  %v8602_v0 = vadd.f32 %v11453_v20, %v6377_v11  ;;  %v2379_v29 = vadd.f32 1.0, %v2063_v32  ;;  %v8607_v50 = vmul.f32 0.5, %v8521_v24  ;;  %v11458_v10 = vld [vmem:[#allocation87_spill] sm:$0xff] }
 0x2bc   :  { %v1749_v4 = vmul.f32 0.7978846, %v8527_v3  ;;  %v2381_v36 = vadd.f32 1.0, %v2065_v21  ;;  %v3638_v42 = vadd.f32 1.0, %v5805_v61  ;;  %v8611_v54 = vmul.f32 0.5, %v8527_v3  ;;  %v8640_v48 = vpop.f32.mrf.mxu1 }
 0x2bd   :  { %11454 = vst [vmem:[#allocation50_spill] sm:$0xff] %v8607_v50  ;;  %v2066_v44 = vmul.f32 0.044715, %v1434_v27  ;;  %v8615_v52 = vadd.f32 %v11456_v57, %v6380_v12  ;;  %v1750_v25 = vmul.f32 0.7978846, %v647_v14  ;;  %v8619_v20 = vmul.f32 0.5, %v647_v14  ;;  %v8628_v57 = vpop.f32.mrf.mxu0 }
 0x2be   :  { %11455 = vst [vmem:[#allocation54_spill] sm:$0xff] %v8611_v54  ;;  %v1752_v24 = vmul.f32 0.7978846, %v8568_v6  ;;  %v1435_v32 = vmul.f32 %v8591_v30, %v8591_v30  ;;  %v3640_v21 = vadd.f32 1.0, %v5807_v34  ;;  %v2068_v61 = vmul.f32 0.044715, %v1436_v40 }
 0x2bf   :  { %v1437_v3 = vmul.f32 %v8598_v46, %v8598_v46  ;;  %v1438_v27 = vmul.f32 %v8602_v0, %v8602_v0  ;;  %11457 = vst [vmem:[#allocation55_spill] sm:$0xff] %v8628_v57  ;;  %v2695_v54 = vmul.f32 %v2379_v29, %v1747_v38  ;;  %v2697_v50 = vmul.f32 %v2381_v36, %v1749_v4  ;;  %v11459_v14 = vld [vmem:[#allocation94_spill] sm:$0xff]  ;;  %v11467_v4 = vld [vmem:[#allocation103_spill] sm:$0xff] }
 0x2c0   :  { %v4142_v28 = vpack.c.bf16 %v11459_v14, %v11458_v10  ;;  %v4144_v15 = vpack.c.bf16 %v11461_v8, %v11460_v58  ;;  %v8635_v19 = vmul.f32 %v3638_v42, %v8541_v37  ;;  %v2382_v40 = vadd.f32 1.0, %v2066_v44  ;;  %11464 = vst [vmem:[#allocation94_spill] sm:$0xff] %v8640_v48  ;;  %v11466_v10 = vld [vmem:[#allocation106_spill] sm:$0xff] }
 0x2c1   :  { %v1440_v34 = vmul.f32 %v8615_v52, %v8615_v52  ;;  %v3547_v18 = vadd.f32 1.0, %v11463_v17  ;;  %v8642_v57 = vpop.eup %5808  ;;  %v2067_v38 = vmul.f32 0.044715, %v1435_v32  ;;  %v3551_v29 = vadd.f32 1.0, %v11466_v10  ;;  %v11468_v58 = vld [vmem:[#allocation110_spill] sm:$0xff]  ;;  %v11473_v10 = vld [vmem:[#allocation95_spill] sm:$0xff] }
 0x2c2   :  { %11462 = vst [vmem:[#allocation87_spill] sm:$0xff] %v8635_v19  ;;  %11465 = vst [vmem:[#allocation92_spill] sm:$0xff] %v8642_v57  ;;  %4626 = vmatmul.mubr.bf16.gmra.mxu0 %v4142_v28  ;;  %4978 = vmatmul.mubr.bf16.gmra.mxu1 %v4144_v15  ;;  %v3549_v8 = vadd.f32 1.0, %v11467_v4  ;;  %v3553_v37 = vadd.f32 1.0, %v11468_v58  ;;  %v2384_v42 = vadd.f32 1.0, %v2068_v61  ;;  %v8651_v17 = vadd.f32 %v8319_v16, %v6377_v11  ;;  %v8653_v19 = vpop.f32.mrf.mxu0  ;;  %v11472_v15 = vld [vmem:[#allocation88_spill] sm:$0xff] }
 0x2c3   :  { %v8647_v36 = vpop.eup %5810  ;;  %v2069_v44 = vmul.f32 0.044715, %v1437_v3  ;;  %v2070_v14 = vmul.f32 0.044715, %v1438_v27  ;;  %11470 = vst [vmem:[#allocation101_spill] sm:$0xff] %v8653_v19  ;;  %v3863_v28 = vmul.f32 %v3547_v18, %v11472_v15  ;;  %v3867_v57 = vmul.f32 %v3551_v29, %v11473_v10  ;;  %v11474_v4 = vld [vmem:[#allocation90_spill] sm:$0xff]  ;;  %v8669_v19 = vpop.f32.mrf.mxu1 }
 0x2c4   :  { %11469 = vst [vmem:[#allocation97_spill] sm:$0xff] %v8647_v36  ;;  %v8655_v32 = vpop.eup %5812  ;;  %v3865_v48 = vmul.f32 %v3549_v8, %v11474_v4  ;;  %v11475_v58 = vld [vmem:[#allocation98_spill] sm:$0xff]  ;;  %v8664_v61 = vmul.f32 %v3640_v21, %v8561_v13  ;;  %v2698_v3 = vmul.f32 %v2382_v40, %v1750_v25  ;;  %v8667_v16 = vmul.f32 0.5, %v8568_v6  ;;  %v8676_v21 = vpop.f32.mrf.mxu0 }
 0x2c5   :  { %11471 = vst [vmem:[#allocation106_spill] sm:$0xff] %v8655_v32  ;;  %v3869_v55 = vmul.f32 %v3553_v37, %v11475_v58  ;;  %v8661_v36 = vpop.eup %5814  ;;  %v2072_v27 = vmul.f32 0.044715, %v1440_v34  ;;  %v2383_v18 = vadd.f32 1.0, %v2067_v38  ;;  %v8673_v29 = vadd.f32 %v8333_v7, %v6380_v12 }
 0x2c6   :  { %11476 = vst [vmem:[#allocation103_spill] sm:$0xff] %v8661_v36  ;;  %11477 = vst [vmem:[#allocation110_spill] sm:$0xff] %v8664_v61  ;;  %v5817_v32 = vpop.eup %5816  ;;  %v4147_v8 = vpack.c.bf16 %v3867_v57, %v3863_v28  ;;  %5820 = vtanh.f32 %v2695_v54  ;;  %v2700_v10 = vmul.f32 %v2384_v42, %v1752_v24  ;;  %v1751_v13 = vmul.f32 0.7978846, %v8591_v30  ;;  %v8685_v54 = vpop.f32.mrf.mxu1 }
 0x2c7   :  { %v4149_v37 = vpack.c.bf16 %v3869_v55, %v3865_v48  ;;  %v5819_v15 = vpop.eup %5818  ;;  %v2386_v25 = vadd.f32 1.0, %v2070_v14  ;;  %5822 = vtanh.f32 %v2697_v50  ;;  %v2385_v6 = vadd.f32 1.0, %v2069_v44  ;;  %v8691_v14 = vpop.f32.mrf.mxu0 }
 0x2c8   :  { %v655_v40 = vadd.f32 %v8303_v2, %v6479_v45  ;;  %v1442_v34 = vmul.f32 %v8651_v17, %v8651_v17  ;;  %4633 = vmatprep.mubr.bf16.mxu0 %v4147_v8  ;;  %5824 = vtanh.f32 %v2698_v3  ;;  %v1754_v7 = vmul.f32 0.7978846, %v8602_v0  ;;  %v8702_v8 = vpop.f32.mrf.mxu1 }
 0x2c9   :  { %4985 = vmatprep.mubr.bf16.mxu1 %v4149_v37  ;;  %v2388_v55 = vadd.f32 1.0, %v2072_v27  ;;  %v1086_v48 = vadd.f32 %v8312_v39, %v6486_v51  ;;  %v3642_v24 = vadd.f32 1.0, %v5817_v32  ;;  %v2699_v50 = vmul.f32 %v2383_v18, %v1751_v13 }
 0x2ca   :  { %v1753_v57 = vmul.f32 0.7978846, %v8598_v46  ;;  %v1444_v2 = vmul.f32 %v8673_v29, %v8673_v29  ;;  %v3644_v38 = vadd.f32 1.0, %v5819_v15  ;;  %5826 = vtanh.f32 %v2700_v10 }
 0x2cb   :  { %v2702_v42 = vmul.f32 %v2386_v25, %v1754_v7  ;;  %v1756_v44 = vmul.f32 0.7978846, %v8615_v52  ;;  %v8694_v28 = vmul.f32 0.5, %v8591_v30  ;;  %v1439_v4 = vmul.f32 %v655_v40, %v655_v40 }
 0x2cc   :  { %v2701_v39 = vmul.f32 %v2385_v6, %v1753_v57  ;;  %v2074_v58 = vmul.f32 0.044715, %v1442_v34  ;;  %v8697_v32 = vmul.f32 0.5, %v8598_v46  ;;  %v8700_v3 = vmul.f32 0.5, %v8602_v0  ;;  %v11483_v6 = vld [vmem:[#allocation99_spill] sm:$0xff] }
 0x2cd   :  { %11478 = vst [vmem:[#allocation88_spill] sm:$0xff] %v8694_v28  ;;  %v2704_v27 = vmul.f32 %v2388_v55, %v1756_v44  ;;  %v1441_v18 = vmul.f32 %v1086_v48, %v1086_v48  ;;  %v8705_v37 = vmul.f32 %v3642_v24, %v8579_v47  ;;  %5828 = vtanh.f32 %v2699_v50  ;;  %v8722_v47 = vpop.f32.mrf.mxu0  ;;  %v8733_v55 = vpop.f32.mrf.mxu1 }
 0x2ce   :  { %11479 = vst [vmem:[#allocation95_spill] sm:$0xff] %v8697_v32  ;;  %v2076_v15 = vmul.f32 0.044715, %v1444_v2  ;;  %v8709_v30 = vadd.f32 %v8344_v63, %v6479_v45  ;;  %v8712_v10 = vmul.f32 %v3644_v38, %v8587_v59  ;;  %5830 = vtanh.f32 %v2702_v42  ;;  %11482 = vst [vmem:[#allocation167_spill] sm:$0xff] %v8722_v47  ;;  %v11484_v63 = vld [vmem:[#allocation105_spill] sm:$0xff] }
 0x2cf   :  { %11480 = vst [vmem:[#allocation90_spill] sm:$0xff] %v8705_v37  ;;  %v8716_v46 = vadd.f32 %v8359_v9, %v6486_v51  ;;  %v8720_v0 = vadd.f32 %v8367_v31, %v6377_v11  ;;  %5832 = vtanh.f32 %v2701_v39  ;;  %v2071_v13 = vmul.f32 0.044715, %v1439_v4  ;;  %11485 = vst [vmem:[#allocation99_spill] sm:$0xff] %v8733_v55  ;;  %v8744_v42 = vpop.f32.mrf.mxu0  ;;  %v11495_v37 = vld [vmem:[#allocation119_spill] sm:$0xff] }
 0x2d0   :  { %11481 = vst [vmem:[#allocation98_spill] sm:$0xff] %v8712_v10  ;;  %v2390_v25 = vadd.f32 1.0, %v2074_v58  ;;  %v4146_v34 = vpack.c.bf16 %v11484_v63, %v11483_v6  ;;  %v8727_v59 = vmul.f32 0.5, %v8615_v52  ;;  %5834 = vtanh.f32 %v2704_v27  ;;  %11487 = vst [vmem:[#allocation168_spill] sm:$0xff] %v8744_v42  ;;  %v11491_v63 = vld [vmem:[#allocation104_spill] sm:$0xff]  ;;  %v8760_v10 = vpop.f32.mrf.mxu1 }
 0x2d1   :  { %v2073_v7 = vmul.f32 0.044715, %v1441_v18  ;;  %v8731_v9 = vadd.f32 %v8381_v5, %v6380_v12  ;;  %v1755_v31 = vmul.f32 0.7978846, %v655_v40  ;;  %v1758_v24 = vmul.f32 0.7978846, %v8651_v17  ;;  %v8766_v36 = vpop.f32.mrf.mxu0 }
 0x2d2   :  { %v2392_v50 = vadd.f32 1.0, %v2076_v15  ;;  %v1443_v57 = vmul.f32 %v8709_v30, %v8709_v30  ;;  %4634 = vmatmul.mubr.bf16.gmra.mxu0 %v4146_v34  ;;  %v8738_v2 = vmul.f32 0.5, %v655_v40  ;;  %v1757_v52 = vmul.f32 0.7978846, %v1086_v48  ;;  %v11492_v34 = vld [vmem:[#allocation108_spill] sm:$0xff]  ;;  %11493 = vst [vmem:[#allocation104_spill] sm:$0xff] %v8760_v10  ;;  %v8776_v10 = vpop.f32.mrf.mxu1 }
 0x2d3   :  { %v1445_v38 = vmul.f32 %v8716_v46, %v8716_v46  ;;  %v1446_v5 = vmul.f32 %v8720_v0, %v8720_v0  ;;  %v8746_v44 = vpop.eup %5820  ;;  %v2387_v39 = vadd.f32 1.0, %v2071_v13  ;;  %v8748_v4 = vmul.f32 0.5, %v1086_v48  ;;  %11498 = vst [vmem:[#allocation108_spill] sm:$0xff] %v8766_v36 }
 0x2d4   :  { %11486 = vst [vmem:[#allocation105_spill] sm:$0xff] %v8738_v2  ;;  %11488 = vst [vmem:[#allocation169_spill] sm:$0xff] %v8746_v44  ;;  %v2706_v58 = vmul.f32 %v2390_v25, %v1758_v24  ;;  %v1760_v27 = vmul.f32 0.7978846, %v8673_v29  ;;  %v8751_v18 = vpop.eup %5822  ;;  %v2389_v40 = vadd.f32 1.0, %v2073_v7  ;;  %v8754_v15 = vmul.f32 0.5, %v8651_v17 }
 0x2d5   :  { %11489 = vst [vmem:[#allocation170_spill] sm:$0xff] %v8748_v4  ;;  %11490 = vst [vmem:[#allocation171_spill] sm:$0xff] %v8751_v18  ;;  %v1448_v6 = vmul.f32 %v8731_v9, %v8731_v9  ;;  %v4148_v2 = vpack.c.bf16 %v11492_v34, %v11491_v63  ;;  %v5825_v13 = vpop.eup %5824  ;;  %v2075_v4 = vmul.f32 0.044715, %v1443_v57  ;;  %v11494_v25 = vld [vmem:[#allocation112_spill] sm:$0xff]  ;;  %v3559_v32 = vadd.f32 1.0, %v11495_v37 }
 0x2d6   :  { %v2708_v48 = vmul.f32 %v2392_v50, %v1760_v27  ;;  %v3555_v24 = vadd.f32 1.0, %v11494_v25  ;;  %v2077_v28 = vmul.f32 0.044715, %v1445_v38  ;;  %v2078_v7 = vmul.f32 0.044715, %v1446_v5  ;;  %v11496_v17 = vld [vmem:[#allocation115_spill] sm:$0xff] }
 0x2d7   :  { %4986 = vmatmul.mubr.bf16.gmra.mxu1 %v4148_v2  ;;  %v3557_v18 = vadd.f32 1.0, %v11496_v17  ;;  %v11497_v44 = vld [vmem:[#allocation121_spill] sm:$0xff]  ;;  %v5827_v42 = vpop.eup %5826  ;;  %5836 = vtanh.f32 %v2706_v58  ;;  %v8770_v63 = vadd.f32 %v8420_v1, %v6377_v11  ;;  %v11499_v50 = vld [vmem:[#allocation100_spill] sm:$0xff]  ;;  %v11500_v27 = vld [vmem:[#allocation107_spill] sm:$0xff]  ;;  %v3646_v37 = vadd.f32 1.0, %v5825_v13  ;;  %v8782_v13 = vpop.f32.mrf.mxu0 }
 0x2d8   :  { %v3561_v61 = vadd.f32 1.0, %v11497_v44  ;;  %v3871_v57 = vmul.f32 %v3555_v24, %v11499_v50  ;;  %v3875_v34 = vmul.f32 %v3559_v32, %v11500_v27  ;;  %v2080_v38 = vmul.f32 0.044715, %v1448_v6  ;;  %v11501_v5 = vld [vmem:[#allocation102_spill] sm:$0xff]  ;;  %v11502_v25 = vld [vmem:[#allocation109_spill] sm:$0xff] }
 0x2d9   :  { %v3873_v2 = vmul.f32 %v3557_v18, %v11501_v5  ;;  %v2703_v44 = vmul.f32 %v2387_v39, %v1755_v31  ;;  %5838 = vtanh.f32 %v2708_v48  ;;  %v2391_v36 = vadd.f32 1.0, %v2075_v4 }
 0x2da   :  { %v3877_v17 = vmul.f32 %v3561_v61, %v11502_v25  ;;  %v4151_v58 = vpack.c.bf16 %v3875_v34, %v3871_v57  ;;  %v8778_v55 = vpop.eup %5828  ;;  %v3648_v1 = vadd.f32 1.0, %v5827_v42  ;;  %v2394_v47 = vadd.f32 1.0, %v2078_v7 }
 0x2db   :  { %11503 = vst [vmem:[#allocation112_spill] sm:$0xff] %v8778_v55  ;;  %v665_v24 = vadd.f32 %v8395_v22, %v6479_v45  ;;  %v5831_v6 = vpop.eup %5830  ;;  %v2705_v18 = vmul.f32 %v2389_v40, %v1757_v52  ;;  %v1759_v61 = vmul.f32 0.7978846, %v8709_v30  ;;  %v2393_v50 = vadd.f32 1.0, %v2077_v28  ;;  %v8795_v52 = vpop.f32.mrf.mxu1  ;;  %v11530_v55 = vld [vmem:[#allocation122_spill] sm:$0xff] }
 0x2dc   :  { %v4153_v32 = vpack.c.bf16 %v3877_v17, %v3873_v2  ;;  %v1450_v31 = vmul.f32 %v8770_v63, %v8770_v63  ;;  %4641 = vmatprep.mubr.bf16.mxu0 %v4151_v58  ;;  %v8787_v39 = vpop.eup %5832  ;;  %v8790_v42 = vmul.f32 0.5, %v8673_v29  ;;  %v1762_v4 = vmul.f32 0.7978846, %v8720_v0 }
 0x2dd   :  { %11504 = vst [vmem:[#allocation119_spill] sm:$0xff] %v8787_v39  ;;  %v2396_v22 = vadd.f32 1.0, %v2080_v38  ;;  %v1096_v48 = vadd.f32 %v8408_v62, %v6486_v51  ;;  %v5835_v40 = vpop.eup %5834  ;;  %v8798_v28 = vmul.f32 %v3646_v37, %v8619_v20  ;;  %5840 = vtanh.f32 %v2703_v44  ;;  %v8802_v38 = vpop.f32.mrf.mxu0 }
 0x2de   :  { %4993 = vmatprep.mubr.bf16.mxu1 %v4153_v32  ;;  %v2707_v7 = vmul.f32 %v2391_v36, %v1759_v61  ;;  %v1761_v57 = vmul.f32 0.7978846, %v8716_v46  ;;  %v3650_v27 = vadd.f32 1.0, %v5831_v6  ;;  %v2710_v29 = vmul.f32 %v2394_v47, %v1762_v4  ;;  %v8810_v44 = vpop.f32.mrf.mxu1 }
 0x2df   :  { %11505 = vst [vmem:[#allocation115_spill] sm:$0xff] %v8798_v28  ;;  %v1764_v34 = vmul.f32 0.7978846, %v8731_v9  ;;  %v1447_v5 = vmul.f32 %v665_v24, %v665_v24  ;;  %v8805_v62 = vmul.f32 %v3648_v1, %v8667_v16  ;;  %5842 = vtanh.f32 %v2705_v18  ;;  %v8827_v6 = vpop.f32.mrf.mxu0 }
 0x2e0   :  { %v2709_v2 = vmul.f32 %v2393_v50, %v1761_v57  ;;  %v2082_v25 = vmul.f32 0.044715, %v1450_v31  ;;  %v3652_v17 = vadd.f32 1.0, %v5835_v40  ;;  %v8808_v20 = vmul.f32 0.5, %v8709_v30  ;;  %v8843_v50 = vpop.f32.mrf.mxu1 }
 0x2e1   :  { %11506 = vst [vmem:[#allocation121_spill] sm:$0xff] %v8805_v62  ;;  %v2712_v36 = vmul.f32 %v2396_v22, %v1764_v34  ;;  %v1449_v37 = vmul.f32 %v1096_v48, %v1096_v48  ;;  %5844 = vtanh.f32 %v2707_v7  ;;  %v8813_v47 = vmul.f32 0.5, %v8716_v46 }
 0x2e2   :  { %11507 = vst [vmem:[#allocation100_spill] sm:$0xff] %v8808_v20  ;;  %v1098_v58 = vadd.f32 %v8426_v53, %v6380_v12  ;;  %v8819_v16 = vadd.f32 %v8438_v49, %v6479_v45  ;;  %v8822_v1 = vmul.f32 %v3650_v27, %v8700_v3  ;;  %v8825_v30 = vmul.f32 0.5, %v8720_v0 }
 0x2e3   :  { %11508 = vst [vmem:[#allocation107_spill] sm:$0xff] %v8813_v47  ;;  %5846 = vtanh.f32 %v2710_v29  ;;  %v2079_v32 = vmul.f32 0.044715, %v1447_v5  ;;  %v8830_v46 = vmul.f32 0.5, %v8731_v9  ;;  %v2398_v18 = vadd.f32 1.0, %v2082_v25 }
 0x2e4   :  { %11509 = vst [vmem:[#allocation102_spill] sm:$0xff] %v8822_v1  ;;  %5848 = vtanh.f32 %v2709_v2  ;;  %v8834_v53 = vadd.f32 %v8445_v43, %v6486_v51  ;;  %v5837_v49 = vpop.eup %5836  ;;  %v8837_v3 = vmul.f32 %v3652_v17, %v8727_v59  ;;  %v2081_v0 = vmul.f32 0.044715, %v1449_v37  ;;  %v11511_v43 = vld [vmem:[#allocation69_spill] sm:$0xff]  ;;  %v11519_v1 = vld [vmem:[#allocation120_spill] sm:$0xff] }
 0x2e5   :  { %5850 = vtanh.f32 %v2712_v36  ;;  %v8841_v61 = vadd.f32 %v8462_v35, %v6377_v11  ;;  %v1766_v9 = vmul.f32 0.7978846, %v8770_v63  ;;  %v1452_v31 = vmul.f32 %v1098_v58, %v1098_v58  ;;  %v8854_v35 = vpop.f32.mrf.mxu0 }
 0x2e6   :  { %11510 = vst [vmem:[#allocation109_spill] sm:$0xff] %v8837_v3  ;;  %v1451_v4 = vmul.f32 %v8819_v16, %v8819_v16  ;;  %v8850_v22 = vadd.f32 %v11511_v43, %v6380_v12  ;;  %v5839_v59 = vpop.eup %5838  ;;  %v1763_v40 = vmul.f32 0.7978846, %v665_v24  ;;  %v2395_v7 = vadd.f32 1.0, %v2079_v32  ;;  %v11518_v3 = vld [vmem:[#allocation114_spill] sm:$0xff] }
 0x2e7   :  { %v8852_v57 = vmul.f32 0.5, %v665_v24  ;;  %v1765_v27 = vmul.f32 0.7978846, %v1096_v48  ;;  %v3654_v29 = vadd.f32 1.0, %v5837_v49  ;;  %v8856_v34 = vmul.f32 0.5, %v1096_v48  ;;  %v8865_v24 = vpop.f32.mrf.mxu1  ;;  %v8877_v20 = vpop.f32.mrf.mxu0 }
 0x2e8   :  { %v2714_v5 = vmul.f32 %v2398_v18, %v1766_v9  ;;  %v1453_v2 = vmul.f32 %v8834_v53, %v8834_v53  ;;  %v2397_v25 = vadd.f32 1.0, %v2081_v0  ;;  %v8861_v17 = vmul.f32 0.5, %v8770_v63  ;;  %11514 = vst [vmem:[#allocation173_spill] sm:$0xff] %v8865_v24  ;;  %v11516_v0 = vld [vmem:[#allocation111_spill] sm:$0xff]  ;;  %v11517_v63 = vld [vmem:[#allocation117_spill] sm:$0xff] }
 0x2e9   :  { %11512 = vst [vmem:[#allocation69_spill] sm:$0xff] %v8852_v57  ;;  %11513 = vst [vmem:[#allocation172_spill] sm:$0xff] %v8856_v34  ;;  %v1768_v36 = vmul.f32 0.7978846, %v1098_v58  ;;  %v1454_v37 = vmul.f32 %v8841_v61, %v8841_v61  ;;  %v3656_v32 = vadd.f32 1.0, %v5839_v59  ;;  %v1456_v48 = vmul.f32 %v8850_v22, %v8850_v22  ;;  %v8896_v24 = vpop.f32.mrf.mxu0 }
 0x2ea   :  { %v2084_v43 = vmul.f32 0.044715, %v1452_v31  ;;  %v2083_v57 = vmul.f32 0.044715, %v1451_v4  ;;  %v8869_v18 = vpop.eup %5840  ;;  %v2711_v49 = vmul.f32 %v2395_v7, %v1763_v40  ;;  %v8871_v9 = vmul.f32 0.5, %v1098_v58  ;;  %v11521_v4 = vld [vmem:[#allocation124_spill] sm:$0xff] }
 0x2eb   :  { %11515 = vst [vmem:[#allocation174_spill] sm:$0xff] %v8869_v18  ;;  %v4150_v34 = vpack.c.bf16 %v11517_v63, %v11516_v0  ;;  %v4152_v47 = vpack.c.bf16 %v11519_v1, %v11518_v3  ;;  %v8880_v59 = vmul.f32 %v3654_v29, %v8754_v15  ;;  %5852 = vtanh.f32 %v2714_v5  ;;  %v11523_v58 = vld [vmem:[#allocation130_spill] sm:$0xff]  ;;  %v11524_v0 = vld [vmem:[#allocation128_spill] sm:$0xff]  ;;  %v8888_v3 = vpop.f32.mrf.mxu1 }
 0x2ec   :  { %v2085_v31 = vmul.f32 0.044715, %v1453_v2  ;;  %v3563_v62 = vadd.f32 1.0, %v11521_v4  ;;  %v8883_v28 = vpop.eup %5842  ;;  %v2086_v40 = vmul.f32 0.044715, %v1454_v37  ;;  %v3567_v7 = vadd.f32 1.0, %v11523_v58 }
 0x2ed   :  { %11520 = vst [vmem:[#allocation111_spill] sm:$0xff] %v8880_v59  ;;  %11522 = vst [vmem:[#allocation117_spill] sm:$0xff] %v8883_v28  ;;  %4642 = vmatmul.mubr.bf16.gmra.mxu0 %v4150_v34  ;;  %4994 = vmatmul.mubr.bf16.gmra.mxu1 %v4152_v47  ;;  %v3565_v63 = vadd.f32 1.0, %v11524_v0  ;;  %v11525_v18 = vld [vmem:[#allocation134_spill] sm:$0xff]  ;;  %v2713_v39 = vmul.f32 %v2397_v25, %v1765_v27  ;;  %v2400_v15 = vadd.f32 1.0, %v2084_v43  ;;  %v2399_v29 = vadd.f32 1.0, %v2083_v57 }
 0x2ee   :  { %v3569_v1 = vadd.f32 1.0, %v11525_v18  ;;  %v2088_v5 = vmul.f32 0.044715, %v1456_v48  ;;  %v8890_v2 = vpop.eup %5844  ;;  %v11527_v4 = vld [vmem:[#allocation113_spill] sm:$0xff]  ;;  %v11528_v28 = vld [vmem:[#allocation118_spill] sm:$0xff]  ;;  %v11529_v34 = vld [vmem:[#allocation116_spill] sm:$0xff]  ;;  %v8899_v18 = vmul.f32 %v3656_v32, %v8790_v42  ;;  %v677_v25 = vadd.f32 %v8507_v56, %v6377_v11 }
 0x2ef   :  { %11526 = vst [vmem:[#allocation114_spill] sm:$0xff] %v8890_v2  ;;  %v3879_v59 = vmul.f32 %v3563_v62, %v11527_v4  ;;  %v3883_v37 = vmul.f32 %v3567_v7, %v11528_v28  ;;  %v3881_v47 = vmul.f32 %v3565_v63, %v11529_v34  ;;  %v1767_v27 = vmul.f32 0.7978846, %v8819_v16  ;;  %v11533_v28 = vld [vmem:[#allocation76_spill] sm:$0xff]  ;;  %v8910_v63 = vpop.f32.mrf.mxu1 }
 0x2f0   :  { %v3885_v58 = vmul.f32 %v3569_v1, %v11530_v55  ;;  %v5847_v0 = vpop.eup %5846  ;;  %11531 = vst [vmem:[#allocation120_spill] sm:$0xff] %v8899_v18  ;;  %v2401_v57 = vadd.f32 1.0, %v2085_v31  ;;  %v2402_v62 = vadd.f32 1.0, %v2086_v40  ;;  %v8908_v48 = vadd.f32 %v11533_v28, %v6380_v12  ;;  %v11534_v40 = vld [vmem:[#allocation31_spill] sm:$0xff]  ;;  %v8916_v28 = vpop.f32.mrf.mxu0 }
 0x2f1   :  { %v8904_v43 = vpop.eup %5848  ;;  %v4155_v55 = vpack.c.bf16 %v3883_v37, %v3879_v59  ;;  %5854 = vtanh.f32 %v2711_v49  ;;  %v2716_v42 = vmul.f32 %v2400_v15, %v1768_v36  ;;  %v1769_v32 = vmul.f32 0.7978846, %v8834_v53 }
 0x2f2   :  { %11532 = vst [vmem:[#allocation124_spill] sm:$0xff] %v8904_v43  ;;  %v4157_v7 = vpack.c.bf16 %v3885_v58, %v3881_v47  ;;  %v5851_v1 = vpop.eup %5850  ;;  %v2404_v31 = vadd.f32 1.0, %v2088_v5  ;;  %v3658_v4 = vadd.f32 1.0, %v5847_v0  ;;  %v2715_v34 = vmul.f32 %v2399_v29, %v1767_v27  ;;  %v8924_v47 = vpop.f32.mrf.mxu1 }
 0x2f3   :  { %v1770_v56 = vmul.f32 0.7978846, %v8841_v61  ;;  %v675_v18 = vadd.f32 %v11534_v40, %v6479_v45  ;;  %4649 = vmatprep.mubr.bf16.mxu0 %v4155_v55  ;;  %5856 = vtanh.f32 %v2713_v39  ;;  %v2717_v59 = vmul.f32 %v2401_v57, %v1769_v32  ;;  %v11537_v39 = vld [vmem:[#allocation164_spill] sm:$0xff]  ;;  %v8937_v55 = vpop.f32.mrf.mxu0 }
 0x2f4   :  { %5001 = vmatprep.mubr.bf16.mxu1 %v4157_v7  ;;  %v1772_v37 = vmul.f32 0.7978846, %v8850_v22  ;;  %v1458_v49 = vmul.f32 %v677_v25, %v677_v25  ;;  %v3660_v36 = vadd.f32 1.0, %v5851_v1  ;;  %v8920_v15 = vmul.f32 0.5, %v8819_v16  ;;  %11539 = vst [vmem:[#allocation113_spill] sm:$0xff] %v8937_v55  ;;  %v11540_v1 = vld [vmem:[#allocation85_spill] sm:$0xff] }
 0x2f5   :  { %v2718_v5 = vmul.f32 %v2402_v62, %v1770_v56  ;;  %v1460_v29 = vmul.f32 %v8908_v48, %v8908_v48  ;;  %5858 = vtanh.f32 %v2716_v42  ;;  %v8927_v58 = vmul.f32 0.5, %v8834_v53 }
 0x2f6   :  { %11535 = vst [vmem:[#allocation130_spill] sm:$0xff] %v8920_v15  ;;  %v2720_v0 = vmul.f32 %v2404_v31, %v1772_v37  ;;  %v1106_v27 = vadd.f32 %v11537_v39, %v6486_v51  ;;  %v8932_v57 = vmul.f32 %v3658_v4, %v8825_v30  ;;  %5860 = vtanh.f32 %v2715_v34  ;;  %v8953_v4 = vpop.f32.mrf.mxu1  ;;  %v11552_v15 = vld [vmem:[#allocation139_spill] sm:$0xff] }
 0x2f7   :  { %11536 = vst [vmem:[#allocation128_spill] sm:$0xff] %v8927_v58  ;;  %v8935_v16 = vmul.f32 0.5, %v8841_v61  ;;  %v1455_v62 = vmul.f32 %v675_v18, %v675_v18  ;;  %5862 = vtanh.f32 %v2717_v59  ;;  %v8940_v7 = vmul.f32 0.5, %v8850_v22  ;;  %11542 = vst [vmem:[#allocation116_spill] sm:$0xff] %v8953_v4  ;;  %v11556_v4 = vld [vmem:[#allocation141_spill] sm:$0xff] }
 0x2f8   :  { %11538 = vst [vmem:[#allocation134_spill] sm:$0xff] %v8932_v57  ;;  %v2090_v53 = vmul.f32 0.044715, %v1458_v49  ;;  %v8944_v42 = vadd.f32 %v11540_v1, %v6479_v45  ;;  %v5853_v32 = vpop.eup %5852  ;;  %v8947_v30 = vmul.f32 %v3660_v36, %v8830_v46  ;;  %5864 = vtanh.f32 %v2718_v5  ;;  %v8965_v49 = vpop.f32.mrf.mxu0  ;;  %v11551_v57 = vld [vmem:[#allocation132_spill] sm:$0xff] }
 0x2f9   :  { %v2092_v31 = vmul.f32 0.044715, %v1460_v29  ;;  %v8951_v61 = vadd.f32 %v8534_v33, %v6486_v51  ;;  %5866 = vtanh.f32 %v2720_v0  ;;  %v1771_v22 = vmul.f32 0.7978846, %v675_v18  ;;  %11544 = vst [vmem:[#allocation76_spill] sm:$0xff] %v8965_v49 }
 0x2fa   :  { %11541 = vst [vmem:[#allocation118_spill] sm:$0xff] %v8947_v30  ;;  %v1457_v34 = vmul.f32 %v1106_v27, %v1106_v27  ;;  %v8957_v56 = vadd.f32 %v8544_v41, %v6377_v11  ;;  %v2087_v40 = vmul.f32 0.044715, %v1455_v62  ;;  %v8959_v59 = vmul.f32 0.5, %v675_v18  ;;  %v8975_v62 = vpop.f32.mrf.mxu1 }
 0x2fb   :  { %v1773_v46 = vmul.f32 0.7978846, %v1106_v27  ;;  %v8963_v37 = vadd.f32 %v8555_v23, %v6380_v12  ;;  %v3662_v33 = vadd.f32 1.0, %v5853_v32  ;;  %v8967_v36 = vmul.f32 0.5, %v1106_v27  ;;  %11546 = vst [vmem:[#allocation164_spill] sm:$0xff] %v8975_v62  ;;  %v11547_v32 = vld [vmem:[#allocation123_spill] sm:$0xff] }
 0x2fc   :  { %11543 = vst [vmem:[#allocation122_spill] sm:$0xff] %v8959_v59  ;;  %v2406_v5 = vadd.f32 1.0, %v2090_v53  ;;  %v1459_v29 = vmul.f32 %v8944_v42, %v8944_v42  ;;  %v1774_v0 = vmul.f32 0.7978846, %v677_v25  ;;  %v8971_v41 = vmul.f32 0.5, %v677_v25  ;;  %v11548_v53 = vld [vmem:[#allocation131_spill] sm:$0xff]  ;;  %v9001_v55 = vpop.f32.mrf.mxu1 }
 0x2fd   :  { %11545 = vst [vmem:[#allocation31_spill] sm:$0xff] %v8967_v36  ;;  %v2408_v39 = vadd.f32 1.0, %v2092_v31  ;;  %v1461_v18 = vmul.f32 %v8951_v61, %v8951_v61  ;;  %v2089_v23 = vmul.f32 0.044715, %v1457_v34  ;;  %v1776_v1 = vmul.f32 0.7978846, %v8908_v48  ;;  %v8989_v34 = vpop.f32.mrf.mxu0 }
 0x2fe   :  { %v1462_v27 = vmul.f32 %v8957_v56, %v8957_v56  ;;  %v4154_v36 = vpack.c.bf16 %v11548_v53, %v11547_v32  ;;  %v8982_v59 = vpop.eup %5854  ;;  %v2403_v30 = vadd.f32 1.0, %v2087_v40  ;;  %v1464_v25 = vmul.f32 %v8963_v37, %v8963_v37  ;;  %v11550_v31 = vld [vmem:[#allocation127_spill] sm:$0xff]  ;;  %11553 = vst [vmem:[#allocation123_spill] sm:$0xff] %v8989_v34  ;;  %11558 = vst [vmem:[#allocation132_spill] sm:$0xff] %v9001_v55 }
 0x2ff   :  { %11549 = vst [vmem:[#allocation85_spill] sm:$0xff] %v8982_v59  ;;  %v4156_v58 = vpack.c.bf16 %v11551_v57, %v11550_v31  ;;  %v3571_v43 = vadd.f32 1.0, %v11552_v15  ;;  %v8992_v2 = vmul.f32 %v3662_v33, %v8861_v17  ;;  %v2722_v62 = vmul.f32 %v2406_v5, %v1774_v0  ;;  %v11557_v31 = vld [vmem:[#allocation140_spill] sm:$0xff] }
 0x300   :  { %v8995_v49 = vmul.f32 0.5, %v8908_v48  ;;  %v2091_v32 = vmul.f32 0.044715, %v1459_v29  ;;  %4650 = vmatmul.mubr.bf16.gmra.mxu0 %v4154_v36  ;;  %v8997_v40 = vpop.eup %5856  ;;  %v2724_v53 = vmul.f32 %v2408_v39, %v1776_v1  ;;  %v2093_v59 = vmul.f32 0.044715, %v1461_v18  ;;  %v11559_v48 = vld [vmem:[#allocation142_spill] sm:$0xff] }
 0x301   :  { %11554 = vst [vmem:[#allocation131_spill] sm:$0xff] %v8992_v2  ;;  %11555 = vst [vmem:[#allocation127_spill] sm:$0xff] %v8997_v40  ;;  %5002 = vmatmul.mubr.bf16.gmra.mxu1 %v4156_v58  ;;  %v3575_v57 = vadd.f32 1.0, %v11556_v4  ;;  %v3573_v15 = vadd.f32 1.0, %v11557_v31  ;;  %v2405_v34 = vadd.f32 1.0, %v2089_v23  ;;  %v9005_v33 = vadd.f32 %v8604_v60, %v6377_v11  ;;  %v11560_v39 = vld [vmem:[#allocation125_spill] sm:$0xff]  ;;  %v9010_v4 = vpop.f32.mrf.mxu0 }
 0x302   :  { %v2094_v17 = vmul.f32 0.044715, %v1462_v27  ;;  %v3577_v5 = vadd.f32 1.0, %v11559_v48  ;;  %v5859_v36 = vpop.eup %5858  ;;  %v2719_v29 = vmul.f32 %v2403_v30, %v1771_v22  ;;  %v2096_v0 = vmul.f32 0.044715, %v1464_v25  ;;  %v11561_v58 = vld [vmem:[#allocation129_spill] sm:$0xff]  ;;  %v9022_v22 = vpop.f32.mrf.mxu1 }
 0x303   :  { %v3887_v18 = vmul.f32 %v3571_v43, %v11560_v39  ;;  %v3891_v1 = vmul.f32 %v3575_v57, %v11561_v58  ;;  %v9012_v31 = vpop.eup %5860  ;;  %5868 = vtanh.f32 %v2722_v62  ;;  %v2407_v23 = vadd.f32 1.0, %v2091_v32  ;;  %v11563_v27 = vld [vmem:[#allocation126_spill] sm:$0xff]  ;;  %v11564_v40 = vld [vmem:[#allocation133_spill] sm:$0xff] }
 0x304   :  { %11562 = vst [vmem:[#allocation139_spill] sm:$0xff] %v9012_v31  ;;  %v3889_v2 = vmul.f32 %v3573_v15, %v11563_v27  ;;  %v3893_v60 = vmul.f32 %v3577_v5, %v11564_v40  ;;  %v9016_v55 = vpop.eup %5862  ;;  %5870 = vtanh.f32 %v2724_v53  ;;  %v2409_v48 = vadd.f32 1.0, %v2093_v59 }
 0x305   :  { %11565 = vst [vmem:[#allocation141_spill] sm:$0xff] %v9016_v55  ;;  %v9020_v30 = vadd.f32 %v8617_v26, %v6380_v12  ;;  %v4159_v43 = vpack.c.bf16 %v3891_v1, %v3887_v18  ;;  %v5865_v25 = vpop.eup %5864  ;;  %v1775_v57 = vmul.f32 0.7978846, %v8944_v42  ;;  %v2410_v62 = vadd.f32 1.0, %v2094_v17  ;;  %v9028_v26 = vpop.f32.mrf.mxu0  ;;  %v11568_v17 = vld [vmem:[#allocation96_spill] sm:$0xff] }
 0x306   :  { %v1466_v32 = vmul.f32 %v9005_v33, %v9005_v33  ;;  %v4161_v15 = vpack.c.bf16 %v3893_v60, %v3889_v2  ;;  %v5867_v40 = vpop.eup %5866  ;;  %v3664_v5 = vadd.f32 1.0, %v5859_v36  ;;  %v2721_v39 = vmul.f32 %v2405_v34, %v1773_v46  ;;  %11566 = vst [vmem:[#allocation140_spill] sm:$0xff] %v9028_v26  ;;  %v9039_v36 = vpop.f32.mrf.mxu1  ;;  %v11590_v26 = vld [vmem:[#allocation15_spill] sm:$0xff] }
 0x307   :  { %v1777_v59 = vmul.f32 0.7978846, %v8951_v61  ;;  %v2412_v53 = vadd.f32 1.0, %v2096_v0  ;;  %4657 = vmatprep.mubr.bf16.mxu0 %v4159_v43  ;;  %v2723_v18 = vmul.f32 %v2407_v23, %v1775_v57  ;;  %v9031_v58 = vmul.f32 0.5, %v8944_v42  ;;  %11569 = vst [vmem:[#allocation125_spill] sm:$0xff] %v9039_v36  ;;  %v11570_v42 = vld [vmem:[#allocation165_spill] sm:$0xff] }
 0x308   :  { %v1778_v1 = vmul.f32 0.7978846, %v8957_v56  ;;  %v685_v27 = vadd.f32 %v11568_v17, %v6479_v45  ;;  %5009 = vmatprep.mubr.bf16.mxu1 %v4161_v15  ;;  %v3666_v2 = vadd.f32 1.0, %v5865_v25  ;;  %v1780_v46 = vmul.f32 0.7978846, %v8963_v37 }
 0x309   :  { %11567 = vst [vmem:[#allocation142_spill] sm:$0xff] %v9031_v58  ;;  %v2725_v60 = vmul.f32 %v2409_v48, %v1777_v59  ;;  %v1468_v34 = vmul.f32 %v9020_v30, %v9020_v30  ;;  %5872 = vtanh.f32 %v2719_v29  ;;  %v1116_v23 = vadd.f32 %v11570_v42, %v6486_v51  ;;  %v9046_v48 = vpop.f32.mrf.mxu0  ;;  %v11574_v29 = vld [vmem:[#allocation55_spill] sm:$0xff] }
 0x30a   :  { %v2726_v0 = vmul.f32 %v2410_v62, %v1778_v1  ;;  %v2098_v43 = vmul.f32 0.044715, %v1466_v32  ;;  %v9044_v57 = vmul.f32 %v3664_v5, %v8871_v9  ;;  %v3668_v17 = vadd.f32 1.0, %v5867_v40  ;;  %11572 = vst [vmem:[#allocation126_spill] sm:$0xff] %v9046_v48  ;;  %v9061_v40 = vpop.f32.mrf.mxu1  ;;  %v11584_v58 = vld [vmem:[#allocation135_spill] sm:$0xff] }
 0x30b   :  { %5874 = vtanh.f32 %v2721_v39  ;;  %v2728_v25 = vmul.f32 %v2412_v53, %v1780_v46  ;;  %v9049_v15 = vmul.f32 0.5, %v8951_v61  ;;  %v1463_v59 = vmul.f32 %v685_v27, %v685_v27  ;;  %11576 = vst [vmem:[#allocation165_spill] sm:$0xff] %v9061_v40  ;;  %v11577_v61 = vld [vmem:[#allocation101_spill] sm:$0xff] }
 0x30c   :  { %11571 = vst [vmem:[#allocation129_spill] sm:$0xff] %v9044_v57  ;;  %5876 = vtanh.f32 %v2723_v18  ;;  %v9053_v62 = vadd.f32 %v11574_v29, %v6479_v45  ;;  %v9056_v1 = vmul.f32 %v3666_v2, %v8935_v16  ;;  %v9059_v9 = vmul.f32 0.5, %v8957_v56  ;;  %v9077_v2 = vpop.f32.mrf.mxu0  ;;  %v11586_v57 = vld [vmem:[#allocation137_spill] sm:$0xff] }
 0x30d   :  { %11573 = vst [vmem:[#allocation133_spill] sm:$0xff] %v9049_v15  ;;  %5878 = vtanh.f32 %v2725_v60  ;;  %v2100_v32 = vmul.f32 0.044715, %v1468_v34  ;;  %v1465_v5 = vmul.f32 %v1116_v23, %v1116_v23  ;;  %v2414_v39 = vadd.f32 1.0, %v2098_v43  ;;  %11579 = vst [vmem:[#allocation101_spill] sm:$0xff] %v9077_v2  ;;  %v11589_v2 = vld [vmem:[#allocation148_spill] sm:$0xff] }
 0x30e   :  { %11575 = vst [vmem:[#allocation96_spill] sm:$0xff] %v9056_v1  ;;  %5880 = vtanh.f32 %v2726_v0  ;;  %v9065_v53 = vadd.f32 %v11577_v61, %v6377_v11  ;;  %v9068_v18 = vmul.f32 %v3668_v17, %v8940_v7  ;;  %v9071_v16 = vmul.f32 0.5, %v8963_v37  ;;  %v11580_v0 = vld [vmem:[#allocation94_spill] sm:$0xff]  ;;  %v9101_v31 = vpop.f32.mrf.mxu0 }
 0x30f   :  { %5882 = vtanh.f32 %v2728_v25  ;;  %v9075_v56 = vadd.f32 %v8669_v19, %v6380_v12  ;;  %v2095_v60 = vmul.f32 0.044715, %v1463_v59  ;;  %v1782_v46 = vmul.f32 0.7978846, %v9005_v33  ;;  %v9088_v19 = vpop.f32.mrf.mxu1  ;;  %11588 = vst [vmem:[#allocation135_spill] sm:$0xff] %v9101_v31  ;;  %v11593_v31 = vld [vmem:[#allocation136_spill] sm:$0xff] }
 0x310   :  { %11578 = vst [vmem:[#allocation55_spill] sm:$0xff] %v9068_v18  ;;  %v1467_v34 = vmul.f32 %v9053_v62, %v9053_v62  ;;  %v9084_v7 = vadd.f32 %v11580_v0, %v6486_v51  ;;  %v5869_v42 = vpop.eup %5868  ;;  %v1779_v37 = vmul.f32 0.7978846, %v685_v27  ;;  %v9086_v43 = vmul.f32 0.5, %v685_v27  ;;  %11582 = vst [vmem:[#allocation175_spill] sm:$0xff] %v9088_v19  ;;  %v11585_v27 = vld [vmem:[#allocation143_spill] sm:$0xff] }
 0x311   :  { %v1781_v17 = vmul.f32 0.7978846, %v1116_v23  ;;  %v2416_v25 = vadd.f32 1.0, %v2100_v32  ;;  %v5871_v29 = vpop.eup %5870  ;;  %v2097_v61 = vmul.f32 0.044715, %v1465_v5  ;;  %v9090_v59 = vmul.f32 0.5, %v1116_v23 }
 0x312   :  { %11581 = vst [vmem:[#allocation94_spill] sm:$0xff] %v9086_v43  ;;  %v2730_v18 = vmul.f32 %v2414_v39, %v1782_v46  ;;  %v1470_v1 = vmul.f32 %v9065_v53, %v9065_v53  ;;  %v1784_v15 = vmul.f32 0.7978846, %v9020_v30  ;;  %v1472_v0 = vmul.f32 %v9075_v56, %v9075_v56  ;;  %v11587_v32 = vld [vmem:[#allocation145_spill] sm:$0xff] }
 0x313   :  { %11583 = vst [vmem:[#allocation176_spill] sm:$0xff] %v9090_v59  ;;  %v4158_v43 = vpack.c.bf16 %v11585_v27, %v11584_v58  ;;  %v4160_v55 = vpack.c.bf16 %v11587_v32, %v11586_v57  ;;  %v3670_v5 = vadd.f32 1.0, %v5869_v42  ;;  %v2411_v23 = vadd.f32 1.0, %v2095_v60  ;;  %v9107_v58 = vpop.f32.mrf.mxu1  ;;  %v11591_v32 = vld [vmem:[#allocation152_spill] sm:$0xff] }
 0x314   :  { %v2099_v59 = vmul.f32 0.044715, %v1467_v34  ;;  %v1469_v39 = vmul.f32 %v9084_v7, %v9084_v7  ;;  %v3672_v46 = vadd.f32 1.0, %v5871_v29  ;;  %v2732_v19 = vmul.f32 %v2416_v25, %v1784_v15  ;;  %v11594_v29 = vld [vmem:[#allocation144_spill] sm:$0xff]  ;;  %v9115_v25 = vpop.f32.mrf.mxu0 }
 0x315   :  { %4658 = vmatmul.mubr.bf16.gmra.mxu0 %v4158_v43  ;;  %5010 = vmatmul.mubr.bf16.gmra.mxu1 %v4160_v55  ;;  %v3579_v36 = vadd.f32 1.0, %v11589_v2  ;;  %v3583_v40 = vadd.f32 1.0, %v11590_v26  ;;  %v2413_v27 = vadd.f32 1.0, %v2097_v61  ;;  %5884 = vtanh.f32 %v2730_v18  ;;  %v11595_v43 = vld [vmem:[#allocation17_spill] sm:$0xff] }
 0x316   :  { %v2102_v57 = vmul.f32 0.044715, %v1470_v1  ;;  %v3581_v42 = vadd.f32 1.0, %v11591_v32  ;;  %v9110_v60 = vpop.eup %5872  ;;  %v2104_v34 = vmul.f32 0.044715, %v1472_v0  ;;  %v3585_v55 = vadd.f32 1.0, %v11595_v43  ;;  %v9130_v43 = vpop.f32.mrf.mxu1 }
 0x317   :  { %11592 = vst [vmem:[#allocation143_spill] sm:$0xff] %v9110_v60  ;;  %v3895_v48 = vmul.f32 %v3579_v36, %v11593_v31  ;;  %v3899_v15 = vmul.f32 %v3583_v40, %v11594_v29  ;;  %v9120_v26 = vmul.f32 0.5, %v9005_v33  ;;  %v2415_v18 = vadd.f32 1.0, %v2099_v59  ;;  %v11598_v36 = vld [vmem:[#allocation138_spill] sm:$0xff]  ;;  %11600 = vst [vmem:[#allocation148_spill] sm:$0xff] %v9130_v43 }
 0x318   :  { %v9117_v2 = vpop.eup %5874  ;;  %v2101_v1 = vmul.f32 0.044715, %v1469_v39  ;;  %v9124_v61 = vadd.f32 %v8691_v14, %v6377_v11  ;;  %5886 = vtanh.f32 %v2732_v19  ;;  %v3897_v40 = vmul.f32 %v3581_v42, %v11598_v36  ;;  %v11599_v32 = vld [vmem:[#allocation146_spill] sm:$0xff] }
 0x319   :  { %11596 = vst [vmem:[#allocation137_spill] sm:$0xff] %v9117_v2  ;;  %v9126_v0 = vpop.eup %5876  ;;  %v4163_v31 = vpack.c.bf16 %v3899_v15, %v3895_v48  ;;  %v3901_v29 = vmul.f32 %v3585_v55, %v11599_v32  ;;  %v9135_v33 = vmul.f32 %v3670_v5, %v8971_v41  ;;  %v2727_v59 = vmul.f32 %v2411_v23, %v1779_v37  ;;  %v9142_v55 = vpop.f32.mrf.mxu0 }
 0x31a   :  { %11597 = vst [vmem:[#allocation145_spill] sm:$0xff] %v9126_v0  ;;  %v9132_v2 = vpop.eup %5878  ;;  %v2418_v39 = vadd.f32 1.0, %v2102_v57  ;;  %v695_v14 = vadd.f32 %v8676_v21, %v6479_v45  ;;  %v1783_v19 = vmul.f32 0.7978846, %v9053_v62  ;;  %v2420_v48 = vadd.f32 1.0, %v2104_v34  ;;  %11603 = vst [vmem:[#allocation136_spill] sm:$0xff] %v9142_v55 }
 0x31b   :  { %11601 = vst [vmem:[#allocation15_spill] sm:$0xff] %v9132_v2  ;;  %11602 = vst [vmem:[#allocation152_spill] sm:$0xff] %v9135_v33  ;;  %v5881_v60 = vpop.eup %5880  ;;  %v1126_v42 = vadd.f32 %v8685_v54, %v6486_v51  ;;  %4665 = vmatprep.mubr.bf16.mxu0 %v4163_v31  ;;  %v4165_v15 = vpack.c.bf16 %v3901_v29, %v3897_v40  ;;  %v9145_v41 = vmul.f32 %v3672_v46, %v8995_v49  ;;  %v9154_v31 = vpop.f32.mrf.mxu1  ;;  %v11626_v0 = vld [vmem:[#allocation155_spill] sm:$0xff]  ;;  %v11635_v55 = vld [vmem:[#allocation154_spill] sm:$0xff] }
 0x31c   :  { %v5883_v36 = vpop.eup %5882  ;;  %v2729_v37 = vmul.f32 %v2413_v27, %v1781_v17  ;;  %v1786_v5 = vmul.f32 0.7978846, %v9065_v53  ;;  %v1474_v21 = vmul.f32 %v9124_v61, %v9124_v61  ;;  %v9151_v23 = vmul.f32 0.5, %v9020_v30  ;;  %11605 = vst [vmem:[#allocation17_spill] sm:$0xff] %v9154_v31  ;;  %v9161_v29 = vpop.f32.mrf.mxu0 }
 0x31d   :  { %11604 = vst [vmem:[#allocation144_spill] sm:$0xff] %v9145_v41  ;;  %v2731_v57 = vmul.f32 %v2415_v18, %v1783_v19  ;;  %v2417_v34 = vadd.f32 1.0, %v2101_v1  ;;  %v1788_v54 = vmul.f32 0.7978846, %v9075_v56  ;;  %5017 = vmatprep.mubr.bf16.mxu1 %v4165_v15  ;;  %5888 = vtanh.f32 %v2727_v59  ;;  %11606 = vst [vmem:[#allocation138_spill] sm:$0xff] %v9161_v29  ;;  %v11624_v41 = vld [vmem:[#allocation153_spill] sm:$0xff] }
 0x31e   :  { %v2734_v40 = vmul.f32 %v2418_v39, %v1786_v5  ;;  %v1471_v49 = vmul.f32 %v695_v14, %v695_v14  ;;  %v9158_v17 = vadd.f32 %v8702_v8, %v6380_v12  ;;  %v3674_v46 = vadd.f32 1.0, %v5881_v60  ;;  %v9172_v60 = vpop.f32.mrf.mxu1  ;;  %v11630_v29 = vld [vmem:[#allocation23_spill] sm:$0xff] }
 0x31f   :  { %v1785_v27 = vmul.f32 0.7978846, %v9084_v7  ;;  %v2736_v32 = vmul.f32 %v2420_v48, %v1788_v54  ;;  %v1473_v30 = vmul.f32 %v1126_v42, %v1126_v42  ;;  %v3676_v18 = vadd.f32 1.0, %v5883_v36  ;;  %11609 = vst [vmem:[#allocation178_spill] sm:$0xff] %v9172_v60  ;;  %v11610_v36 = vld [vmem:[#allocation167_spill] sm:$0xff] }
 0x320   :  { %5890 = vtanh.f32 %v2729_v37  ;;  %v9164_v1 = vmul.f32 0.5, %v9053_v62  ;;  %v2106_v19 = vmul.f32 0.044715, %v1474_v21  ;;  %v9167_v39 = vmul.f32 0.5, %v9084_v7  ;;  %v9186_v21 = vpop.f32.mrf.mxu0  ;;  %v11614_v54 = vld [vmem:[#allocation99_spill] sm:$0xff] }
 0x321   :  { %5892 = vtanh.f32 %v2731_v57  ;;  %v2733_v59 = vmul.f32 %v2417_v34, %v1785_v27  ;;  %v9170_v8 = vmul.f32 0.5, %v9065_v53  ;;  %v2103_v48 = vmul.f32 0.044715, %v1471_v49  ;;  %11612 = vst [vmem:[#allocation179_spill] sm:$0xff] %v9186_v21  ;;  %v11615_v49 = vld [vmem:[#allocation168_spill] sm:$0xff]  ;;  %v11628_v60 = vld [vmem:[#allocation19_spill] sm:$0xff] }
 0x322   :  { %11607 = vst [vmem:[#allocation146_spill] sm:$0xff] %v9164_v1  ;;  %11608 = vst [vmem:[#allocation177_spill] sm:$0xff] %v9167_v39  ;;  %5894 = vtanh.f32 %v2734_v40  ;;  %v1476_v15 = vmul.f32 %v9158_v17, %v9158_v17  ;;  %v9178_v62 = vadd.f32 %v11610_v36, %v6479_v45  ;;  %v5885_v37 = vpop.eup %5884  ;;  %v9181_v5 = vmul.f32 %v3674_v46, %v9059_v9 }
 0x323   :  { %v9184_v7 = vmul.f32 0.5, %v9075_v56  ;;  %5896 = vtanh.f32 %v2736_v32  ;;  %v2105_v53 = vmul.f32 0.044715, %v1473_v30  ;;  %v9189_v57 = vmul.f32 %v3676_v18, %v9071_v16  ;;  %v9201_v32 = vpop.f32.mrf.mxu1 }
 0x324   :  { %11611 = vst [vmem:[#allocation167_spill] sm:$0xff] %v9181_v5  ;;  %v2422_v34 = vadd.f32 1.0, %v2106_v19  ;;  %v9193_v40 = vadd.f32 %v11614_v54, %v6486_v51  ;;  %v9197_v27 = vadd.f32 %v11615_v49, %v6377_v11  ;;  %5898 = vtanh.f32 %v2733_v59  ;;  %11617 = vst [vmem:[#allocation168_spill] sm:$0xff] %v9201_v32  ;;  %v11619_v59 = vld [vmem:[#allocation104_spill] sm:$0xff] }
 0x325   :  { %11613 = vst [vmem:[#allocation180_spill] sm:$0xff] %v9189_v57  ;;  %v1787_v9 = vmul.f32 0.7978846, %v695_v14  ;;  %v9199_v56 = vmul.f32 0.5, %v695_v14  ;;  %v1789_v46 = vmul.f32 0.7978846, %v1126_v42  ;;  %v5887_v30 = vpop.eup %5886  ;;  %v1475_v19 = vmul.f32 %v9178_v62, %v9178_v62  ;;  %v9212_v14 = vpop.f32.mrf.mxu0 }
 0x326   :  { %v2419_v36 = vadd.f32 1.0, %v2103_v48  ;;  %v1790_v16 = vmul.f32 0.7978846, %v9124_v61  ;;  %v2108_v18 = vmul.f32 0.044715, %v1476_v15  ;;  %v3678_v54 = vadd.f32 1.0, %v5885_v37  ;;  %v9226_v2 = vpop.f32.mrf.mxu1 }
 0x327   :  { %11616 = vst [vmem:[#allocation99_spill] sm:$0xff] %v9199_v56  ;;  %v2421_v57 = vadd.f32 1.0, %v2105_v53  ;;  %v9206_v5 = vmul.f32 0.5, %v1126_v42  ;;  %v9210_v49 = vadd.f32 %v11619_v59, %v6380_v12  ;;  %11620 = vst [vmem:[#allocation104_spill] sm:$0xff] %v9212_v14  ;;  %v9215_v39 = vmul.f32 0.5, %v9124_v61  ;;  %v11621_v53 = vld [vmem:[#allocation149_spill] sm:$0xff] }
 0x328   :  { %v2738_v56 = vmul.f32 %v2422_v34, %v1790_v16  ;;  %v1477_v48 = vmul.f32 %v9193_v40, %v9193_v40  ;;  %v1478_v15 = vmul.f32 %v9197_v27, %v9197_v27  ;;  %v3680_v37 = vadd.f32 1.0, %v5887_v30  ;;  %v11623_v59 = vld [vmem:[#allocation150_spill] sm:$0xff]  ;;  %11625 = vst [vmem:[#allocation149_spill] sm:$0xff] %v9226_v2  ;;  %v11633_v2 = vld [vmem:[#allocation16_spill] sm:$0xff]  ;;  %v9244_v43 = vpop.f32.mrf.mxu1 }
 0x329   :  { %11618 = vst [vmem:[#allocation181_spill] sm:$0xff] %v9206_v5  ;;  %v1792_v42 = vmul.f32 0.7978846, %v9158_v17  ;;  %v11622_v5 = vld [vmem:[#allocation18_spill] sm:$0xff]  ;;  %v4164_v33 = vpack.c.bf16 %v11624_v41, %v11623_v59  ;;  %v2735_v34 = vmul.f32 %v2419_v36, %v1787_v9  ;;  %v2424_v61 = vadd.f32 1.0, %v2108_v18  ;;  %v9236_v59 = vpop.f32.mrf.mxu0 }
 0x32a   :  { %v4162_v1 = vpack.c.bf16 %v11622_v5, %v11621_v53  ;;  %v2107_v16 = vmul.f32 0.044715, %v1475_v19  ;;  %v3587_v14 = vadd.f32 1.0, %v11626_v0  ;;  %v9229_v32 = vpop.eup %5888  ;;  %v1480_v30 = vmul.f32 %v9210_v49, %v9210_v49  ;;  %v11629_v5 = vld [vmem:[#allocation160_spill] sm:$0xff]  ;;  %v11632_v19 = vld [vmem:[#allocation147_spill] sm:$0xff] }
 0x32b   :  { %11627 = vst [vmem:[#allocation18_spill] sm:$0xff] %v9229_v32  ;;  %5018 = vmatmul.mubr.bf16.gmra.mxu1 %v4164_v33  ;;  %v3591_v21 = vadd.f32 1.0, %v11628_v60  ;;  %v3589_v53 = vadd.f32 1.0, %v11629_v5  ;;  %v3593_v41 = vadd.f32 1.0, %v11630_v29  ;;  %v2737_v9 = vmul.f32 %v2421_v57, %v1789_v46  ;;  %v11638_v46 = vld [vmem:[#allocation108_spill] sm:$0xff] }
 0x32c   :  { %4666 = vmatmul.mubr.bf16.gmra.mxu0 %v4162_v1  ;;  %5900 = vtanh.f32 %v2738_v56  ;;  %v2109_v36 = vmul.f32 0.044715, %v1477_v48  ;;  %v2110_v18 = vmul.f32 0.044715, %v1478_v15  ;;  %v3903_v32 = vmul.f32 %v3587_v14, %v11632_v19  ;;  %v11634_v1 = vld [vmem:[#allocation151_spill] sm:$0xff] }
 0x32d   :  { %v9238_v0 = vpop.eup %5890  ;;  %v3907_v31 = vmul.f32 %v3591_v21, %v11633_v2  ;;  %v3905_v33 = vmul.f32 %v3589_v53, %v11634_v1  ;;  %v3909_v60 = vmul.f32 %v3593_v41, %v11635_v55  ;;  %v9249_v29 = vmul.f32 %v3678_v54, %v9120_v26  ;;  %v9256_v55 = vpop.f32.mrf.mxu0 }
 0x32e   :  { %11631 = vst [vmem:[#allocation150_spill] sm:$0xff] %v9238_v0  ;;  %v9246_v5 = vpop.eup %5892  ;;  %v2740_v57 = vmul.f32 %v2424_v61, %v1792_v42  ;;  %v9252_v56 = vmul.f32 0.5, %v9158_v17  ;;  %v705_v14 = vadd.f32 %v11638_v46, %v6479_v45  ;;  %v2423_v2 = vadd.f32 1.0, %v2107_v16 }
 0x32f   :  { %11636 = vst [vmem:[#allocation153_spill] sm:$0xff] %v9246_v5  ;;  %11637 = vst [vmem:[#allocation155_spill] sm:$0xff] %v9249_v29  ;;  %v5895_v48 = vpop.eup %5894  ;;  %v2112_v21 = vmul.f32 0.044715, %v1480_v30  ;;  %v4167_v15 = vpack.c.bf16 %v3907_v31, %v3903_v32  ;;  %v4169_v53 = vpack.c.bf16 %v3909_v60, %v3905_v33  ;;  %v9259_v19 = vmul.f32 %v3680_v37, %v9151_v23  ;;  %v9270_v32 = vpop.f32.mrf.mxu1  ;;  %v11659_v29 = vld [vmem:[#allocation30_spill] sm:$0xff]  ;;  %v11661_v5 = vld [vmem:[#allocation157_spill] sm:$0xff] }
 0x330   :  { %v5897_v41 = vpop.eup %5896  ;;  %v2425_v26 = vadd.f32 1.0, %v2109_v36  ;;  %v1136_v54 = vadd.f32 %v8776_v10, %v6486_v51  ;;  %v707_v17 = vadd.f32 %v8782_v13, %v6377_v11  ;;  %5902 = vtanh.f32 %v2735_v34 }
 0x331   :  { %11639 = vst [vmem:[#allocation19_spill] sm:$0xff] %v9259_v19  ;;  %v1791_v42 = vmul.f32 0.7978846, %v9178_v62  ;;  %v2426_v61 = vadd.f32 1.0, %v2110_v18  ;;  %v9268_v31 = vadd.f32 %v8795_v52, %v6380_v12  ;;  %4673 = vmatprep.mubr.bf16.mxu0 %v4167_v15  ;;  %5025 = vmatprep.mubr.bf16.mxu1 %v4169_v53  ;;  %v9272_v23 = vpop.eup %5898  ;;  %v3682_v37 = vadd.f32 1.0, %v5895_v48  ;;  %v9276_v18 = vpop.f32.mrf.mxu0 }
 0x332   :  { %11640 = vst [vmem:[#allocation160_spill] sm:$0xff] %v9272_v23  ;;  %v1793_v10 = vmul.f32 0.7978846, %v9193_v40  ;;  %v1794_v16 = vmul.f32 0.7978846, %v9197_v27  ;;  %v1479_v13 = vmul.f32 %v705_v14, %v705_v14  ;;  %v3684_v34 = vadd.f32 1.0, %v5897_v41  ;;  %v9284_v53 = vpop.f32.mrf.mxu1 }
 0x333   :  { %5904 = vtanh.f32 %v2740_v57  ;;  %v2739_v30 = vmul.f32 %v2423_v2, %v1791_v42  ;;  %v2428_v36 = vadd.f32 1.0, %v2112_v21  ;;  %v1481_v1 = vmul.f32 %v1136_v54, %v1136_v54  ;;  %v9301_v42 = vpop.f32.mrf.mxu0 }
 0x334   :  { %5906 = vtanh.f32 %v2737_v9  ;;  %v2741_v52 = vmul.f32 %v2425_v26, %v1793_v10  ;;  %v1482_v33 = vmul.f32 %v707_v17, %v707_v17  ;;  %v9279_v60 = vmul.f32 0.5, %v9178_v62  ;;  %11645 = vst [vmem:[#allocation154_spill] sm:$0xff] %v9301_v42  ;;  %v11646_v10 = vld [vmem:[#allocation156_spill] sm:$0xff] }
 0x335   :  { %v2742_v46 = vmul.f32 %v2426_v61, %v1794_v16  ;;  %v1796_v48 = vmul.f32 0.7978846, %v9210_v49  ;;  %v1484_v15 = vmul.f32 %v9268_v31, %v9268_v31  ;;  %v9287_v57 = vmul.f32 %v3682_v37, %v9170_v8  ;;  %v11647_v16 = vld [vmem:[#allocation26_spill] sm:$0xff] }
 0x336   :  { %11641 = vst [vmem:[#allocation23_spill] sm:$0xff] %v9279_v60  ;;  %v9290_v2 = vmul.f32 0.5, %v9193_v40  ;;  %v9293_v9 = vmul.f32 0.5, %v9197_v27  ;;  %v2111_v21 = vmul.f32 0.044715, %v1479_v13  ;;  %v9296_v62 = vmul.f32 %v3684_v34, %v9184_v7  ;;  %v9313_v13 = vpop.f32.mrf.mxu1 }
 0x337   :  { %11642 = vst [vmem:[#allocation147_spill] sm:$0xff] %v9287_v57  ;;  %5908 = vtanh.f32 %v2739_v30  ;;  %v2744_v41 = vmul.f32 %v2428_v36, %v1796_v48  ;;  %v9299_v26 = vmul.f32 0.5, %v9210_v49  ;;  %v2113_v8 = vmul.f32 0.044715, %v1481_v1  ;;  %11648 = vst [vmem:[#allocation108_spill] sm:$0xff] %v9313_v13  ;;  %v11656_v57 = vld [vmem:[#allocation35_spill] sm:$0xff] }
 0x338   :  { %11643 = vst [vmem:[#allocation16_spill] sm:$0xff] %v9290_v2  ;;  %11644 = vst [vmem:[#allocation151_spill] sm:$0xff] %v9296_v62  ;;  %5910 = vtanh.f32 %v2741_v52  ;;  %v2114_v61 = vmul.f32 0.044715, %v1482_v33  ;;  %v9305_v40 = vadd.f32 %v8827_v6, %v6377_v11  ;;  %v2116_v37 = vmul.f32 0.044715, %v1484_v15  ;;  %v9327_v33 = vpop.f32.mrf.mxu0 }
 0x339   :  { %v5901_v27 = vpop.eup %5900  ;;  %5912 = vtanh.f32 %v2742_v46  ;;  %v9309_v7 = vadd.f32 %v8802_v38, %v6479_v45  ;;  %v4166_v49 = vpack.c.bf16 %v11647_v16, %v11646_v10  ;;  %v1795_v34 = vmul.f32 0.7978846, %v705_v14  ;;  %v9335_v10 = vpop.f32.mrf.mxu1  ;;  %v11662_v13 = vld [vmem:[#allocation21_spill] sm:$0xff] }
 0x33a   :  { %v2427_v30 = vadd.f32 1.0, %v2111_v21  ;;  %v9315_v36 = vmul.f32 0.5, %v705_v14  ;;  %v9319_v6 = vadd.f32 %v8843_v50, %v6380_v12  ;;  %5914 = vtanh.f32 %v2744_v41  ;;  %11651 = vst [vmem:[#allocation182_spill] sm:$0xff] %v9335_v10 }
 0x33b   :  { %v1797_v52 = vmul.f32 0.7978846, %v1136_v54  ;;  %v9321_v1 = vmul.f32 0.5, %v1136_v54  ;;  %v9325_v38 = vadd.f32 %v8810_v44, %v6486_v51  ;;  %4674 = vmatmul.mubr.bf16.gmra.mxu0 %v4166_v49  ;;  %v2429_v46 = vadd.f32 1.0, %v2113_v8  ;;  %v11653_v49 = vld [vmem:[#allocation158_spill] sm:$0xff]  ;;  %v9360_v42 = vpop.f32.mrf.mxu1 }
 0x33c   :  { %11649 = vst [vmem:[#allocation156_spill] sm:$0xff] %v9315_v36  ;;  %v1798_v48 = vmul.f32 0.7978846, %v707_v17  ;;  %v2430_v15 = vadd.f32 1.0, %v2114_v61  ;;  %v1486_v14 = vmul.f32 %v9305_v40, %v9305_v40  ;;  %v3686_v21 = vadd.f32 1.0, %v5901_v27  ;;  %v11654_v27 = vld [vmem:[#allocation28_spill] sm:$0xff] }
 0x33d   :  { %11650 = vst [vmem:[#allocation26_spill] sm:$0xff] %v9321_v1  ;;  %v9331_v50 = vmul.f32 0.5, %v707_v17  ;;  %v2432_v41 = vadd.f32 1.0, %v2116_v37  ;;  %v1483_v54 = vmul.f32 %v9309_v7, %v9309_v7  ;;  %v9337_v44 = vpop.eup %5902  ;;  %v2743_v16 = vmul.f32 %v2427_v30, %v1795_v34  ;;  %v11655_v36 = vld [vmem:[#allocation33_spill] sm:$0xff]  ;;  %v9352_v34 = vpop.f32.mrf.mxu0 }
 0x33e   :  { %11652 = vst [vmem:[#allocation183_spill] sm:$0xff] %v9337_v44  ;;  %v1488_v8 = vmul.f32 %v9319_v6, %v9319_v6  ;;  %v9343_v61 = vadd.f32 %v8877_v20, %v6377_v11  ;;  %v4168_v17 = vpack.c.bf16 %v11654_v27, %v11653_v49  ;;  %v1800_v37 = vmul.f32 0.7978846, %v9268_v31  ;;  %11657 = vst [vmem:[#allocation158_spill] sm:$0xff] %v9352_v34  ;;  %v11658_v20 = vld [vmem:[#allocation27_spill] sm:$0xff] }
 0x33f   :  { %v1485_v1 = vmul.f32 %v9325_v38, %v9325_v38  ;;  %v3595_v62 = vadd.f32 1.0, %v11655_v36  ;;  %v3599_v2 = vadd.f32 1.0, %v11656_v57  ;;  %v2746_v60 = vmul.f32 %v2430_v15, %v1798_v48  ;;  %v11663_v15 = vld [vmem:[#allocation159_spill] sm:$0xff] }
 0x340   :  { %v5905_v30 = vpop.eup %5904  ;;  %v2118_v44 = vmul.f32 0.044715, %v1486_v14  ;;  %5026 = vmatmul.mubr.bf16.gmra.mxu1 %v4168_v17  ;;  %v3597_v19 = vadd.f32 1.0, %v11658_v20  ;;  %v3601_v23 = vadd.f32 1.0, %v11659_v29  ;;  %v2748_v27 = vmul.f32 %v2432_v41, %v1800_v37  ;;  %v11664_v17 = vld [vmem:[#allocation32_spill] sm:$0xff] }
 0x341   :  { %v9356_v49 = vpop.eup %5906  ;;  %v2115_v0 = vmul.f32 0.044715, %v1483_v54  ;;  %v3911_v10 = vmul.f32 %v3595_v62, %v11661_v5  ;;  %v3915_v36 = vmul.f32 %v3599_v2, %v11662_v13  ;;  %v2120_v57 = vmul.f32 0.044715, %v1488_v8  ;;  %v9370_v5 = vpop.f32.mrf.mxu0 }
 0x342   :  { %11660 = vst [vmem:[#allocation28_spill] sm:$0xff] %v9356_v49  ;;  %v1490_v48 = vmul.f32 %v9343_v61, %v9343_v61  ;;  %v3913_v14 = vmul.f32 %v3597_v19, %v11663_v15  ;;  %v3917_v20 = vmul.f32 %v3601_v23, %v11664_v17  ;;  %v3688_v34 = vadd.f32 1.0, %v5905_v30  ;;  %v11689_v49 = vld [vmem:[#allocation39_spill] sm:$0xff] }
 0x343   :  { %v2745_v29 = vmul.f32 %v2429_v46, %v1797_v52  ;;  %v9368_v41 = vadd.f32 %v8888_v3, %v6380_v12  ;;  %v4171_v54 = vpack.c.bf16 %v3915_v36, %v3911_v10  ;;  %5916 = vtanh.f32 %v2746_v60  ;;  %v9382_v52 = vpop.f32.mrf.mxu1 }
 0x344   :  { %v9372_v2 = vpop.eup %5908  ;;  %v2117_v62 = vmul.f32 0.044715, %v1485_v1  ;;  %v2434_v13 = vadd.f32 1.0, %v2118_v44  ;;  %v4173_v8 = vpack.c.bf16 %v3917_v20, %v3913_v14  ;;  %v9377_v19 = vmul.f32 %v3686_v21, %v9215_v39  ;;  %v9393_v21 = vpop.f32.mrf.mxu0 }
 0x345   :  { %11665 = vst [vmem:[#allocation33_spill] sm:$0xff] %v9372_v2  ;;  %v9374_v37 = vpop.eup %5910  ;;  %v9380_v23 = vmul.f32 0.5, %v9268_v31  ;;  %5918 = vtanh.f32 %v2748_v27  ;;  %v2431_v3 = vadd.f32 1.0, %v2115_v0  ;;  %4681 = vmatprep.mubr.bf16.mxu0 %v4171_v54  ;;  %v1802_v60 = vmul.f32 0.7978846, %v9305_v40  ;;  %v9402_v15 = vpop.f32.mrf.mxu1 }
 0x346   :  { %11666 = vst [vmem:[#allocation35_spill] sm:$0xff] %v9374_v37  ;;  %11667 = vst [vmem:[#allocation27_spill] sm:$0xff] %v9377_v19  ;;  %v5913_v46 = vpop.eup %5912  ;;  %5920 = vtanh.f32 %v2743_v16  ;;  %v2436_v1 = vadd.f32 1.0, %v2120_v57  ;;  %v2122_v10 = vmul.f32 0.044715, %v1490_v48  ;;  %5033 = vmatprep.mubr.bf16.mxu1 %v4173_v8  ;;  %v9386_v44 = vmul.f32 %v3688_v34, %v9252_v56  ;;  %v11670_v48 = vld [vmem:[#allocation173_spill] sm:$0xff]  ;;  %v9415_v8 = vpop.f32.mrf.mxu0 }
 0x347   :  { %v1799_v39 = vmul.f32 0.7978846, %v9309_v7  ;;  %v715_v31 = vadd.f32 %v8854_v35, %v6479_v45  ;;  %v1492_v0 = vmul.f32 %v9368_v41, %v9368_v41  ;;  %v5915_v30 = vpop.eup %5914  ;;  %5922 = vtanh.f32 %v2745_v29  ;;  %11671 = vst [vmem:[#allocation21_spill] sm:$0xff] %v9402_v15 }
 0x348   :  { %11668 = vst [vmem:[#allocation30_spill] sm:$0xff] %v9386_v44  ;;  %v2433_v16 = vadd.f32 1.0, %v2117_v62  ;;  %v2750_v27 = vmul.f32 %v2434_v13, %v1802_v60  ;;  %v1804_v36 = vmul.f32 0.7978846, %v9319_v6  ;;  %v9397_v56 = vmul.f32 0.5, %v9309_v7 }
 0x349   :  { %v2747_v57 = vmul.f32 %v2431_v3, %v1799_v39  ;;  %v1801_v34 = vmul.f32 0.7978846, %v9325_v38  ;;  %v1146_v35 = vadd.f32 %v11670_v48, %v6486_v51  ;;  %v3690_v14 = vadd.f32 1.0, %v5913_v46 }
 0x34a   :  { %11669 = vst [vmem:[#allocation157_spill] sm:$0xff] %v9397_v56  ;;  %v9405_v17 = vmul.f32 0.5, %v9325_v38  ;;  %v2752_v20 = vmul.f32 %v2436_v1, %v1804_v36  ;;  %v2438_v29 = vadd.f32 1.0, %v2122_v10  ;;  %v1487_v54 = vmul.f32 %v715_v31, %v715_v31  ;;  %v9425_v10 = vpop.f32.mrf.mxu1  ;;  %v11682_v56 = vld [vmem:[#allocation25_spill] sm:$0xff] }
 0x34b   :  { %v2124_v62 = vmul.f32 0.044715, %v1492_v0  ;;  %v9409_v13 = vadd.f32 %v8896_v24, %v6479_v45  ;;  %v9413_v7 = vadd.f32 %v8910_v63, %v6486_v51  ;;  %v3692_v3 = vadd.f32 1.0, %v5915_v30 }
 0x34c   :  { %11672 = vst [vmem:[#allocation159_spill] sm:$0xff] %v9405_v17  ;;  %v2749_v60 = vmul.f32 %v2433_v16, %v1801_v34  ;;  %5924 = vtanh.f32 %v2750_v27  ;;  %v1806_v38 = vmul.f32 0.7978846, %v9343_v61  ;;  %v9419_v46 = vmul.f32 0.5, %v9305_v40  ;;  %v9438_v27 = vpop.f32.mrf.mxu0  ;;  %v11681_v17 = vld [vmem:[#allocation36_spill] sm:$0xff] }
 0x34d   :  { %5926 = vtanh.f32 %v2747_v57  ;;  %v1489_v1 = vmul.f32 %v1146_v35, %v1146_v35  ;;  %v9423_v24 = vadd.f32 %v8916_v28, %v6377_v11  ;;  %v9428_v63 = vmul.f32 %v3690_v14, %v9293_v9  ;;  %11674 = vst [vmem:[#allocation173_spill] sm:$0xff] %v9438_v27 }
 0x34e   :  { %5928 = vtanh.f32 %v2752_v20  ;;  %v2754_v39 = vmul.f32 %v2438_v29, %v1806_v38  ;;  %v9432_v0 = vadd.f32 %v8924_v47, %v6380_v12  ;;  %v2119_v30 = vmul.f32 0.044715, %v1487_v54  ;;  %v9451_v29 = vpop.f32.mrf.mxu1 }
 0x34f   :  { %11673 = vst [vmem:[#allocation32_spill] sm:$0xff] %v9428_v63  ;;  %v2440_v16 = vadd.f32 1.0, %v2124_v62  ;;  %v1491_v40 = vmul.f32 %v9409_v13, %v9409_v13  ;;  %v1493_v28 = vmul.f32 %v9413_v7, %v9413_v7  ;;  %v9441_v36 = vmul.f32 %v3692_v3, %v9299_v26  ;;  %11677 = vst [vmem:[#allocation186_spill] sm:$0xff] %v9451_v29 }
 0x350   :  { %5930 = vtanh.f32 %v2749_v60  ;;  %v9444_v9 = vmul.f32 0.5, %v9319_v6  ;;  %v1803_v57 = vmul.f32 0.7978846, %v715_v31  ;;  %v5917_v47 = vpop.eup %5916  ;;  %v9446_v34 = vmul.f32 0.5, %v715_v31 }
 0x351   :  { %11675 = vst [vmem:[#allocation184_spill] sm:$0xff] %v9441_v36  ;;  %v2121_v48 = vmul.f32 0.044715, %v1489_v1  ;;  %v1808_v14 = vmul.f32 0.7978846, %v9368_v41  ;;  %v1494_v20 = vmul.f32 %v9423_v24, %v9423_v24  ;;  %v9453_v26 = vmul.f32 0.5, %v1146_v35  ;;  %v9459_v36 = vpop.f32.mrf.mxu0 }
 0x352   :  { %11676 = vst [vmem:[#allocation185_spill] sm:$0xff] %v9446_v34  ;;  %v5919_v54 = vpop.eup %5918  ;;  %v1805_v62 = vmul.f32 0.7978846, %v1146_v35  ;;  %5932 = vtanh.f32 %v2754_v39  ;;  %v1496_v6 = vmul.f32 %v9432_v0, %v9432_v0  ;;  %v2435_v31 = vadd.f32 1.0, %v2119_v30  ;;  %11680 = vst [vmem:[#allocation189_spill] sm:$0xff] %v9459_v36  ;;  %v11684_v39 = vld [vmem:[#allocation42_spill] sm:$0xff] }
 0x353   :  { %11678 = vst [vmem:[#allocation187_spill] sm:$0xff] %v9453_v26  ;;  %v9457_v3 = vpop.eup %5920  ;;  %v2756_v60 = vmul.f32 %v2440_v16, %v1808_v14  ;;  %v2123_v38 = vmul.f32 0.044715, %v1491_v40  ;;  %v2125_v1 = vmul.f32 0.044715, %v1493_v28  ;;  %v3694_v63 = vadd.f32 1.0, %v5917_v47  ;;  %v9471_v28 = vpop.f32.mrf.mxu1 }
 0x354   :  { %11679 = vst [vmem:[#allocation188_spill] sm:$0xff] %v9457_v3  ;;  %v9462_v34 = vmul.f32 0.5, %v9343_v61  ;;  %v4170_v35 = vpack.c.bf16 %v11682_v56, %v11681_v17  ;;  %v11683_v26 = vld [vmem:[#allocation24_spill] sm:$0xff]  ;;  %v9468_v19 = vpop.eup %5922  ;;  %v3696_v37 = vadd.f32 1.0, %v5919_v54  ;;  %v2437_v3 = vadd.f32 1.0, %v2121_v48  ;;  %v11686_v16 = vld [vmem:[#allocation38_spill] sm:$0xff]  ;;  %v9476_v54 = vpop.f32.mrf.mxu0 }
 0x355   :  { %v4172_v44 = vpack.c.bf16 %v11684_v39, %v11683_v26  ;;  %11685 = vst [vmem:[#allocation36_spill] sm:$0xff] %v9468_v19  ;;  %v2126_v30 = vmul.f32 0.044715, %v1494_v20  ;;  %v3603_v40 = vadd.f32 1.0, %v11686_v16  ;;  %11687 = vst [vmem:[#allocation25_spill] sm:$0xff] %v9471_v28  ;;  %v11688_v61 = vld [vmem:[#allocation48_spill] sm:$0xff]  ;;  %v2751_v36 = vmul.f32 %v2435_v31, %v1803_v57 }
 0x356   :  { %v2128_v14 = vmul.f32 0.044715, %v1496_v6  ;;  %4682 = vmatmul.mubr.bf16.gmra.mxu0 %v4170_v35  ;;  %v3607_v47 = vadd.f32 1.0, %v11688_v61  ;;  %v3605_v2 = vadd.f32 1.0, %v11689_v49  ;;  %v11690_v56 = vld [vmem:[#allocation43_spill] sm:$0xff]  ;;  %5934 = vtanh.f32 %v2756_v60  ;;  %11691 = vst [vmem:[#allocation24_spill] sm:$0xff] %v9476_v54  ;;  %v9485_v60 = vpop.f32.mrf.mxu1 }
 0x357   :  { %5034 = vmatmul.mubr.bf16.gmra.mxu1 %v4172_v44  ;;  %v3609_v17 = vadd.f32 1.0, %v11690_v56  ;;  %v2439_v26 = vadd.f32 1.0, %v2123_v38  ;;  %v2441_v39 = vadd.f32 1.0, %v2125_v1  ;;  %v11692_v48 = vld [vmem:[#allocation20_spill] sm:$0xff]  ;;  %v11693_v16 = vld [vmem:[#allocation37_spill] sm:$0xff]  ;;  %v11694_v28 = vld [vmem:[#allocation22_spill] sm:$0xff]  ;;  %v2753_v61 = vmul.f32 %v2437_v3, %v1805_v62 }
 0x358   :  { %v3919_v20 = vmul.f32 %v3603_v40, %v11692_v48  ;;  %v3923_v19 = vmul.f32 %v3607_v47, %v11693_v16  ;;  %v3921_v6 = vmul.f32 %v3605_v2, %v11694_v28  ;;  %v11695_v35 = vld [vmem:[#allocation46_spill] sm:$0xff]  ;;  %v1807_v49 = vmul.f32 0.7978846, %v9409_v13  ;;  %v11696_v57 = vld [vmem:[#allocation113_spill] sm:$0xff]  ;;  %11697 = vst [vmem:[#allocation42_spill] sm:$0xff] %v9485_v60 }
 0x359   :  { %v3925_v44 = vmul.f32 %v3609_v17, %v11695_v35  ;;  %v5925_v29 = vpop.eup %5924  ;;  %v2442_v27 = vadd.f32 1.0, %v2126_v30  ;;  %v725_v31 = vadd.f32 %v11696_v57, %v6479_v45  ;;  %v1809_v1 = vmul.f32 0.7978846, %v9413_v7  ;;  %v9497_v17 = vpop.f32.mrf.mxu0 }
 0x35a   :  { %v9487_v38 = vpop.eup %5926  ;;  %v2444_v40 = vadd.f32 1.0, %v2128_v14  ;;  %v4175_v47 = vpack.c.bf16 %v3923_v19, %v3919_v20  ;;  %v9491_v28 = vmul.f32 %v3694_v63, %v9331_v50  ;;  %v9494_v62 = vmul.f32 0.5, %v9368_v41  ;;  %11700 = vst [vmem:[#allocation39_spill] sm:$0xff] %v9497_v17  ;;  %v11701_v14 = vld [vmem:[#allocation116_spill] sm:$0xff] }
 0x35b   :  { %11698 = vst [vmem:[#allocation38_spill] sm:$0xff] %v9487_v38  ;;  %v4177_v56 = vpack.c.bf16 %v3925_v44, %v3921_v6  ;;  %v5929_v2 = vpop.eup %5928  ;;  %v2755_v3 = vmul.f32 %v2439_v26, %v1807_v49  ;;  %v1810_v30 = vmul.f32 0.7978846, %v9423_v24  ;;  %v3698_v48 = vadd.f32 1.0, %v5925_v29  ;;  %v11703_v63 = vld [vmem:[#allocation76_spill] sm:$0xff]  ;;  %v9506_v6 = vpop.f32.mrf.mxu1 }
 0x35c   :  { %11699 = vst [vmem:[#allocation48_spill] sm:$0xff] %v9491_v28  ;;  %v2757_v16 = vmul.f32 %v2441_v39, %v1809_v1  ;;  %v1812_v35 = vmul.f32 0.7978846, %v9432_v0  ;;  %v1156_v19 = vadd.f32 %v11701_v14, %v6486_v51  ;;  %4689 = vmatprep.mubr.bf16.mxu0 %v4175_v47  ;;  %5936 = vtanh.f32 %v2751_v36  ;;  %11704 = vst [vmem:[#allocation20_spill] sm:$0xff] %v9506_v6  ;;  %v9521_v47 = vpop.f32.mrf.mxu0  ;;  %v11737_v6 = vld [vmem:[#allocation60_spill] sm:$0xff] }
 0x35d   :  { %5041 = vmatprep.mubr.bf16.mxu1 %v4177_v56  ;;  %v9502_v20 = vpop.eup %5930  ;;  %v2758_v50 = vmul.f32 %v2442_v27, %v1810_v30  ;;  %v1495_v41 = vmul.f32 %v725_v31, %v725_v31  ;;  %v727_v26 = vadd.f32 %v11703_v63, %v6377_v11  ;;  %v9509_v29 = vmul.f32 %v3696_v37, %v9380_v23  ;;  %v11708_v27 = vld [vmem:[#allocation164_spill] sm:$0xff] }
 0x35e   :  { %11702 = vst [vmem:[#allocation43_spill] sm:$0xff] %v9502_v20  ;;  %v3700_v39 = vadd.f32 1.0, %v5929_v2  ;;  %5938 = vtanh.f32 %v2753_v61  ;;  %v2760_v44 = vmul.f32 %v2444_v40, %v1812_v35  ;;  %v9512_v57 = vmul.f32 0.5, %v9409_v13  ;;  %11709 = vst [vmem:[#allocation113_spill] sm:$0xff] %v9521_v47  ;;  %v9533_v2 = vpop.f32.mrf.mxu1  ;;  %v9549_v14 = vpop.f32.mrf.mxu0 }
 0x35f   :  { %11705 = vst [vmem:[#allocation37_spill] sm:$0xff] %v9509_v29  ;;  %v5933_v49 = vpop.eup %5932  ;;  %5940 = vtanh.f32 %v2755_v3  ;;  %v9515_v36 = vmul.f32 0.5, %v9413_v7  ;;  %v9519_v1 = vadd.f32 %v11708_v27, %v6380_v12  ;;  %v9524_v37 = vmul.f32 %v3698_v48, %v9419_v46  ;;  %v11711_v7 = vld [vmem:[#allocation123_spill] sm:$0xff]  ;;  %11712 = vst [vmem:[#allocation76_spill] sm:$0xff] %v9533_v2 }
 0x360   :  { %11706 = vst [vmem:[#allocation22_spill] sm:$0xff] %v9512_v57  ;;  %5942 = vtanh.f32 %v2757_v16  ;;  %v9527_v23 = vmul.f32 0.5, %v9423_v24  ;;  %v1497_v61 = vmul.f32 %v1156_v19, %v1156_v19  ;;  %v2127_v13 = vmul.f32 0.044715, %v1495_v41  ;;  %11715 = vst [vmem:[#allocation190_spill] sm:$0xff] %v9549_v14  ;;  %v9559_v27 = vpop.f32.mrf.mxu1  ;;  %v9575_v29 = vpop.f32.mrf.mxu0  ;;  %v11736_v14 = vld [vmem:[#allocation29_spill] sm:$0xff] }
 0x361   :  { %11707 = vst [vmem:[#allocation46_spill] sm:$0xff] %v9515_v36  ;;  %11710 = vst [vmem:[#allocation116_spill] sm:$0xff] %v9524_v37  ;;  %5944 = vtanh.f32 %v2758_v50  ;;  %v1498_v40 = vmul.f32 %v727_v26, %v727_v26  ;;  %v9531_v56 = vadd.f32 %v11711_v7, %v6479_v45  ;;  %v9536_v3 = vmul.f32 %v3700_v39, %v9444_v9  ;;  %v11720_v37 = vld [vmem:[#allocation44_spill] sm:$0xff]  ;;  %v11725_v36 = vld [vmem:[#allocation161_spill] sm:$0xff] }
 0x362   :  { %v3702_v30 = vadd.f32 1.0, %v5933_v49  ;;  %v9539_v46 = vmul.f32 0.5, %v9432_v0  ;;  %5946 = vtanh.f32 %v2760_v44  ;;  %v1811_v24 = vmul.f32 0.7978846, %v725_v31  ;;  %11717 = vst [vmem:[#allocation192_spill] sm:$0xff] %v9559_v27  ;;  %v9583_v38 = vpop.f32.mrf.mxu1  ;;  %v9602_v47 = vpop.f32.mrf.mxu0 }
 0x363   :  { %11713 = vst [vmem:[#allocation164_spill] sm:$0xff] %v9536_v3  ;;  %v9541_v48 = vmul.f32 0.5, %v725_v31  ;;  %v1500_v16 = vmul.f32 %v9519_v1, %v9519_v1  ;;  %v9547_v35 = vadd.f32 %v9010_v4, %v6377_v11  ;;  %v5935_v50 = vpop.eup %5934  ;;  %v1813_v9 = vmul.f32 0.7978846, %v1156_v19  ;;  %11726 = vst [vmem:[#allocation44_spill] sm:$0xff] %v9583_v38 }
 0x364   :  { %v2129_v41 = vmul.f32 0.044715, %v1497_v61  ;;  %v9551_v63 = vmul.f32 0.5, %v1156_v19  ;;  %v9555_v0 = vadd.f32 %v9022_v22, %v6380_v12  ;;  %v2443_v31 = vadd.f32 1.0, %v2127_v13  ;;  %v11719_v61 = vld [vmem:[#allocation132_spill] sm:$0xff]  ;;  %v9612_v15 = vpop.f32.mrf.mxu1 }
 0x365   :  { %11714 = vst [vmem:[#allocation123_spill] sm:$0xff] %v9541_v48  ;;  %v1814_v39 = vmul.f32 0.7978846, %v727_v26  ;;  %v2130_v44 = vmul.f32 0.044715, %v1498_v40  ;;  %v1499_v49 = vmul.f32 %v9531_v56, %v9531_v56  ;;  %v9562_v4 = vmul.f32 %v3702_v30, %v9462_v34  ;;  %11722 = vst [vmem:[#allocation132_spill] sm:$0xff] %v9575_v29 }
 0x366   :  { %11716 = vst [vmem:[#allocation191_spill] sm:$0xff] %v9551_v63  ;;  %v9564_v7 = vmul.f32 0.5, %v727_v26  ;;  %v1816_v19 = vmul.f32 0.7978846, %v9519_v1  ;;  %v9569_v3 = vadd.f32 %v11719_v61, %v6486_v51  ;;  %v3704_v22 = vadd.f32 1.0, %v5935_v50  ;;  %v11721_v63 = vld [vmem:[#allocation49_spill] sm:$0xff] }
 0x367   :  { %11718 = vst [vmem:[#allocation193_spill] sm:$0xff] %v9562_v4  ;;  %v2132_v13 = vmul.f32 0.044715, %v1500_v16  ;;  %v1502_v40 = vmul.f32 %v9547_v35, %v9547_v35  ;;  %v4174_v48 = vpack.c.bf16 %v11721_v63, %v11720_v37  ;;  %v2445_v34 = vadd.f32 1.0, %v2129_v41  ;;  %v11723_v30 = vld [vmem:[#allocation47_spill] sm:$0xff]  ;;  %v11728_v63 = vld [vmem:[#allocation126_spill] sm:$0xff] }
 0x368   :  { %v1504_v26 = vmul.f32 %v9555_v0, %v9555_v0  ;;  %v11724_v4 = vld [vmem:[#allocation51_spill] sm:$0xff]  ;;  %v3611_v61 = vadd.f32 1.0, %v11725_v36  ;;  %v2759_v57 = vmul.f32 %v2443_v31, %v1811_v24  ;;  %v2446_v50 = vadd.f32 1.0, %v2130_v44  ;;  %v11730_v24 = vld [vmem:[#allocation57_spill] sm:$0xff] }
 0x369   :  { %v4176_v28 = vpack.c.bf16 %v11724_v4, %v11723_v30  ;;  %v1815_v16 = vmul.f32 0.7978846, %v9531_v56  ;;  %v2131_v20 = vmul.f32 0.044715, %v1499_v49  ;;  %4690 = vmatmul.mubr.bf16.gmra.mxu0 %v4174_v48  ;;  %v9585_v37 = vpop.eup %5936  ;;  %v1501_v41 = vmul.f32 %v9569_v3, %v9569_v3  ;;  %v11729_v4 = vld [vmem:[#allocation58_spill] sm:$0xff]  ;;  %v11732_v30 = vld [vmem:[#allocation165_spill] sm:$0xff] }
 0x36a   :  { %11727 = vst [vmem:[#allocation49_spill] sm:$0xff] %v9585_v37  ;;  %v9591_v29 = vadd.f32 %v11728_v63, %v6377_v11  ;;  %v3615_v36 = vadd.f32 1.0, %v11729_v4  ;;  %v3613_v31 = vadd.f32 1.0, %v11730_v24  ;;  %v2448_v49 = vadd.f32 1.0, %v2132_v13  ;;  %v11733_v37 = vld [vmem:[#allocation72_spill] sm:$0xff]  ;;  %11734 = vst [vmem:[#allocation51_spill] sm:$0xff] %v9602_v47 }
 0x36b   :  { %5042 = vmatmul.mubr.bf16.gmra.mxu1 %v4176_v28  ;;  %v9595_v44 = vpop.eup %5938  ;;  %v2134_v48 = vmul.f32 0.044715, %v1502_v40  ;;  %v9599_v38 = vadd.f32 %v11732_v30, %v6380_v12  ;;  %v3617_v2 = vadd.f32 1.0, %v11733_v37  ;;  %v2761_v63 = vmul.f32 %v2445_v34, %v1813_v9  ;;  %v11740_v30 = vld [vmem:[#allocation52_spill] sm:$0xff] }
 0x36c   :  { %11731 = vst [vmem:[#allocation47_spill] sm:$0xff] %v9595_v44  ;;  %v9604_v27 = vpop.eup %5940  ;;  %v2136_v28 = vmul.f32 0.044715, %v1504_v26  ;;  %v3927_v4 = vmul.f32 %v3611_v61, %v11736_v14  ;;  %v3931_v24 = vmul.f32 %v3615_v36, %v11737_v6  ;;  %v2762_v13 = vmul.f32 %v2446_v50, %v1814_v39  ;;  %v11739_v44 = vld [vmem:[#allocation34_spill] sm:$0xff]  ;;  %v9618_v61 = vpop.f32.mrf.mxu0 }
 0x36d   :  { %11735 = vst [vmem:[#allocation161_spill] sm:$0xff] %v9604_v27  ;;  %v9608_v17 = vpop.eup %5942  ;;  %v2447_v40 = vadd.f32 1.0, %v2131_v20  ;;  %v3929_v60 = vmul.f32 %v3613_v31, %v11739_v44  ;;  %v3933_v54 = vmul.f32 %v3617_v2, %v11740_v30  ;;  %5948 = vtanh.f32 %v2759_v57  ;;  %v11747_v30 = vld [vmem:[#allocation175_spill] sm:$0xff] }
 0x36e   :  { %11738 = vst [vmem:[#allocation126_spill] sm:$0xff] %v9608_v17  ;;  %v5945_v37 = vpop.eup %5944  ;;  %v2133_v47 = vmul.f32 0.044715, %v1501_v41  ;;  %v1506_v9 = vmul.f32 %v9591_v29, %v9591_v29  ;;  %v4179_v34 = vpack.c.bf16 %v3931_v24, %v3927_v4  ;;  %v2764_v26 = vmul.f32 %v2448_v49, %v1816_v19  ;;  %v11763_v17 = vld [vmem:[#allocation64_spill] sm:$0xff] }
 0x36f   :  { %v5947_v14 = vpop.eup %5946  ;;  %v2450_v6 = vadd.f32 1.0, %v2134_v48  ;;  %v1508_v39 = vmul.f32 %v9599_v38, %v9599_v38  ;;  %v4181_v20 = vpack.c.bf16 %v3933_v54, %v3929_v60  ;;  %5950 = vtanh.f32 %v2761_v63  ;;  %v9630_v54 = vpop.f32.mrf.mxu1  ;;  %v11744_v48 = vld [vmem:[#allocation125_spill] sm:$0xff] }
 0x370   :  { %v9621_v2 = vmul.f32 0.5, %v9519_v1  ;;  %v9624_v57 = vmul.f32 0.5, %v9531_v56  ;;  %v2452_v50 = vadd.f32 1.0, %v2136_v28  ;;  %4697 = vmatprep.mubr.bf16.mxu0 %v4179_v34  ;;  %v9627_v41 = vmul.f32 %v3704_v22, %v9494_v62  ;;  %v11743_v1 = vld [vmem:[#allocation140_spill] sm:$0xff]  ;;  %v9637_v63 = vpop.f32.mrf.mxu0 }
 0x371   :  { %5952 = vtanh.f32 %v2762_v13  ;;  %v2763_v19 = vmul.f32 %v2447_v40, %v1815_v16  ;;  %v1818_v36 = vmul.f32 0.7978846, %v9547_v35  ;;  %5049 = vmatprep.mubr.bf16.mxu1 %v4181_v20  ;;  %v2449_v60 = vadd.f32 1.0, %v2133_v47  ;;  %v11746_v13 = vld [vmem:[#allocation101_spill] sm:$0xff]  ;;  %v9654_v34 = vpop.f32.mrf.mxu1 }
 0x372   :  { %11741 = vst [vmem:[#allocation58_spill] sm:$0xff] %v9624_v57  ;;  %11742 = vst [vmem:[#allocation57_spill] sm:$0xff] %v9627_v41  ;;  %v1820_v31 = vmul.f32 0.7978846, %v9555_v0  ;;  %v735_v44 = vadd.f32 %v11743_v1, %v6479_v45  ;;  %v2138_v56 = vmul.f32 0.044715, %v1506_v9  ;;  %5954 = vtanh.f32 %v2764_v26 }
 0x373   :  { %v2766_v49 = vmul.f32 %v2450_v6, %v1818_v36  ;;  %v1166_v62 = vadd.f32 %v11744_v48, %v6486_v51  ;;  %v2140_v22 = vmul.f32 0.044715, %v1508_v39  ;;  %v3706_v16 = vadd.f32 1.0, %v5945_v37  ;;  %v11755_v41 = vld [vmem:[#allocation40_spill] sm:$0xff] }
 0x374   :  { %v1817_v28 = vmul.f32 0.7978846, %v9569_v3  ;;  %v9641_v4 = vmul.f32 0.5, %v9569_v3  ;;  %v2768_v47 = vmul.f32 %v2452_v50, %v1820_v31  ;;  %5956 = vtanh.f32 %v2763_v19  ;;  %v9660_v19 = vpop.f32.mrf.mxu0 }
 0x375   :  { %v9644_v24 = vmul.f32 0.5, %v9547_v35  ;;  %v9648_v40 = vadd.f32 %v11746_v13, %v6479_v45  ;;  %v9652_v9 = vadd.f32 %v11747_v30, %v6486_v51  ;;  %v3708_v37 = vadd.f32 1.0, %v5947_v14  ;;  %v11748_v35 = vld [vmem:[#allocation135_spill] sm:$0xff]  ;;  %11749 = vst [vmem:[#allocation72_spill] sm:$0xff] %v9660_v19 }
 0x376   :  { %11745 = vst [vmem:[#allocation165_spill] sm:$0xff] %v9641_v4  ;;  %v2765_v26 = vmul.f32 %v2449_v60, %v1817_v28  ;;  %v1503_v6 = vmul.f32 %v735_v44, %v735_v44  ;;  %v2454_v3 = vadd.f32 1.0, %v2138_v56  ;;  %5958 = vtanh.f32 %v2766_v49  ;;  %v9687_v30 = vpop.f32.mrf.mxu0 }
 0x377   :  { %v1505_v39 = vmul.f32 %v1166_v62, %v1166_v62  ;;  %v2456_v20 = vadd.f32 1.0, %v2140_v22  ;;  %v9658_v50 = vadd.f32 %v11748_v35, %v6377_v11  ;;  %v9663_v36 = vmul.f32 %v3706_v16, %v9527_v23  ;;  %v9678_v23 = vpop.f32.mrf.mxu1  ;;  %11754 = vst [vmem:[#allocation140_spill] sm:$0xff] %v9687_v30 }
 0x378   :  { %5960 = vtanh.f32 %v2768_v47  ;;  %v1822_v31 = vmul.f32 0.7978846, %v9591_v29  ;;  %v9668_v14 = vadd.f32 %v9107_v58, %v6380_v12  ;;  %v9671_v60 = vmul.f32 0.5, %v9555_v0  ;;  %11751 = vst [vmem:[#allocation60_spill] sm:$0xff] %v9678_v23 }
 0x379   :  { %11750 = vst [vmem:[#allocation29_spill] sm:$0xff] %v9663_v36  ;;  %v1824_v1 = vmul.f32 0.7978846, %v9599_v38  ;;  %v1507_v56 = vmul.f32 %v9648_v40, %v9648_v40  ;;  %v1509_v49 = vmul.f32 %v9652_v9, %v9652_v9  ;;  %v9681_v48 = vmul.f32 %v3708_v37, %v9539_v46  ;;  %v11756_v46 = vld [vmem:[#allocation63_spill] sm:$0xff]  ;;  %v9701_v4 = vpop.f32.mrf.mxu1 }
 0x37a   :  { %5962 = vtanh.f32 %v2765_v26  ;;  %v2135_v22 = vmul.f32 0.044715, %v1503_v6  ;;  %v2770_v58 = vmul.f32 %v2454_v3, %v1822_v31  ;;  %v9683_v16 = vpop.eup %5948  ;;  %v1819_v0 = vmul.f32 0.7978846, %v735_v44  ;;  %v11757_v26 = vld [vmem:[#allocation45_spill] sm:$0xff]  ;;  %v11758_v6 = vld [vmem:[#allocation66_spill] sm:$0xff] }
 0x37b   :  { %11752 = vst [vmem:[#allocation34_spill] sm:$0xff] %v9681_v48  ;;  %11753 = vst [vmem:[#allocation52_spill] sm:$0xff] %v9683_v16  ;;  %v2137_v28 = vmul.f32 0.044715, %v1505_v39  ;;  %v2772_v47 = vmul.f32 %v2456_v20, %v1824_v1  ;;  %v1510_v13 = vmul.f32 %v9658_v50, %v9658_v50  ;;  %v1821_v35 = vmul.f32 0.7978846, %v1166_v62 }
 0x37c   :  { %v1512_v36 = vmul.f32 %v9668_v14, %v9668_v14  ;;  %v4178_v37 = vpack.c.bf16 %v11756_v46, %v11755_v41  ;;  %v4180_v3 = vpack.c.bf16 %v11758_v6, %v11757_v26  ;;  %v9695_v31 = vpop.eup %5950  ;;  %v9697_v48 = vmul.f32 0.5, %v735_v44  ;;  %11762 = vst [vmem:[#allocation135_spill] sm:$0xff] %v9701_v4  ;;  %v11764_v46 = vld [vmem:[#allocation73_spill] sm:$0xff]  ;;  %v11765_v44 = vld [vmem:[#allocation67_spill] sm:$0xff]  ;;  %v11768_v4 = vld [vmem:[#allocation74_spill] sm:$0xff] }
 0x37d   :  { %11759 = vst [vmem:[#allocation125_spill] sm:$0xff] %v9695_v31  ;;  %v9699_v39 = vmul.f32 0.5, %v1166_v62  ;;  %v2139_v20 = vmul.f32 0.044715, %v1507_v56  ;;  %v2141_v1 = vmul.f32 0.044715, %v1509_v49  ;;  %5964 = vtanh.f32 %v2770_v58  ;;  %v9706_v62 = vpop.f32.mrf.mxu0 }
 0x37e   :  { %11760 = vst [vmem:[#allocation101_spill] sm:$0xff] %v9697_v48  ;;  %v5953_v57 = vpop.eup %5952  ;;  %v2451_v16 = vadd.f32 1.0, %v2135_v22  ;;  %4698 = vmatmul.mubr.bf16.gmra.mxu0 %v4178_v37  ;;  %5050 = vmatmul.mubr.bf16.gmra.mxu1 %v4180_v3  ;;  %v3619_v41 = vadd.f32 1.0, %v11763_v17  ;;  %v3623_v27 = vadd.f32 1.0, %v11764_v46  ;;  %v2453_v26 = vadd.f32 1.0, %v2137_v28  ;;  %11766 = vst [vmem:[#allocation40_spill] sm:$0xff] %v9706_v62 }
 0x37f   :  { %11761 = vst [vmem:[#allocation175_spill] sm:$0xff] %v9699_v39  ;;  %5966 = vtanh.f32 %v2772_v47  ;;  %v2142_v6 = vmul.f32 0.044715, %v1510_v13  ;;  %v3621_v48 = vadd.f32 1.0, %v11765_v44  ;;  %v5955_v56 = vpop.eup %5954  ;;  %v2144_v49 = vmul.f32 0.044715, %v1512_v36  ;;  %v9715_v47 = vpop.f32.mrf.mxu1 }
 0x380   :  { %v11767_v39 = vld [vmem:[#allocation62_spill] sm:$0xff]  ;;  %v3939_v22 = vmul.f32 %v3623_v27, %v11768_v4  ;;  %v3710_v3 = vadd.f32 1.0, %v5953_v57  ;;  %v2455_v30 = vadd.f32 1.0, %v2139_v20  ;;  %v2457_v17 = vadd.f32 1.0, %v2141_v1  ;;  %11770 = vst [vmem:[#allocation63_spill] sm:$0xff] %v9715_v47  ;;  %v11772_v46 = vld [vmem:[#allocation148_spill] sm:$0xff] }
 0x381   :  { %v3935_v31 = vmul.f32 %v3619_v41, %v11767_v39  ;;  %v11769_v58 = vld [vmem:[#allocation78_spill] sm:$0xff]  ;;  %v9713_v28 = vadd.f32 %v9115_v25, %v6479_v45  ;;  %v9717_v13 = vpop.eup %5956  ;;  %v9721_v36 = vadd.f32 %v11772_v46, %v6486_v51  ;;  %v11773_v41 = vld [vmem:[#allocation41_spill] sm:$0xff]  ;;  %v3712_v57 = vadd.f32 1.0, %v5955_v56  ;;  %v9726_v25 = vpop.f32.mrf.mxu0 }
 0x382   :  { %v3625_v37 = vadd.f32 1.0, %v11769_v58  ;;  %11771 = vst [vmem:[#allocation45_spill] sm:$0xff] %v9717_v13  ;;  %v3937_v27 = vmul.f32 %v3621_v48, %v11773_v41  ;;  %v11774_v4 = vld [vmem:[#allocation53_spill] sm:$0xff]  ;;  %v2767_v20 = vmul.f32 %v2451_v16, %v1819_v0  ;;  %v1823_v1 = vmul.f32 0.7978846, %v9648_v40  ;;  %v11775_v16 = vld [vmem:[#allocation136_spill] sm:$0xff] }
 0x383   :  { %v4183_v39 = vpack.c.bf16 %v3939_v22, %v3935_v31  ;;  %v2458_v58 = vadd.f32 1.0, %v2142_v6  ;;  %v5959_v62 = vpop.eup %5958  ;;  %v2769_v47 = vmul.f32 %v2453_v26, %v1821_v35  ;;  %v1825_v13 = vmul.f32 0.7978846, %v9652_v9  ;;  %v9735_v6 = vpop.f32.mrf.mxu1 }
 0x384   :  { %v3941_v44 = vmul.f32 %v3625_v37, %v11774_v4  ;;  %v2460_v23 = vadd.f32 1.0, %v2144_v49  ;;  %v9730_v31 = vmul.f32 0.5, %v9591_v29  ;;  %v2771_v48 = vmul.f32 %v2455_v30, %v1823_v1  ;;  %v11779_v1 = vld [vmem:[#allocation17_spill] sm:$0xff] }
 0x385   :  { %4705 = vmatprep.mubr.bf16.mxu0 %v4183_v39  ;;  %v5961_v19 = vpop.eup %5960  ;;  %v1826_v56 = vmul.f32 0.7978846, %v9658_v50  ;;  %v747_v0 = vadd.f32 %v11775_v16, %v6377_v11  ;;  %v2773_v22 = vmul.f32 %v2457_v17, %v1825_v13  ;;  %v1828_v35 = vmul.f32 0.7978846, %v9668_v14  ;;  %v9750_v17 = vpop.f32.mrf.mxu0 }
 0x386   :  { %v4185_v46 = vpack.c.bf16 %v3941_v44, %v3937_v27  ;;  %v1511_v26 = vmul.f32 %v9713_v28, %v9713_v28  ;;  %v1513_v49 = vmul.f32 %v9721_v36, %v9721_v36  ;;  %v9745_v30 = vmul.f32 %v3710_v3, %v9564_v7  ;;  %v9757_v3 = vpop.f32.mrf.mxu1 }
 0x387   :  { %v9742_v29 = vpop.eup %5962  ;;  %v9748_v37 = vmul.f32 %v3712_v57, %v9621_v2  ;;  %5968 = vtanh.f32 %v2767_v20  ;;  %v2774_v39 = vmul.f32 %v2458_v58, %v1826_v56  ;;  %v3714_v13 = vadd.f32 1.0, %v5959_v62  ;;  %11780 = vst [vmem:[#allocation67_spill] sm:$0xff] %v9757_v3 }
 0x388   :  { %5057 = vmatprep.mubr.bf16.mxu1 %v4185_v46  ;;  %11776 = vst [vmem:[#allocation66_spill] sm:$0xff] %v9742_v29  ;;  %11777 = vst [vmem:[#allocation64_spill] sm:$0xff] %v9745_v30  ;;  %v3716_v41 = vadd.f32 1.0, %v5961_v19  ;;  %5970 = vtanh.f32 %v2769_v47  ;;  %v2776_v27 = vmul.f32 %v2460_v23, %v1828_v35  ;;  %v9753_v4 = vmul.f32 0.5, %v9599_v38  ;;  %v9771_v47 = vpop.f32.mrf.mxu0  ;;  %v9788_v35 = vpop.f32.mrf.mxu1  ;;  %v11797_v30 = vld [vmem:[#allocation56_spill] sm:$0xff] }
 0x389   :  { %11778 = vst [vmem:[#allocation73_spill] sm:$0xff] %v9748_v37  ;;  %5972 = vtanh.f32 %v2771_v48  ;;  %v1514_v44 = vmul.f32 %v747_v0, %v747_v0  ;;  %v1178_v7 = vadd.f32 %v11779_v1, %v6380_v12  ;;  %v9760_v2 = vmul.f32 0.5, %v9648_v40  ;;  %11783 = vst [vmem:[#allocation78_spill] sm:$0xff] %v9771_v47  ;;  %v11812_v47 = vld [vmem:[#allocation84_spill] sm:$0xff] }
 0x38a   :  { %5974 = vtanh.f32 %v2773_v22  ;;  %v2143_v57 = vmul.f32 0.044715, %v1511_v26  ;;  %v2145_v20 = vmul.f32 0.044715, %v1513_v49  ;;  %v5965_v62 = vpop.eup %5964  ;;  %v9763_v19 = vmul.f32 0.5, %v9652_v9  ;;  %v11786_v9 = vld [vmem:[#allocation138_spill] sm:$0xff]  ;;  %v9801_v1 = vpop.f32.mrf.mxu0 }
 0x38b   :  { %11781 = vst [vmem:[#allocation62_spill] sm:$0xff] %v9760_v2  ;;  %v9766_v38 = vmul.f32 0.5, %v9658_v50  ;;  %5976 = vtanh.f32 %v2774_v39  ;;  %v9769_v23 = vmul.f32 0.5, %v9668_v14  ;;  %v9774_v40 = vmul.f32 %v3714_v13, %v9644_v24  ;;  %v11787_v14 = vld [vmem:[#allocation179_spill] sm:$0xff]  ;;  %11788 = vst [vmem:[#allocation53_spill] sm:$0xff] %v9788_v35 }
 0x38c   :  { %11782 = vst [vmem:[#allocation74_spill] sm:$0xff] %v9763_v19  ;;  %v5967_v58 = vpop.eup %5966  ;;  %v9777_v46 = vmul.f32 %v3716_v41, %v9671_v60  ;;  %5978 = vtanh.f32 %v2776_v27  ;;  %v9781_v48 = vadd.f32 %v11786_v9, %v6479_v45  ;;  %v1827_v50 = vmul.f32 0.7978846, %v9713_v28  ;;  %v11791_v27 = vld [vmem:[#allocation178_spill] sm:$0xff]  ;;  %11792 = vst [vmem:[#allocation138_spill] sm:$0xff] %v9801_v1  ;;  %v9827_v29 = vpop.f32.mrf.mxu0 }
 0x38d   :  { %11784 = vst [vmem:[#allocation148_spill] sm:$0xff] %v9774_v40  ;;  %v2146_v56 = vmul.f32 0.044715, %v1514_v44  ;;  %v1516_v16 = vmul.f32 %v1178_v7, %v1178_v7  ;;  %v9786_v22 = vadd.f32 %v11787_v14, %v6377_v11  ;;  %v2459_v24 = vadd.f32 1.0, %v2143_v57  ;;  %v11798_v19 = vld [vmem:[#allocation82_spill] sm:$0xff] }
 0x38e   :  { %11785 = vst [vmem:[#allocation41_spill] sm:$0xff] %v9777_v46  ;;  %v9791_v26 = vmul.f32 0.5, %v9713_v28  ;;  %v1829_v60 = vmul.f32 0.7978846, %v9721_v36  ;;  %v2461_v49 = vadd.f32 1.0, %v2145_v20  ;;  %v3718_v39 = vadd.f32 1.0, %v5965_v62 }
 0x38f   :  { %v9795_v13 = vmul.f32 0.5, %v9721_v36  ;;  %v1830_v41 = vmul.f32 0.7978846, %v747_v0  ;;  %v9799_v44 = vadd.f32 %v11791_v27, %v6486_v51  ;;  %v3720_v9 = vadd.f32 1.0, %v5967_v58  ;;  %v11793_v62 = vld [vmem:[#allocation168_spill] sm:$0xff]  ;;  %v9813_v27 = vpop.f32.mrf.mxu1  ;;  %v11795_v58 = vld [vmem:[#allocation59_spill] sm:$0xff] }
 0x390   :  { %11789 = vst [vmem:[#allocation136_spill] sm:$0xff] %v9791_v26  ;;  %v9803_v14 = vmul.f32 0.5, %v747_v0  ;;  %v1832_v57 = vmul.f32 0.7978846, %v1178_v7  ;;  %v1515_v28 = vmul.f32 %v9781_v48, %v9781_v48  ;;  %v2462_v46 = vadd.f32 1.0, %v2146_v56  ;;  %11794 = vst [vmem:[#allocation179_spill] sm:$0xff] %v9813_v27 }
 0x391   :  { %11790 = vst [vmem:[#allocation17_spill] sm:$0xff] %v9795_v13  ;;  %v2148_v20 = vmul.f32 0.044715, %v1516_v16  ;;  %v1518_v36 = vmul.f32 %v9786_v22, %v9786_v22  ;;  %v9811_v40 = vadd.f32 %v11793_v62, %v6380_v12  ;;  %v2775_v13 = vmul.f32 %v2459_v24, %v1827_v50  ;;  %v11796_v0 = vld [vmem:[#allocation70_spill] sm:$0xff]  ;;  %v11800_v62 = vld [vmem:[#allocation71_spill] sm:$0xff]  ;;  %11801 = vst [vmem:[#allocation168_spill] sm:$0xff] %v9827_v29  ;;  %v9838_v29 = vpop.f32.mrf.mxu1 }
 0x392   :  { %v2777_v26 = vmul.f32 %v2461_v49, %v1829_v60  ;;  %v4182_v37 = vpack.c.bf16 %v11796_v0, %v11795_v58  ;;  %v4184_v2 = vpack.c.bf16 %v11798_v19, %v11797_v30  ;;  %v9820_v56 = vmul.f32 %v3718_v39, %v9730_v31  ;;  %v11803_v60 = vld [vmem:[#allocation89_spill] sm:$0xff]  ;;  %v11804_v30 = vld [vmem:[#allocation83_spill] sm:$0xff]  ;;  %11807 = vst [vmem:[#allocation56_spill] sm:$0xff] %v9838_v29  ;;  %v11811_v27 = vld [vmem:[#allocation162_spill] sm:$0xff] }
 0x393   :  { %v9822_v16 = vmul.f32 0.5, %v1178_v7  ;;  %v1517_v1 = vmul.f32 %v9799_v44, %v9799_v44  ;;  %v3627_v35 = vadd.f32 1.0, %v11800_v62  ;;  %v2147_v24 = vmul.f32 0.044715, %v1515_v28  ;;  %v11805_v31 = vld [vmem:[#allocation91_spill] sm:$0xff]  ;;  %v11810_v28 = vld [vmem:[#allocation80_spill] sm:$0xff] }
 0x394   :  { %11799 = vst [vmem:[#allocation178_spill] sm:$0xff] %v9820_v56  ;;  %v9829_v50 = vpop.eup %5968  ;;  %4706 = vmatmul.mubr.bf16.gmra.mxu0 %v4182_v37  ;;  %5058 = vmatmul.mubr.bf16.gmra.mxu1 %v4184_v2  ;;  %v3631_v49 = vadd.f32 1.0, %v11803_v60  ;;  %v3629_v19 = vadd.f32 1.0, %v11804_v30  ;;  %v3633_v39 = vadd.f32 1.0, %v11805_v31  ;;  %v2778_v58 = vmul.f32 %v2462_v46, %v1830_v41  ;;  %v11809_v37 = vld [vmem:[#allocation61_spill] sm:$0xff]  ;;  %v11842_v29 = vld [vmem:[#allocation103_spill] sm:$0xff] }
 0x395   :  { %11802 = vst [vmem:[#allocation59_spill] sm:$0xff] %v9829_v50  ;;  %v9834_v7 = vpop.eup %5970  ;;  %v2464_v0 = vadd.f32 1.0, %v2148_v20  ;;  %v2150_v56 = vmul.f32 0.044715, %v1518_v36  ;;  %v1520_v62 = vmul.f32 %v9811_v40, %v9811_v40  ;;  %v3943_v2 = vmul.f32 %v3627_v35, %v11809_v37  ;;  %v9855_v36 = vpop.f32.mrf.mxu0 }
 0x396   :  { %11806 = vst [vmem:[#allocation70_spill] sm:$0xff] %v9834_v7  ;;  %v9840_v50 = vpop.eup %5972  ;;  %v3947_v60 = vmul.f32 %v3631_v49, %v11810_v28  ;;  %v3945_v30 = vmul.f32 %v3629_v19, %v11811_v27  ;;  %v3949_v31 = vmul.f32 %v3633_v39, %v11812_v47  ;;  %v9849_v46 = vmul.f32 %v3720_v9, %v9753_v4  ;;  %v11817_v39 = vld [vmem:[#allocation104_spill] sm:$0xff] }
 0x397   :  { %11808 = vst [vmem:[#allocation82_spill] sm:$0xff] %v9840_v50  ;;  %v9846_v3 = vpop.eup %5974  ;;  %5980 = vtanh.f32 %v2775_v13  ;;  %v2149_v41 = vmul.f32 0.044715, %v1517_v1  ;;  %v9853_v20 = vadd.f32 %v9236_v59, %v6377_v11  ;;  %11815 = vst [vmem:[#allocation83_spill] sm:$0xff] %v9855_v36  ;;  %v2463_v37 = vadd.f32 1.0, %v2147_v24  ;;  %v9861_v1 = vpop.f32.mrf.mxu1  ;;  %v11818_v24 = vld [vmem:[#allocation149_spill] sm:$0xff] }
 0x398   :  { %11813 = vst [vmem:[#allocation71_spill] sm:$0xff] %v9846_v3  ;;  %11814 = vst [vmem:[#allocation89_spill] sm:$0xff] %v9849_v46  ;;  %v5977_v35 = vpop.eup %5976  ;;  %v9859_v27 = vadd.f32 %v9244_v43, %v6380_v12  ;;  %v4187_v47 = vpack.c.bf16 %v3947_v60, %v3943_v2  ;;  %v4189_v49 = vpack.c.bf16 %v3949_v31, %v3945_v30  ;;  %5982 = vtanh.f32 %v2778_v58 }
 0x399   :  { %v5979_v19 = vpop.eup %5978  ;;  %v2780_v4 = vmul.f32 %v2464_v0, %v1832_v57  ;;  %v2466_v9 = vadd.f32 1.0, %v2150_v56  ;;  %v2152_v13 = vmul.f32 0.044715, %v1520_v62  ;;  %11816 = vst [vmem:[#allocation91_spill] sm:$0xff] %v9861_v1  ;;  %5984 = vtanh.f32 %v2777_v26  ;;  %v9871_v56 = vpop.f32.mrf.mxu0 }
 0x39a   :  { %v1831_v59 = vmul.f32 0.7978846, %v9781_v48  ;;  %v755_v28 = vadd.f32 %v11817_v39, %v6479_v45  ;;  %v1186_v36 = vadd.f32 %v11818_v24, %v6486_v51  ;;  %4713 = vmatprep.mubr.bf16.mxu0 %v4187_v47  ;;  %5065 = vmatprep.mubr.bf16.mxu1 %v4189_v49  ;;  %v3722_v43 = vadd.f32 1.0, %v5977_v35  ;;  %11819 = vst [vmem:[#allocation61_spill] sm:$0xff] %v9871_v56  ;;  %v9879_v35 = vpop.f32.mrf.mxu1  ;;  %v11840_v56 = vld [vmem:[#allocation106_spill] sm:$0xff] }
 0x39b   :  { %v2465_v2 = vadd.f32 1.0, %v2149_v41  ;;  %v1834_v58 = vmul.f32 0.7978846, %v9786_v22  ;;  %v1522_v57 = vmul.f32 %v9853_v20, %v9853_v20  ;;  %v3724_v26 = vadd.f32 1.0, %v5979_v19  ;;  %11821 = vst [vmem:[#allocation162_spill] sm:$0xff] %v9879_v35  ;;  %v9891_v24 = vpop.f32.mrf.mxu0  ;;  %v11836_v35 = vld [vmem:[#allocation77_spill] sm:$0xff] }
 0x39c   :  { %v2779_v0 = vmul.f32 %v2463_v37, %v1831_v59  ;;  %v9874_v62 = vmul.f32 0.5, %v9781_v48  ;;  %v1524_v60 = vmul.f32 %v9859_v27, %v9859_v27  ;;  %5986 = vtanh.f32 %v2780_v4  ;;  %11824 = vst [vmem:[#allocation149_spill] sm:$0xff] %v9891_v24  ;;  %v11835_v24 = vld [vmem:[#allocation68_spill] sm:$0xff] }
 0x39d   :  { %v1833_v30 = vmul.f32 0.7978846, %v9799_v44  ;;  %v2782_v31 = vmul.f32 %v2466_v9, %v1834_v58  ;;  %v2468_v41 = vadd.f32 1.0, %v2152_v13  ;;  %v9882_v47 = vmul.f32 0.5, %v9799_v44 }
 0x39e   :  { %11820 = vst [vmem:[#allocation80_spill] sm:$0xff] %v9874_v62  ;;  %v9885_v49 = vmul.f32 0.5, %v9786_v22  ;;  %v1519_v37 = vmul.f32 %v755_v28, %v755_v28  ;;  %v1521_v19 = vmul.f32 %v1186_v36, %v1186_v36  ;;  %v9888_v48 = vmul.f32 %v3722_v43, %v9766_v38 }
 0x39f   :  { %11822 = vst [vmem:[#allocation84_spill] sm:$0xff] %v9882_v47  ;;  %v2781_v59 = vmul.f32 %v2465_v2, %v1833_v30  ;;  %v1836_v4 = vmul.f32 0.7978846, %v9811_v40  ;;  %v2154_v39 = vmul.f32 0.044715, %v1522_v57  ;;  %v9894_v9 = vmul.f32 %v3724_v26, %v9769_v23  ;;  %v9907_v2 = vpop.f32.mrf.mxu1  ;;  %v11827_v26 = vld [vmem:[#allocation65_spill] sm:$0xff] }
 0x3a0   :  { %11823 = vst [vmem:[#allocation104_spill] sm:$0xff] %v9888_v48  ;;  %5988 = vtanh.f32 %v2779_v0  ;;  %v2156_v44 = vmul.f32 0.044715, %v1524_v60  ;;  %v9898_v22 = vadd.f32 %v9256_v55, %v6479_v45  ;;  %v9901_v38 = vmul.f32 0.5, %v9811_v40  ;;  %11826 = vst [vmem:[#allocation195_spill] sm:$0xff] %v9907_v2  ;;  %v11828_v55 = vld [vmem:[#allocation93_spill] sm:$0xff] }
 0x3a1   :  { %11825 = vst [vmem:[#allocation194_spill] sm:$0xff] %v9894_v9  ;;  %5990 = vtanh.f32 %v2782_v31  ;;  %v2784_v13 = vmul.f32 %v2468_v41, %v1836_v4  ;;  %v9905_v43 = vadd.f32 %v9276_v18, %v6377_v11  ;;  %v2151_v58 = vmul.f32 0.044715, %v1519_v37  ;;  %v9919_v18 = vpop.f32.mrf.mxu0 }
 0x3a2   :  { %v2153_v23 = vmul.f32 0.044715, %v1521_v19  ;;  %v9911_v57 = vadd.f32 %v9270_v32, %v6486_v51  ;;  %v4186_v0 = vpack.c.bf16 %v11828_v55, %v11827_v26  ;;  %5992 = vtanh.f32 %v2781_v59  ;;  %11829 = vst [vmem:[#allocation65_spill] sm:$0xff] %v9919_v18 }
 0x3a3   :  { %v1835_v60 = vmul.f32 0.7978846, %v755_v28  ;;  %v2470_v30 = vadd.f32 1.0, %v2154_v39  ;;  %v9917_v40 = vadd.f32 %v9284_v53, %v6380_v12  ;;  %v9923_v41 = vmul.f32 0.5, %v755_v28  ;;  %v9932_v39 = vpop.f32.mrf.mxu1  ;;  %v9946_v9 = vpop.f32.mrf.mxu0 }
 0x3a4   :  { %v9921_v31 = vpop.eup %5980  ;;  %v1837_v37 = vmul.f32 0.7978846, %v1186_v36  ;;  %v2472_v19 = vadd.f32 1.0, %v2156_v44  ;;  %v1523_v32 = vmul.f32 %v9898_v22, %v9898_v22  ;;  %4714 = vmatmul.mubr.bf16.gmra.mxu0 %v4186_v0  ;;  %5994 = vtanh.f32 %v2784_v13  ;;  %11833 = vst [vmem:[#allocation198_spill] sm:$0xff] %v9932_v39  ;;  %11837 = vst [vmem:[#allocation68_spill] sm:$0xff] %v9946_v9 }
 0x3a5   :  { %11830 = vst [vmem:[#allocation93_spill] sm:$0xff] %v9921_v31  ;;  %11831 = vst [vmem:[#allocation196_spill] sm:$0xff] %v9923_v41  ;;  %v9927_v59 = vmul.f32 0.5, %v1186_v36  ;;  %v1838_v4 = vmul.f32 0.7978846, %v9853_v20  ;;  %v1526_v53 = vmul.f32 %v9905_v43, %v9905_v43  ;;  %v5983_v26 = vpop.eup %5982  ;;  %v2467_v55 = vadd.f32 1.0, %v2151_v58  ;;  %v9948_v58 = vpop.f32.mrf.mxu1 }
 0x3a6   :  { %v2469_v28 = vadd.f32 1.0, %v2153_v23  ;;  %v1840_v18 = vmul.f32 0.7978846, %v9859_v27  ;;  %v1525_v44 = vmul.f32 %v9911_v57, %v9911_v57  ;;  %v9937_v2 = vpop.eup %5984  ;;  %v9940_v36 = vmul.f32 0.5, %v9853_v20  ;;  %11838 = vst [vmem:[#allocation77_spill] sm:$0xff] %v9948_v58  ;;  %v11841_v20 = vld [vmem:[#allocation97_spill] sm:$0xff]  ;;  %v836_v62 = vpop.f32.mrf.mxu0 }
 0x3a7   :  { %11832 = vst [vmem:[#allocation197_spill] sm:$0xff] %v9927_v59  ;;  %11834 = vst [vmem:[#allocation199_spill] sm:$0xff] %v9937_v2  ;;  %v2786_v13 = vmul.f32 %v2470_v30, %v1838_v4  ;;  %v1528_v0 = vmul.f32 %v9917_v40, %v9917_v40  ;;  %v4188_v39 = vpack.c.bf16 %v11836_v35, %v11835_v24  ;;  %v2155_v48 = vmul.f32 0.044715, %v1523_v32  ;;  %v11839_v59 = vld [vmem:[#allocation92_spill] sm:$0xff]  ;;  %v1267_v2 = vpop.f32.mrf.mxu1  ;;  %v11844_v32 = vld [vmem:[#allocation81_spill] sm:$0xff] }
 0x3a8   :  { %v2788_v23 = vmul.f32 %v2472_v19, %v1840_v18  ;;  %v3635_v41 = vadd.f32 1.0, %v11839_v59  ;;  %v3639_v1 = vadd.f32 1.0, %v11840_v56  ;;  %v3726_v30 = vadd.f32 1.0, %v5983_v26  ;;  %v11843_v18 = vld [vmem:[#allocation163_spill] sm:$0xff]  ;;  %v837_v9 = vpop.f32.mrf.mxu0  ;;  %v11847_v2 = vld [vmem:[#allocation154_spill] sm:$0xff] }
 0x3a9   :  { %v2158_v4 = vmul.f32 0.044715, %v1526_v53  ;;  %5066 = vmatmul.mubr.bf16.gmra.mxu1 %v4188_v39  ;;  %v3637_v46 = vadd.f32 1.0, %v11841_v20  ;;  %v3641_v47 = vadd.f32 1.0, %v11842_v29  ;;  %v5987_v35 = vpop.eup %5986  ;;  %v2157_v24 = vmul.f32 0.044715, %v1525_v44  ;;  %v1268_v29 = vpop.f32.mrf.mxu1 }
 0x3aa   :  { %v9956_v58 = vadd.f32 %v9327_v33, %v6377_v11  ;;  %v3951_v19 = vmul.f32 %v3635_v41, %v11843_v18  ;;  %v3955_v59 = vmul.f32 %v3639_v1, %v11844_v32  ;;  %5996 = vtanh.f32 %v2786_v13  ;;  %v11845_v53 = vld [vmem:[#allocation75_spill] sm:$0xff]  ;;  %v11852_v29 = vld [vmem:[#allocation182_spill] sm:$0xff] }
 0x3ab   :  { %v2160_v56 = vmul.f32 0.044715, %v1528_v0  ;;  %v3953_v39 = vmul.f32 %v3637_v46, %v11845_v53  ;;  %v11846_v26 = vld [vmem:[#allocation79_spill] sm:$0xff]  ;;  %5998 = vtanh.f32 %v2788_v23  ;;  %v2471_v62 = vadd.f32 1.0, %v2155_v48  ;;  %v9968_v0 = vpop.f32.mrf.mxu0  ;;  %v9970_v46 = vpop.f32.mrf.mxu1 }
 0x3ac   :  { %v3957_v20 = vmul.f32 %v3641_v47, %v11846_v26  ;;  %v9964_v44 = vadd.f32 %v11847_v2, %v6479_v45  ;;  %v4191_v33 = vpack.c.bf16 %v3955_v59, %v3951_v19  ;;  %v3728_v41 = vadd.f32 1.0, %v5987_v35 }
 0x3ad   :  { %v9966_v31 = vpop.eup %5988  ;;  %v2783_v18 = vmul.f32 %v2467_v55, %v1835_v60  ;;  %v2474_v1 = vadd.f32 1.0, %v2158_v4  ;;  %v2785_v9 = vmul.f32 %v2469_v28, %v1837_v37  ;;  %v1839_v23 = vmul.f32 0.7978846, %v9898_v22  ;;  %v11849_v4 = vld [vmem:[#allocation108_spill] sm:$0xff]  ;;  %v4573_v59 = vpop.f32.mrf.mxu0 }
 0x3ae   :  { %11848 = vst [vmem:[#allocation92_spill] sm:$0xff] %v9966_v31  ;;  %v4193_v13 = vpack.c.bf16 %v3957_v20, %v3953_v39  ;;  %v5991_v47 = vpop.eup %5990  ;;  %v2473_v48 = vadd.f32 1.0, %v2157_v24  ;;  %v1530_v32 = vmul.f32 %v9956_v58, %v9956_v58  ;;  %4721 = vmatprep.mubr.bf16.mxu0 %v4191_v33  ;;  %v9976_v19 = vmul.f32 0.5, %v9859_v27  ;;  %v4925_v53 = vpop.f32.mrf.mxu1 }
 0x3af   :  { %v1842_v60 = vmul.f32 0.7978846, %v9905_v43  ;;  %v2476_v55 = vadd.f32 1.0, %v2160_v56  ;;  %v1196_v35 = vadd.f32 %v11849_v4, %v6486_v51  ;;  %v9981_v37 = vpop.eup %5992  ;;  %v9984_v28 = vmul.f32 %v3726_v30, %v9803_v14  ;;  %v9992_v33 = vpop.f32.mrf.mxu0 }
 0x3b0   :  { %5073 = vmatprep.mubr.bf16.mxu1 %v4193_v13  ;;  %11850 = vst [vmem:[#allocation106_spill] sm:$0xff] %v9981_v37  ;;  %v2787_v24 = vmul.f32 %v2471_v62, %v1839_v23  ;;  %v1841_v39 = vmul.f32 0.7978846, %v9911_v57  ;;  %v1527_v27 = vmul.f32 %v9964_v44, %v9964_v44  ;;  %v3730_v26 = vadd.f32 1.0, %v5991_v47  ;;  %v9994_v13 = vpop.f32.mrf.mxu1  ;;  %v11870_v37 = vld [vmem:[#allocation119_spill] sm:$0xff] }
 0x3b1   :  { %11851 = vst [vmem:[#allocation97_spill] sm:$0xff] %v9984_v28  ;;  %v2790_v20 = vmul.f32 %v2474_v1, %v1842_v60  ;;  %v1844_v56 = vmul.f32 0.7978846, %v9917_v40  ;;  %v1198_v2 = vadd.f32 %v11852_v29, %v6380_v12  ;;  %v5995_v4 = vpop.eup %5994  ;;  %v9997_v14 = vmul.f32 %v3728_v41, %v9822_v16  ;;  %v4576_v60 = vpop.f32.mrf.mxu0  ;;  %v11864_v28 = vld [vmem:[#allocation110_spill] sm:$0xff] }
 0x3b2   :  { %6000 = vtanh.f32 %v2783_v18  ;;  %v2789_v30 = vmul.f32 %v2473_v48, %v1841_v39  ;;  %v2162_v62 = vmul.f32 0.044715, %v1530_v32  ;;  %v10000_v47 = vmul.f32 0.5, %v9898_v22  ;;  %v4928_v59 = vpop.f32.mrf.mxu1 }
 0x3b3   :  { %11853 = vst [vmem:[#allocation103_spill] sm:$0xff] %v9997_v14  ;;  %6002 = vtanh.f32 %v2785_v9  ;;  %v2792_v1 = vmul.f32 %v2476_v55, %v1844_v56  ;;  %v1529_v23 = vmul.f32 %v1196_v35, %v1196_v35  ;;  %v10003_v53 = vmul.f32 0.5, %v9911_v57  ;;  %v10011_v22 = vpop.f32.mrf.mxu0  ;;  %v11857_v55 = vld [vmem:[#allocation158_spill] sm:$0xff] }
 0x3b4   :  { %11854 = vst [vmem:[#allocation163_spill] sm:$0xff] %v10000_v47  ;;  %6004 = vtanh.f32 %v2787_v24  ;;  %v10006_v29 = vmul.f32 0.5, %v9905_v43  ;;  %v2159_v16 = vmul.f32 0.044715, %v1527_v27  ;;  %v10009_v41 = vmul.f32 %v3730_v26, %v9885_v49  ;;  %v10013_v48 = vpop.f32.mrf.mxu1  ;;  %v11863_v14 = vld [vmem:[#allocation166_spill] sm:$0xff] }
 0x3b5   :  { %11855 = vst [vmem:[#allocation81_spill] sm:$0xff] %v10003_v53  ;;  %v3732_v18 = vadd.f32 1.0, %v5995_v4  ;;  %6006 = vtanh.f32 %v2790_v20  ;;  %v1532_v9 = vmul.f32 %v1198_v2, %v1198_v2  ;;  %v10016_v32 = vmul.f32 0.5, %v9917_v40  ;;  %v4581_v27 = vpop.f32.mrf.mxu0 }
 0x3b6   :  { %11856 = vst [vmem:[#allocation75_spill] sm:$0xff] %v10009_v41  ;;  %6008 = vtanh.f32 %v2789_v30  ;;  %v2478_v57 = vadd.f32 1.0, %v2162_v62  ;;  %v10020_v43 = vadd.f32 %v11857_v55, %v6479_v45  ;;  %v1843_v49 = vmul.f32 0.7978846, %v9964_v44  ;;  %v4933_v26 = vpop.f32.mrf.mxu1 }
 0x3b7   :  { %6010 = vtanh.f32 %v2792_v1  ;;  %v2161_v24 = vmul.f32 0.044715, %v1529_v23  ;;  %v10025_v39 = vadd.f32 %v9370_v5, %v6377_v11  ;;  %v5997_v20 = vpop.eup %5996  ;;  %v2475_v56 = vadd.f32 1.0, %v2159_v16  ;;  %v10042_v59 = vpop.f32.mrf.mxu0 }
 0x3b8   :  { %v1846_v40 = vmul.f32 0.7978846, %v9956_v58  ;;  %v10030_v4 = vadd.f32 %v9360_v42, %v6486_v51  ;;  %v10034_v30 = vadd.f32 %v9382_v52, %v6380_v12  ;;  %v5999_v62 = vpop.eup %5998  ;;  %v10037_v1 = vmul.f32 %v3732_v18, %v9901_v38  ;;  %v10044_v16 = vpop.f32.mrf.mxu1 }
 0x3b9   :  { %v10040_v5 = vmul.f32 0.5, %v9964_v44  ;;  %v1845_v23 = vmul.f32 0.7978846, %v1196_v35  ;;  %v2164_v60 = vmul.f32 0.044715, %v1532_v9  ;;  %v10046_v55 = vmul.f32 0.5, %v1196_v35  ;;  %v4584_v9 = vpop.f32.mrf.mxu0 }
 0x3ba   :  { %11858 = vst [vmem:[#allocation79_spill] sm:$0xff] %v10037_v1  ;;  %v2794_v42 = vmul.f32 %v2478_v57, %v1846_v40  ;;  %v10049_v27 = vmul.f32 0.5, %v9956_v58  ;;  %v1531_v52 = vmul.f32 %v10020_v43, %v10020_v43  ;;  %v3734_v38 = vadd.f32 1.0, %v5997_v20  ;;  %v4936_v1 = vpop.f32.mrf.mxu1  ;;  %v11862_v20 = vld [vmem:[#allocation87_spill] sm:$0xff] }
 0x3bb   :  { %11859 = vst [vmem:[#allocation154_spill] sm:$0xff] %v10040_v5  ;;  %11860 = vst [vmem:[#allocation108_spill] sm:$0xff] %v10046_v55  ;;  %v2477_v18 = vadd.f32 1.0, %v2161_v24  ;;  %v1848_v26 = vmul.f32 0.7978846, %v1198_v2  ;;  %v1534_v44 = vmul.f32 %v10025_v39, %v10025_v39  ;;  %v3736_v5 = vadd.f32 1.0, %v5999_v62  ;;  %v10065_v47 = vpop.f32.mrf.mxu0 }
 0x3bc   :  { %v2791_v41 = vmul.f32 %v2475_v56, %v1843_v49  ;;  %v1533_v35 = vmul.f32 %v10030_v4, %v10030_v4  ;;  %v1536_v58 = vmul.f32 %v10034_v30, %v10034_v30  ;;  %v2480_v57 = vadd.f32 1.0, %v2164_v60  ;;  %v11861_v55 = vld [vmem:[#allocation86_spill] sm:$0xff]  ;;  %v10067_v1 = vpop.f32.mrf.mxu1  ;;  %v11866_v62 = vld [vmem:[#allocation169_spill] sm:$0xff] }
 0x3bd   :  { %v10059_v40 = vmul.f32 0.5, %v1198_v2  ;;  %v4190_v24 = vpack.c.bf16 %v11862_v20, %v11861_v55  ;;  %v4192_v53 = vpack.c.bf16 %v11864_v28, %v11863_v14  ;;  %11865 = vst [vmem:[#allocation182_spill] sm:$0xff] %v10067_v1  ;;  %6012 = vtanh.f32 %v2794_v42  ;;  %v11868_v55 = vld [vmem:[#allocation112_spill] sm:$0xff]  ;;  %v11869_v28 = vld [vmem:[#allocation171_spill] sm:$0xff]  ;;  %v4589_v7 = vpop.f32.mrf.mxu0 }
 0x3be   :  { %v2163_v49 = vmul.f32 0.044715, %v1531_v52  ;;  %v10071_v56 = vadd.f32 %v9415_v8, %v6377_v11  ;;  %v3643_v60 = vadd.f32 1.0, %v11866_v62  ;;  %v2166_v9 = vmul.f32 0.044715, %v1534_v44  ;;  %v4941_v42 = vpop.f32.mrf.mxu1 }
 0x3bf   :  { %v10074_v2 = vpop.eup %6000  ;;  %4722 = vmatmul.mubr.bf16.gmra.mxu0 %v4190_v24  ;;  %5074 = vmatmul.mubr.bf16.gmra.mxu1 %v4192_v53  ;;  %v3647_v20 = vadd.f32 1.0, %v11868_v55  ;;  %v3645_v14 = vadd.f32 1.0, %v11869_v28  ;;  %v3649_v31 = vadd.f32 1.0, %v11870_v37  ;;  %v2793_v3 = vmul.f32 %v2477_v18, %v1845_v23  ;;  %v11873_v53 = vld [vmem:[#allocation50_spill] sm:$0xff]  ;;  %v11874_v55 = vld [vmem:[#allocation88_spill] sm:$0xff]  ;;  %v11876_v37 = vld [vmem:[#allocation95_spill] sm:$0xff]  ;;  %v10091_v42 = vpop.f32.mrf.mxu0 }
 0x3c0   :  { %11867 = vst [vmem:[#allocation158_spill] sm:$0xff] %v10074_v2  ;;  %v10079_v52 = vpop.eup %6002  ;;  %v2165_v8 = vmul.f32 0.044715, %v1533_v35  ;;  %v2168_v50 = vmul.f32 0.044715, %v1536_v58  ;;  %v10083_v62 = vadd.f32 %v9425_v10, %v6380_v12  ;;  %v3959_v24 = vmul.f32 %v3643_v60, %v11873_v53  ;;  %v11875_v28 = vld [vmem:[#allocation54_spill] sm:$0xff] }
 0x3c1   :  { %11871 = vst [vmem:[#allocation86_spill] sm:$0xff] %v10079_v52  ;;  %v10085_v44 = vpop.eup %6004  ;;  %v3963_v2 = vmul.f32 %v3647_v20, %v11874_v55  ;;  %v3961_v1 = vmul.f32 %v3645_v14, %v11875_v28  ;;  %v3965_v7 = vmul.f32 %v3649_v31, %v11876_v37  ;;  %v10093_v52 = vpop.f32.mrf.mxu1  ;;  %v10096_v18 = vmul.f32 %v3734_v38, %v9940_v36 }
 0x3c2   :  { %11872 = vst [vmem:[#allocation87_spill] sm:$0xff] %v10085_v44  ;;  %11877 = vst [vmem:[#allocation166_spill] sm:$0xff] %v10093_v52  ;;  %v6007_v23 = vpop.eup %6006  ;;  %v10099_v10 = vmul.f32 %v3736_v5, %v9976_v19  ;;  %v2479_v35 = vadd.f32 1.0, %v2163_v49  ;;  %v1538_v58 = vmul.f32 %v10071_v56, %v10071_v56  ;;  %v2796_v20 = vmul.f32 %v2480_v57, %v1848_v26  ;;  %v4592_v55 = vpop.f32.mrf.mxu0 }
 0x3c3   :  { %11878 = vst [vmem:[#allocation110_spill] sm:$0xff] %v10096_v18  ;;  %v10103_v60 = vpop.eup %6008  ;;  %v2482_v14 = vadd.f32 1.0, %v2166_v9  ;;  %v4195_v31 = vpack.c.bf16 %v3963_v2, %v3959_v24  ;;  %v4197_v53 = vpack.c.bf16 %v3965_v7, %v3961_v1  ;;  %v4944_v28 = vpop.f32.mrf.mxu1  ;;  %6014 = vtanh.f32 %v2791_v41 }
 0x3c4   :  { %11879 = vst [vmem:[#allocation169_spill] sm:$0xff] %v10099_v10  ;;  %11880 = vst [vmem:[#allocation112_spill] sm:$0xff] %v10103_v60  ;;  %v6011_v37 = vpop.eup %6010  ;;  %v1847_v36 = vmul.f32 0.7978846, %v10020_v43  ;;  %v2484_v38 = vadd.f32 1.0, %v2168_v50  ;;  %v1540_v19 = vmul.f32 %v10083_v62, %v10083_v62  ;;  %v3738_v5 = vadd.f32 1.0, %v6007_v23  ;;  %v10109_v26 = vpop.f32.mrf.mxu0 }
 0x3c5   :  { %6016 = vtanh.f32 %v2793_v3  ;;  %v2481_v49 = vadd.f32 1.0, %v2165_v8  ;;  %v1850_v10 = vmul.f32 0.7978846, %v10025_v39  ;;  %4729 = vmatprep.mubr.bf16.mxu0 %v4195_v31  ;;  %5081 = vmatprep.mubr.bf16.mxu1 %v4197_v53  ;;  %v10111_v57 = vpop.f32.mrf.mxu1  ;;  %v1849_v41 = vmul.f32 0.7978846, %v10030_v4  ;;  %v11901_v60 = vld [vmem:[#allocation121_spill] sm:$0xff] }
 0x3c6   :  { %11881 = vst [vmem:[#allocation171_spill] sm:$0xff] %v10111_v57  ;;  %v2795_v1 = vmul.f32 %v2479_v35, %v1847_v36  ;;  %v1852_v2 = vmul.f32 0.7978846, %v10034_v30  ;;  %v2170_v50 = vmul.f32 0.044715, %v1538_v58  ;;  %v3740_v9 = vadd.f32 1.0, %v6011_v37  ;;  %v4597_v8 = vpop.f32.mrf.mxu0 }
 0x3c7   :  { %6018 = vtanh.f32 %v2796_v20  ;;  %v2798_v24 = vmul.f32 %v2482_v14, %v1850_v10  ;;  %v775_v3 = vadd.f32 %v9393_v21, %v6479_v45  ;;  %v4949_v7 = vpop.f32.mrf.mxu1  ;;  %v10118_v23 = vmul.f32 0.5, %v10020_v43  ;;  %v11885_v10 = vld [vmem:[#allocation21_spill] sm:$0xff] }
 0x3c8   :  { %v10121_v31 = vmul.f32 0.5, %v10030_v4  ;;  %v2800_v35 = vmul.f32 %v2484_v38, %v1852_v2  ;;  %v2172_v53 = vmul.f32 0.044715, %v1540_v19  ;;  %v10124_v55 = vmul.f32 %v3738_v5, %v10006_v29  ;;  %v10131_v14 = vpop.f32.mrf.mxu0  ;;  %v11888_v37 = vld [vmem:[#allocation173_spill] sm:$0xff]  ;;  %v11890_v19 = vld [vmem:[#allocation186_spill] sm:$0xff] }
 0x3c9   :  { %11882 = vst [vmem:[#allocation119_spill] sm:$0xff] %v10118_v23  ;;  %v2797_v58 = vmul.f32 %v2481_v49, %v1849_v41  ;;  %v10127_v20 = vmul.f32 0.5, %v10025_v39  ;;  %v1206_v21 = vadd.f32 %v11885_v10, %v6486_v51  ;;  %11886 = vst [vmem:[#allocation54_spill] sm:$0xff] %v10131_v14  ;;  %v10133_v28 = vpop.f32.mrf.mxu1  ;;  %6020 = vtanh.f32 %v2795_v1  ;;  %v11891_v2 = vld [vmem:[#allocation189_spill] sm:$0xff] }
 0x3ca   :  { %11883 = vst [vmem:[#allocation50_spill] sm:$0xff] %v10121_v31  ;;  %11884 = vst [vmem:[#allocation88_spill] sm:$0xff] %v10124_v55  ;;  %v10136_v43 = vmul.f32 0.5, %v10034_v30  ;;  %v2486_v4 = vadd.f32 1.0, %v2170_v50  ;;  %v10140_v29 = vadd.f32 %v11888_v37, %v6479_v45  ;;  %v6013_v36 = vpop.eup %6012  ;;  %v10143_v39 = vmul.f32 %v3740_v9, %v10016_v32  ;;  %v4600_v49 = vpop.f32.mrf.mxu0  ;;  %v11892_v9 = vld [vmem:[#allocation25_spill] sm:$0xff] }
 0x3cb   :  { %11887 = vst [vmem:[#allocation95_spill] sm:$0xff] %v10133_v28  ;;  %6022 = vtanh.f32 %v2798_v24  ;;  %v1535_v38 = vmul.f32 %v775_v3, %v775_v3  ;;  %v10147_v5 = vadd.f32 %v11890_v19, %v6486_v51  ;;  %v4952_v1 = vpop.f32.mrf.mxu1  ;;  %v1854_v30 = vmul.f32 0.7978846, %v10071_v56 }
 0x3cc   :  { %11889 = vst [vmem:[#allocation21_spill] sm:$0xff] %v10143_v39  ;;  %6024 = vtanh.f32 %v2800_v35  ;;  %v2488_v41 = vadd.f32 1.0, %v2172_v53  ;;  %v10152_v50 = vadd.f32 %v11891_v2, %v6377_v11  ;;  %v1851_v8 = vmul.f32 0.7978846, %v775_v3  ;;  %v10158_v7 = vpop.f32.mrf.mxu0 }
 0x3cd   :  { %6026 = vtanh.f32 %v2797_v58  ;;  %v1537_v32 = vmul.f32 %v1206_v21, %v1206_v21  ;;  %v10156_v24 = vadd.f32 %v11892_v9, %v6380_v12  ;;  %11893 = vst [vmem:[#allocation173_spill] sm:$0xff] %v10158_v7  ;;  %v10160_v10 = vpop.f32.mrf.mxu1  ;;  %v3742_v37 = vadd.f32 1.0, %v6013_v36  ;;  %v11897_v36 = vld [vmem:[#allocation90_spill] sm:$0xff] }
 0x3ce   :  { %11894 = vst [vmem:[#allocation186_spill] sm:$0xff] %v10160_v10  ;;  %v2802_v35 = vmul.f32 %v2486_v4, %v1854_v30  ;;  %v1856_v19 = vmul.f32 0.7978846, %v10083_v62  ;;  %v1539_v53 = vmul.f32 %v10140_v29, %v10140_v29  ;;  %v2167_v49 = vmul.f32 0.044715, %v1535_v38  ;;  %v4605_v9 = vpop.f32.mrf.mxu0  ;;  %v11898_v30 = vld [vmem:[#allocation115_spill] sm:$0xff] }
 0x3cf   :  { %v10165_v1 = vmul.f32 0.5, %v775_v3  ;;  %v1853_v58 = vmul.f32 0.7978846, %v1206_v21  ;;  %v1541_v2 = vmul.f32 %v10147_v5, %v10147_v5  ;;  %v4957_v39 = vpop.f32.mrf.mxu1  ;;  %v10169_v55 = vmul.f32 0.5, %v1206_v21  ;;  %v11902_v9 = vld [vmem:[#allocation174_spill] sm:$0xff] }
 0x3d0   :  { %v2804_v18 = vmul.f32 %v2488_v41, %v1856_v19  ;;  %v1542_v4 = vmul.f32 %v10152_v50, %v10152_v50  ;;  %v4194_v31 = vpack.c.bf16 %v11898_v30, %v11897_v36  ;;  %v10175_v23 = vpop.eup %6014  ;;  %v2169_v38 = vmul.f32 0.044715, %v1537_v32  ;;  %v10182_v21 = vpop.f32.mrf.mxu0 }
 0x3d1   :  { %11895 = vst [vmem:[#allocation189_spill] sm:$0xff] %v10165_v1  ;;  %11896 = vst [vmem:[#allocation25_spill] sm:$0xff] %v10169_v55  ;;  %v1544_v3 = vmul.f32 %v10156_v24, %v10156_v24  ;;  %v11900_v1 = vld [vmem:[#allocation98_spill] sm:$0xff]  ;;  %v3651_v39 = vadd.f32 1.0, %v11902_v9  ;;  %v10184_v41 = vpop.f32.mrf.mxu1  ;;  %v10189_v55 = vmul.f32 %v3742_v37, %v10049_v27  ;;  %v10192_v36 = vmul.f32 0.5, %v10071_v56  ;;  %v11908_v9 = vld [vmem:[#allocation117_spill] sm:$0xff] }
 0x3d2   :  { %11899 = vst [vmem:[#allocation90_spill] sm:$0xff] %v10175_v23  ;;  %v4196_v44 = vpack.c.bf16 %v11901_v60, %v11900_v1  ;;  %11903 = vst [vmem:[#allocation115_spill] sm:$0xff] %v10182_v21  ;;  %v10186_v19 = vpop.eup %6016  ;;  %6028 = vtanh.f32 %v2802_v35  ;;  %v2171_v32 = vmul.f32 0.044715, %v1539_v53  ;;  %4730 = vmatmul.mubr.bf16.gmra.mxu0 %v4194_v31  ;;  %v2483_v30 = vadd.f32 1.0, %v2167_v49  ;;  %v11907_v60 = vld [vmem:[#allocation114_spill] sm:$0xff]  ;;  %v4608_v10 = vpop.f32.mrf.mxu0 }
 0x3d3   :  { %11904 = vst [vmem:[#allocation98_spill] sm:$0xff] %v10184_v41  ;;  %11905 = vst [vmem:[#allocation121_spill] sm:$0xff] %v10186_v19  ;;  %v2173_v23 = vmul.f32 0.044715, %v1541_v2  ;;  %v3655_v1 = vadd.f32 1.0, %v11907_v60  ;;  %v3653_v21 = vadd.f32 1.0, %v11908_v9  ;;  %v4960_v41 = vpop.f32.mrf.mxu1  ;;  %6030 = vtanh.f32 %v2804_v18 }
 0x3d4   :  { %11906 = vst [vmem:[#allocation174_spill] sm:$0xff] %v10189_v55  ;;  %5082 = vmatmul.mubr.bf16.gmra.mxu1 %v4196_v44  ;;  %v6019_v28 = vpop.eup %6018  ;;  %v10197_v19 = vmul.f32 0.5, %v10083_v62  ;;  %v2174_v27 = vmul.f32 0.044715, %v1542_v4  ;;  %v11909_v56 = vld [vmem:[#allocation124_spill] sm:$0xff]  ;;  %v2485_v35 = vadd.f32 1.0, %v2169_v38  ;;  %v10202_v55 = vpop.f32.mrf.mxu0 }
 0x3d5   :  { %v3657_v37 = vadd.f32 1.0, %v11909_v56  ;;  %v2176_v53 = vmul.f32 0.044715, %v1544_v3  ;;  %v11910_v31 = vld [vmem:[#allocation105_spill] sm:$0xff]  ;;  %v11911_v2 = vld [vmem:[#allocation100_spill] sm:$0xff]  ;;  %11912 = vst [vmem:[#allocation114_spill] sm:$0xff] %v10202_v55  ;;  %v10204_v60 = vpop.f32.mrf.mxu1  ;;  %v2799_v3 = vmul.f32 %v2483_v30, %v1851_v8 }
 0x3d6   :  { %v3967_v49 = vmul.f32 %v3651_v39, %v11910_v31  ;;  %v3971_v44 = vmul.f32 %v3655_v1, %v11911_v2  ;;  %11913 = vst [vmem:[#allocation117_spill] sm:$0xff] %v10204_v60  ;;  %v2487_v10 = vadd.f32 1.0, %v2171_v32  ;;  %v11914_v41 = vld [vmem:[#allocation24_spill] sm:$0xff]  ;;  %v11915_v62 = vld [vmem:[#allocation170_spill] sm:$0xff]  ;;  %v11916_v18 = vld [vmem:[#allocation107_spill] sm:$0xff]  ;;  %v10210_v14 = vpop.eup %6020  ;;  %v3744_v38 = vadd.f32 1.0, %v6019_v28  ;;  %v4613_v31 = vpop.f32.mrf.mxu0 }
 0x3d7   :  { %v785_v9 = vadd.f32 %v11914_v41, %v6479_v45  ;;  %v3969_v7 = vmul.f32 %v3653_v21, %v11915_v62  ;;  %v3973_v4 = vmul.f32 %v3657_v37, %v11916_v18  ;;  %11917 = vst [vmem:[#allocation124_spill] sm:$0xff] %v10210_v14  ;;  %v2489_v56 = vadd.f32 1.0, %v2173_v23  ;;  %v4965_v1 = vpop.f32.mrf.mxu1  ;;  %v11918_v32 = vld [vmem:[#allocation42_spill] sm:$0xff] }
 0x3d8   :  { %v4199_v39 = vpack.c.bf16 %v3971_v44, %v3967_v49  ;;  %v6023_v2 = vpop.eup %6022  ;;  %v1855_v55 = vmul.f32 0.7978846, %v10140_v29  ;;  %v2490_v60 = vadd.f32 1.0, %v2174_v27  ;;  %v1216_v57 = vadd.f32 %v11918_v32, %v6486_v51  ;;  %v10219_v23 = vpop.f32.mrf.mxu0 }
 0x3d9   :  { %v4201_v41 = vpack.c.bf16 %v3973_v4, %v3969_v7  ;;  %v6025_v52 = vpop.eup %6024  ;;  %v2801_v21 = vmul.f32 %v2485_v35, %v1853_v58  ;;  %v10216_v37 = vmul.f32 0.5, %v10140_v29  ;;  %v1857_v28 = vmul.f32 0.7978846, %v10147_v5  ;;  %v10221_v30 = vpop.f32.mrf.mxu1  ;;  %v11922_v7 = vld [vmem:[#allocation39_spill] sm:$0xff] }
 0x3da   :  { %v2492_v8 = vadd.f32 1.0, %v2176_v53  ;;  %4737 = vmatprep.mubr.bf16.mxu0 %v4199_v39  ;;  %11920 = vst [vmem:[#allocation100_spill] sm:$0xff] %v10221_v30  ;;  %v10223_v49 = vpop.eup %6026  ;;  %v2803_v27 = vmul.f32 %v2487_v10, %v1855_v55  ;;  %v1858_v44 = vmul.f32 0.7978846, %v10152_v50  ;;  %v1543_v62 = vmul.f32 %v785_v9, %v785_v9  ;;  %v11923_v53 = vld [vmem:[#allocation20_spill] sm:$0xff]  ;;  %v4616_v39 = vpop.f32.mrf.mxu0 }
 0x3db   :  { %11919 = vst [vmem:[#allocation105_spill] sm:$0xff] %v10216_v37  ;;  %11921 = vst [vmem:[#allocation24_spill] sm:$0xff] %v10223_v49  ;;  %v787_v58 = vadd.f32 %v11922_v7, %v6377_v11  ;;  %5089 = vmatprep.mubr.bf16.mxu1 %v4201_v41  ;;  %v3746_v29 = vadd.f32 1.0, %v6023_v2  ;;  %v2805_v35 = vmul.f32 %v2489_v56, %v1857_v28  ;;  %v1860_v18 = vmul.f32 0.7978846, %v10156_v24  ;;  %v4968_v31 = vpop.f32.mrf.mxu1 }
 0x3dc   :  { %v10231_v4 = vadd.f32 %v11923_v53, %v6380_v12  ;;  %v3748_v1 = vadd.f32 1.0, %v6025_v52  ;;  %6032 = vtanh.f32 %v2799_v3  ;;  %v2806_v55 = vmul.f32 %v2490_v60, %v1858_v44  ;;  %v10239_v2 = vpop.f32.mrf.mxu0 }
 0x3dd   :  { %v1545_v10 = vmul.f32 %v1216_v57, %v1216_v57  ;;  %v10234_v32 = vmul.f32 %v3744_v38, %v10059_v40  ;;  %6034 = vtanh.f32 %v2801_v21  ;;  %v10237_v41 = vmul.f32 0.5, %v10147_v5  ;;  %11926 = vst [vmem:[#allocation42_spill] sm:$0xff] %v10239_v2  ;;  %v10241_v28 = vpop.f32.mrf.mxu1 }
 0x3de   :  { %v2808_v56 = vmul.f32 %v2492_v8, %v1860_v18  ;;  %11927 = vst [vmem:[#allocation39_spill] sm:$0xff] %v10241_v28  ;;  %6036 = vtanh.f32 %v2803_v27  ;;  %v10244_v7 = vmul.f32 0.5, %v10152_v50  ;;  %v2175_v52 = vmul.f32 0.044715, %v1543_v62  ;;  %v4621_v38 = vpop.f32.mrf.mxu0  ;;  %v11930_v27 = vld [vmem:[#allocation190_spill] sm:$0xff] }
 0x3df   :  { %11924 = vst [vmem:[#allocation170_spill] sm:$0xff] %v10234_v32  ;;  %11925 = vst [vmem:[#allocation107_spill] sm:$0xff] %v10237_v41  ;;  %v1546_v3 = vmul.f32 %v787_v58, %v787_v58  ;;  %v6029_v60 = vpop.eup %6028  ;;  %v10247_v44 = vmul.f32 %v3746_v29, %v10127_v20  ;;  %6038 = vtanh.f32 %v2805_v35  ;;  %v10250_v40 = vmul.f32 0.5, %v10156_v24  ;;  %v4973_v21 = vpop.f32.mrf.mxu1  ;;  %v11932_v24 = vld [vmem:[#allocation192_spill] sm:$0xff] }
 0x3e0   :  { %v1548_v5 = vmul.f32 %v10231_v4, %v10231_v4  ;;  %v10255_v8 = vmul.f32 %v3748_v1, %v10136_v43  ;;  %6040 = vtanh.f32 %v2806_v55  ;;  %v2177_v50 = vmul.f32 0.044715, %v1545_v10  ;;  %v6031_v20 = vpop.eup %6030  ;;  %v10267_v53 = vpop.f32.mrf.mxu0  ;;  %v11941_v32 = vld [vmem:[#allocation120_spill] sm:$0xff] }
 0x3e1   :  { %11928 = vst [vmem:[#allocation20_spill] sm:$0xff] %v10247_v44  ;;  %v10259_v62 = vadd.f32 %v11930_v27, %v6377_v11  ;;  %6042 = vtanh.f32 %v2808_v56  ;;  %v1859_v29 = vmul.f32 0.7978846, %v785_v9  ;;  %v10261_v35 = vmul.f32 0.5, %v785_v9  ;;  %11933 = vst [vmem:[#allocation192_spill] sm:$0xff] %v10267_v53  ;;  %v10269_v39 = vpop.f32.mrf.mxu1  ;;  %v11936_v56 = vld [vmem:[#allocation113_spill] sm:$0xff] }
 0x3e2   :  { %11929 = vst [vmem:[#allocation200_spill] sm:$0xff] %v10255_v8  ;;  %v10265_v18 = vadd.f32 %v11932_v24, %v6380_v12  ;;  %11934 = vst [vmem:[#allocation201_spill] sm:$0xff] %v10269_v39  ;;  %v3750_v43 = vadd.f32 1.0, %v6029_v60  ;;  %v2491_v31 = vadd.f32 1.0, %v2175_v52  ;;  %v1861_v1 = vmul.f32 0.7978846, %v1216_v57  ;;  %v4624_v24 = vpop.f32.mrf.mxu0 }
 0x3e3   :  { %11931 = vst [vmem:[#allocation190_spill] sm:$0xff] %v10261_v35  ;;  %v2178_v55 = vmul.f32 0.044715, %v1546_v3  ;;  %v10271_v10 = vmul.f32 0.5, %v1216_v57  ;;  %v2180_v38 = vmul.f32 0.044715, %v1548_v5  ;;  %v10275_v21 = vadd.f32 %v11936_v56, %v6479_v45  ;;  %v4976_v8 = vpop.f32.mrf.mxu1 }
 0x3e4   :  { %v11937_v9 = vld [vmem:[#allocation76_spill] sm:$0xff]  ;;  %v3752_v44 = vadd.f32 1.0, %v6031_v20  ;;  %v2493_v35 = vadd.f32 1.0, %v2177_v50  ;;  %v1862_v41 = vmul.f32 0.7978846, %v787_v58  ;;  %v1550_v52 = vmul.f32 %v10259_v62, %v10259_v62  ;;  %v11938_v60 = vld [vmem:[#allocation102_spill] sm:$0xff]  ;;  %v10291_v37 = vpop.f32.mrf.mxu0 }
 0x3e5   :  { %11935 = vst [vmem:[#allocation202_spill] sm:$0xff] %v10271_v10  ;;  %v10279_v27 = vadd.f32 %v11937_v9, %v6486_v51  ;;  %v10283_v3 = vmul.f32 0.5, %v787_v58  ;;  %v1552_v57 = vmul.f32 %v10265_v18, %v10265_v18  ;;  %v11939_v5 = vld [vmem:[#allocation111_spill] sm:$0xff]  ;;  %v11940_v10 = vld [vmem:[#allocation109_spill] sm:$0xff]  ;;  %11942 = vst [vmem:[#allocation113_spill] sm:$0xff] %v10291_v37  ;;  %v10293_v8 = vpop.f32.mrf.mxu1  ;;  %v10296_v50 = vmul.f32 %v3750_v43, %v10192_v36 }
 0x3e6   :  { %v4198_v56 = vpack.c.bf16 %v11939_v5, %v11938_v60  ;;  %v4200_v9 = vpack.c.bf16 %v11941_v32, %v11940_v10  ;;  %11943 = vst [vmem:[#allocation76_spill] sm:$0xff] %v10293_v8  ;;  %v2807_v20 = vmul.f32 %v2491_v31, %v1859_v29  ;;  %v2494_v24 = vadd.f32 1.0, %v2178_v55  ;;  %v11945_v60 = vld [vmem:[#allocation85_spill] sm:$0xff]  ;;  %v11946_v32 = vld [vmem:[#allocation139_spill] sm:$0xff]  ;;  %v4629_v39 = vpop.f32.mrf.mxu0 }
 0x3e7   :  { %11944 = vst [vmem:[#allocation102_spill] sm:$0xff] %v10296_v50  ;;  %v1864_v58 = vmul.f32 0.7978846, %v10231_v4  ;;  %v2496_v49 = vadd.f32 1.0, %v2180_v38  ;;  %v1547_v14 = vmul.f32 %v10275_v21, %v10275_v21  ;;  %v3659_v5 = vadd.f32 1.0, %v11945_v60  ;;  %v4981_v37 = vpop.f32.mrf.mxu1  ;;  %v11947_v29 = vld [vmem:[#allocation51_spill] sm:$0xff] }
 0x3e8   :  { %4738 = vmatmul.mubr.bf16.gmra.mxu0 %v4198_v56  ;;  %5090 = vmatmul.mubr.bf16.gmra.mxu1 %v4200_v9  ;;  %v3663_v10 = vadd.f32 1.0, %v11946_v32  ;;  %v1549_v36 = vmul.f32 %v10279_v27, %v10279_v27  ;;  %v2182_v43 = vmul.f32 0.044715, %v1550_v52  ;;  %v10307_v31 = vadd.f32 %v11947_v29, %v6377_v11  ;;  %v11948_v55 = vld [vmem:[#allocation127_spill] sm:$0xff]  ;;  %v11950_v9 = vld [vmem:[#allocation69_spill] sm:$0xff]  ;;  %v11951_v60 = vld [vmem:[#allocation130_spill] sm:$0xff]  ;;  %v10315_v37 = vpop.f32.mrf.mxu0 }
 0x3e9   :  { %v3661_v38 = vadd.f32 1.0, %v11948_v55  ;;  %v10310_v50 = vpop.eup %6032  ;;  %v2184_v56 = vmul.f32 0.044715, %v1552_v57  ;;  %v3975_v8 = vmul.f32 %v3659_v5, %v11950_v9  ;;  %v11952_v32 = vld [vmem:[#allocation141_spill] sm:$0xff]  ;;  %11953 = vst [vmem:[#allocation109_spill] sm:$0xff] %v10315_v37  ;;  %v10317_v28 = vpop.f32.mrf.mxu1  ;;  %v10322_v29 = vmul.f32 %v3752_v44, %v10197_v19 }
 0x3ea   :  { %11949 = vst [vmem:[#allocation111_spill] sm:$0xff] %v10310_v50  ;;  %v3979_v53 = vmul.f32 %v3663_v10, %v11951_v60  ;;  %v3665_v39 = vadd.f32 1.0, %v11952_v32  ;;  %11954 = vst [vmem:[#allocation120_spill] sm:$0xff] %v10317_v28  ;;  %v10319_v52 = vpop.eup %6034  ;;  %v2809_v30 = vmul.f32 %v2493_v35, %v1861_v1  ;;  %v2810_v55 = vmul.f32 %v2494_v24, %v1862_v41  ;;  %v11958_v60 = vld [vmem:[#allocation172_spill] sm:$0xff]  ;;  %v4632_v28 = vpop.f32.mrf.mxu0 }
 0x3eb   :  { %11955 = vst [vmem:[#allocation85_spill] sm:$0xff] %v10319_v52  ;;  %11956 = vst [vmem:[#allocation139_spill] sm:$0xff] %v10322_v29  ;;  %v10326_v57 = vadd.f32 %v9612_v15, %v6380_v12  ;;  %v10328_v5 = vpop.eup %6036  ;;  %v2179_v10 = vmul.f32 0.044715, %v1547_v14  ;;  %v3977_v32 = vmul.f32 %v3661_v38, %v11958_v60  ;;  %v11959_v50 = vld [vmem:[#allocation128_spill] sm:$0xff]  ;;  %v4984_v2 = vpop.f32.mrf.mxu1  ;;  %v2812_v19 = vmul.f32 %v2496_v49, %v1864_v58  ;;  %v11982_v29 = vld [vmem:[#allocation129_spill] sm:$0xff] }
 0x3ec   :  { %11957 = vst [vmem:[#allocation51_spill] sm:$0xff] %v10328_v5  ;;  %v4203_v9 = vpack.c.bf16 %v3979_v53, %v3975_v8  ;;  %v3981_v37 = vmul.f32 %v3665_v39, %v11959_v50  ;;  %v10332_v52 = vpop.eup %6038  ;;  %v10335_v44 = vmul.f32 0.5, %v10231_v4  ;;  %v2498_v41 = vadd.f32 1.0, %v2182_v43  ;;  %v10339_v8 = vpop.f32.mrf.mxu0  ;;  %v11963_v4 = vld [vmem:[#allocation132_spill] sm:$0xff] }
 0x3ed   :  { %11960 = vst [vmem:[#allocation127_spill] sm:$0xff] %v10332_v52  ;;  %v1554_v15 = vmul.f32 %v10307_v31, %v10307_v31  ;;  %v6041_v35 = vpop.eup %6040  ;;  %6044 = vtanh.f32 %v2807_v20  ;;  %v2181_v14 = vmul.f32 0.044715, %v1549_v36  ;;  %v2500_v53 = vadd.f32 1.0, %v2184_v56  ;;  %11961 = vst [vmem:[#allocation69_spill] sm:$0xff] %v10339_v8  ;;  %v10341_v28 = vpop.f32.mrf.mxu1  ;;  %v11964_v36 = vld [vmem:[#allocation44_spill] sm:$0xff] }
 0x3ee   :  { %4745 = vmatprep.mubr.bf16.mxu0 %v4203_v9  ;;  %v4205_v1 = vpack.c.bf16 %v3981_v37, %v3977_v32  ;;  %11962 = vst [vmem:[#allocation130_spill] sm:$0xff] %v10341_v28  ;;  %v6043_v2 = vpop.eup %6042  ;;  %6046 = vtanh.f32 %v2810_v55  ;;  %v1866_v49 = vmul.f32 0.7978846, %v10259_v62  ;;  %v795_v50 = vadd.f32 %v11963_v4, %v6479_v45  ;;  %v4637_v38 = vpop.f32.mrf.mxu0 }
 0x3ef   :  { %v1556_v24 = vmul.f32 %v10326_v57, %v10326_v57  ;;  %6048 = vtanh.f32 %v2809_v30  ;;  %v2495_v20 = vadd.f32 1.0, %v2179_v10  ;;  %v1868_v58 = vmul.f32 0.7978846, %v10265_v18  ;;  %v4989_v56 = vpop.f32.mrf.mxu1 }
 0x3f0   :  { %v1226_v43 = vadd.f32 %v11964_v36, %v6486_v51  ;;  %5097 = vmatprep.mubr.bf16.mxu1 %v4205_v1  ;;  %6050 = vtanh.f32 %v2812_v19  ;;  %v1863_v39 = vmul.f32 0.7978846, %v10275_v21  ;;  %v2814_v37 = vmul.f32 %v2498_v41, %v1866_v49  ;;  %v10355_v10 = vpop.f32.mrf.mxu0 }
 0x3f1   :  { %v2186_v55 = vmul.f32 0.044715, %v1554_v15  ;;  %v3754_v9 = vadd.f32 1.0, %v6041_v35  ;;  %v10353_v60 = vmul.f32 0.5, %v10275_v21  ;;  %v2497_v32 = vadd.f32 1.0, %v2181_v14  ;;  %11966 = vst [vmem:[#allocation172_spill] sm:$0xff] %v10355_v10  ;;  %v10357_v4 = vpop.f32.mrf.mxu1 }
 0x3f2   :  { %v2816_v30 = vmul.f32 %v2500_v53, %v1868_v58  ;;  %11967 = vst [vmem:[#allocation128_spill] sm:$0xff] %v10357_v4  ;;  %v1865_v36 = vmul.f32 0.7978846, %v10279_v27  ;;  %v10361_v1 = vmul.f32 0.5, %v10279_v27  ;;  %v1551_v19 = vmul.f32 %v795_v50, %v795_v50  ;;  %v4640_v35 = vpop.f32.mrf.mxu0 }
 0x3f3   :  { %11965 = vst [vmem:[#allocation141_spill] sm:$0xff] %v10353_v60  ;;  %v2188_v38 = vmul.f32 0.044715, %v1556_v24  ;;  %v3756_v56 = vadd.f32 1.0, %v6043_v2  ;;  %v2811_v41 = vmul.f32 %v2495_v20, %v1863_v39  ;;  %v1553_v15 = vmul.f32 %v1226_v43, %v1226_v43  ;;  %v4992_v14 = vpop.f32.mrf.mxu1 }
 0x3f4   :  { %11968 = vst [vmem:[#allocation132_spill] sm:$0xff] %v10361_v1  ;;  %v10365_v21 = vadd.f32 %v9618_v61, %v6479_v45  ;;  %v10368_v53 = vmul.f32 0.5, %v10259_v62  ;;  %6052 = vtanh.f32 %v2814_v37  ;;  %v2502_v49 = vadd.f32 1.0, %v2186_v55  ;;  %v10380_v61 = vpop.f32.mrf.mxu0 }
 0x3f5   :  { %v10372_v27 = vadd.f32 %v9630_v54, %v6486_v51  ;;  %v10375_v24 = vmul.f32 %v3754_v9, %v10244_v7  ;;  %v2813_v2 = vmul.f32 %v2497_v32, %v1865_v36  ;;  %v10378_v20 = vmul.f32 0.5, %v10265_v18  ;;  %11970 = vst [vmem:[#allocation203_spill] sm:$0xff] %v10380_v61  ;;  %v10382_v58 = vpop.f32.mrf.mxu1 }
 0x3f6   :  { %6054 = vtanh.f32 %v2816_v30  ;;  %11971 = vst [vmem:[#allocation204_spill] sm:$0xff] %v10382_v58  ;;  %v2183_v62 = vmul.f32 0.044715, %v1551_v19  ;;  %v1870_v39 = vmul.f32 0.7978846, %v10307_v31  ;;  %v2504_v37 = vadd.f32 1.0, %v2188_v38  ;;  %v4645_v9 = vpop.f32.mrf.mxu0 }
 0x3f7   :  { %11969 = vst [vmem:[#allocation44_spill] sm:$0xff] %v10375_v24  ;;  %v10387_v54 = vadd.f32 %v9637_v63, %v6377_v11  ;;  %v10390_v7 = vmul.f32 %v3756_v56, %v10250_v40  ;;  %6056 = vtanh.f32 %v2811_v41  ;;  %v2185_v55 = vmul.f32 0.044715, %v1553_v15  ;;  %v4997_v32 = vpop.f32.mrf.mxu1 }
 0x3f8   :  { %v1555_v18 = vmul.f32 %v10365_v21, %v10365_v21  ;;  %v2818_v30 = vmul.f32 %v2502_v49, %v1870_v39  ;;  %v1872_v36 = vmul.f32 0.7978846, %v10326_v57  ;;  %v1557_v19 = vmul.f32 %v10372_v27, %v10372_v27  ;;  %v10403_v41 = vpop.f32.mrf.mxu0 }
 0x3f9   :  { %11972 = vst [vmem:[#allocation205_spill] sm:$0xff] %v10390_v7  ;;  %v10399_v63 = vadd.f32 %v9654_v34, %v6380_v12  ;;  %6058 = vtanh.f32 %v2813_v2  ;;  %v1867_v40 = vmul.f32 0.7978846, %v795_v50  ;;  %v10401_v38 = vmul.f32 0.5, %v795_v50  ;;  %11975 = vst [vmem:[#allocation208_spill] sm:$0xff] %v10403_v41  ;;  %v10405_v15 = vpop.f32.mrf.mxu1  ;;  %v11979_v7 = vld [vmem:[#allocation134_spill] sm:$0xff] }
 0x3fa   :  { %v1869_v56 = vmul.f32 0.7978846, %v1226_v43  ;;  %11976 = vst [vmem:[#allocation209_spill] sm:$0xff] %v10405_v15  ;;  %v10407_v35 = vpop.eup %6044  ;;  %v2499_v14 = vadd.f32 1.0, %v2183_v62  ;;  %v10409_v49 = vmul.f32 0.5, %v1226_v43  ;;  %v2820_v39 = vmul.f32 %v2504_v37, %v1872_v36  ;;  %v11980_v50 = vld [vmem:[#allocation131_spill] sm:$0xff]  ;;  %v4648_v60 = vpop.f32.mrf.mxu0 }
 0x3fb   :  { %11973 = vst [vmem:[#allocation206_spill] sm:$0xff] %v10399_v63  ;;  %11974 = vst [vmem:[#allocation207_spill] sm:$0xff] %v10401_v38  ;;  %v1558_v9 = vmul.f32 %v10387_v54, %v10387_v54  ;;  %v6047_v34 = vpop.eup %6046  ;;  %v2501_v32 = vadd.f32 1.0, %v2185_v55  ;;  %v2187_v2 = vmul.f32 0.044715, %v1555_v18  ;;  %v4202_v24 = vpack.c.bf16 %v11980_v50, %v11979_v7  ;;  %v11981_v38 = vld [vmem:[#allocation118_spill] sm:$0xff]  ;;  %v5000_v52 = vpop.f32.mrf.mxu1 }
 0x3fc   :  { %11977 = vst [vmem:[#allocation210_spill] sm:$0xff] %v10407_v35  ;;  %11978 = vst [vmem:[#allocation211_spill] sm:$0xff] %v10409_v49  ;;  %v4204_v1 = vpack.c.bf16 %v11982_v29, %v11981_v38  ;;  %v10417_v5 = vpop.eup %6048  ;;  %6060 = vtanh.f32 %v2818_v30  ;;  %v2189_v43 = vmul.f32 0.044715, %v1557_v19  ;;  %v1560_v62 = vmul.f32 %v10399_v63, %v10399_v63  ;;  %v11984_v37 = vld [vmem:[#allocation143_spill] sm:$0xff]  ;;  %v11985_v55 = vld [vmem:[#allocation72_spill] sm:$0xff]  ;;  %v10429_v30 = vpop.f32.mrf.mxu0 }
 0x3fd   :  { %11983 = vst [vmem:[#allocation134_spill] sm:$0xff] %v10417_v5  ;;  %v3667_v36 = vadd.f32 1.0, %v11984_v37  ;;  %v6051_v49 = vpop.eup %6050  ;;  %v10424_v18 = vadd.f32 %v11985_v55, %v6479_v45  ;;  %4746 = vmatmul.mubr.bf16.gmra.mxu0 %v4202_v24  ;;  %v11986_v7 = vld [vmem:[#allocation145_spill] sm:$0xff]  ;;  %v11988_v38 = vld [vmem:[#allocation15_spill] sm:$0xff]  ;;  %11989 = vst [vmem:[#allocation131_spill] sm:$0xff] %v10429_v30  ;;  %v10431_v19 = vpop.f32.mrf.mxu1  ;;  %v3758_v5 = vadd.f32 1.0, %v6047_v34  ;;  %6062 = vtanh.f32 %v2820_v39 }
 0x3fe   :  { %5098 = vmatmul.mubr.bf16.gmra.mxu1 %v4204_v1  ;;  %v3671_v29 = vadd.f32 1.0, %v11986_v7  ;;  %v11987_v60 = vld [vmem:[#allocation137_spill] sm:$0xff]  ;;  %v3673_v50 = vadd.f32 1.0, %v11988_v38  ;;  %11990 = vst [vmem:[#allocation118_spill] sm:$0xff] %v10431_v19  ;;  %v2190_v37 = vmul.f32 0.044715, %v1558_v9  ;;  %v4653_v38 = vpop.f32.mrf.mxu0  ;;  %v2815_v10 = vmul.f32 %v2499_v14, %v1867_v40 }
 0x3ff   :  { %v3669_v52 = vadd.f32 1.0, %v11987_v60  ;;  %v11991_v35 = vld [vmem:[#allocation60_spill] sm:$0xff]  ;;  %v11992_v55 = vld [vmem:[#allocation122_spill] sm:$0xff]  ;;  %v11994_v7 = vld [vmem:[#allocation31_spill] sm:$0xff]  ;;  %v5005_v61 = vpop.f32.mrf.mxu1  ;;  %v3760_v30 = vadd.f32 1.0, %v6051_v49  ;;  %v2503_v19 = vadd.f32 1.0, %v2187_v2  ;;  %v10452_v14 = vmul.f32 %v3758_v5, %v10283_v3 }
 0x400   :  { %v10435_v15 = vadd.f32 %v11991_v35, %v6486_v51  ;;  %v3983_v24 = vmul.f32 %v3667_v36, %v11992_v55  ;;  %v11993_v1 = vld [vmem:[#allocation142_spill] sm:$0xff]  ;;  %v11995_v60 = vld [vmem:[#allocation133_spill] sm:$0xff]  ;;  %v2505_v34 = vadd.f32 1.0, %v2189_v43  ;;  %v2192_v9 = vmul.f32 0.044715, %v1560_v62  ;;  %v10443_v36 = vpop.f32.mrf.mxu0  ;;  %v11999_v38 = vld [vmem:[#allocation135_spill] sm:$0xff] }
 0x401   :  { %v3987_v41 = vmul.f32 %v3671_v29, %v11993_v1  ;;  %v3985_v58 = vmul.f32 %v3669_v52, %v11994_v7  ;;  %v3989_v4 = vmul.f32 %v3673_v50, %v11995_v60  ;;  %v6053_v39 = vpop.eup %6052  ;;  %v1559_v35 = vmul.f32 %v10424_v18, %v10424_v18  ;;  %v10445_v29 = vpop.f32.mrf.mxu1  ;;  %11996 = vst [vmem:[#allocation129_spill] sm:$0xff] %v10452_v14 }
 0x402   :  { %v2817_v55 = vmul.f32 %v2501_v32, %v1869_v56  ;;  %v10448_v50 = vmul.f32 0.5, %v10307_v31  ;;  %v1871_v61 = vmul.f32 0.7978846, %v10365_v21  ;;  %v2506_v40 = vadd.f32 1.0, %v2190_v37  ;;  %v4656_v56 = vpop.f32.mrf.mxu0 }
 0x403   :  { %v4207_v28 = vpack.c.bf16 %v3987_v41, %v3983_v24  ;;  %v4209_v8 = vpack.c.bf16 %v3989_v4, %v3985_v58  ;;  %v6055_v52 = vpop.eup %6054  ;;  %v1873_v49 = vmul.f32 0.7978846, %v10372_v27  ;;  %v1561_v4 = vmul.f32 %v10435_v15, %v10435_v15  ;;  %v11997_v58 = vld [vmem:[#allocation140_spill] sm:$0xff]  ;;  %v5008_v32 = vpop.f32.mrf.mxu1 }
 0x404   :  { %v807_v41 = vadd.f32 %v11997_v58, %v6377_v11  ;;  %v10459_v31 = vpop.eup %6056  ;;  %v10462_v2 = vmul.f32 %v3760_v30, %v10335_v44  ;;  %v10465_v3 = vmul.f32 0.5, %v10326_v57  ;;  %v2819_v5 = vmul.f32 %v2503_v19, %v1871_v61  ;;  %v10468_v1 = vpop.f32.mrf.mxu0 }
 0x405   :  { %4753 = vmatprep.mubr.bf16.mxu0 %v4207_v28  ;;  %5105 = vmatprep.mubr.bf16.mxu1 %v4209_v8  ;;  %v1874_v43 = vmul.f32 0.7978846, %v10387_v54  ;;  %6064 = vtanh.f32 %v2815_v10  ;;  %v2821_v62 = vmul.f32 %v2505_v34, %v1873_v49  ;;  %v2508_v37 = vadd.f32 1.0, %v2192_v9  ;;  %v10470_v8 = vpop.f32.mrf.mxu1 }
 0x406   :  { %11998 = vst [vmem:[#allocation143_spill] sm:$0xff] %v10462_v2  ;;  %v2191_v24 = vmul.f32 0.044715, %v1559_v35  ;;  %v10472_v28 = vpop.eup %6058  ;;  %v3762_v7 = vadd.f32 1.0, %v6053_v39  ;;  %v3764_v60 = vadd.f32 1.0, %v6055_v52  ;;  %6066 = vtanh.f32 %v2817_v55  ;;  %v4661_v34 = vpop.f32.mrf.mxu0  ;;  %v12002_v39 = vld [vmem:[#allocation40_spill] sm:$0xff] }
 0x407   :  { %v2822_v44 = vmul.f32 %v2506_v40, %v1874_v43  ;;  %v1876_v57 = vmul.f32 0.7978846, %v10399_v63  ;;  %v2193_v30 = vmul.f32 0.044715, %v1561_v4  ;;  %v1562_v19 = vmul.f32 %v807_v41, %v807_v41  ;;  %v5013_v9 = vpop.f32.mrf.mxu1 }
 0x408   :  { %v1238_v10 = vadd.f32 %v11999_v38, %v6380_v12  ;;  %v10478_v35 = vmul.f32 0.5, %v10365_v21  ;;  %6068 = vtanh.f32 %v2819_v5  ;;  %v10481_v61 = vmul.f32 0.5, %v10372_v27  ;;  %v10490_v58 = vpop.f32.mrf.mxu0  ;;  %v12006_v38 = vld [vmem:[#allocation96_spill] sm:$0xff] }
 0x409   :  { %v10485_v52 = vadd.f32 %v12002_v39, %v6479_v45  ;;  %v6061_v55 = vpop.eup %6060  ;;  %6070 = vtanh.f32 %v2821_v62  ;;  %v10488_v40 = vmul.f32 0.5, %v10387_v54  ;;  %v2824_v49 = vmul.f32 %v2508_v37, %v1876_v57  ;;  %v10492_v56 = vpop.f32.mrf.mxu1  ;;  %v12007_v37 = vld [vmem:[#allocation152_spill] sm:$0xff] }
 0x40a   :  { %12000 = vst [vmem:[#allocation72_spill] sm:$0xff] %v10478_v35  ;;  %12001 = vst [vmem:[#allocation145_spill] sm:$0xff] %v10481_v61  ;;  %v2507_v4 = vadd.f32 1.0, %v2191_v24  ;;  %v10495_v21 = vmul.f32 %v3762_v7, %v10368_v53  ;;  %v10498_v27 = vmul.f32 %v3764_v60, %v10378_v20  ;;  %6072 = vtanh.f32 %v2822_v44  ;;  %v6063_v5 = vpop.eup %6062  ;;  %v4664_v57 = vpop.f32.mrf.mxu0  ;;  %v12010_v44 = vld [vmem:[#allocation63_spill] sm:$0xff]  ;;  %v12027_v61 = vld [vmem:[#allocation176_spill] sm:$0xff] }
 0x40b   :  { %12003 = vst [vmem:[#allocation137_spill] sm:$0xff] %v10488_v40  ;;  %v1875_v32 = vmul.f32 0.7978846, %v10424_v18  ;;  %v2509_v43 = vadd.f32 1.0, %v2193_v30  ;;  %v2194_v62 = vmul.f32 0.044715, %v1562_v19  ;;  %v1564_v54 = vmul.f32 %v1238_v10, %v1238_v10  ;;  %v5016_v34 = vpop.f32.mrf.mxu1 }
 0x40c   :  { %12004 = vst [vmem:[#allocation15_spill] sm:$0xff] %v10495_v21  ;;  %12005 = vst [vmem:[#allocation60_spill] sm:$0xff] %v10498_v27  ;;  %v4206_v24 = vpack.c.bf16 %v12007_v37, %v12006_v38  ;;  %v3766_v9 = vadd.f32 1.0, %v6061_v55  ;;  %v10504_v39 = vmul.f32 0.5, %v10424_v18  ;;  %v1877_v53 = vmul.f32 0.7978846, %v10435_v15  ;;  %v10514_v19 = vpop.f32.mrf.mxu0 }
 0x40d   :  { %v1563_v20 = vmul.f32 %v10485_v52, %v10485_v52  ;;  %6074 = vtanh.f32 %v2824_v49  ;;  %v2823_v7 = vmul.f32 %v2507_v4, %v1875_v32  ;;  %v10510_v60 = vmul.f32 0.5, %v10435_v15  ;;  %v10516_v55 = vpop.f32.mrf.mxu1  ;;  %v12015_v27 = vld [vmem:[#allocation55_spill] sm:$0xff]  ;;  %v12028_v35 = vld [vmem:[#allocation177_spill] sm:$0xff] }
 0x40e   :  { %12008 = vst [vmem:[#allocation122_spill] sm:$0xff] %v10504_v39  ;;  %v1240_v30 = vadd.f32 %v12010_v44, %v6486_v51  ;;  %4754 = vmatmul.mubr.bf16.gmra.mxu0 %v4206_v24  ;;  %v1878_v18 = vmul.f32 0.7978846, %v807_v41  ;;  %v10518_v38 = vmul.f32 0.5, %v807_v41  ;;  %v1880_v37 = vmul.f32 0.7978846, %v1238_v10  ;;  %v4669_v34 = vpop.f32.mrf.mxu0 }
 0x40f   :  { %12009 = vst [vmem:[#allocation142_spill] sm:$0xff] %v10510_v60  ;;  %v10522_v57 = vadd.f32 %v9726_v25, %v6377_v11  ;;  %v3768_v49 = vadd.f32 1.0, %v6063_v5  ;;  %v2825_v4 = vmul.f32 %v2509_v43, %v1877_v53  ;;  %v2510_v15 = vadd.f32 1.0, %v2194_v62  ;;  %v5021_v40 = vpop.f32.mrf.mxu1  ;;  %v12016_v41 = vld [vmem:[#allocation144_spill] sm:$0xff]  ;;  %v12017_v60 = vld [vmem:[#allocation18_spill] sm:$0xff]  ;;  %v12018_v39 = vld [vmem:[#allocation153_spill] sm:$0xff] }
 0x410   :  { %12011 = vst [vmem:[#allocation31_spill] sm:$0xff] %v10518_v38  ;;  %v2196_v32 = vmul.f32 0.044715, %v1564_v54  ;;  %v10525_v24 = vmul.f32 %v3766_v9, %v10448_v50  ;;  %v10527_v44 = vmul.f32 0.5, %v1238_v10  ;;  %v2195_v63 = vmul.f32 0.044715, %v1563_v20  ;;  %v10533_v43 = vpop.f32.mrf.mxu0 }
 0x411   :  { %12012 = vst [vmem:[#allocation133_spill] sm:$0xff] %v10522_v57  ;;  %v4208_v38 = vpack.c.bf16 %v12016_v41, %v12015_v27  ;;  %6076 = vtanh.f32 %v2823_v7  ;;  %v1565_v21 = vmul.f32 %v1240_v30, %v1240_v30  ;;  %v3675_v25 = vadd.f32 1.0, %v12017_v60  ;;  %v10535_v62 = vpop.f32.mrf.mxu1  ;;  %v12021_v27 = vld [vmem:[#allocation150_spill] sm:$0xff]  ;;  %v12022_v9 = vld [vmem:[#allocation160_spill] sm:$0xff] }
 0x412   :  { %12013 = vst [vmem:[#allocation140_spill] sm:$0xff] %v10525_v24  ;;  %12014 = vst [vmem:[#allocation135_spill] sm:$0xff] %v10527_v44  ;;  %v3679_v5 = vadd.f32 1.0, %v12018_v39  ;;  %v10537_v40 = vpop.eup %6064  ;;  %v1566_v50 = vmul.f32 %v10522_v57, %v10522_v57  ;;  %v10543_v10 = vadd.f32 %v9735_v6, %v6380_v12  ;;  %v3677_v54 = vadd.f32 1.0, %v12021_v27  ;;  %v12024_v60 = vld [vmem:[#allocation94_spill] sm:$0xff]  ;;  %v4672_v24 = vpop.f32.mrf.mxu0 }
 0x413   :  { %12019 = vst [vmem:[#allocation40_spill] sm:$0xff] %v10537_v40  ;;  %5106 = vmatmul.mubr.bf16.gmra.mxu1 %v4208_v38  ;;  %v3681_v53 = vadd.f32 1.0, %v12022_v9  ;;  %v10547_v20 = vpop.eup %6066  ;;  %v2826_v39 = vmul.f32 %v2510_v15, %v1878_v18  ;;  %v2512_v7 = vadd.f32 1.0, %v2196_v32  ;;  %v3991_v34 = vmul.f32 %v3675_v25, %v12024_v60  ;;  %v12025_v41 = vld [vmem:[#allocation146_spill] sm:$0xff]  ;;  %v5024_v2 = vpop.f32.mrf.mxu1  ;;  %v10562_v24 = vld [vmem:[%s11131_s4] ss:$0 sm:$0xff] }
 0x414   :  { %12020 = vst [vmem:[#allocation96_spill] sm:$0xff] %v10543_v10  ;;  %12023 = vst [vmem:[#allocation152_spill] sm:$0xff] %v10547_v20  ;;  %v3995_v44 = vmul.f32 %v3679_v5, %v12025_v41  ;;  %v10552_v14 = vmul.f32 %v3768_v49, %v10465_v3  ;;  %v2511_v6 = vadd.f32 1.0, %v2195_v63  ;;  %v3993_v38 = vmul.f32 %v3677_v54, %v12027_v61  ;;  %v10564_v2 = vpop.f32.mrf.mxu0  ;;  %v12033_v60 = vld [vmem:[#allocation167_spill] sm:$0xff]  ;;  %v12035_v41 = vld [vmem:[#allocation180_spill] sm:$0xff] }
 0x415   :  { %v3997_v27 = vmul.f32 %v3681_v53, %v12028_v35  ;;  %v10556_v40 = vpop.eup %6068  ;;  %6078 = vtanh.f32 %v2825_v4  ;;  %v1879_v18 = vmul.f32 0.7978846, %v10485_v52  ;;  %v2197_v15 = vmul.f32 0.044715, %v1565_v21  ;;  %v10566_v3 = vpop.f32.mrf.mxu1 }
 0x416   :  { %12026 = vst [vmem:[#allocation63_spill] sm:$0xff] %v10552_v14  ;;  %12029 = vst [vmem:[#allocation55_spill] sm:$0xff] %v10556_v40  ;;  %v4211_v32 = vpack.c.bf16 %v3995_v44, %v3991_v34  ;;  %v10568_v63 = vpop.eup %6070  ;;  %v10571_v35 = vmul.f32 0.5, %v10485_v52  ;;  %v2198_v61 = vmul.f32 0.044715, %v1566_v50  ;;  %v1568_v49 = vmul.f32 %v10543_v10, %v10543_v10  ;;  %v4677_v54 = vpop.f32.mrf.mxu0  ;;  %v12034_v50 = vld [vmem:[#allocation155_spill] sm:$0xff] }
 0x417   :  { %12030 = vst [vmem:[#allocation144_spill] sm:$0xff] %v10568_v63  ;;  %v4213_v21 = vpack.c.bf16 %v3997_v27, %v3993_v38  ;;  %v6073_v4 = vpop.eup %6072  ;;  %6080 = vtanh.f32 %v2826_v39  ;;  %v2828_v44 = vmul.f32 %v2512_v7, %v1880_v37  ;;  %v1881_v25 = vmul.f32 0.7978846, %v1240_v30  ;;  %v5029_v9 = vpop.f32.mrf.mxu1  ;;  %v12036_v14 = vld [vmem:[#allocation19_spill] sm:$0xff]  ;;  %v12038_v7 = vld [vmem:[#allocation33_spill] sm:$0xff] }
 0x418   :  { %12031 = vst [vmem:[#allocation18_spill] sm:$0xff] %v10571_v35  ;;  %v10575_v5 = vmul.f32 0.5, %v1240_v30  ;;  %4761 = vmatprep.mubr.bf16.mxu0 %v4211_v32  ;;  %v2827_v53 = vmul.f32 %v2511_v6, %v1879_v18  ;;  %v4572_v52 = vadd.f32 %v10562_v24, %v9968_v0  ;;  %v4210_v34 = vpack.c.bf16 %v12034_v50, %v12033_v60  ;;  %v12037_v39 = vld [vmem:[#allocation183_spill] sm:$0xff]  ;;  %v10586_v54 = vpop.f32.mrf.mxu0 }
 0x419   :  { %5113 = vmatprep.mubr.bf16.mxu1 %v4213_v21  ;;  %v4212_v38 = vpack.c.bf16 %v12036_v14, %v12035_v41  ;;  %v2513_v27 = vadd.f32 1.0, %v2197_v15  ;;  %v3683_v37 = vadd.f32 1.0, %v12037_v39  ;;  %v3687_v30 = vadd.f32 1.0, %v12038_v7  ;;  %v10588_v6 = vpop.f32.mrf.mxu1  ;;  %v12041_v14 = vld [vmem:[#allocation35_spill] sm:$0xff] }
 0x41a   :  { %12032 = vst [vmem:[#allocation153_spill] sm:$0xff] %v10575_v5  ;;  %v12039_v5 = vld [vmem:[#allocation28_spill] sm:$0xff]  ;;  %v10590_v18 = vpop.eup %6074  ;;  %v2514_v0 = vadd.f32 1.0, %v2198_v61  ;;  %v2200_v21 = vmul.f32 0.044715, %v1568_v49  ;;  %4762 = vmatmul.mubr.bf16.gmra.mxu0 %v4210_v34  ;;  %v4924_v9 = vadd.f32 %v9970_v46, %v4572_v52  ;;  %v3689_v15 = vadd.f32 1.0, %v12041_v14  ;;  %v4680_v7 = vpop.f32.mrf.mxu0 }
 0x41b   :  { %v3685_v32 = vadd.f32 1.0, %v12039_v5  ;;  %12040 = vst [vmem:[#allocation150_spill] sm:$0xff] %v10590_v18  ;;  %5114 = vmatmul.mubr.bf16.gmra.mxu1 %v4212_v38  ;;  %6082 = vtanh.f32 %v2828_v44  ;;  %v1882_v60 = vmul.f32 0.7978846, %v10522_v57  ;;  %v12042_v50 = vld [vmem:[#allocation99_spill] sm:$0xff]  ;;  %v5032_v35 = vpop.f32.mrf.mxu1  ;;  %v10597_v20 = vadd.f32 1.0, %v6073_v4 }
 0x41c   :  { %v3999_v41 = vmul.f32 %v3683_v37, %v12042_v50  ;;  %v12043_v5 = vld [vmem:[#allocation23_spill] sm:$0xff]  ;;  %6084 = vtanh.f32 %v2827_v53  ;;  %5241 = vst [vmem:[#allocation10] sm:$0xff] %v4924_v9  ;;  %v12045_v61 = vld [vmem:[#allocation181_spill] sm:$0xff]  ;;  %v12046_v34 = vld [vmem:[#allocation16_spill] sm:$0xff]  ;;  %v2829_v52 = vmul.f32 %v2513_v27, %v1881_v25  ;;  %v1884_v38 = vmul.f32 0.7978846, %v10543_v10  ;;  %v10604_v37 = vpop.f32.mrf.mxu0 }
 0x41d   :  { %v4003_v39 = vmul.f32 %v3687_v30, %v12043_v5  ;;  %12044 = vst [vmem:[#allocation160_spill] sm:$0xff] %v10597_v20  ;;  %v4001_v49 = vmul.f32 %v3685_v32, %v12045_v61  ;;  %v4005_v46 = vmul.f32 %v3689_v15, %v12046_v34  ;;  %v4575_v14 = vadd.f32 %v10562_v24, %v9992_v33  ;;  %v10606_v30 = vpop.f32.mrf.mxu1  ;;  %v12048_v27 = vld [vmem:[#allocation147_spill] sm:$0xff]  ;;  %v12051_v33 = vld [vmem:[#allocation30_spill] sm:$0xff] }
 0x41e   :  { %v10608_v35 = vpop.eup %6076  ;;  %v2830_v4 = vmul.f32 %v2514_v0, %v1882_v60  ;;  %v2516_v53 = vadd.f32 1.0, %v2200_v21  ;;  %v4580_v32 = vadd.f32 %v10562_v24, %v10011_v22  ;;  %v12049_v15 = vld [vmem:[#allocation27_spill] sm:$0xff]  ;;  %v4685_v61 = vpop.f32.mrf.mxu0  ;;  %v12053_v21 = vld [vmem:[#allocation38_spill] sm:$0xff]  ;;  %6086 = vtanh.f32 %v2829_v52 }
 0x41f   :  { %v4215_v44 = vpack.c.bf16 %v4003_v39, %v3999_v41  ;;  %12047 = vst [vmem:[#allocation94_spill] sm:$0xff] %v10608_v35  ;;  %v4217_v9 = vpack.c.bf16 %v4005_v46, %v4001_v49  ;;  %v4927_v25 = vadd.f32 %v9994_v13, %v4575_v14  ;;  %v4214_v50 = vpack.c.bf16 %v12049_v15, %v12048_v27  ;;  %v12050_v41 = vld [vmem:[#allocation151_spill] sm:$0xff]  ;;  %v12052_v39 = vld [vmem:[#allocation188_spill] sm:$0xff]  ;;  %v5037_v34 = vpop.f32.mrf.mxu1 }
 0x420   :  { %v4216_v5 = vpack.c.bf16 %v12051_v33, %v12050_v41  ;;  %v3691_v7 = vadd.f32 1.0, %v12052_v39  ;;  %v4932_v0 = vadd.f32 %v10013_v48, %v4580_v32  ;;  %v3695_v60 = vadd.f32 1.0, %v12053_v21  ;;  %v12054_v49 = vld [vmem:[#allocation36_spill] sm:$0xff]  ;;  %v12055_v46 = vld [vmem:[#allocation43_spill] sm:$0xff]  ;;  %v10631_v48 = vpop.f32.mrf.mxu0  ;;  %v12061_v33 = vld [vmem:[#allocation26_spill] sm:$0xff] }
 0x421   :  { %4769 = vmatprep.mubr.bf16.mxu0 %v4215_v44  ;;  %5121 = vmatprep.mubr.bf16.mxu1 %v4217_v9  ;;  %v3693_v22 = vadd.f32 1.0, %v12054_v49  ;;  %v3697_v44 = vadd.f32 1.0, %v12055_v46  ;;  %v10624_v13 = vadd.f32 %v9750_v17, %v6479_v45  ;;  %5242 = vst [vmem:[#allocation10 + $0x8] sm:$0xff] %v4927_v25  ;;  %v12057_v14 = vld [vmem:[#allocation156_spill] sm:$0xff]  ;;  %v4583_v15 = vadd.f32 %v10562_v24, %v10042_v59  ;;  %v10633_v32 = vpop.f32.mrf.mxu1  ;;  %v12060_v17 = vld [vmem:[#allocation157_spill] sm:$0xff]  ;;  %v12063_v59 = vld [vmem:[#allocation67_spill] sm:$0xff] }
 0x422   :  { %v4007_v27 = vmul.f32 %v3691_v7, %v12057_v14  ;;  %v4588_v9 = vadd.f32 %v10562_v24, %v10065_v47  ;;  %12058 = vst [vmem:[#allocation176_spill] sm:$0xff] %v10633_v32  ;;  %v10635_v41 = vpop.eup %6078  ;;  %4770 = vmatmul.mubr.bf16.gmra.mxu0 %v4214_v50  ;;  %5243 = vst [vmem:[#allocation10 + $0x10] sm:$0xff] %v4932_v0  ;;  %v4011_v25 = vmul.f32 %v3695_v60, %v12060_v17  ;;  %v12062_v7 = vld [vmem:[#allocation159_spill] sm:$0xff]  ;;  %v12065_v21 = vld [vmem:[#allocation182_spill] sm:$0xff]  ;;  %v4688_v52 = vpop.f32.mrf.mxu0 }
 0x423   :  { %12056 = vst [vmem:[#allocation146_spill] sm:$0xff] %v10624_v13  ;;  %12059 = vst [vmem:[#allocation177_spill] sm:$0xff] %v10635_v41  ;;  %5122 = vmatmul.mubr.bf16.gmra.mxu1 %v4216_v5  ;;  %v4009_v39 = vmul.f32 %v3693_v22, %v12061_v33  ;;  %v4013_v61 = vmul.f32 %v3697_v44, %v12062_v7  ;;  %v10642_v34 = vadd.f32 %v12063_v59, %v6486_v51  ;;  %v12066_v46 = vld [vmem:[#allocation49_spill] sm:$0xff]  ;;  %v5040_v50 = vpop.f32.mrf.mxu1  ;;  %v12067_v5 = vld [vmem:[#allocation78_spill] sm:$0xff] }
 0x424   :  { %v4935_v47 = vadd.f32 %v10044_v16, %v4583_v15  ;;  %v4940_v49 = vadd.f32 %v12065_v21, %v4588_v9  ;;  %v3699_v14 = vadd.f32 1.0, %v12066_v46  ;;  %v10647_v0 = vpop.eup %6080  ;;  %v10651_v60 = vadd.f32 %v12067_v5, %v6377_v11  ;;  %v12069_v17 = vld [vmem:[#allocation161_spill] sm:$0xff]  ;;  %v12070_v15 = vld [vmem:[#allocation47_spill] sm:$0xff]  ;;  %v12071_v59 = vld [vmem:[#allocation126_spill] sm:$0xff] }
 0x425   :  { %12064 = vst [vmem:[#allocation167_spill] sm:$0xff] %v10642_v34  ;;  %v4219_v22 = vpack.c.bf16 %v4011_v25, %v4007_v27  ;;  %v4221_v44 = vpack.c.bf16 %v4013_v61, %v4009_v39  ;;  %v3703_v33 = vadd.f32 1.0, %v12069_v17  ;;  %v2832_v7 = vmul.f32 %v2516_v53, %v1884_v38  ;;  %v12072_v46 = vld [vmem:[#allocation22_spill] sm:$0xff]  ;;  %v12073_v25 = vld [vmem:[#allocation185_spill] sm:$0xff]  ;;  %v12074_v61 = vld [vmem:[#allocation187_spill] sm:$0xff] }
 0x426   :  { %12068 = vst [vmem:[#allocation155_spill] sm:$0xff] %v10651_v60  ;;  %v1567_v16 = vmul.f32 %v10624_v13, %v10624_v13  ;;  %5244 = vst [vmem:[#allocation10 + $0x18] sm:$0xff] %v4935_v47  ;;  %v3701_v9 = vadd.f32 1.0, %v12070_v15  ;;  %v3705_v21 = vadd.f32 1.0, %v12071_v59  ;;  %6088 = vtanh.f32 %v2830_v4  ;;  %v12077_v5 = vld [vmem:[#allocation32_spill] sm:$0xff]  ;;  %v12081_v15 = vld [vmem:[#allocation166_spill] sm:$0xff] }
 0x427   :  { %5245 = vst [vmem:[#allocation10 + $0x20] sm:$0xff] %v4940_v49  ;;  %4777 = vmatprep.mubr.bf16.mxu0 %v4219_v22  ;;  %5129 = vmatprep.mubr.bf16.mxu1 %v4221_v44  ;;  %v4019_v52 = vmul.f32 %v3703_v33, %v12072_v46  ;;  %v4591_v27 = vadd.f32 %v10562_v24, %v10091_v42  ;;  %v10664_v53 = vmul.f32 0.7978846, %v10624_v13  ;;  %v12075_v49 = vld [vmem:[#allocation46_spill] sm:$0xff]  ;;  %v12078_v22 = vld [vmem:[#allocation48_spill] sm:$0xff]  ;;  %v12080_v33 = vld [vmem:[#allocation37_spill] sm:$0xff]  ;;  %6090 = vtanh.f32 %v2832_v7 }
 0x428   :  { %v4596_v38 = vadd.f32 %v10562_v24, %v10109_v26  ;;  %v4015_v39 = vmul.f32 %v3699_v14, %v12073_v25  ;;  %v4017_v47 = vmul.f32 %v3701_v9, %v12074_v61  ;;  %v4021_v50 = vmul.f32 %v3705_v21, %v12075_v49  ;;  %v10669_v4 = vpop.eup %6082  ;;  %v12079_v17 = vld [vmem:[#allocation184_spill] sm:$0xff]  ;;  %v12082_v26 = vld [vmem:[#allocation171_spill] sm:$0xff]  ;;  %v12084_v21 = vld [vmem:[#allocation45_spill] sm:$0xff] }
 0x429   :  { %12076 = vst [vmem:[#allocation180_spill] sm:$0xff] %v10669_v4  ;;  %v4218_v44 = vpack.c.bf16 %v12078_v22, %v12077_v5  ;;  %v4220_v42 = vpack.c.bf16 %v12080_v33, %v12079_v17  ;;  %v4943_v59 = vadd.f32 %v12081_v15, %v4591_v27  ;;  %v10677_v10 = vpop.eup %6084  ;;  %v1569_v14 = vmul.f32 %v10642_v34, %v10642_v34  ;;  %v10682_v49 = vpop.f32.mrf.mxu0  ;;  %v12085_v5 = vld [vmem:[#allocation66_spill] sm:$0xff]  ;;  %v12087_v17 = vld [vmem:[#allocation173_spill] sm:$0xff]  ;;  %v12111_v32 = vld [vmem:[#allocation71_spill] sm:$0xff] }
 0x42a   :  { %v4948_v46 = vadd.f32 %v12082_v26, %v4596_v38  ;;  %12083 = vst [vmem:[#allocation19_spill] sm:$0xff] %v10677_v10  ;;  %v4223_v9 = vpack.c.bf16 %v4019_v52, %v4015_v39  ;;  %v4225_v25 = vpack.c.bf16 %v4021_v50, %v4017_v47  ;;  %v3711_v61 = vadd.f32 1.0, %v12084_v21  ;;  %v12086_v22 = vld [vmem:[#allocation54_spill] sm:$0xff]  ;;  %v12089_v39 = vld [vmem:[#allocation53_spill] sm:$0xff]  ;;  %v12091_v47 = vld [vmem:[#allocation52_spill] sm:$0xff] }
 0x42b   :  { %v2199_v57 = vmul.f32 0.044715, %v1567_v16  ;;  %4778 = vmatmul.mubr.bf16.gmra.mxu0 %v4218_v44  ;;  %5130 = vmatmul.mubr.bf16.gmra.mxu1 %v4220_v42  ;;  %5246 = vst [vmem:[#allocation10 + $0x28] sm:$0xff] %v4943_v59  ;;  %v3713_v27 = vadd.f32 1.0, %v12085_v5  ;;  %v4599_v38 = vadd.f32 %v10562_v24, %v12086_v22  ;;  %v4604_v33 = vadd.f32 %v10562_v24, %v12087_v17  ;;  %v10689_v15 = vpop.f32.mrf.mxu1  ;;  %v12092_v44 = vld [vmem:[#allocation125_spill] sm:$0xff]  ;;  %v4693_v59 = vpop.f32.mrf.mxu0  ;;  %v12094_v5 = vld [vmem:[#allocation186_spill] sm:$0xff] }
 0x42c   :  { %5247 = vst [vmem:[#allocation10 + $0x30] sm:$0xff] %v4948_v46  ;;  %12088 = vst [vmem:[#allocation183_spill] sm:$0xff] %v10689_v15  ;;  %v1570_v52 = vmul.f32 %v10651_v60, %v10651_v60  ;;  %v10695_v16 = vadd.f32 %v12089_v39, %v6380_v12  ;;  %4785 = vmatprep.mubr.bf16.mxu0 %v4223_v9  ;;  %5137 = vmatprep.mubr.bf16.mxu1 %v4225_v25  ;;  %v3707_v50 = vadd.f32 1.0, %v12091_v47  ;;  %v12093_v46 = vld [vmem:[#allocation95_spill] sm:$0xff]  ;;  %v12095_v39 = vld [vmem:[#allocation58_spill] sm:$0xff] }
 0x42d   :  { %v3709_v42 = vadd.f32 1.0, %v12092_v44  ;;  %v1885_v26 = vmul.f32 0.7978846, %v10642_v34  ;;  %v4951_v21 = vadd.f32 %v12093_v46, %v4599_v38  ;;  %v4956_v22 = vadd.f32 %v12094_v5, %v4604_v33  ;;  %v5045_v17 = vpop.f32.mrf.mxu1  ;;  %v12096_v25 = vld [vmem:[#allocation165_spill] sm:$0xff]  ;;  %v10707_v47 = vpop.f32.mrf.mxu0  ;;  %v12097_v7 = vld [vmem:[#allocation138_spill] sm:$0xff]  ;;  %v12098_v38 = vld [vmem:[#allocation115_spill] sm:$0xff] }
 0x42e   :  { %12090 = vst [vmem:[#allocation33_spill] sm:$0xff] %v10695_v16  ;;  %v2201_v20 = vmul.f32 0.044715, %v1569_v14  ;;  %v10703_v13 = vmul.f32 0.7978846, %v10651_v60  ;;  %v4027_v9 = vmul.f32 %v3711_v61, %v12095_v39  ;;  %v4029_v18 = vmul.f32 %v3713_v27, %v12096_v25  ;;  %v12099_v14 = vld [vmem:[#allocation114_spill] sm:$0xff]  ;;  %v10719_v61 = vpop.eup %6086 }
 0x42f   :  { %v2515_v44 = vadd.f32 1.0, %v2199_v57  ;;  %v10711_v59 = vadd.f32 %v12097_v7, %v6479_v45  ;;  %5248 = vst [vmem:[#allocation10 + $0x38] sm:$0xff] %v4951_v21  ;;  %5249 = vst [vmem:[#allocation10 + $0x40] sm:$0xff] %v4956_v22  ;;  %v4607_v33 = vadd.f32 %v10562_v24, %v12098_v38  ;;  %v4612_v46 = vadd.f32 %v10562_v24, %v12099_v14  ;;  %v10717_v5 = vpop.f32.mrf.mxu1  ;;  %v12102_v17 = vld [vmem:[#allocation123_spill] sm:$0xff]  ;;  %v4696_v21 = vpop.f32.mrf.mxu0  ;;  %v12104_v22 = vld [vmem:[#allocation116_spill] sm:$0xff] }
 0x430   :  { %12100 = vst [vmem:[#allocation28_spill] sm:$0xff] %v10717_v5  ;;  %12101 = vst [vmem:[#allocation35_spill] sm:$0xff] %v10719_v61  ;;  %v2202_v27 = vmul.f32 0.044715, %v1570_v52  ;;  %v1572_v57 = vmul.f32 %v10695_v16, %v10695_v16  ;;  %v4023_v39 = vmul.f32 %v3707_v50, %v12102_v17  ;;  %v12103_v25 = vld [vmem:[#allocation191_spill] sm:$0xff]  ;;  %v12105_v60 = vld [vmem:[#allocation193_spill] sm:$0xff] }
 0x431   :  { %v4025_v7 = vmul.f32 %v3709_v42, %v12103_v25  ;;  %v4222_v34 = vpack.c.bf16 %v12105_v60, %v12104_v22  ;;  %v12106_v38 = vld [vmem:[#allocation164_spill] sm:$0xff]  ;;  %v12107_v4 = vld [vmem:[#allocation57_spill] sm:$0xff]  ;;  %v12108_v14 = vld [vmem:[#allocation98_spill] sm:$0xff]  ;;  %v5048_v61 = vpop.f32.mrf.mxu1  ;;  %v3721_v50 = vadd.f32 1.0, %v12111_v32  ;;  %v2517_v17 = vadd.f32 1.0, %v2201_v20 }
 0x432   :  { %v4224_v41 = vpack.c.bf16 %v12107_v4, %v12106_v38  ;;  %v4959_v35 = vadd.f32 %v12108_v14, %v4607_v33  ;;  %v12109_v10 = vld [vmem:[#allocation117_spill] sm:$0xff]  ;;  %v4227_v52 = vpack.c.bf16 %v4027_v9, %v4023_v39  ;;  %v12110_v5 = vld [vmem:[#allocation82_spill] sm:$0xff]  ;;  %v12112_v42 = vld [vmem:[#allocation179_spill] sm:$0xff]  ;;  %v4615_v60 = vadd.f32 %v10562_v24, %v10219_v23 }
 0x433   :  { %v4964_v63 = vadd.f32 %v12109_v10, %v4612_v46  ;;  %v4229_v40 = vpack.c.bf16 %v4029_v18, %v4025_v7  ;;  %v3719_v15 = vadd.f32 1.0, %v12110_v5  ;;  %v10735_v25 = vadd.f32 %v12112_v42, %v6486_v51  ;;  %4786 = vmatmul.mubr.bf16.gmra.mxu0 %v4222_v34  ;;  %v12113_v10 = vld [vmem:[#allocation42_spill] sm:$0xff]  ;;  %v10741_v18 = vpop.eup %6088  ;;  %v12115_v32 = vld [vmem:[#allocation59_spill] sm:$0xff]  ;;  %v12118_v23 = vld [vmem:[#allocation168_spill] sm:$0xff] }
 0x434   :  { %5138 = vmatmul.mubr.bf16.gmra.mxu1 %v4224_v41  ;;  %5250 = vst [vmem:[#allocation10 + $0x48] sm:$0xff] %v4959_v35  ;;  %v4620_v4 = vadd.f32 %v10562_v24, %v12113_v10  ;;  %12114 = vst [vmem:[#allocation99_spill] sm:$0xff] %v10741_v18  ;;  %v2204_v9 = vmul.f32 0.044715, %v1572_v57  ;;  %v1571_v20 = vmul.f32 %v10711_v59, %v10711_v59  ;;  %4793 = vmatprep.mubr.bf16.mxu0 %v4227_v52  ;;  %v12116_v34 = vld [vmem:[#allocation70_spill] sm:$0xff]  ;;  %v12120_v46 = vld [vmem:[#allocation100_spill] sm:$0xff] }
 0x435   :  { %5251 = vst [vmem:[#allocation10 + $0x50] sm:$0xff] %v4964_v63  ;;  %5145 = vmatprep.mubr.bf16.mxu1 %v4229_v40  ;;  %v3715_v33 = vadd.f32 1.0, %v12115_v32  ;;  %v3717_v41 = vadd.f32 1.0, %v12116_v34  ;;  %v10748_v63 = vadd.f32 1.0, %v10647_v0  ;;  %v10752_v35 = vadd.f32 %v12118_v23, %v6377_v11  ;;  %v12121_v61 = vld [vmem:[#allocation39_spill] sm:$0xff]  ;;  %v12122_v40 = vld [vmem:[#allocation62_spill] sm:$0xff] }
 0x436   :  { %v4967_v5 = vadd.f32 %v12120_v46, %v4615_v60  ;;  %v4972_v57 = vadd.f32 %v12121_v61, %v4620_v4  ;;  %v2831_v39 = vmul.f32 %v2515_v44, %v10664_v53  ;;  %v1888_v7 = vmul.f32 0.7978846, %v10695_v16  ;;  %v12123_v22 = vld [vmem:[#allocation74_spill] sm:$0xff]  ;;  %v12124_v0 = vld [vmem:[#allocation192_spill] sm:$0xff]  ;;  %v12125_v10 = vld [vmem:[#allocation113_spill] sm:$0xff] }
 0x437   :  { %12117 = vst [vmem:[#allocation23_spill] sm:$0xff] %v10748_v63  ;;  %12119 = vst [vmem:[#allocation181_spill] sm:$0xff] %v10752_v35  ;;  %v4035_v21 = vmul.f32 %v3719_v15, %v12122_v40  ;;  %v4037_v38 = vmul.f32 %v3721_v50, %v12123_v22  ;;  %v2833_v14 = vmul.f32 %v2517_v17, %v1885_v26  ;;  %v2518_v52 = vadd.f32 1.0, %v2202_v27  ;;  %v12126_v34 = vld [vmem:[#allocation101_spill] sm:$0xff]  ;;  %v12127_v44 = vld [vmem:[#allocation175_spill] sm:$0xff]  ;;  %v10772_v22 = vpop.eup %6090 }
 0x438   :  { %5252 = vst [vmem:[#allocation10 + $0x58] sm:$0xff] %v4967_v5  ;;  %5253 = vst [vmem:[#allocation10 + $0x60] sm:$0xff] %v4972_v57  ;;  %v4623_v42 = vadd.f32 %v10562_v24, %v12124_v0  ;;  %v4628_v60 = vadd.f32 %v10562_v24, %v12125_v10  ;;  %v2520_v32 = vadd.f32 1.0, %v2204_v9  ;;  %v2203_v4 = vmul.f32 0.044715, %v1571_v20  ;;  %v12128_v46 = vld [vmem:[#allocation29_spill] sm:$0xff] }
 0x439   :  { %v4031_v53 = vmul.f32 %v3715_v33, %v12126_v34  ;;  %v4033_v23 = vmul.f32 %v3717_v41, %v12127_v44  ;;  %v12129_v15 = vld [vmem:[#allocation64_spill] sm:$0xff]  ;;  %v12130_v50 = vld [vmem:[#allocation34_spill] sm:$0xff]  ;;  %v12131_v26 = vld [vmem:[#allocation73_spill] sm:$0xff]  ;;  %12134 = vst [vmem:[#allocation16_spill] sm:$0xff] %v10772_v22  ;;  %6092 = vtanh.f32 %v2831_v39  ;;  %v1573_v41 = vmul.f32 %v10735_v25, %v10735_v25 }
 0x43a   :  { %v4226_v61 = vpack.c.bf16 %v12129_v15, %v12128_v46  ;;  %v4228_v27 = vpack.c.bf16 %v12131_v26, %v12130_v50  ;;  %v12132_v17 = vld [vmem:[#allocation201_spill] sm:$0xff]  ;;  %v12133_v57 = vld [vmem:[#allocation76_spill] sm:$0xff]  ;;  %v12136_v16 = vld [vmem:[#allocation106_spill] sm:$0xff]  ;;  %v2834_v46 = vmul.f32 %v2518_v52, %v10703_v13  ;;  %v1887_v15 = vmul.f32 0.7978846, %v10711_v59 }
 0x43b   :  { %v4975_v5 = vadd.f32 %v12132_v17, %v4623_v42  ;;  %v4980_v40 = vadd.f32 %v12133_v57, %v4628_v60  ;;  %v4231_v0 = vpack.c.bf16 %v4035_v21, %v4031_v53  ;;  %v4233_v10 = vpack.c.bf16 %v4037_v38, %v4033_v23  ;;  %v12135_v9 = vld [vmem:[#allocation92_spill] sm:$0xff]  ;;  %v12137_v34 = vld [vmem:[#allocation109_spill] sm:$0xff]  ;;  %v12140_v53 = vld [vmem:[#allocation199_spill] sm:$0xff] }
 0x43c   :  { %v3727_v20 = vadd.f32 1.0, %v12135_v9  ;;  %v3729_v33 = vadd.f32 1.0, %v12136_v16  ;;  %4794 = vmatmul.mubr.bf16.gmra.mxu0 %v4226_v61  ;;  %5146 = vmatmul.mubr.bf16.gmra.mxu1 %v4228_v27  ;;  %v4631_v42 = vadd.f32 %v10562_v24, %v12137_v34  ;;  %v12138_v60 = vld [vmem:[#allocation69_spill] sm:$0xff]  ;;  %v2519_v21 = vadd.f32 1.0, %v2203_v4  ;;  %v12141_v61 = vld [vmem:[#allocation120_spill] sm:$0xff]  ;;  %v12142_v26 = vld [vmem:[#allocation130_spill] sm:$0xff] }
 0x43d   :  { %5254 = vst [vmem:[#allocation10 + $0x68] sm:$0xff] %v4975_v5  ;;  %5255 = vst [vmem:[#allocation10 + $0x70] sm:$0xff] %v4980_v40  ;;  %v4636_v44 = vadd.f32 %v10562_v24, %v12138_v60  ;;  %v1574_v38 = vmul.f32 %v10752_v35, %v10752_v35  ;;  %4801 = vmatprep.mubr.bf16.mxu0 %v4231_v0  ;;  %5153 = vmatprep.mubr.bf16.mxu1 %v4233_v10  ;;  %v12139_v16 = vld [vmem:[#allocation93_spill] sm:$0xff]  ;;  %v3725_v23 = vadd.f32 1.0, %v12140_v53  ;;  %v12143_v4 = vld [vmem:[#allocation80_spill] sm:$0xff] }
 0x43e   :  { %v3723_v39 = vadd.f32 1.0, %v12139_v16  ;;  %v4983_v50 = vadd.f32 %v12141_v61, %v4631_v42  ;;  %6094 = vtanh.f32 %v2833_v14  ;;  %v2836_v17 = vmul.f32 %v2520_v32, %v1888_v7  ;;  %v12144_v57 = vld [vmem:[#allocation84_spill] sm:$0xff]  ;;  %v12147_v34 = vld [vmem:[#allocation203_spill] sm:$0xff]  ;;  %v10800_v60 = vpop.f32.mrf.mxu0  ;;  %v10802_v7 = vpop.f32.mrf.mxu1  ;;  %v12151_v53 = vld [vmem:[#allocation178_spill] sm:$0xff] }
 0x43f   :  { %v4988_v27 = vadd.f32 %v12142_v26, %v4636_v44  ;;  %v4043_v5 = vmul.f32 %v3727_v20, %v12143_v4  ;;  %v4045_v40 = vmul.f32 %v3729_v33, %v12144_v57  ;;  %v2205_v0 = vmul.f32 0.044715, %v1573_v41  ;;  %v12145_v10 = vld [vmem:[#allocation56_spill] sm:$0xff]  ;;  %v12149_v41 = vld [vmem:[#allocation17_spill] sm:$0xff] }
 0x440   :  { %v10794_v9 = vadd.f32 %v12145_v10, %v6380_v12  ;;  %5256 = vst [vmem:[#allocation10 + $0x78] sm:$0xff] %v4983_v50  ;;  %v12146_v13 = vld [vmem:[#allocation172_spill] sm:$0xff]  ;;  %v4644_v42 = vadd.f32 %v10562_v24, %v12147_v34  ;;  %v2835_v14 = vmul.f32 %v2519_v21, %v1887_v15  ;;  %v2206_v32 = vmul.f32 0.044715, %v1574_v38  ;;  %v12152_v50 = vld [vmem:[#allocation41_spill] sm:$0xff]  ;;  %v4701_v34 = vpop.f32.mrf.mxu0  ;;  %v5053_v22 = vpop.f32.mrf.mxu1  ;;  %v12156_v21 = vld [vmem:[#allocation87_spill] sm:$0xff] }
 0x441   :  { %5257 = vst [vmem:[#allocation10 + $0x80] sm:$0xff] %v4988_v27  ;;  %v4639_v52 = vadd.f32 %v10562_v24, %v12146_v13  ;;  %v12148_v20 = vld [vmem:[#allocation136_spill] sm:$0xff]  ;;  %v4041_v44 = vmul.f32 %v3725_v23, %v12149_v41  ;;  %v12153_v26 = vld [vmem:[#allocation89_spill] sm:$0xff]  ;;  %v3735_v38 = vadd.f32 1.0, %v12156_v21  ;;  %6096 = vtanh.f32 %v2834_v46  ;;  %v12160_v46 = vld [vmem:[#allocation158_spill] sm:$0xff] }
 0x442   :  { %v4039_v33 = vmul.f32 %v3723_v39, %v12148_v20  ;;  %v12150_v16 = vld [vmem:[#allocation148_spill] sm:$0xff]  ;;  %v4232_v27 = vpack.c.bf16 %v12153_v26, %v12152_v50  ;;  %v2521_v23 = vadd.f32 1.0, %v2205_v0  ;;  %v10820_v22 = vpop.f32.mrf.mxu1  ;;  %v3731_v0 = vadd.f32 1.0, %v12160_v46  ;;  %v12163_v26 = vld [vmem:[#allocation118_spill] sm:$0xff] }
 0x443   :  { %v4230_v61 = vpack.c.bf16 %v12151_v53, %v12150_v16  ;;  %v12154_v4 = vld [vmem:[#allocation128_spill] sm:$0xff]  ;;  %v4237_v63 = vpack.c.bf16 %v4045_v40, %v4041_v44  ;;  %v10818_v16 = vpop.f32.mrf.mxu0  ;;  %v1890_v40 = vmul.f32 0.7978846, %v10752_v35  ;;  %6098 = vtanh.f32 %v2836_v17 }
 0x444   :  { %v4991_v57 = vadd.f32 %v12154_v4, %v4639_v52  ;;  %v12155_v10 = vld [vmem:[#allocation204_spill] sm:$0xff]  ;;  %v4235_v18 = vpack.c.bf16 %v4043_v5, %v4039_v33  ;;  %5154 = vmatmul.mubr.bf16.gmra.mxu1 %v4232_v27  ;;  %v12159_v52 = vld [vmem:[#allocation131_spill] sm:$0xff]  ;;  %v1889_v5 = vmul.f32 0.7978846, %v10735_v25  ;;  %v12161_v33 = vld [vmem:[#allocation86_spill] sm:$0xff]  ;;  %v1576_v53 = vmul.f32 %v10794_v9, %v10794_v9 }
 0x445   :  { %v4996_v13 = vadd.f32 %v12155_v10, %v4644_v42  ;;  %v12157_v15 = vld [vmem:[#allocation112_spill] sm:$0xff]  ;;  %4802 = vmatmul.mubr.bf16.gmra.mxu0 %v4230_v61  ;;  %v4652_v42 = vadd.f32 %v10562_v24, %v12159_v52  ;;  %5161 = vmatprep.mubr.bf16.mxu1 %v4237_v63  ;;  %v3733_v44 = vadd.f32 1.0, %v12161_v33  ;;  %v12162_v61 = vld [vmem:[#allocation209_spill] sm:$0xff]  ;;  %v4704_v4 = vpop.f32.mrf.mxu0  ;;  %6100 = vtanh.f32 %v2835_v14  ;;  %v12167_v14 = vld [vmem:[#allocation91_spill] sm:$0xff] }
 0x446   :  { %v3737_v39 = vadd.f32 1.0, %v12157_v15  ;;  %5258 = vst [vmem:[#allocation10 + $0x88] sm:$0xff] %v4991_v57  ;;  %v12158_v20 = vld [vmem:[#allocation208_spill] sm:$0xff]  ;;  %4809 = vmatprep.mubr.bf16.mxu0 %v4235_v18  ;;  %v5056_v57 = vpop.f32.mrf.mxu1  ;;  %v2522_v10 = vadd.f32 1.0, %v2206_v32  ;;  %v12165_v18 = vld [vmem:[#allocation81_spill] sm:$0xff]  ;;  %v2837_v21 = vmul.f32 %v2521_v23, %v1889_v5  ;;  %v12166_v15 = vld [vmem:[#allocation83_spill] sm:$0xff]  ;;  %v4655_v17 = vadd.f32 %v10562_v24, %v10443_v36  ;;  %v10840_v52 = vpop.eup %6092 }
 0x447   :  { %5259 = vst [vmem:[#allocation10 + $0x90] sm:$0xff] %v4996_v13  ;;  %v4647_v41 = vadd.f32 %v10562_v24, %v12158_v20  ;;  %v5004_v27 = vadd.f32 %v12163_v26, %v4652_v42  ;;  %v12164_v13 = vld [vmem:[#allocation163_spill] sm:$0xff]  ;;  %v10834_v20 = vadd.f32 %v12166_v15, %v6479_v45  ;;  %v10844_v32 = vadd.f32 %v12167_v14, %v6486_v51  ;;  %v12169_v23 = vld [vmem:[#allocation196_spill] sm:$0xff]  ;;  %v12170_v5 = vld [vmem:[#allocation197_spill] sm:$0xff] }
 0x448   :  { %v4051_v34 = vmul.f32 %v3735_v38, %v12164_v13  ;;  %v4053_v63 = vmul.f32 %v3737_v39, %v12165_v18  ;;  %v12168_v38 = vld [vmem:[#allocation61_spill] sm:$0xff]  ;;  %v4047_v42 = vmul.f32 %v3731_v0, %v12169_v23  ;;  %v4049_v46 = vmul.f32 %v3733_v44, %v12170_v5  ;;  %v12171_v33 = vld [vmem:[#allocation104_spill] sm:$0xff]  ;;  %v12174_v26 = vld [vmem:[#allocation103_spill] sm:$0xff] }
 0x449   :  { %v4999_v50 = vadd.f32 %v12162_v61, %v4647_v41  ;;  %5261 = vst [vmem:[#allocation10 + $0xa0] sm:$0xff] %v5004_v27  ;;  %v4660_v41 = vadd.f32 %v10562_v24, %v10468_v1  ;;  %v10848_v39 = vadd.f32 %v12168_v38, %v6377_v11  ;;  %v12172_v61 = vld [vmem:[#allocation97_spill] sm:$0xff]  ;;  %v5007_v27 = vadd.f32 %v10445_v29, %v4655_v17  ;;  %v12175_v18 = vld [vmem:[#allocation124_spill] sm:$0xff] }
 0x44a   :  { %v4234_v36 = vpack.c.bf16 %v12172_v61, %v12171_v33  ;;  %v4239_v57 = vpack.c.bf16 %v4051_v34, %v4047_v42  ;;  %v4241_v13 = vpack.c.bf16 %v4053_v63, %v4049_v46  ;;  %v3743_v15 = vadd.f32 1.0, %v12175_v18  ;;  %v12176_v14 = vld [vmem:[#allocation24_spill] sm:$0xff]  ;;  %v12179_v42 = vld [vmem:[#allocation162_spill] sm:$0xff]  ;;  %v12181_v33 = vld [vmem:[#allocation119_spill] sm:$0xff] }
 0x44b   :  { %5260 = vst [vmem:[#allocation10 + $0x98] sm:$0xff] %v4999_v50  ;;  %v12173_v50 = vld [vmem:[#allocation194_spill] sm:$0xff]  ;;  %v5012_v4 = vadd.f32 %v10470_v8, %v4660_v41  ;;  %v3745_v38 = vadd.f32 1.0, %v12176_v14  ;;  %v10860_v35 = vpop.eup %6094  ;;  %v10862_v0 = vmul.f32 0.044715, %v1576_v53  ;;  %v1575_v44 = vmul.f32 %v10834_v20, %v10834_v20  ;;  %5262 = vst [vmem:[#allocation10 + $0xa8] sm:$0xff] %v5007_v27 }
 0x44c   :  { %v4236_v1 = vpack.c.bf16 %v12174_v26, %v12173_v50  ;;  %v4663_v29 = vadd.f32 %v10562_v24, %v10490_v58  ;;  %v4668_v8 = vadd.f32 %v10562_v24, %v10514_v19  ;;  %v10870_v34 = vmul.f32 %v2522_v10, %v1890_v40  ;;  %v12177_v53 = vld [vmem:[#allocation90_spill] sm:$0xff]  ;;  %v12178_v41 = vld [vmem:[#allocation121_spill] sm:$0xff]  ;;  %v12183_v26 = vld [vmem:[#allocation51_spill] sm:$0xff] }
 0x44d   :  { %4810 = vmatmul.mubr.bf16.gmra.mxu0 %v4234_v36  ;;  %5263 = vst [vmem:[#allocation10 + $0xb0] sm:$0xff] %v5012_v4  ;;  %v1577_v63 = vmul.f32 %v10844_v32, %v10844_v32  ;;  %v3739_v17 = vadd.f32 1.0, %v12177_v53  ;;  %v3741_v23 = vadd.f32 1.0, %v12178_v41  ;;  %6102 = vtanh.f32 %v2837_v21  ;;  %v12180_v10 = vld [vmem:[#allocation149_spill] sm:$0xff]  ;;  %v12182_v36 = vld [vmem:[#allocation50_spill] sm:$0xff]  ;;  %v12190_v41 = vld [vmem:[#allocation111_spill] sm:$0xff] }
 0x44e   :  { %5162 = vmatmul.mubr.bf16.gmra.mxu1 %v4236_v1  ;;  %4817 = vmatprep.mubr.bf16.mxu0 %v4239_v57  ;;  %v10878_v5 = vadd.f32 %v12179_v42, %v6380_v12  ;;  %v5015_v58 = vadd.f32 %v10492_v56, %v4663_v29  ;;  %v5020_v19 = vadd.f32 %v10516_v55, %v4668_v8  ;;  %v2207_v21 = vmul.f32 0.044715, %v1575_v44  ;;  %v10895_v27 = vpop.eup %6096  ;;  %v12184_v57 = vld [vmem:[#allocation75_spill] sm:$0xff]  ;;  %v12189_v8 = vld [vmem:[#allocation169_spill] sm:$0xff] }
 0x44f   :  { %5169 = vmatprep.mubr.bf16.mxu1 %v4241_v13  ;;  %v1578_v40 = vmul.f32 %v10848_v39, %v10848_v39  ;;  %v10886_v46 = vadd.f32 %v12180_v10, %v6479_v45  ;;  %v4059_v61 = vmul.f32 %v3743_v15, %v12181_v33  ;;  %v4061_v50 = vmul.f32 %v3745_v38, %v12182_v36  ;;  %v12185_v13 = vld [vmem:[#allocation110_spill] sm:$0xff]  ;;  %v12187_v38 = vld [vmem:[#allocation108_spill] sm:$0xff]  ;;  %v12188_v29 = vld [vmem:[#allocation79_spill] sm:$0xff] }
 0x450   :  { %v3751_v1 = vadd.f32 1.0, %v12183_v26  ;;  %5264 = vst [vmem:[#allocation10 + $0xb8] sm:$0xff] %v5015_v58  ;;  %5265 = vst [vmem:[#allocation10 + $0xc0] sm:$0xff] %v5020_v19  ;;  %v4671_v56 = vadd.f32 %v10562_v24, %v10533_v43  ;;  %v4676_v55 = vadd.f32 %v10562_v24, %v10564_v2  ;;  %v2209_v4 = vmul.f32 0.044715, %v1577_v63  ;;  %v12186_v15 = vld [vmem:[#allocation154_spill] sm:$0xff]  ;;  %v10906_v2 = vpop.eup %6098 }
 0x451   :  { %v4238_v18 = vpack.c.bf16 %v12185_v13, %v12184_v57  ;;  %v4055_v14 = vmul.f32 %v3739_v17, %v12186_v15  ;;  %v4057_v44 = vmul.f32 %v3741_v23, %v12187_v38  ;;  %v4240_v53 = vpack.c.bf16 %v12189_v8, %v12188_v29  ;;  %v12191_v63 = vld [vmem:[#allocation195_spill] sm:$0xff]  ;;  %v12193_v26 = vld [vmem:[#allocation105_spill] sm:$0xff]  ;;  %v12197_v29 = vld [vmem:[#allocation174_spill] sm:$0xff] }
 0x452   :  { %v3747_v42 = vadd.f32 1.0, %v12190_v41  ;;  %v5023_v43 = vadd.f32 %v10535_v62, %v4671_v56  ;;  %v5028_v58 = vadd.f32 %v10566_v3, %v4676_v55  ;;  %v10910_v19 = vadd.f32 %v12191_v63, %v6486_v51  ;;  %v12192_v17 = vld [vmem:[#allocation127_spill] sm:$0xff]  ;;  %v10913_v23 = vpop.eup %6100  ;;  %v12194_v13 = vld [vmem:[#allocation85_spill] sm:$0xff]  ;;  %v12199_v41 = vld [vmem:[#allocation170_spill] sm:$0xff] }
 0x453   :  { %v4243_v10 = vpack.c.bf16 %v4059_v61, %v4055_v14  ;;  %v4245_v33 = vpack.c.bf16 %v4061_v50, %v4057_v44  ;;  %v3753_v36 = vadd.f32 1.0, %v12192_v17  ;;  %v4067_v57 = vmul.f32 %v3751_v1, %v12193_v26  ;;  %v12195_v15 = vld [vmem:[#allocation189_spill] sm:$0xff]  ;;  %v12196_v44 = vld [vmem:[#allocation88_spill] sm:$0xff] }
 0x454   :  { %v3749_v62 = vadd.f32 1.0, %v12194_v13  ;;  %5266 = vst [vmem:[#allocation10 + $0xc8] sm:$0xff] %v5023_v43  ;;  %5267 = vst [vmem:[#allocation10 + $0xd0] sm:$0xff] %v5028_v58  ;;  %v4679_v3 = vadd.f32 %v10562_v24, %v10586_v54  ;;  %v4684_v56 = vadd.f32 %v10562_v24, %v10604_v37  ;;  %v10921_v61 = vadd.f32 1.0, %v2207_v21  ;;  %v4707_v37 = vpop.f32.mrf.mxu0  ;;  %v5059_v21 = vpop.f32.mrf.mxu1  ;;  %v12200_v58 = vld [vmem:[#allocation107_spill] sm:$0xff] }
 0x455   :  { %4818 = vmatmul.mubr.bf16.gmra.mxu0 %v4238_v18  ;;  %v2210_v50 = vmul.f32 0.044715, %v1578_v40  ;;  %v1580_v55 = vmul.f32 %v10878_v5, %v10878_v5  ;;  %v1579_v18 = vmul.f32 %v10886_v46, %v10886_v46  ;;  %v10927_v1 = vadd.f32 1.0, %v2209_v4 }
 0x456   :  { %5170 = vmatmul.mubr.bf16.gmra.mxu1 %v4240_v53  ;;  %4825 = vmatprep.mubr.bf16.mxu0 %v4243_v10  ;;  %v4063_v14 = vmul.f32 %v3747_v42, %v12195_v15  ;;  %v5031_v54 = vadd.f32 %v10588_v6, %v4679_v3  ;;  %v5036_v38 = vadd.f32 %v10606_v30, %v4684_v56  ;;  %v12198_v53 = vld [vmem:[#allocation21_spill] sm:$0xff]  ;;  %v5061_v17 = vpop.f32.mrf.mxu1  ;;  %v3759_v26 = vadd.f32 1.0, %v10459_v31  ;;  %v12203_v56 = vld [vmem:[#allocation183_spill] sm:$0xff] }
 0x457   :  { %5177 = vmatprep.mubr.bf16.mxu1 %v4245_v33  ;;  %v1581_v40 = vmul.f32 %v10910_v19, %v10910_v19  ;;  %v4242_v8 = vpack.c.bf16 %v12197_v29, %v12196_v44  ;;  %v4244_v43 = vpack.c.bf16 %v12199_v41, %v12198_v53  ;;  %v4069_v4 = vmul.f32 %v3753_v36, %v12200_v58  ;;  %v12201_v10 = vld [vmem:[#allocation25_spill] sm:$0xff]  ;;  %v4709_v33 = vpop.f32.mrf.mxu0 }
 0x458   :  { %v4247_v63 = vpack.c.bf16 %v4067_v57, %v4063_v14  ;;  %v4065_v42 = vmul.f32 %v3749_v62, %v12201_v10  ;;  %5268 = vst [vmem:[#allocation10 + $0xd8] sm:$0xff] %v5031_v54  ;;  %5269 = vst [vmem:[#allocation10 + $0xe0] sm:$0xff] %v5036_v38  ;;  %v4687_v6 = vadd.f32 %v10562_v24, %v10631_v48  ;;  %v3761_v13 = vadd.f32 1.0, %v10472_v28  ;;  %v12202_v62 = vld [vmem:[#allocation176_spill] sm:$0xff]  ;;  %v5062_v54 = vpop.f32.mrf.mxu1  ;;  %v12209_v33 = vld [vmem:[#allocation141_spill] sm:$0xff] }
 0x459   :  { %v4692_v30 = vadd.f32 %v10562_v24, %v10682_v49  ;;  %v4695_v36 = vadd.f32 %v10562_v24, %v10707_v47  ;;  %v4700_v57 = vadd.f32 %v10562_v24, %v10800_v60  ;;  %v4703_v48 = vadd.f32 %v10562_v24, %v10818_v16  ;;  %v4710_v14 = vpop.f32.mrf.mxu0  ;;  %v12204_v38 = vld [vmem:[#allocation28_spill] sm:$0xff] }
 0x45a   :  { %v5039_v3 = vadd.f32 %v12202_v62, %v4687_v6  ;;  %v4708_v49 = vadd.f32 %v10562_v24, %v4707_v37  ;;  %v10955_v31 = vpop.eup %6102  ;;  %v4249_v28 = vpack.c.bf16 %v4069_v4, %v4065_v42  ;;  %v4711_v60 = vadd.f32 %v10562_v24, %v4710_v14  ;;  %v5064_v58 = vpop.f32.mrf.mxu1  ;;  %v12205_v10 = vld [vmem:[#allocation68_spill] sm:$0xff]  ;;  %v12207_v6 = vld [vmem:[#allocation134_spill] sm:$0xff] }
 0x45b   :  { %v5044_v15 = vadd.f32 %v12203_v56, %v4692_v30  ;;  %v5047_v44 = vadd.f32 %v12204_v38, %v4695_v36  ;;  %v5052_v47 = vadd.f32 %v10802_v7, %v4700_v57  ;;  %v2211_v29 = vmul.f32 0.044715, %v1579_v18  ;;  %v4712_v41 = vpop.f32.mrf.mxu0  ;;  %v12206_v7 = vld [vmem:[#allocation210_spill] sm:$0xff]  ;;  %v12210_v36 = vld [vmem:[#allocation132_spill] sm:$0xff]  ;;  %v12219_v58 = vld [vmem:[#allocation65_spill] sm:$0xff] }
 0x45c   :  { %v2213_v53 = vmul.f32 0.044715, %v1581_v40  ;;  %5270 = vst [vmem:[#allocation10 + $0xe8] sm:$0xff] %v5039_v3  ;;  %v5055_v16 = vadd.f32 %v10820_v22, %v4703_v48  ;;  %v5060_v37 = vadd.f32 %v5059_v21, %v4708_v49  ;;  %v10963_v4 = vadd.f32 %v12205_v10, %v6479_v45  ;;  %v12211_v48 = vld [vmem:[#allocation190_spill] sm:$0xff]  ;;  %v12213_v14 = vld [vmem:[#allocation20_spill] sm:$0xff] }
 0x45d   :  { %4826 = vmatmul.mubr.bf16.gmra.mxu0 %v4242_v8  ;;  %5271 = vst [vmem:[#allocation10 + $0xf0] sm:$0xff] %v5044_v15  ;;  %v3755_v42 = vadd.f32 1.0, %v12206_v7  ;;  %v3757_v18 = vadd.f32 1.0, %v12207_v6  ;;  %5272 = vst [vmem:[#allocation10 + $0xf8] sm:$0xff] %v5047_v44  ;;  %v5063_v40 = vadd.f32 %v5062_v54, %v4711_v60  ;;  %v10968_v8 = vadd.f32 1.0, %v10862_v0  ;;  %v12217_v60 = vld [vmem:[#allocation55_spill] sm:$0xff] }
 0x45e   :  { %5178 = vmatmul.mubr.bf16.gmra.mxu1 %v4244_v43  ;;  %4833 = vmatprep.mubr.bf16.mxu0 %v4247_v63  ;;  %5273 = vst [vmem:[#allocation10 + $0x100] sm:$0xff] %v5052_v47  ;;  %v1891_v22 = vmul.f32 0.7978846, %v10834_v20  ;;  %v1893_v21 = vmul.f32 0.7978846, %v10844_v32  ;;  %v12208_v43 = vld [vmem:[#allocation77_spill] sm:$0xff]  ;;  %v4075_v17 = vmul.f32 %v3759_v26, %v12209_v33  ;;  %v4077_v57 = vmul.f32 %v3761_v13, %v12210_v36 }
 0x45f   :  { %5185 = vmatprep.mubr.bf16.mxu1 %v4249_v28  ;;  %v10974_v45 = vadd.f32 %v12208_v43, %v6486_v51  ;;  %5274 = vst [vmem:[#allocation10 + $0x108] sm:$0xff] %v5055_v16  ;;  %5275 = vst [vmem:[#allocation10 + $0x110] sm:$0xff] %v5060_v37  ;;  %v2526_v63 = vadd.f32 1.0, %v2210_v50  ;;  %v2212_v30 = vmul.f32 0.044715, %v1580_v55  ;;  %v2527_v56 = vadd.f32 1.0, %v2211_v29 }
 0x460   :  { %5276 = vst [vmem:[#allocation10 + $0x118] sm:$0xff] %v5063_v40  ;;  %v2839_v0 = vmul.f32 %v10921_v61, %v1891_v22  ;;  %v2841_v62 = vmul.f32 %v10927_v1, %v1893_v21  ;;  %v1895_v3 = vmul.f32 0.7978846, %v10886_v46  ;;  %v2529_v15 = vadd.f32 1.0, %v2213_v53  ;;  %v12212_v50 = vld [vmem:[#allocation202_spill] sm:$0xff]  ;;  %v12215_v1 = vld [vmem:[#allocation200_spill] sm:$0xff] }
 0x461   :  { %v1583_v51 = vmul.f32 %v10963_v4, %v10963_v4  ;;  %v4071_v49 = vmul.f32 %v3755_v42, %v12211_v48  ;;  %v4073_v55 = vmul.f32 %v3757_v18, %v12212_v50  ;;  %v1897_v26 = vmul.f32 0.7978846, %v10910_v19  ;;  %v12214_v61 = vld [vmem:[#allocation102_spill] sm:$0xff]  ;;  %v12216_v28 = vld [vmem:[#allocation139_spill] sm:$0xff]  ;;  %v12218_v53 = vld [vmem:[#allocation144_spill] sm:$0xff] }
 0x462   :  { %v1585_v13 = vmul.f32 %v10974_v45, %v10974_v45  ;;  %v4246_v54 = vpack.c.bf16 %v12214_v61, %v12213_v14  ;;  %v4248_v38 = vpack.c.bf16 %v12216_v28, %v12215_v1  ;;  %v3767_v29 = vadd.f32 1.0, %v12217_v60  ;;  %v12220_v7 = vld [vmem:[#allocation198_spill] sm:$0xff]  ;;  %v12221_v40 = vld [vmem:[#allocation40_spill] sm:$0xff]  ;;  %v12225_v50 = vld [vmem:[#allocation207_spill] sm:$0xff] }
 0x463   :  { %v4251_v44 = vpack.c.bf16 %v4075_v17, %v4071_v49  ;;  %v4253_v47 = vpack.c.bf16 %v4077_v57, %v4073_v55  ;;  %v3769_v16 = vadd.f32 1.0, %v12218_v53  ;;  %v1894_v37 = vmul.f32 0.7978846, %v10848_v39  ;;  %v12222_v21 = vld [vmem:[#allocation152_spill] sm:$0xff]  ;;  %v12228_v61 = vld [vmem:[#allocation129_spill] sm:$0xff]  ;;  %v12230_v28 = vld [vmem:[#allocation143_spill] sm:$0xff] }
 0x464   :  { %v2843_v41 = vmul.f32 %v2527_v56, %v1895_v3  ;;  %v10997_v10 = vadd.f32 %v12219_v58, %v6377_v11  ;;  %v11001_v42 = vadd.f32 %v12220_v7, %v6380_v12  ;;  %v2845_v6 = vmul.f32 %v2529_v15, %v1897_v26  ;;  %v4715_v36 = vpop.f32.mrf.mxu0  ;;  %v12223_v12 = vld [vmem:[#allocation72_spill] sm:$0xff]  ;;  %v12224_v56 = vld [vmem:[#allocation145_spill] sm:$0xff] }
 0x465   :  { %4834 = vmatmul.mubr.bf16.gmra.mxu0 %v4246_v54  ;;  %v2215_v18 = vmul.f32 0.044715, %v1583_v51  ;;  %v3763_v22 = vadd.f32 1.0, %v12221_v40  ;;  %v3765_v43 = vadd.f32 1.0, %v12222_v21  ;;  %6104 = vtanh.f32 %v2839_v0  ;;  %v12227_v14 = vld [vmem:[#allocation44_spill] sm:$0xff]  ;;  %v12229_v1 = vld [vmem:[#allocation205_spill] sm:$0xff] }
 0x466   :  { %5186 = vmatmul.mubr.bf16.gmra.mxu1 %v4248_v38  ;;  %4841 = vmatprep.mubr.bf16.mxu0 %v4251_v44  ;;  %v2842_v33 = vmul.f32 %v2526_v63, %v1894_v37  ;;  %v1896_v17 = vmul.f32 0.7978846, %v10878_v5  ;;  %v2217_v11 = vmul.f32 0.044715, %v1585_v13  ;;  %6106 = vtanh.f32 %v2841_v62  ;;  %v4717_v63 = vpop.f32.mrf.mxu0  ;;  %v12226_v62 = vld [vmem:[#allocation211_spill] sm:$0xff] }
 0x467   :  { %5193 = vmatprep.mubr.bf16.mxu1 %v4253_v47  ;;  %v2528_v57 = vadd.f32 1.0, %v2212_v30  ;;  %v4083_v3 = vmul.f32 %v3767_v29, %v12223_v12  ;;  %v4085_v48 = vmul.f32 %v3769_v16, %v12224_v56  ;;  %6108 = vtanh.f32 %v2843_v41  ;;  %v12231_v29 = vld [vmem:[#allocation19_spill] sm:$0xff]  ;;  %v12237_v63 = vld [vmem:[#allocation153_spill] sm:$0xff] }
 0x468   :  { %v1582_v15 = vmul.f32 %v10997_v10, %v10997_v10  ;;  %v1584_v51 = vmul.f32 %v11001_v42, %v11001_v42  ;;  %v4716_v0 = vadd.f32 %v10562_v24, %v4715_v36  ;;  %6110 = vtanh.f32 %v2845_v6  ;;  %v4718_v44 = vpop.f32.mrf.mxu0  ;;  %v12232_v16 = vld [vmem:[#allocation35_spill] sm:$0xff]  ;;  %v12234_v36 = vld [vmem:[#allocation177_spill] sm:$0xff] }
 0x469   :  { %v2531_v49 = vadd.f32 1.0, %v2215_v18  ;;  %v4079_v55 = vmul.f32 %v3763_v22, %v12225_v50  ;;  %v4081_v30 = vmul.f32 %v3765_v43, %v12226_v62  ;;  %v1899_v26 = vmul.f32 0.7978846, %v10963_v4  ;;  %v5067_v41 = vpop.f32.mrf.mxu1  ;;  %v12233_v43 = vld [vmem:[#allocation94_spill] sm:$0xff] }
 0x46a   :  { %v2533_v13 = vadd.f32 1.0, %v2217_v11  ;;  %v4250_v54 = vpack.c.bf16 %v12228_v61, %v12227_v14  ;;  %v4252_v38 = vpack.c.bf16 %v12230_v28, %v12229_v1  ;;  %v3775_v53 = vadd.f32 1.0, %v12231_v29  ;;  %v4720_v40 = vpop.f32.mrf.mxu0  ;;  %v12241_v1 = vld [vmem:[#allocation140_spill] sm:$0xff] }
 0x46b   :  { %v4255_v47 = vpack.c.bf16 %v4083_v3, %v4079_v55  ;;  %v4257_v60 = vpack.c.bf16 %v4085_v48, %v4081_v30  ;;  %v3777_v37 = vadd.f32 1.0, %v12232_v16  ;;  %v2844_v58 = vmul.f32 %v2528_v57, %v1896_v17  ;;  %v5069_v3 = vpop.f32.mrf.mxu1  ;;  %v12235_v48 = vld [vmem:[#allocation180_spill] sm:$0xff] }
 0x46c   :  { %v1901_v7 = vmul.f32 0.7978846, %v10974_v45  ;;  %v5068_v6 = vadd.f32 %v5067_v41, %v4716_v0  ;;  %v4719_v18 = vadd.f32 %v10562_v24, %v4718_v44  ;;  %v2214_v22 = vmul.f32 0.044715, %v1582_v15  ;;  %v12236_v24 = vld [vmem:[#allocation18_spill] sm:$0xff]  ;;  %v12243_v44 = vld [vmem:[#allocation63_spill] sm:$0xff] }
 0x46d   :  { %4842 = vmatmul.mubr.bf16.gmra.mxu0 %v4250_v54  ;;  %v2847_v21 = vmul.f32 %v2531_v49, %v1899_v26  ;;  %v3771_v11 = vadd.f32 1.0, %v12233_v43  ;;  %v3773_v12 = vadd.f32 1.0, %v12234_v36  ;;  %6112 = vtanh.f32 %v10870_v34  ;;  %v5070_v50 = vpop.f32.mrf.mxu1  ;;  %v12238_v26 = vld [vmem:[#allocation122_spill] sm:$0xff]  ;;  %v12246_v36 = vld [vmem:[#allocation31_spill] sm:$0xff] }
 0x46e   :  { %5194 = vmatmul.mubr.bf16.gmra.mxu1 %v4252_v38  ;;  %4849 = vmatprep.mubr.bf16.mxu0 %v4255_v47  ;;  %v1892_v17 = vmul.f32 0.7978846, %v10794_v9  ;;  %v2216_v57 = vmul.f32 0.044715, %v1584_v51  ;;  %v2849_v56 = vmul.f32 %v2533_v13, %v1901_v7  ;;  %5277 = vst [vmem:[#allocation10 + $0x120] sm:$0xff] %v5068_v6  ;;  %v3776_v0 = vadd.f32 1.0, %v12235_v48 }
 0x46f   :  { %5201 = vmatprep.mubr.bf16.mxu1 %v4257_v60  ;;  %6114 = vtanh.f32 %v2842_v33  ;;  %v4091_v15 = vmul.f32 %v3775_v53, %v12236_v24  ;;  %v4093_v49 = vmul.f32 %v3777_v37, %v12237_v63  ;;  %v1898_v62 = vmul.f32 0.7978846, %v10997_v10  ;;  %v12239_v13 = vld [vmem:[#allocation142_spill] sm:$0xff]  ;;  %v5072_v61 = vpop.f32.mrf.mxu1  ;;  %v12240_v33 = vld [vmem:[#allocation15_spill] sm:$0xff]  ;;  %v12242_v38 = vld [vmem:[#allocation60_spill] sm:$0xff] }
 0x470   :  { %v2840_v55 = vmul.f32 %v10968_v8, %v1892_v17  ;;  %6116 = vtanh.f32 %v2844_v58  ;;  %v5071_v30 = vadd.f32 %v5070_v50, %v4719_v18  ;;  %v2530_v34 = vadd.f32 1.0, %v2214_v22  ;;  %v12244_v41 = vld [vmem:[#allocation150_spill] sm:$0xff]  ;;  %v12248_v3 = vld [vmem:[#allocation135_spill] sm:$0xff]  ;;  %v12252_v50 = vld [vmem:[#allocation160_spill] sm:$0xff] }
 0x471   :  { %6118 = vtanh.f32 %v2847_v21  ;;  %v4087_v51 = vmul.f32 %v3771_v11, %v12238_v26  ;;  %v4089_v14 = vmul.f32 %v3773_v12, %v12239_v13  ;;  %v2532_v54 = vadd.f32 1.0, %v2216_v57  ;;  %v12245_v43 = vld [vmem:[#allocation206_spill] sm:$0xff]  ;;  %v12250_v24 = vld [vmem:[#allocation167_spill] sm:$0xff] }
 0x472   :  { %6120 = vtanh.f32 %v2849_v56  ;;  %v4254_v28 = vpack.c.bf16 %v12241_v1, %v12240_v33  ;;  %v4256_v47 = vpack.c.bf16 %v12243_v44, %v12242_v38  ;;  %5278 = vst [vmem:[#allocation10 + $0x128] sm:$0xff] %v5071_v30  ;;  %v6105_v8 = vpop.eup %6104  ;;  %v3783_v53 = vadd.f32 1.0, %v10913_v23  ;;  %v12249_v56 = vld [vmem:[#allocation146_spill] sm:$0xff]  ;;  %v12253_v1 = vld [vmem:[#allocation99_spill] sm:$0xff]  ;;  %v12254_v38 = vld [vmem:[#allocation16_spill] sm:$0xff] }
 0x473   :  { %v4259_v60 = vpack.c.bf16 %v4091_v15, %v4087_v51  ;;  %v4261_v29 = vpack.c.bf16 %v4093_v49, %v4089_v14  ;;  %v3785_v16 = vadd.f32 1.0, %v10955_v31  ;;  %v6107_v37 = vpop.eup %6106  ;;  %v3772_v58 = vadd.f32 1.0, %v12244_v41  ;;  %v12251_v49 = vld [vmem:[#allocation137_spill] sm:$0xff] }
 0x474   :  { %v3151_v7 = vmul.f32 0.5, %v10711_v59  ;;  %6122 = vtanh.f32 %v2840_v55  ;;  %v1900_v6 = vmul.f32 0.7978846, %v11001_v42  ;;  %v6109_v18 = vpop.eup %6108  ;;  %v3153_v40 = vmul.f32 0.5, %v10735_v25  ;;  %v12247_v59 = vld [vmem:[#allocation23_spill] sm:$0xff] }
 0x475   :  { %4850 = vmatmul.mubr.bf16.gmra.mxu0 %v4254_v28  ;;  %v2846_v22 = vmul.f32 %v2530_v34, %v1898_v62  ;;  %v3779_v23 = vadd.f32 1.0, %v10840_v52  ;;  %v3781_v31 = vadd.f32 1.0, %v10860_v35  ;;  %v6111_v21 = vpop.eup %6110  ;;  %v3140_v11 = vmul.f32 0.5, %v12245_v43 }
 0x476   :  { %5202 = vmatmul.mubr.bf16.gmra.mxu1 %v4256_v47  ;;  %4857 = vmatprep.mubr.bf16.mxu0 %v4259_v60  ;;  %v4090_v12 = vmul.f32 %v12247_v59, %v12246_v36  ;;  %v4092_v17 = vmul.f32 %v3776_v0, %v12248_v3  ;;  %v2848_v57 = vmul.f32 %v2532_v54, %v1900_v6  ;;  %v3147_v48 = vmul.f32 0.5, %v12249_v56  ;;  %v12255_v47 = vld [vmem:[#allocation155_spill] sm:$0xff]  ;;  %v12256_v60 = vld [vmem:[#allocation33_spill] sm:$0xff] }
 0x477   :  { %5209 = vmatprep.mubr.bf16.mxu1 %v4261_v29  ;;  %v3149_v25 = vmul.f32 0.5, %v12250_v24  ;;  %v4099_v15 = vmul.f32 %v3783_v53, %v3151_v7  ;;  %v4101_v63 = vmul.f32 %v3785_v16, %v3153_v40  ;;  %v4086_v52 = vmul.f32 %v12252_v50, %v12251_v49  ;;  %v12257_v6 = vld [vmem:[#allocation133_spill] sm:$0xff]  ;;  %v12258_v40 = vld [vmem:[#allocation96_spill] sm:$0xff] }
 0x478   :  { %v4088_v55 = vmul.f32 %v3772_v58, %v3140_v11  ;;  %v3782_v35 = vadd.f32 1.0, %v10895_v27  ;;  %6124 = vtanh.f32 %v2846_v22  ;;  %v4095_v62 = vmul.f32 %v3779_v23, %v3147_v48 }
 0x479   :  { %v4097_v30 = vmul.f32 %v3781_v31, %v3149_v25  ;;  %v3784_v34 = vadd.f32 1.0, %v10906_v2  ;;  %6126 = vtanh.f32 %v2848_v57  ;;  %v4258_v0 = vpack.c.bf16 %v4090_v12, %v4086_v52 }
 0x47a   :  { %v4260_v26 = vpack.c.bf16 %v4092_v17, %v4088_v55  ;;  %v6113_v51 = vpop.eup %6112  ;;  %v4263_v13 = vpack.c.bf16 %v4099_v15, %v4095_v62  ;;  %v3791_v61 = vadd.f32 1.0, %v6109_v18  ;;  %v3793_v54 = vadd.f32 1.0, %v6111_v21 }
 0x47b   :  { %v4265_v14 = vpack.c.bf16 %v4101_v63, %v4097_v30  ;;  %v3778_v28 = vadd.f32 1.0, %v12253_v1  ;;  %v3780_v44 = vadd.f32 1.0, %v12254_v38  ;;  %v3150_v27 = vmul.f32 0.5, %v12255_v47 }
 0x47c   :  { %v6115_v33 = vpop.eup %6114  ;;  %v3152_v29 = vmul.f32 0.5, %v12256_v60  ;;  %v3159_v53 = vmul.f32 0.5, %v10886_v46  ;;  %v3161_v16 = vmul.f32 0.5, %v10910_v19  ;;  %v3787_v41 = vadd.f32 1.0, %v6105_v8 }
 0x47d   :  { %4858 = vmatmul.mubr.bf16.gmra.mxu0 %v4258_v0  ;;  %v6117_v2 = vpop.eup %6116  ;;  %v3789_v58 = vadd.f32 1.0, %v6107_v37  ;;  %v3146_v18 = vmul.f32 0.5, %v12257_v6  ;;  %v3148_v22 = vmul.f32 0.5, %v12258_v40  ;;  %v4098_v23 = vmul.f32 %v3782_v35, %v3150_v27 }
 0x47e   :  { %5210 = vmatmul.mubr.bf16.gmra.mxu1 %v4260_v26  ;;  %4865 = vmatprep.mubr.bf16.mxu0 %v4263_v13  ;;  %v6119_v7 = vpop.eup %6118  ;;  %v4100_v31 = vmul.f32 %v3784_v34, %v3152_v29  ;;  %v3155_v43 = vmul.f32 0.5, %v10834_v20  ;;  %v3157_v11 = vmul.f32 0.5, %v10844_v32  ;;  %v4107_v36 = vmul.f32 %v3791_v61, %v3159_v53  ;;  %v11071_v20 = vld [vmem:[%s11131_s4] ss:$0 sm:$0xff]  ;;  %v12259_v34 = vld [vmem:[#allocation181_spill] sm:$0xff]  ;;  %s6248_s4 = smov [#allocation10]  }
 0x47f   :  { %5217 = vmatprep.mubr.bf16.mxu1 %v4265_v14  ;;  %v6121_v21 = vpop.eup %6120  ;;  %v4109_v46 = vmul.f32 %v3793_v54, %v3161_v16  ;;  %v4094_v59 = vmul.f32 %v3778_v28, %v3146_v18  ;;  %v4096_v19 = vmul.f32 %v3780_v44, %v3148_v22  ;;  %v3158_v8 = vmul.f32 0.5, %v10848_v39  ;;  %v4723_v57 = vpop.f32.mrf.mxu0  ;;  %s5325_s19 = sshll.u32 %s6248_s4, 4  ;;  %s5326_s19 = int_to_ptr.vmem [resolvable:$true] %s5325_s19 }
 0x480   :  { %v3790_v37 = vadd.f32 1.0, %v6115_v33  ;;  %v4103_v3 = vmul.f32 %v3787_v41, %v3155_v43  ;;  %v4105_v17 = vmul.f32 %v3789_v58, %v3157_v11  ;;  %v5075_v56 = vpop.f32.mrf.mxu1  ;;  %v3792_v48 = vadd.f32 1.0, %v6117_v2  ;;  %s6209_s20 = scalar_lea.vmem %s5326_s19, 10112  ;;  %p6214_p7 = scmp.lt.s32.totalorder %s5326_s19, %s5326_s19 }
 0x481   :  { %v6123_v12 = vpop.eup %6122  ;;  %v4262_v24 = vpack.c.bf16 %v4098_v23, %v4094_v59  ;;  %v4264_v25 = vpack.c.bf16 %v4100_v31, %v4096_v19  ;;  %v4724_v32 = vadd.f32 %v11071_v20, %v4723_v57  ;;  %v3795_v49 = vadd.f32 1.0, %v6119_v7  ;;  %v4725_v39 = vpop.f32.mrf.mxu0  ;;  %p6210_p6 = scmp.ne.s32.totalorder %s5326_s19, %s6209_s20  ;;  %p6215_p8 = scmp.lt.s32.totalorder %s6209_s20, %s6209_s20 }
 0x482   :  { %v4267_v15 = vpack.c.bf16 %v4107_v36, %v4103_v3  ;;  %v4269_v63 = vpack.c.bf16 %v4109_v46, %v4105_v17  ;;  %v3797_v50 = vadd.f32 1.0, %v6121_v21  ;;  %v5077_v52 = vpop.f32.mrf.mxu1  ;;  %v3786_v55 = vadd.f32 1.0, %v6113_v51 }
 0x483   :  { %v3788_v35 = vadd.f32 1.0, %v6123_v12  ;;  %v3160_v62 = vmul.f32 0.5, %v10878_v5  ;;  %v5076_v30 = vadd.f32 %v5075_v56, %v4724_v32  ;;  %v3154_v0 = vmul.f32 0.5, %v12259_v34  ;;  %v4726_v14 = vpop.f32.mrf.mxu0  ;;  %p6216_p9 = por %p6215_p8, %p6214_p7 }
 0x484   :  { %v3163_v26 = vmul.f32 0.5, %v10963_v4  ;;  %v3165_v13 = vmul.f32 0.5, %v10974_v45  ;;  %v5078_v61 = vpop.f32.mrf.mxu1  ;;  %v3156_v33 = vmul.f32 0.5, %v10794_v9  ;;  %v4106_v51 = vmul.f32 %v3790_v37, %v3158_v8 }
 0x485   :  { %4866 = vmatmul.mubr.bf16.gmra.mxu0 %v4262_v24  ;;  %v6125_v54 = vpop.eup %6124  ;;  %v4108_v1 = vmul.f32 %v3792_v48, %v3160_v62  ;;  %5279 = vst [vmem:[#allocation10 + $0x130] sm:$0xff] %v5076_v30  ;;  %v4727_v5 = vadd.f32 %v11071_v20, %v4726_v14  ;;  %v4728_v47 = vpop.f32.mrf.mxu0  ;;  %v4102_v4 = vmul.f32 %v3786_v55, %v3154_v0  ;;  %v3162_v58 = vmul.f32 0.5, %v10997_v10  ;;  %p6217_p10 = pnand %p6216_p9, %p6210_p6 }
 0x486   :  { %5218 = vmatmul.mubr.bf16.gmra.mxu1 %v4264_v25  ;;  %4873 = vmatprep.mubr.bf16.mxu0 %v4267_v15  ;;  %v6127_v28 = vpop.eup %6126  ;;  %v4111_v38 = vmul.f32 %v3795_v49, %v3163_v26  ;;  %v4113_v44 = vmul.f32 %v3797_v50, %v3165_v13  ;;  %v5080_v27 = vpop.f32.mrf.mxu1  ;;  %v4104_v60 = vmul.f32 %v3788_v35, %v3156_v33  ;;  %v3794_v29 = vadd.f32 1.0, %v6125_v54 }
 0x487   :  { %5225 = vmatprep.mubr.bf16.mxu1 %v4269_v63  ;;  %v5079_v45 = vadd.f32 %v5078_v61, %v4727_v5  ;;  %v3796_v2 = vadd.f32 1.0, %v6127_v28  ;;  %v4266_v53 = vpack.c.bf16 %v4106_v51, %v4102_v4  ;;  %v3164_v7 = vmul.f32 0.5, %v11001_v42 }
 0x488   :  { %v4268_v16 = vpack.c.bf16 %v4108_v1, %v4104_v60  ;;  %v4271_v41 = vpack.c.bf16 %v4111_v38, %v4111_v38  ;;  %v4273_v9 = vpack.c.bf16 %v4113_v44, %v4113_v44  ;;  %v4110_v6 = vmul.f32 %v3794_v29, %v3162_v58 }
 0x489   :  { %5280 = vst [vmem:[#allocation10 + $0x138] sm:$0xff] %v5079_v45  ;;  %v4112_v18 = vmul.f32 %v3796_v2, %v3164_v7 }
 0x48a   :  { %v4270_v40 = vpack.c.bf16 %v4110_v6, %v4110_v6 }
 0x48b   :  { %v4272_v22 = vpack.c.bf16 %v4112_v18, %v4112_v18 }
 0x48d   :  { %4874 = vmatmul.mubr.bf16.gmra.mxu0 %v4266_v53 }
 0x48e   :  { %5226 = vmatmul.mubr.bf16.gmra.mxu1 %v4268_v16  ;;  %4881 = vmatprep.mubr.bf16.mxu0 %v4271_v41 }
 0x48f   :  { %5233 = vmatprep.mubr.bf16.mxu1 %v4273_v9 }
 0x492   :  { %v4731_v23 = vpop.f32.mrf.mxu0 }
 0x493   :  { %v4732_v31 = vadd.f32 %v11071_v20, %v4731_v23 }
 0x494   :  { %v5083_v21 = vpop.f32.mrf.mxu1  ;;  %v4733_v43 = vpop.f32.mrf.mxu0 }
 0x495   :  { %4882 = vmatmul.mubr.bf16.gmra.mxu0 %v4270_v40  ;;  %v5084_v11 = vadd.f32 %v5083_v21, %v4732_v31 }
 0x496   :  { %5234 = vmatmul.mubr.bf16.gmra.mxu1 %v4272_v22  ;;  %v5085_v36 = vpop.f32.mrf.mxu1  ;;  %v4734_v10 = vpop.f32.mrf.mxu0 }
 0x497   :  { %5281 = vst [vmem:[#allocation10 + $0x140] sm:$0xff] %v5084_v11  ;;  %v4735_v42 = vadd.f32 %v11071_v20, %v4734_v10 }
 0x498   :  { %v5086_v46 = vpop.f32.mrf.mxu1  ;;  %v4736_v59 = vpop.f32.mrf.mxu0 }
 0x499   :  { %v5087_v19 = vadd.f32 %v5086_v46, %v4735_v42 }
 0x49a   :  { %v5088_v12 = vpop.f32.mrf.mxu1 }
 0x49b   :  { %5282 = vst [vmem:[#allocation10 + $0x148] sm:$0xff] %v5087_v19 }
 0x4a8   :  { %v4739_v8 = vpop.f32.mrf.mxu0  ;;  %v5091_v37 = vpop.f32.mrf.mxu1 }
 0x4a9   :  { %v4740_v3 = vadd.f32 %v11071_v20, %v4739_v8 }
 0x4aa   :  { %v4741_v17 = vpop.f32.mrf.mxu0  ;;  %v5093_v57 = vpop.f32.mrf.mxu1 }
 0x4ab   :  { %v5092_v56 = vadd.f32 %v5091_v37, %v4740_v3 }
 0x4ac   :  { %v4742_v48 = vpop.f32.mrf.mxu0  ;;  %v5094_v24 = vpop.f32.mrf.mxu1 }
 0x4ad   :  { %5283 = vst [vmem:[#allocation10 + $0x150] sm:$0xff] %v5092_v56  ;;  %v4743_v25 = vadd.f32 %v11071_v20, %v4742_v48 }
 0x4ae   :  { %v4744_v32 = vpop.f32.mrf.mxu0  ;;  %v5096_v15 = vpop.f32.mrf.mxu1 }
 0x4af   :  { %v5095_v63 = vadd.f32 %v5094_v24, %v4743_v25 }
 0x4b1   :  { %5284 = vst [vmem:[#allocation10 + $0x158] sm:$0xff] %v5095_v63 }
 0x4bd   :  { %v4747_v49 = vpop.f32.mrf.mxu0 }
 0x4be   :  { %v5099_v50 = vpop.f32.mrf.mxu1  ;;  %v4748_v39 = vadd.f32 %v11071_v20, %v4747_v49 }
 0x4bf   :  { %v4749_v52 = vpop.f32.mrf.mxu0 }
 0x4c0   :  { %v5101_v55 = vpop.f32.mrf.mxu1  ;;  %v5100_v35 = vadd.f32 %v5099_v50, %v4748_v39 }
 0x4c1   :  { %v4750_v62 = vpop.f32.mrf.mxu0 }
 0x4c2   :  { %v5102_v30 = vpop.f32.mrf.mxu1  ;;  %5285 = vst [vmem:[#allocation10 + $0x160] sm:$0xff] %v5100_v35  ;;  %v4751_v34 = vadd.f32 %v11071_v20, %v4750_v62 }
 0x4c3   :  { %v4752_v0 = vpop.f32.mrf.mxu0 }
 0x4c4   :  { %v5104_v26 = vpop.f32.mrf.mxu1  ;;  %v5103_v13 = vadd.f32 %v5102_v30, %v4751_v34 }
 0x4c6   :  { %5286 = vst [vmem:[#allocation10 + $0x168] sm:$0xff] %v5103_v13 }
 0x4ce   :  { %v4755_v14 = vpop.f32.mrf.mxu0 }
 0x4cf   :  { %v4756_v61 = vadd.f32 %v11071_v20, %v4755_v14 }
 0x4d0   :  { %v4757_v54 = vpop.f32.mrf.mxu0 }
 0x4d2   :  { %v4758_v33 = vpop.f32.mrf.mxu0 }
 0x4d3   :  { %v5107_v51 = vpop.f32.mrf.mxu1  ;;  %v4759_v5 = vadd.f32 %v11071_v20, %v4758_v33 }
 0x4d4   :  { %v5108_v1 = vadd.f32 %v5107_v51, %v4756_v61  ;;  %v4760_v28 = vpop.f32.mrf.mxu0 }
 0x4d5   :  { %v5109_v38 = vpop.f32.mrf.mxu1 }
 0x4d6   :  { %5287 = vst [vmem:[#allocation10 + $0x170] sm:$0xff] %v5108_v1 }
 0x4d7   :  { %v5110_v44 = vpop.f32.mrf.mxu1 }
 0x4d8   :  { %v5111_v47 = vadd.f32 %v5110_v44, %v4759_v5 }
 0x4d9   :  { %v5112_v27 = vpop.f32.mrf.mxu1 }
 0x4da   :  { %5288 = vst [vmem:[#allocation10 + $0x178] sm:$0xff] %v5111_v47  ;;  %v4763_v4 = vpop.f32.mrf.mxu0 }
 0x4db   :  { %v5115_v60 = vpop.f32.mrf.mxu1  ;;  %v4764_v45 = vadd.f32 %v11071_v20, %v4763_v4 }
 0x4dc   :  { %v4765_v29 = vpop.f32.mrf.mxu0 }
 0x4dd   :  { %v5117_v2 = vpop.f32.mrf.mxu1  ;;  %v5116_v53 = vadd.f32 %v5115_v60, %v4764_v45 }
 0x4de   :  { %v4766_v16 = vpop.f32.mrf.mxu0 }
 0x4df   :  { %v5118_v41 = vpop.f32.mrf.mxu1  ;;  %5289 = vst [vmem:[#allocation10 + $0x180] sm:$0xff] %v5116_v53  ;;  %v4767_v9 = vadd.f32 %v11071_v20, %v4766_v16 }
 0x4e0   :  { %v4768_v58 = vpop.f32.mrf.mxu0 }
 0x4e1   :  { %v5120_v7 = vpop.f32.mrf.mxu1  ;;  %v5119_v6 = vadd.f32 %v5118_v41, %v4767_v9 }
 0x4e2   :  { %v4771_v18 = vpop.f32.mrf.mxu0 }
 0x4e3   :  { %v5123_v40 = vpop.f32.mrf.mxu1  ;;  %5290 = vst [vmem:[#allocation10 + $0x188] sm:$0xff] %v5119_v6  ;;  %v4772_v22 = vadd.f32 %v11071_v20, %v4771_v18 }
 0x4e4   :  { %v4773_v23 = vpop.f32.mrf.mxu0 }
 0x4e5   :  { %v5125_v31 = vpop.f32.mrf.mxu1  ;;  %v5124_v21 = vadd.f32 %v5123_v40, %v4772_v22 }
 0x4e6   :  { %v4774_v43 = vpop.f32.mrf.mxu0 }
 0x4e7   :  { %v5126_v11 = vpop.f32.mrf.mxu1  ;;  %5291 = vst [vmem:[#allocation10 + $0x190] sm:$0xff] %v5124_v21  ;;  %v4775_v36 = vadd.f32 %v11071_v20, %v4774_v43 }
 0x4e8   :  { %v4776_v10 = vpop.f32.mrf.mxu0 }
 0x4e9   :  { %v5128_v42 = vpop.f32.mrf.mxu1  ;;  %v5127_v46 = vadd.f32 %v5126_v11, %v4775_v36 }
 0x4eb   :  { %v4779_v59 = vpop.f32.mrf.mxu0  ;;  %v5131_v19 = vpop.f32.mrf.mxu1  ;;  %5292 = vst [vmem:[#allocation10 + $0x198] sm:$0xff] %v5127_v46 }
 0x4ec   :  { %v4780_v12 = vadd.f32 %v11071_v20, %v4779_v59 }
 0x4ed   :  { %v4781_v8 = vpop.f32.mrf.mxu0  ;;  %v5133_v37 = vpop.f32.mrf.mxu1 }
 0x4ee   :  { %v5132_v3 = vadd.f32 %v5131_v19, %v4780_v12 }
 0x4ef   :  { %v4782_v17 = vpop.f32.mrf.mxu0  ;;  %v5134_v57 = vpop.f32.mrf.mxu1 }
 0x4f0   :  { %5293 = vst [vmem:[#allocation10 + $0x1a0] sm:$0xff] %v5132_v3  ;;  %v4783_v56 = vadd.f32 %v11071_v20, %v4782_v17 }
 0x4f1   :  { %v4784_v48 = vpop.f32.mrf.mxu0  ;;  %v5136_v24 = vpop.f32.mrf.mxu1 }
 0x4f2   :  { %v5135_v25 = vadd.f32 %v5134_v57, %v4783_v56 }
 0x4f3   :  { %v4787_v32 = vpop.f32.mrf.mxu0 }
 0x4f4   :  { %v5139_v15 = vpop.f32.mrf.mxu1  ;;  %5294 = vst [vmem:[#allocation10 + $0x1a8] sm:$0xff] %v5135_v25  ;;  %v4788_v63 = vadd.f32 %v11071_v20, %v4787_v32 }
 0x4f5   :  { %v4789_v49 = vpop.f32.mrf.mxu0 }
 0x4f6   :  { %v5141_v50 = vpop.f32.mrf.mxu1  ;;  %v5140_v39 = vadd.f32 %v5139_v15, %v4788_v63 }
 0x4f7   :  { %v4790_v52 = vpop.f32.mrf.mxu0 }
 0x4f8   :  { %v5142_v55 = vpop.f32.mrf.mxu1  ;;  %5295 = vst [vmem:[#allocation10 + $0x1b0] sm:$0xff] %v5140_v39  ;;  %v4791_v35 = vadd.f32 %v11071_v20, %v4790_v52 }
 0x4f9   :  { %v4792_v62 = vpop.f32.mrf.mxu0 }
 0x4fa   :  { %v5144_v30 = vpop.f32.mrf.mxu1  ;;  %v5143_v34 = vadd.f32 %v5142_v55, %v4791_v35 }
 0x4fc   :  { %v4795_v0 = vpop.f32.mrf.mxu0  ;;  %v5147_v26 = vpop.f32.mrf.mxu1  ;;  %5296 = vst [vmem:[#allocation10 + $0x1b8] sm:$0xff] %v5143_v34 }
 0x4fd   :  { %v4796_v13 = vadd.f32 %v11071_v20, %v4795_v0 }
 0x4fe   :  { %v4797_v14 = vpop.f32.mrf.mxu0  ;;  %v5149_v61 = vpop.f32.mrf.mxu1 }
 0x4ff   :  { %v5148_v54 = vadd.f32 %v5147_v26, %v4796_v13 }
 0x500   :  { %v4798_v33 = vpop.f32.mrf.mxu0  ;;  %v5150_v51 = vpop.f32.mrf.mxu1 }
 0x501   :  { %5297 = vst [vmem:[#allocation10 + $0x1c0] sm:$0xff] %v5148_v54  ;;  %v4799_v1 = vadd.f32 %v11071_v20, %v4798_v33 }
 0x502   :  { %v4800_v5 = vpop.f32.mrf.mxu0  ;;  %v5152_v28 = vpop.f32.mrf.mxu1 }
 0x503   :  { %v5151_v38 = vadd.f32 %v5150_v51, %v4799_v1 }
 0x504   :  { %v5155_v47 = vpop.f32.mrf.mxu1 }
 0x505   :  { %v4803_v44 = vpop.f32.mrf.mxu0  ;;  %5298 = vst [vmem:[#allocation10 + $0x1c8] sm:$0xff] %v5151_v38 }
 0x506   :  { %v4804_v27 = vadd.f32 %v11071_v20, %v4803_v44  ;;  %v5157_v60 = vpop.f32.mrf.mxu1 }
 0x507   :  { %v4805_v4 = vpop.f32.mrf.mxu0 }
 0x508   :  { %v5156_v45 = vadd.f32 %v5155_v47, %v4804_v27  ;;  %v5158_v2 = vpop.f32.mrf.mxu1 }
 0x509   :  { %v4806_v29 = vpop.f32.mrf.mxu0 }
 0x50a   :  { %5299 = vst [vmem:[#allocation10 + $0x1d0] sm:$0xff] %v5156_v45  ;;  %v4807_v53 = vadd.f32 %v11071_v20, %v4806_v29  ;;  %v5160_v41 = vpop.f32.mrf.mxu1 }
 0x50b   :  { %v4808_v16 = vpop.f32.mrf.mxu0 }
 0x50c   :  { %v5159_v9 = vadd.f32 %v5158_v2, %v4807_v53 }
 0x50d   :  { %v4811_v58 = vpop.f32.mrf.mxu0 }
 0x50e   :  { %v5163_v7 = vpop.f32.mrf.mxu1  ;;  %5300 = vst [vmem:[#allocation10 + $0x1d8] sm:$0xff] %v5159_v9  ;;  %v4812_v6 = vadd.f32 %v11071_v20, %v4811_v58 }
 0x50f   :  { %v4813_v18 = vpop.f32.mrf.mxu0 }
 0x510   :  { %v5165_v40 = vpop.f32.mrf.mxu1  ;;  %v5164_v22 = vadd.f32 %v5163_v7, %v4812_v6 }
 0x511   :  { %v4814_v23 = vpop.f32.mrf.mxu0 }
 0x512   :  { %v5166_v31 = vpop.f32.mrf.mxu1  ;;  %5301 = vst [vmem:[#allocation10 + $0x1e0] sm:$0xff] %v5164_v22  ;;  %v4815_v21 = vadd.f32 %v11071_v20, %v4814_v23 }
 0x513   :  { %v4816_v43 = vpop.f32.mrf.mxu0 }
 0x514   :  { %v5168_v11 = vpop.f32.mrf.mxu1  ;;  %v5167_v36 = vadd.f32 %v5166_v31, %v4815_v21 }
 0x515   :  { %v4819_v10 = vpop.f32.mrf.mxu0 }
 0x516   :  { %v5171_v42 = vpop.f32.mrf.mxu1  ;;  %5302 = vst [vmem:[#allocation10 + $0x1e8] sm:$0xff] %v5167_v36  ;;  %v4820_v46 = vadd.f32 %v11071_v20, %v4819_v10 }
 0x517   :  { %v4821_v59 = vpop.f32.mrf.mxu0 }
 0x518   :  { %v5173_v19 = vpop.f32.mrf.mxu1  ;;  %v5172_v12 = vadd.f32 %v5171_v42, %v4820_v46 }
 0x519   :  { %v4822_v8 = vpop.f32.mrf.mxu0 }
 0x51a   :  { %v5174_v37 = vpop.f32.mrf.mxu1  ;;  %5303 = vst [vmem:[#allocation10 + $0x1f0] sm:$0xff] %v5172_v12  ;;  %v4823_v3 = vadd.f32 %v11071_v20, %v4822_v8 }
 0x51b   :  { %v4824_v17 = vpop.f32.mrf.mxu0 }
 0x51c   :  { %v5176_v57 = vpop.f32.mrf.mxu1  ;;  %v5175_v56 = vadd.f32 %v5174_v37, %v4823_v3 }
 0x51d   :  { %v4827_v48 = vpop.f32.mrf.mxu0 }
 0x51e   :  { %v5179_v24 = vpop.f32.mrf.mxu1  ;;  %5304 = vst [vmem:[#allocation10 + $0x1f8] sm:$0xff] %v5175_v56  ;;  %v4828_v25 = vadd.f32 %v11071_v20, %v4827_v48 }
 0x51f   :  { %v4829_v32 = vpop.f32.mrf.mxu0 }
 0x520   :  { %v5181_v15 = vpop.f32.mrf.mxu1  ;;  %v5180_v63 = vadd.f32 %v5179_v24, %v4828_v25 }
 0x521   :  { %v4830_v49 = vpop.f32.mrf.mxu0 }
 0x522   :  { %v5182_v50 = vpop.f32.mrf.mxu1  ;;  %5305 = vst [vmem:[#allocation10 + $0x200] sm:$0xff] %v5180_v63  ;;  %v4831_v39 = vadd.f32 %v11071_v20, %v4830_v49 }
 0x523   :  { %v4832_v52 = vpop.f32.mrf.mxu0 }
 0x524   :  { %v5184_v55 = vpop.f32.mrf.mxu1  ;;  %v5183_v35 = vadd.f32 %v5182_v50, %v4831_v39 }
 0x525   :  { %v4835_v62 = vpop.f32.mrf.mxu0 }
 0x526   :  { %v5187_v30 = vpop.f32.mrf.mxu1  ;;  %5306 = vst [vmem:[#allocation10 + $0x208] sm:$0xff] %v5183_v35  ;;  %v4836_v34 = vadd.f32 %v11071_v20, %v4835_v62 }
 0x527   :  { %v4837_v0 = vpop.f32.mrf.mxu0 }
 0x528   :  { %v5189_v26 = vpop.f32.mrf.mxu1  ;;  %v5188_v13 = vadd.f32 %v5187_v30, %v4836_v34 }
 0x529   :  { %v4838_v14 = vpop.f32.mrf.mxu0 }
 0x52a   :  { %v5190_v61 = vpop.f32.mrf.mxu1  ;;  %5307 = vst [vmem:[#allocation10 + $0x210] sm:$0xff] %v5188_v13  ;;  %v4839_v54 = vadd.f32 %v11071_v20, %v4838_v14 }
 0x52b   :  { %v4840_v33 = vpop.f32.mrf.mxu0 }
 0x52c   :  { %v5192_v51 = vpop.f32.mrf.mxu1  ;;  %v5191_v1 = vadd.f32 %v5190_v61, %v4839_v54 }
 0x52d   :  { %v4843_v5 = vpop.f32.mrf.mxu0 }
 0x52e   :  { %v5195_v28 = vpop.f32.mrf.mxu1  ;;  %5308 = vst [vmem:[#allocation10 + $0x218] sm:$0xff] %v5191_v1  ;;  %v4844_v38 = vadd.f32 %v11071_v20, %v4843_v5 }
 0x52f   :  { %v4845_v44 = vpop.f32.mrf.mxu0 }
 0x530   :  { %v5197_v47 = vpop.f32.mrf.mxu1  ;;  %v5196_v27 = vadd.f32 %v5195_v28, %v4844_v38 }
 0x531   :  { %v4846_v4 = vpop.f32.mrf.mxu0 }
 0x532   :  { %v5198_v60 = vpop.f32.mrf.mxu1  ;;  %5309 = vst [vmem:[#allocation10 + $0x220] sm:$0xff] %v5196_v27  ;;  %v4847_v45 = vadd.f32 %v11071_v20, %v4846_v4 }
 0x533   :  { %v4848_v29 = vpop.f32.mrf.mxu0 }
 0x534   :  { %v5200_v2 = vpop.f32.mrf.mxu1  ;;  %v5199_v53 = vadd.f32 %v5198_v60, %v4847_v45 }
 0x535   :  { %v4851_v16 = vpop.f32.mrf.mxu0 }
 0x536   :  { %v5203_v41 = vpop.f32.mrf.mxu1  ;;  %5310 = vst [vmem:[#allocation10 + $0x228] sm:$0xff] %v5199_v53  ;;  %v4852_v9 = vadd.f32 %v11071_v20, %v4851_v16 }
 0x537   :  { %v4853_v58 = vpop.f32.mrf.mxu0 }
 0x538   :  { %v5205_v7 = vpop.f32.mrf.mxu1  ;;  %v5204_v6 = vadd.f32 %v5203_v41, %v4852_v9 }
 0x539   :  { %v4854_v18 = vpop.f32.mrf.mxu0 }
 0x53a   :  { %v5206_v40 = vpop.f32.mrf.mxu1  ;;  %5311 = vst [vmem:[#allocation10 + $0x230] sm:$0xff] %v5204_v6  ;;  %v4855_v22 = vadd.f32 %v11071_v20, %v4854_v18 }
 0x53b   :  { %v4856_v23 = vpop.f32.mrf.mxu0 }
 0x53c   :  { %v5208_v31 = vpop.f32.mrf.mxu1  ;;  %v5207_v21 = vadd.f32 %v5206_v40, %v4855_v22 }
 0x53d   :  { %v4859_v43 = vpop.f32.mrf.mxu0 }
 0x53e   :  { %v5211_v11 = vpop.f32.mrf.mxu1  ;;  %5312 = vst [vmem:[#allocation10 + $0x238] sm:$0xff] %v5207_v21  ;;  %v4860_v36 = vadd.f32 %v11071_v20, %v4859_v43 }
 0x53f   :  { %v4861_v10 = vpop.f32.mrf.mxu0 }
 0x540   :  { %v5213_v42 = vpop.f32.mrf.mxu1  ;;  %v5212_v46 = vadd.f32 %v5211_v11, %v4860_v36 }
 0x541   :  { %v4862_v59 = vpop.f32.mrf.mxu0 }
 0x542   :  { %v5214_v19 = vpop.f32.mrf.mxu1  ;;  %5313 = vst [vmem:[#allocation10 + $0x240] sm:$0xff] %v5212_v46  ;;  %v4863_v12 = vadd.f32 %v11071_v20, %v4862_v59 }
 0x543   :  { %v4864_v8 = vpop.f32.mrf.mxu0 }
 0x544   :  { %v5216_v37 = vpop.f32.mrf.mxu1  ;;  %v5215_v3 = vadd.f32 %v5214_v19, %v4863_v12 }
 0x545   :  { %v4867_v17 = vpop.f32.mrf.mxu0 }
 0x546   :  { %v5219_v57 = vpop.f32.mrf.mxu1  ;;  %5314 = vst [vmem:[#allocation10 + $0x248] sm:$0xff] %v5215_v3  ;;  %v4868_v56 = vadd.f32 %v11071_v20, %v4867_v17 }
 0x547   :  { %v4869_v48 = vpop.f32.mrf.mxu0 }
 0x548   :  { %v5221_v24 = vpop.f32.mrf.mxu1  ;;  %v5220_v25 = vadd.f32 %v5219_v57, %v4868_v56 }
 0x549   :  { %v4870_v32 = vpop.f32.mrf.mxu0 }
 0x54a   :  { %v5222_v15 = vpop.f32.mrf.mxu1  ;;  %5315 = vst [vmem:[#allocation10 + $0x250] sm:$0xff] %v5220_v25  ;;  %v4871_v63 = vadd.f32 %v11071_v20, %v4870_v32 }
 0x54b   :  { %v4872_v49 = vpop.f32.mrf.mxu0 }
 0x54c   :  { %v5224_v50 = vpop.f32.mrf.mxu1  ;;  %v5223_v39 = vadd.f32 %v5222_v15, %v4871_v63 }
 0x54d   :  { %v4875_v52 = vpop.f32.mrf.mxu0 }
 0x54e   :  { %v5227_v55 = vpop.f32.mrf.mxu1  ;;  %5316 = vst [vmem:[#allocation10 + $0x258] sm:$0xff] %v5223_v39  ;;  %v4876_v35 = vadd.f32 %v11071_v20, %v4875_v52 }
 0x54f   :  { %v4877_v62 = vpop.f32.mrf.mxu0 }
 0x550   :  { %v5229_v30 = vpop.f32.mrf.mxu1  ;;  %v5228_v34 = vadd.f32 %v5227_v55, %v4876_v35 }
 0x551   :  { %v4878_v0 = vpop.f32.mrf.mxu0 }
 0x552   :  { %v5230_v26 = vpop.f32.mrf.mxu1  ;;  %5317 = vst [vmem:[#allocation10 + $0x260] sm:$0xff] %v5228_v34  ;;  %v4879_v13 = vadd.f32 %v11071_v20, %v4878_v0 }
 0x553   :  { %v4880_v14 = vpop.f32.mrf.mxu0 }
 0x554   :  { %v5232_v61 = vpop.f32.mrf.mxu1  ;;  %v5231_v54 = vadd.f32 %v5230_v26, %v4879_v13 }
 0x555   :  { %v4883_v33 = vpop.f32.mrf.mxu0 }
 0x556   :  { %v5235_v51 = vpop.f32.mrf.mxu1  ;;  %5318 = vst [vmem:[#allocation10 + $0x268] sm:$0xff] %v5231_v54  ;;  %v4884_v1 = vadd.f32 %v11071_v20, %v4883_v33 }
 0x557   :  { %v4885_v5 = vpop.f32.mrf.mxu0 }
 0x558   :  { %v5237_v28 = vpop.f32.mrf.mxu1  ;;  %v5236_v38 = vadd.f32 %v5235_v51, %v4884_v1 }
 0x559   :  { %v4886_v44 = vpop.f32.mrf.mxu0 }
 0x55a   :  { %v5238_v47 = vpop.f32.mrf.mxu1  ;;  %5319 = vst [vmem:[#allocation10 + $0x270] sm:$0xff] %v5236_v38 }
 0x55b   :  { %v4887_v27 = vpop.f32.mrf.mxu0 }
 0x55c   :  { %v5239_v4 = vpop.f32.mrf.mxu1 }
 0x55d   :  { %6220 = shalt.err (!%p6217_p10)
}
 0x55e   :  { %5331 = dma.vmem_to_hbm [thread:$0]  %s5326_s19, 10112, %s11132_s5, [#allocation4], %s6241_s28, %s6241_s28, %s6242_s29  }
 0x55f   :  { %6235 = dma.done.wait [#allocation4], 10112  }
 0x560   :  { %6236 = vsyncadd [#allocation4], 4294957184 }
 0x561   :  { %5335 = vsyncpa [#allocation3], 1 }
 0x562   :  { %5336 = vsyncpa [#allocation6], 1 }
 0x563   :  { %5337 = vsyncpa [#allocation9], 1 }
 0x564   :  { %5338 = vsyncpa [#allocation4], 1 }

</bundles_post_ra>
